<compile_context>
chip_gen: v6e
topology: v6e:2x2x1
jax: 0.10.0
libtpu: 0.0.40
codegen_flags: <defaults>
</compile_context>

<pallas_src>
import functools

import numpy as np
import jax
import jax.numpy as jnp
from jax.experimental import pallas as pl
from jax.experimental.pallas import tpu as pltpu


_PARALLEL = pltpu.CompilerParams(dimension_semantics=("parallel",))
_ARBITRARY = pltpu.CompilerParams(dimension_semantics=("arbitrary",))


# ----------------------------------------------------------------------------
# Kernels
# ----------------------------------------------------------------------------
def _stem_kernel(p_ref, w_ref, b_ref, sel_ref, o_ref):
    """Conv1d(1, nf, k=7, s=2, p=3) [BN folded] + ReLU + MaxPool1d(3, 2, 1).

    p_ref:   (1, L1, 7)  im2col patches of the padded, stride-2 input
    w_ref:   (7, nf)     conv weight with BN scale folded in
    b_ref:   (1, nf)     folded BN shift
    sel_ref: (L2, L1)    0/1 selection matrix picking row 2t for output t
    o_ref:   (1, L2, nf)
    """
    h = jnp.dot(p_ref[0], w_ref[...], preferred_element_type=jnp.float32)
    h = jnp.maximum(h + b_ref[...], 0.0)                       # (L1, nf)
    # MaxPool1d(3, 2, 1): after ReLU every value >= 0, so zero padding is
    # equivalent to the -inf padding PyTorch uses.
    z = jnp.zeros((1, h.shape[1]), jnp.float32)
    prev = jnp.concatenate([z, h[:-1]], axis=0)                # h[i-1]
    nxt = jnp.concatenate([h[1:], z], axis=0)                  # h[i+1]
    m = jnp.maximum(jnp.maximum(prev, h), nxt)                 # 3-window max
    # stride-2 downsample m[2t] as a selection matmul (robust on all gens)
    o_ref[0] = jnp.dot(sel_ref[...], m, preferred_element_type=jnp.float32)


def _dense_block_kernel(x_ref, *refs, num_layers, c0, growth, tail):
    """One full _DenseBlock with its tail fused.

    The concatenation slab is a VMEM scratch: layer i reads channels
    [0, c0 + i*g) and writes its growth-channel output into
    [c0 + i*g, c0 + (i+1)*g).  Per-layer params come in groups of 6:
    (s1, b1, w1, s2, b2, w2_stacked).

    tail == "transition": tail refs = (s_t, b_t, pool, w_t); the transition
        (BN + ReLU + 1x1 conv + AvgPool1d(2,2)) is applied to the slab and
        only the halved-length, halved-channel result is written out.
    tail == "avgpool":    tail refs = (p9,); AdaptiveAvgPool1d(9) is applied
        (channels kept on lanes) and only the (9, Cfull) result is written.
    """
    slab = refs[-1]                                      # VMEM scratch (L, Cfull)
    o_ref = refs[-2]
    n_tail = 4 if tail == "transition" else 1
    tail_refs = refs[6 * num_layers: 6 * num_layers + n_tail]
    prm = refs[:6 * num_layers]
    g = growth

    slab[:, 0:c0] = x_ref[0]
    for i in range(num_layers):
        s1, b1, w1, s2, b2, w2 = prm[6 * i:6 * i + 6]
        cin = c0 + i * g
        # BN + ReLU + Conv1d(k=1)  -> (L, cmid)
        a = slab[:, 0:cin]
        a = jnp.maximum(a * s1[...] + b1[...], 0.0)
        mid = jnp.dot(a.astype(jnp.bfloat16), w1[...],
                      preferred_element_type=jnp.float32)
        # BN + ReLU + Conv1d(k=3, pad=1): one matmul with the three taps
        # stacked along N, combined with two shifted adds.
        a2 = jnp.maximum(mid * s2[...] + b2[...], 0.0)
        u = jnp.dot(a2.astype(jnp.bfloat16), w2[...],
                    preferred_element_type=jnp.float32)        # (L, 3*g)
        z = jnp.zeros((1, 3 * g), jnp.float32)
        prev = jnp.concatenate([z, u[:-1]], axis=0)            # u[t-1], 0 @ t=0
        nxt = jnp.concatenate([u[1:], z], axis=0)              # u[t+1], 0 @ t=L-1
        y = prev[:, 0:g] + u[:, g:2 * g] + nxt[:, 2 * g:3 * g]
        # drop_rate = 0 -> Dropout is identity
        slab[:, cin:cin + g] = y

    full = slab[...]                                           # (L, Cfull)
    if tail == "transition":
        s_t, b_t, pool_ref, w_t = tail_refs
        a = jnp.maximum(full * s_t[...] + b_t[...], 0.0)
        # AvgPool before the 1x1 conv (exact by linearity of the conv).
        pooled = jnp.dot(pool_ref[...], a.astype(jnp.bfloat16),
                         preferred_element_type=jnp.float32)   # (Lo, Cfull)
        o_ref[0] = jnp.dot(pooled.astype(jnp.bfloat16), w_t[...],
                           preferred_element_type=jnp.float32)  # (Lo, Cout)
    else:  # "avgpool": AdaptiveAvgPool1d(9), channels stay on lanes
        (p9_ref,) = tail_refs
        o_ref[0] = jnp.dot(p9_ref[...], full,
                           preferred_element_type=jnp.float32)  # (9, Cfull)


def _linear_kernel(x_ref, w_ref, b_ref, o_ref, acc_ref, *, relu):
    """K-tiled  out = maybe_relu(x @ W + b)  with an f32 VMEM accumulator."""
    @pl.when(pl.program_id(0) == 0)
    def _():
        acc_ref[...] = jnp.zeros_like(acc_ref)

    acc_ref[...] += jnp.dot(x_ref[...].astype(jnp.bfloat16), w_ref[...],
                            preferred_element_type=jnp.float32)

    @pl.when(pl.program_id(0) == pl.num_programs(0) - 1)
    def _():
        y = acc_ref[...] + b_ref[...]
        if relu:
            y = jnp.maximum(y, 0.0)
        o_ref[...] = y


# ----------------------------------------------------------------------------
# Kernel wrappers
# ----------------------------------------------------------------------------
def stem(patches, w, bias, sel):
    B, L1, _ = patches.shape
    L2 = sel.shape[0]
    nf = w.shape[1]
    return pl.pallas_call(
        _stem_kernel,
        out_shape=jax.ShapeDtypeStruct((B, L2, nf), jnp.float32),
        grid=(B,),
        in_specs=[
            pl.BlockSpec((1, L1, 7), lambda b: (b, 0, 0)),
            pl.BlockSpec((7, nf), lambda b: (0, 0)),
            pl.BlockSpec((1, nf), lambda b: (0, 0)),
            pl.BlockSpec((L2, L1), lambda b: (0, 0)),
        ],
        out_specs=pl.BlockSpec((1, L2, nf), lambda b: (b, 0, 0)),
        compiler_params=_PARALLEL,
    )(patches, w, bias, sel)


def dense_block(x, layers, tail, tail_params):
    """One _DenseBlock (+ fused tail) as a single pallas_call.

    x: (B, L, C0) f32.
    tail == "transition": returns (B, L//2, Cfull//2) (fused _TransitionLayer)
    tail == "avgpool":    returns (B, 9, Cfull)       (fused AdaptiveAvgPool1d(9))
    """
    B, L, C0 = x.shape
    nl = len(layers)
    growth = layers[0]['w2'].shape[1] // 3
    cmid = layers[0]['w1'].shape[1]
    Cfull = C0 + nl * growth

    in_specs = [pl.BlockSpec((1, L, C0), lambda b: (b, 0, 0))]
    args = [x]
    for lp in layers:
        cin = lp['w1'].shape[0]
        in_specs += [
            pl.BlockSpec((1, cin), lambda b: (0, 0)),
            pl.BlockSpec((1, cin), lambda b: (0, 0)),
            pl.BlockSpec((cin, cmid), lambda b: (0, 0)),
            pl.BlockSpec((1, cmid), lambda b: (0, 0)),
            pl.BlockSpec((1, cmid), lambda b: (0, 0)),
            pl.BlockSpec((cmid, 3 * growth), lambda b: (0, 0)),
        ]
        args += [lp['s1'], lp['b1'], lp['w1'], lp['s2'], lp['b2'], lp['w2']]

    if tail == "transition":
        Lo = L // 2
        Cout = tail_params['w'].shape[1]
        pool = np.zeros((Lo, L), np.float32)
        pool[np.arange(Lo), 2 * np.arange(Lo)] = 0.5
        pool[np.arange(Lo), 2 * np.arange(Lo) + 1] = 0.5
        pool = jnp.asarray(pool, jnp.bfloat16)   # 0.5 / 0.0 exact in bf16
        in_specs += [
            pl.BlockSpec((1, Cfull), lambda b: (0, 0)),
            pl.BlockSpec((1, Cfull), lambda b: (0, 0)),
            pl.BlockSpec((Lo, L), lambda b: (0, 0)),
            pl.BlockSpec((Cfull, Cout), lambda b: (0, 0)),
        ]
        args += [tail_params['s'], tail_params['b'], pool, tail_params['w']]
        out_shape = jax.ShapeDtypeStruct((B, Lo, Cout), jnp.float32)
        out_spec = pl.BlockSpec((1, Lo, Cout), lambda b: (b, 0, 0))
    else:  # "avgpool"
        out_size = 9
        P = np.zeros((out_size, L), np.float32)
        for i in range(out_size):
            s = (i * L) // out_size
            e = -((-(i + 1) * L) // out_size)    # ceil((i+1)*L/out_size)
            P[i, s:e] = 1.0 / (e - s)
        in_specs += [pl.BlockSpec((out_size, L), lambda b: (0, 0))]
        args += [jnp.asarray(P)]
        out_shape = jax.ShapeDtypeStruct((B, out_size, Cfull), jnp.float32)
        out_spec = pl.BlockSpec((1, out_size, Cfull), lambda b: (b, 0, 0))

    kernel = functools.partial(_dense_block_kernel, num_layers=nl,
                               c0=C0, growth=growth, tail=tail)
    # TODO(synk): for very long sequences, additionally tile L with a 1-row
    # halo so the scratch slab stays small and both v7x TensorCores get work
    # even at batch=1; for this model's L (<=128 after the stem) one slab per
    # batch row is already tiny.
    return pl.pallas_call(
        kernel,
        out_shape=out_shape,
        grid=(B,),
        in_specs=in_specs,
        out_specs=out_spec,
        scratch_shapes=[pltpu.VMEM((L, Cfull), jnp.float32)],
        compiler_params=_PARALLEL,
    )(*args)


def linear(x, w, b, relu=False, tk=512):
    """x: (B, K) f32, w: (K, N) bf16, b: (1, N) f32  ->  (B, N) f32."""
    B, K = x.shape
    N = w.shape[1]
    tk = min(tk, ((K + 127) // 128) * 128)     # don't over-pad small heads
    K_pad = ((K + tk - 1) // tk) * tk
    if K_pad != K:
        x = jnp.pad(x, ((0, 0), (0, K_pad - K)))
        w = jnp.pad(w, ((0, K_pad - K), (0, 0)))
    nk = K_pad // tk
    kernel = functools.partial(_linear_kernel, relu=relu)
    return pl.pallas_call(
        kernel,
        out_shape=jax.ShapeDtypeStruct((B, N), jnp.float32),
        grid=(nk,),
        in_specs=[
            pl.BlockSpec((B, tk), lambda k: (0, k)),
            pl.BlockSpec((tk, N), lambda k: (k, 0)),
            pl.BlockSpec((1, N), lambda k: (0, 0)),
        ],
        out_specs=pl.BlockSpec((B, N), lambda k: (0, 0)),
        scratch_shapes=[pltpu.VMEM((B, N), jnp.float32)],
        compiler_params=_ARBITRARY,
    )(x, w, b)


# ----------------------------------------------------------------------------
# Parameter construction (deterministic, synthetic)
# ----------------------------------------------------------------------------
class ParamGen:
    def __init__(self, seed=0):
        self.key = jax.random.PRNGKey(seed)

    def next(self, shape, scale=1.0):
        self.key, sub = jax.random.split(self.key)
        return scale * jax.random.normal(sub, shape, jnp.float32)

    def conv(self, shape):
        fan_in = int(np.prod(shape[1:]))
        return self.next(shape) / np.sqrt(fan_in)


def make_bn(pg, C, eps=1e-5):
    """Eval-mode BatchNorm1d folded into (scale, shift), shaped (1, C)."""
    gamma = 1.0 + 0.1 * pg.next((C,))
    beta = 0.1 * pg.next((C,))
    mean = 0.1 * pg.next((C,))
    var = 1.0 + 0.1 * jnp.abs(pg.next((C,)))
    scale = gamma / jnp.sqrt(var + eps)
    shift = beta - mean * scale
    return scale.reshape(1, C), shift.reshape(1, C)


def init_params(num_init_features=64, growth_rate=32, blocks=(6, 12, 24, 16),
                bn_size=4, num_classes=2, fc_hidden=(1024, 512), seed=0):
    pg = ParamGen(seed)
    p = {}

    # stem: Conv1d(1, nf, k=7, s=2, p=3, bias=False) with BN folded in.
    w_stem = pg.conv((num_init_features, 1, 7))                # (out, in, k)
    s, sh = make_bn(pg, num_init_features)
    p['stem_w'] = jnp.transpose(w_stem[:, 0, :], (1, 0)) * s   # (7, nf) f32
    p['stem_bias'] = sh                                        # (1, nf) f32

    nf = num_init_features
    p['blocks'] = []
    p['transitions'] = []
    for bi, nl in enumerate(blocks):
        blk = []
        for i in range(nl):
            cin = nf + i * growth_rate
            cmid = bn_size * growth_rate
            lp = {}
            lp['s1'], lp['b1'] = make_bn(pg, cin)
            w1 = pg.conv((cmid, cin, 1))
            lp['w1'] = jnp.transpose(w1[:, :, 0], (1, 0)).astype(jnp.bfloat16)
            lp['s2'], lp['b2'] = make_bn(pg, cmid)
            w2 = pg.conv((growth_rate, cmid, 3))               # (g, cmid, 3)
            taps = [jnp.transpose(w2[:, :, k], (1, 0)) for k in range(3)]
            lp['w2'] = jnp.concatenate(taps, axis=1).astype(jnp.bfloat16)  # (cmid, 3g)
            blk.append(lp)
        p['blocks'].append(blk)
        nf = nf + nl * growth_rate
        if bi < len(blocks) - 1:
            tp = {}
            tp['s'], tp['b'] = make_bn(pg, nf)
            wt = pg.conv((nf // 2, nf, 1))
            tp['w'] = jnp.transpose(wt[:, :, 0], (1, 0)).astype(jnp.bfloat16)
            p['transitions'].append(tp)
            nf = nf // 2

    # fc head.  The PyTorch module hardcodes 256*4*9 == nf*9 for the default
    # config; generalized here so smaller test configs stay consistent.
    fc_in = nf * 9
    dims = (fc_in,) + tuple(fc_hidden) + (num_classes,)
    p['fc'] = []
    for d_in, d_out in zip(dims[:-1], dims[1:]):
        w = (pg.next((d_in, d_out)) / np.sqrt(d_in)).astype(jnp.bfloat16)
        b = pg.next((d_out,), 0.01).reshape(1, d_out)
        p['fc'].append((w, b))
    return p


# ----------------------------------------------------------------------------
# Forward pass
# ----------------------------------------------------------------------------
def densenet_forward(x, params):
    """x: (B, L) f32 (PyTorch unsqueezes to (B, 1, L)). Returns (f, logits)."""
    B, L = x.shape

    # ---- stem: Conv(1, nf, 7, s=2, p=3) + BN + ReLU + MaxPool(3, 2, 1) ----
    L1 = (L - 1) // 2 + 1
    L2 = (L1 - 1) // 2 + 1
    xp = jnp.pad(x, ((0, 0), (3, 3)))
    patches = jnp.stack([xp[:, k::2][:, :L1] for k in range(7)], axis=-1)  # (B, L1, 7)
    sel = np.zeros((L2, L1), np.float32)
    sel[np.arange(L2), 2 * np.arange(L2)] = 1.0
    h = stem(patches, params['stem_w'], params['stem_bias'], jnp.asarray(sel))

    # ---- dense blocks; transitions / final adaptive pool fused in-kernel ----
    n_blocks = len(params['blocks'])
    pooled = None
    for bi, blk in enumerate(params['blocks']):
        if bi < n_blocks - 1:
            h = dense_block(h, blk, "transition", params['transitions'][bi])
        else:
            pooled = dense_block(h, blk, "avgpool", None)      # (B, 9, C)

    # ---- feature map back to PyTorch NCL ----
    f = jnp.transpose(pooled, (0, 2, 1))                       # (B, C, 9)

    # ---- classifier (Dropout is identity in eval mode) ----
    z = f.reshape(B, -1)                                       # (B, C*9), PyTorch order
    n_fc = len(params['fc'])
    for i, (w, bvec) in enumerate(params['fc']):
        z = linear(z, w, bvec, relu=(i < n_fc - 1))
    return f, z


# ----------------------------------------------------------------------------
# Main
# ----------------------------------------------------------------------------
if __name__ == "__main__":
    # Small DenseNet config (same structure as the PyTorch module, scaled down
    # so the test is quick; default would be (64, 32, (6,12,24,16), 4, 2)).
    cfg = dict(num_init_features=16, growth_rate=8, blocks=(2, 2, 2, 2),
               bn_size=2, num_classes=2, fc_hidden=(1024, 512))
    params = init_params(**cfg, seed=0)

    B, L = 2, 512   # (batch, length); PyTorch sees (B, 1, L) after unsqueeze
    x = jax.random.normal(jax.random.PRNGKey(0), (B, L), jnp.float32)

    fwd = jax.jit(densenet_forward)
    f, logits = fwd(x, params)
    jax.block_until_ready((f, logits))

    # expected final channel count
    c = cfg['num_init_features']
    for i, nl in enumerate(cfg['blocks']):
        c += nl * cfg['growth_rate']
        if i < len(cfg['blocks']) - 1:
            c //= 2

    assert f.shape == (B, c, 9), f.shape
    assert logits.shape == (B, cfg['num_classes']), logits.shape
    assert bool(jnp.all(jnp.isfinite(f))), "non-finite feature map"
    assert bool(jnp.all(jnp.isfinite(logits))), "non-finite logits"

    print("KERNEL_OK")
</pallas_src>

<mosaic_0001>
module attributes {stable_mosaic.version = 11 : i64} {
  func.func @_stem_kernel(%arg0: i32, %arg1: memref<1x256x7xf32, #tpu.memory_space<vmem>>, %arg2: memref<7x16xf32, #tpu.memory_space<vmem>>, %arg3: memref<1x16xf32, #tpu.memory_space<vmem>>, %arg4: memref<128x256xf32, #tpu.memory_space<vmem>>, %arg5: memref<1x128x16xf32, #tpu.memory_space<vmem>>) attributes {dimension_semantics = [#tpu.dimension_semantics<parallel>], iteration_bounds = array<i64: 2>, scalar_prefetch = 0 : i64, scratch_operands = 0 : i64, tpu.core_type = #tpu.core_type<tc>, window_params = [{transform_indices = @transform_0, window_bounds = array<i64: 1, 256, 7>}, {pipeline_mode = #tpu.pipeline_mode<synchronous>, transform_indices = @transform_1, window_bounds = array<i64: 7, 16>}, {pipeline_mode = #tpu.pipeline_mode<synchronous>, transform_indices = @transform_2, window_bounds = array<i64: 1, 16>}, {pipeline_mode = #tpu.pipeline_mode<synchronous>, transform_indices = @transform_3, window_bounds = array<i64: 128, 256>}, {transform_indices = @transform_4, window_bounds = array<i64: 1, 128, 16>}]} {
    %c0 = arith.constant 0 : index
    %c0_0 = arith.constant 0 : index
    %c0_1 = arith.constant 0 : index
    %0 = vector.load %arg1[%c0, %c0_0, %c0_1] : memref<1x256x7xf32, #tpu.memory_space<vmem>>, vector<1x256x7xf32>
    %1 = vector.shape_cast %0 : vector<1x256x7xf32> to vector<256x7xf32>
    %c0_2 = arith.constant 0 : index
    %c0_3 = arith.constant 0 : index
    %2 = vector.load %arg2[%c0_2, %c0_3] : memref<7x16xf32, #tpu.memory_space<vmem>>, vector<7x16xf32>
    %cst = arith.constant dense<0.000000e+00> : vector<256x16xf32>
    %3 = tpu.matmul %1, %2, %cst {dimension_numbers = #tpu.dot_dimension_numbers<[1], [0], [0], [1], [0, 0, 1, 1], [], []>} : vector<256x7xf32>, vector<7x16xf32>, vector<256x16xf32> -> vector<256x16xf32>
    %c0_4 = arith.constant 0 : index
    %c0_5 = arith.constant 0 : index
    %4 = vector.load %arg3[%c0_4, %c0_5] : memref<1x16xf32, #tpu.memory_space<vmem>>, vector<1x16xf32>
    %5 = vector.broadcast %4 : vector<1x16xf32> to vector<256x16xf32>
    %6 = arith.addf %3, %5 : vector<256x16xf32>
    %cst_6 = arith.constant 0.000000e+00 : f32
    %7 = vector.broadcast %cst_6 : f32 to vector<256x16xf32>
    %8 = arith.maximumf %6, %7 : vector<256x16xf32>
    %cst_7 = arith.constant 0.000000e+00 : f32
    %9 = vector.broadcast %cst_7 : f32 to vector<1x16xf32>
    %10 = vector.extract_strided_slice %8 {offsets = [0, 0], sizes = [255, 16], strides = [1, 1]} : vector<256x16xf32> to vector<255x16xf32>
    %11 = tpu.concatenate %9, %10 in 0 : vector<1x16xf32>, vector<255x16xf32> -> vector<256x16xf32>
    %12 = vector.extract_strided_slice %8 {offsets = [1, 0], sizes = [255, 16], strides = [1, 1]} : vector<256x16xf32> to vector<255x16xf32>
    %13 = tpu.concatenate %12, %9 in 0 : vector<255x16xf32>, vector<1x16xf32> -> vector<256x16xf32>
    %14 = arith.maximumf %11, %8 : vector<256x16xf32>
    %15 = arith.maximumf %14, %13 : vector<256x16xf32>
    %c0_8 = arith.constant 0 : index
    %c0_9 = arith.constant 0 : index
    %16 = vector.load %arg4[%c0_8, %c0_9] : memref<128x256xf32, #tpu.memory_space<vmem>>, vector<128x256xf32>
    %cst_10 = arith.constant dense<0.000000e+00> : vector<128x16xf32>
    %17 = tpu.matmul %16, %15, %cst_10 {dimension_numbers = #tpu.dot_dimension_numbers<[1], [0], [0], [1], [0, 0, 1, 1], [], []>} : vector<128x256xf32>, vector<256x16xf32>, vector<128x16xf32> -> vector<128x16xf32>
    %c0_11 = arith.constant 0 : index
    %c0_12 = arith.constant 0 : index
    %c0_13 = arith.constant 0 : index
    %18 = vector.load %arg5[%c0_11, %c0_12, %c0_13] : memref<1x128x16xf32, #tpu.memory_space<vmem>>, vector<1x128x16xf32>
    %19 = vector.shape_cast %18 : vector<1x128x16xf32> to vector<128x16xf32>
    %20 = vector.shape_cast %17 : vector<128x16xf32> to vector<1x128x16xf32>
    tpu.vector_store %arg5[%c0_11, %c0_12, %c0_13], %20 {strides = array<i32>} : memref<1x128x16xf32, #tpu.memory_space<vmem>>, vector<1x128x16xf32>,
    return
  }
  func.func @transform_0(%arg0: i32) -> (i32, i32, i32) {
    %c0_i32 = arith.constant 0 : i32
    %c0_i32_0 = arith.constant 0 : i32
    %c0_i32_1 = arith.constant 0 : i32
    return %arg0, %c0_i32, %c0_i32_0 : i32, i32, i32
  }
  func.func @transform_1(%arg0: i32) -> (i32, i32) {
    %c0_i32 = arith.constant 0 : i32
    %c0_i32_0 = arith.constant 0 : i32
    %c0_i32_1 = arith.constant 0 : i32
    return %c0_i32, %c0_i32_0 : i32, i32
  }
  func.func @transform_2(%arg0: i32) -> (i32, i32) {
    %c0_i32 = arith.constant 0 : i32
    %c0_i32_0 = arith.constant 0 : i32
    %c0_i32_1 = arith.constant 0 : i32
    return %c0_i32, %c0_i32_0 : i32, i32
  }
  func.func @transform_3(%arg0: i32) -> (i32, i32) {
    %c0_i32 = arith.constant 0 : i32
    %c0_i32_0 = arith.constant 0 : i32
    %c0_i32_1 = arith.constant 0 : i32
    return %c0_i32, %c0_i32_0 : i32, i32
  }
  func.func @transform_4(%arg0: i32) -> (i32, i32, i32) {
    %c0_i32 = arith.constant 0 : i32
    %c0_i32_0 = arith.constant 0 : i32
    %c0_i32_1 = arith.constant 0 : i32
    return %arg0, %c0_i32, %c0_i32_0 : i32, i32, i32
  }
}

module attributes {stable_mosaic.version = 11 : i64} {
  func.func @_dense_block_kernel(%arg0: i32, %arg1: memref<1x128x16xf32, #tpu.memory_space<vmem>>, %arg2: memref<1x16xf32, #tpu.memory_space<vmem>>, %arg3: memref<1x16xf32, #tpu.memory_space<vmem>>, %arg4: memref<16x16xbf16, #tpu.memory_space<vmem>>, %arg5: memref<1x16xf32, #tpu.memory_space<vmem>>, %arg6: memref<1x16xf32, #tpu.memory_space<vmem>>, %arg7: memref<16x24xbf16, #tpu.memory_space<vmem>>, %arg8: memref<1x24xf32, #tpu.memory_space<vmem>>, %arg9: memref<1x24xf32, #tpu.memory_space<vmem>>, %arg10: memref<24x16xbf16, #tpu.memory_space<vmem>>, %arg11: memref<1x16xf32, #tpu.memory_space<vmem>>, %arg12: memref<1x16xf32, #tpu.memory_space<vmem>>, %arg13: memref<16x24xbf16, #tpu.memory_space<vmem>>, %arg14: memref<1x32xf32, #tpu.memory_space<vmem>>, %arg15: memref<1x32xf32, #tpu.memory_space<vmem>>, %arg16: memref<64x128xbf16, #tpu.memory_space<vmem>>, %arg17: memref<32x16xbf16, #tpu.memory_space<vmem>>, %arg18: memref<1x64x16xf32, #tpu.memory_space<vmem>>, %arg19: memref<128x32xf32, #tpu.memory_space<vmem>>) attributes {dimension_semantics = [#tpu.dimension_semantics<parallel>], iteration_bounds = array<i64: 2>, scalar_prefetch = 0 : i64, scratch_operands = 1 : i64, tpu.core_type = #tpu.core_type<tc>, window_params = [{transform_indices = @transform_0, window_bounds = array<i64: 1, 128, 16>}, {pipeline_mode = #tpu.pipeline_mode<synchronous>, transform_indices = @transform_1, window_bounds = array<i64: 1, 16>}, {pipeline_mode = #tpu.pipeline_mode<synchronous>, transform_indices = @transform_2, window_bounds = array<i64: 1, 16>}, {pipeline_mode = #tpu.pipeline_mode<synchronous>, transform_indices = @transform_3, window_bounds = array<i64: 16, 16>}, {pipeline_mode = #tpu.pipeline_mode<synchronous>, transform_indices = @transform_4, window_bounds = array<i64: 1, 16>}, {pipeline_mode = #tpu.pipeline_mode<synchronous>, transform_indices = @transform_5, window_bounds = array<i64: 1, 16>}, {pipeline_mode = #tpu.pipeline_mode<synchronous>, transform_indices = @transform_6, window_bounds = array<i64: 16, 24>}, {pipeline_mode = #tpu.pipeline_mode<synchronous>, transform_indices = @transform_7, window_bounds = array<i64: 1, 24>}, {pipeline_mode = #tpu.pipeline_mode<synchronous>, transform_indices = @transform_8, window_bounds = array<i64: 1, 24>}, {pipeline_mode = #tpu.pipeline_mode<synchronous>, transform_indices = @transform_9, window_bounds = array<i64: 24, 16>}, {pipeline_mode = #tpu.pipeline_mode<synchronous>, transform_indices = @transform_10, window_bounds = array<i64: 1, 16>}, {pipeline_mode = #tpu.pipeline_mode<synchronous>, transform_indices = @transform_11, window_bounds = array<i64: 1, 16>}, {pipeline_mode = #tpu.pipeline_mode<synchronous>, transform_indices = @transform_12, window_bounds = array<i64: 16, 24>}, {pipeline_mode = #tpu.pipeline_mode<synchronous>, transform_indices = @transform_13, window_bounds = array<i64: 1, 32>}, {pipeline_mode = #tpu.pipeline_mode<synchronous>, transform_indices = @transform_14, window_bounds = array<i64: 1, 32>}, {pipeline_mode = #tpu.pipeline_mode<synchronous>, transform_indices = @transform_15, window_bounds = array<i64: 64, 128>}, {pipeline_mode = #tpu.pipeline_mode<synchronous>, transform_indices = @transform_16, window_bounds = array<i64: 32, 16>}, {transform_indices = @transform_17, window_bounds = array<i64: 1, 64, 16>}]} {
    %c0 = arith.constant 0 : index
    %c0_0 = arith.constant 0 : index
    %c0_1 = arith.constant 0 : index
    %0 = vector.load %arg1[%c0, %c0_0, %c0_1] : memref<1x128x16xf32, #tpu.memory_space<vmem>>, vector<1x128x16xf32>
    %1 = vector.shape_cast %0 : vector<1x128x16xf32> to vector<128x16xf32>
    %c0_2 = arith.constant 0 : index
    %c0_3 = arith.constant 0 : index
    %2 = vector.load %arg19[%c0_2, %c0_3] : memref<128x32xf32, #tpu.memory_space<vmem>>, vector<128x16xf32>
    tpu.vector_store %arg19[%c0_2, %c0_3], %1 {strides = array<i32>} : memref<128x32xf32, #tpu.memory_space<vmem>>, vector<128x16xf32>,
    %c0_4 = arith.constant 0 : index
    %c0_5 = arith.constant 0 : index
    %3 = vector.load %arg19[%c0_4, %c0_5] : memref<128x32xf32, #tpu.memory_space<vmem>>, vector<128x16xf32>
    %c0_6 = arith.constant 0 : index
    %c0_7 = arith.constant 0 : index
    %4 = vector.load %arg2[%c0_6, %c0_7] : memref<1x16xf32, #tpu.memory_space<vmem>>, vector<1x16xf32>
    %5 = vector.broadcast %4 : vector<1x16xf32> to vector<128x16xf32>
    %6 = arith.mulf %3, %5 : vector<128x16xf32>
    %c0_8 = arith.constant 0 : index
    %c0_9 = arith.constant 0 : index
    %7 = vector.load %arg3[%c0_8, %c0_9] : memref<1x16xf32, #tpu.memory_space<vmem>>, vector<1x16xf32>
    %8 = vector.broadcast %7 : vector<1x16xf32> to vector<128x16xf32>
    %9 = arith.addf %6, %8 : vector<128x16xf32>
    %cst = arith.constant 0.000000e+00 : f32
    %10 = vector.broadcast %cst : f32 to vector<128x16xf32>
    %11 = arith.maximumf %9, %10 : vector<128x16xf32>
    %12 = arith.truncf %11 : vector<128x16xf32> to vector<128x16xbf16>
    %c0_10 = arith.constant 0 : index
    %c0_11 = arith.constant 0 : index
    %13 = vector.load %arg4[%c0_10, %c0_11] : memref<16x16xbf16, #tpu.memory_space<vmem>>, vector<16x16xbf16>
    %cst_12 = arith.constant dense<0.000000e+00> : vector<128x16xf32>
    %14 = tpu.matmul %12, %13, %cst_12 {dimension_numbers = #tpu.dot_dimension_numbers<[1], [0], [0], [1], [0, 0, 1, 1], [], []>} : vector<128x16xbf16>, vector<16x16xbf16>, vector<128x16xf32> -> vector<128x16xf32>
    %c0_13 = arith.constant 0 : index
    %c0_14 = arith.constant 0 : index
    %15 = vector.load %arg5[%c0_13, %c0_14] : memref<1x16xf32, #tpu.memory_space<vmem>>, vector<1x16xf32>
    %16 = vector.broadcast %15 : vector<1x16xf32> to vector<128x16xf32>
    %17 = arith.mulf %14, %16 : vector<128x16xf32>
    %c0_15 = arith.constant 0 : index
    %c0_16 = arith.constant 0 : index
    %18 = vector.load %arg6[%c0_15, %c0_16] : memref<1x16xf32, #tpu.memory_space<vmem>>, vector<1x16xf32>
    %19 = vector.broadcast %18 : vector<1x16xf32> to vector<128x16xf32>
    %20 = arith.addf %17, %19 : vector<128x16xf32>
    %cst_17 = arith.constant 0.000000e+00 : f32
    %21 = vector.broadcast %cst_17 : f32 to vector<128x16xf32>
    %22 = arith.maximumf %20, %21 : vector<128x16xf32>
    %23 = arith.truncf %22 : vector<128x16xf32> to vector<128x16xbf16>
    %c0_18 = arith.constant 0 : index
    %c0_19 = arith.constant 0 : index
    %24 = vector.load %arg7[%c0_18, %c0_19] : memref<16x24xbf16, #tpu.memory_space<vmem>>, vector<16x24xbf16>
    %cst_20 = arith.constant dense<0.000000e+00> : vector<128x24xf32>
    %25 = tpu.matmul %23, %24, %cst_20 {dimension_numbers = #tpu.dot_dimension_numbers<[1], [0], [0], [1], [0, 0, 1, 1], [], []>} : vector<128x16xbf16>, vector<16x24xbf16>, vector<128x24xf32> -> vector<128x24xf32>
    %cst_21 = arith.constant 0.000000e+00 : f32
    %26 = vector.broadcast %cst_21 : f32 to vector<1x24xf32>
    %27 = vector.extract_strided_slice %25 {offsets = [0, 0], sizes = [127, 24], strides = [1, 1]} : vector<128x24xf32> to vector<127x24xf32>
    %28 = tpu.concatenate %26, %27 in 0 : vector<1x24xf32>, vector<127x24xf32> -> vector<128x24xf32>
    %29 = vector.extract_strided_slice %25 {offsets = [1, 0], sizes = [127, 24], strides = [1, 1]} : vector<128x24xf32> to vector<127x24xf32>
    %30 = tpu.concatenate %29, %26 in 0 : vector<127x24xf32>, vector<1x24xf32> -> vector<128x24xf32>
    %31 = vector.extract_strided_slice %28 {offsets = [0, 0], sizes = [128, 8], strides = [1, 1]} : vector<128x24xf32> to vector<128x8xf32>
    %32 = vector.extract_strided_slice %25 {offsets = [0, 8], sizes = [128, 8], strides = [1, 1]} : vector<128x24xf32> to vector<128x8xf32>
    %33 = arith.addf %31, %32 : vector<128x8xf32>
    %34 = vector.extract_strided_slice %30 {offsets = [0, 16], sizes = [128, 8], strides = [1, 1]} : vector<128x24xf32> to vector<128x8xf32>
    %35 = arith.addf %33, %34 : vector<128x8xf32>
    %c0_22 = arith.constant 0 : index
    %c16 = arith.constant 16 : index
    %36 = vector.load %arg19[%c0_22, %c16] : memref<128x32xf32, #tpu.memory_space<vmem>>, vector<128x8xf32>
    tpu.vector_store %arg19[%c0_22, %c16], %35 {strides = array<i32>} : memref<128x32xf32, #tpu.memory_space<vmem>>, vector<128x8xf32>,
    %c0_23 = arith.constant 0 : index
    %c0_24 = arith.constant 0 : index
    %37 = vector.load %arg19[%c0_23, %c0_24] : memref<128x32xf32, #tpu.memory_space<vmem>>, vector<128x24xf32>
    %c0_25 = arith.constant 0 : index
    %c0_26 = arith.constant 0 : index
    %38 = vector.load %arg8[%c0_25, %c0_26] : memref<1x24xf32, #tpu.memory_space<vmem>>, vector<1x24xf32>
    %39 = vector.broadcast %38 : vector<1x24xf32> to vector<128x24xf32>
    %40 = arith.mulf %37, %39 : vector<128x24xf32>
    %c0_27 = arith.constant 0 : index
    %c0_28 = arith.constant 0 : index
    %41 = vector.load %arg9[%c0_27, %c0_28] : memref<1x24xf32, #tpu.memory_space<vmem>>, vector<1x24xf32>
    %42 = vector.broadcast %41 : vector<1x24xf32> to vector<128x24xf32>
    %43 = arith.addf %40, %42 : vector<128x24xf32>
    %cst_29 = arith.constant 0.000000e+00 : f32
    %44 = vector.broadcast %cst_29 : f32 to vector<128x24xf32>
    %45 = arith.maximumf %43, %44 : vector<128x24xf32>
    %46 = arith.truncf %45 : vector<128x24xf32> to vector<128x24xbf16>
    %c0_30 = arith.constant 0 : index
    %c0_31 = arith.constant 0 : index
    %47 = vector.load %arg10[%c0_30, %c0_31] : memref<24x16xbf16, #tpu.memory_space<vmem>>, vector<24x16xbf16>
    %cst_32 = arith.constant dense<0.000000e+00> : vector<128x16xf32>
    %48 = tpu.matmul %46, %47, %cst_32 {dimension_numbers = #tpu.dot_dimension_numbers<[1], [0], [0], [1], [0, 0, 1, 1], [], []>} : vector<128x24xbf16>, vector<24x16xbf16>, vector<128x16xf32> -> vector<128x16xf32>
    %c0_33 = arith.constant 0 : index
    %c0_34 = arith.constant 0 : index
    %49 = vector.load %arg11[%c0_33, %c0_34] : memref<1x16xf32, #tpu.memory_space<vmem>>, vector<1x16xf32>
    %50 = vector.broadcast %49 : vector<1x16xf32> to vector<128x16xf32>
    %51 = arith.mulf %48, %50 : vector<128x16xf32>
    %c0_35 = arith.constant 0 : index
    %c0_36 = arith.constant 0 : index
    %52 = vector.load %arg12[%c0_35, %c0_36] : memref<1x16xf32, #tpu.memory_space<vmem>>, vector<1x16xf32>
    %53 = vector.broadcast %52 : vector<1x16xf32> to vector<128x16xf32>
    %54 = arith.addf %51, %53 : vector<128x16xf32>
    %cst_37 = arith.constant 0.000000e+00 : f32
    %55 = vector.broadcast %cst_37 : f32 to vector<128x16xf32>
    %56 = arith.maximumf %54, %55 : vector<128x16xf32>
    %57 = arith.truncf %56 : vector<128x16xf32> to vector<128x16xbf16>
    %c0_38 = arith.constant 0 : index
    %c0_39 = arith.constant 0 : index
    %58 = vector.load %arg13[%c0_38, %c0_39] : memref<16x24xbf16, #tpu.memory_space<vmem>>, vector<16x24xbf16>
    %cst_40 = arith.constant dense<0.000000e+00> : vector<128x24xf32>
    %59 = tpu.matmul %57, %58, %cst_40 {dimension_numbers = #tpu.dot_dimension_numbers<[1], [0], [0], [1], [0, 0, 1, 1], [], []>} : vector<128x16xbf16>, vector<16x24xbf16>, vector<128x24xf32> -> vector<128x24xf32>
    %cst_41 = arith.constant 0.000000e+00 : f32
    %60 = vector.broadcast %cst_41 : f32 to vector<1x24xf32>
    %61 = vector.extract_strided_slice %59 {offsets = [0, 0], sizes = [127, 24], strides = [1, 1]} : vector<128x24xf32> to vector<127x24xf32>
    %62 = tpu.concatenate %60, %61 in 0 : vector<1x24xf32>, vector<127x24xf32> -> vector<128x24xf32>
    %63 = vector.extract_strided_slice %59 {offsets = [1, 0], sizes = [127, 24], strides = [1, 1]} : vector<128x24xf32> to vector<127x24xf32>
    %64 = tpu.concatenate %63, %60 in 0 : vector<127x24xf32>, vector<1x24xf32> -> vector<128x24xf32>
    %65 = vector.extract_strided_slice %62 {offsets = [0, 0], sizes = [128, 8], strides = [1, 1]} : vector<128x24xf32> to vector<128x8xf32>
    %66 = vector.extract_strided_slice %59 {offsets = [0, 8], sizes = [128, 8], strides = [1, 1]} : vector<128x24xf32> to vector<128x8xf32>
    %67 = arith.addf %65, %66 : vector<128x8xf32>
    %68 = vector.extract_strided_slice %64 {offsets = [0, 16], sizes = [128, 8], strides = [1, 1]} : vector<128x24xf32> to vector<128x8xf32>
    %69 = arith.addf %67, %68 : vector<128x8xf32>
    %c0_42 = arith.constant 0 : index
    %c24 = arith.constant 24 : index
    %70 = vector.load %arg19[%c0_42, %c24] : memref<128x32xf32, #tpu.memory_space<vmem>>, vector<128x8xf32>
    tpu.vector_store %arg19[%c0_42, %c24], %69 {strides = array<i32>} : memref<128x32xf32, #tpu.memory_space<vmem>>, vector<128x8xf32>,
    %c0_43 = arith.constant 0 : index
    %c0_44 = arith.constant 0 : index
    %71 = vector.load %arg19[%c0_43, %c0_44] : memref<128x32xf32, #tpu.memory_space<vmem>>, vector<128x32xf32>
    %c0_45 = arith.constant 0 : index
    %c0_46 = arith.constant 0 : index
    %72 = vector.load %arg14[%c0_45, %c0_46] : memref<1x32xf32, #tpu.memory_space<vmem>>, vector<1x32xf32>
    %73 = vector.broadcast %72 : vector<1x32xf32> to vector<128x32xf32>
    %74 = arith.mulf %71, %73 : vector<128x32xf32>
    %c0_47 = arith.constant 0 : index
    %c0_48 = arith.constant 0 : index
    %75 = vector.load %arg15[%c0_47, %c0_48] : memref<1x32xf32, #tpu.memory_space<vmem>>, vector<1x32xf32>
    %76 = vector.broadcast %75 : vector<1x32xf32> to vector<128x32xf32>
    %77 = arith.addf %74, %76 : vector<128x32xf32>
    %cst_49 = arith.constant 0.000000e+00 : f32
    %78 = vector.broadcast %cst_49 : f32 to vector<128x32xf32>
    %79 = arith.maximumf %77, %78 : vector<128x32xf32>
    %c0_50 = arith.constant 0 : index
    %c0_51 = arith.constant 0 : index
    %80 = vector.load %arg16[%c0_50, %c0_51] : memref<64x128xbf16, #tpu.memory_space<vmem>>, vector<64x128xbf16>
    %81 = arith.truncf %79 : vector<128x32xf32> to vector<128x32xbf16>
    %cst_52 = arith.constant dense<0.000000e+00> : vector<64x32xf32>
    %82 = tpu.matmul %80, %81, %cst_52 {dimension_numbers = #tpu.dot_dimension_numbers<[1], [0], [0], [1], [0, 0, 1, 1], [], []>} : vector<64x128xbf16>, vector<128x32xbf16>, vector<64x32xf32> -> vector<64x32xf32>
    %83 = arith.truncf %82 : vector<64x32xf32> to vector<64x32xbf16>
    %c0_53 = arith.constant 0 : index
    %c0_54 = arith.constant 0 : index
    %84 = vector.load %arg17[%c0_53, %c0_54] : memref<32x16xbf16, #tpu.memory_space<vmem>>, vector<32x16xbf16>
    %cst_55 = arith.constant dense<0.000000e+00> : vector<64x16xf32>
    %85 = tpu.matmul %83, %84, %cst_55 {dimension_numbers = #tpu.dot_dimension_numbers<[1], [0], [0], [1], [0, 0, 1, 1], [], []>} : vector<64x32xbf16>, vector<32x16xbf16>, vector<64x16xf32> -> vector<64x16xf32>
    %c0_56 = arith.constant 0 : index
    %c0_57 = arith.constant 0 : index
    %c0_58 = arith.constant 0 : index
    %86 = vector.load %arg18[%c0_56, %c0_57, %c0_58] : memref<1x64x16xf32, #tpu.memory_space<vmem>>, vector<1x64x16xf32>
    %87 = vector.shape_cast %86 : vector<1x64x16xf32> to vector<64x16xf32>
    %88 = vector.shape_cast %85 : vector<64x16xf32> to vector<1x64x16xf32>
    tpu.vector_store %arg18[%c0_56, %c0_57, %c0_58], %88 {strides = array<i32>} : memref<1x64x16xf32, #tpu.memory_space<vmem>>, vector<1x64x16xf32>,
    return
  }
  func.func @transform_0(%arg0: i32) -> (i32, i32, i32) {
    %c0_i32 = arith.constant 0 : i32
    %c0_i32_0 = arith.constant 0 : i32
    %c0_i32_1 = arith.constant 0 : i32
    return %arg0, %c0_i32, %c0_i32_0 : i32, i32, i32
  }
  func.func @transform_1(%arg0: i32) -> (i32, i32) {
    %c0_i32 = arith.constant 0 : i32
    %c0_i32_0 = arith.constant 0 : i32
    %c0_i32_1 = arith.constant 0 : i32
    return %c0_i32, %c0_i32_0 : i32, i32
  }
  func.func @transform_2(%arg0: i32) -> (i32, i32) {
    %c0_i32 = arith.constant 0 : i32
    %c0_i32_0 = arith.constant 0 : i32
    %c0_i32_1 = arith.constant 0 : i32
    return %c0_i32, %c0_i32_0 : i32, i32
  }
  func.func @transform_3(%arg0: i32) -> (i32, i32) {
    %c0_i32 = arith.constant 0 : i32
    %c0_i32_0 = arith.constant 0 : i32
    %c0_i32_1 = arith.constant 0 : i32
    return %c0_i32, %c0_i32_0 : i32, i32
  }
  func.func @transform_4(%arg0: i32) -> (i32, i32) {
    %c0_i32 = arith.constant 0 : i32
    %c0_i32_0 = arith.constant 0 : i32
    %c0_i32_1 = arith.constant 0 : i32
    return %c0_i32, %c0_i32_0 : i32, i32
  }
  func.func @transform_5(%arg0: i32) -> (i32, i32) {
    %c0_i32 = arith.constant 0 : i32
    %c0_i32_0 = arith.constant 0 : i32
    %c0_i32_1 = arith.constant 0 : i32
    return %c0_i32, %c0_i32_0 : i32, i32
  }
  func.func @transform_6(%arg0: i32) -> (i32, i32) {
    %c0_i32 = arith.constant 0 : i32
    %c0_i32_0 = arith.constant 0 : i32
    %c0_i32_1 = arith.constant 0 : i32
    return %c0_i32, %c0_i32_0 : i32, i32
  }
  func.func @transform_7(%arg0: i32) -> (i32, i32) {
    %c0_i32 = arith.constant 0 : i32
    %c0_i32_0 = arith.constant 0 : i32
    %c0_i32_1 = arith.constant 0 : i32
    return %c0_i32, %c0_i32_0 : i32, i32
  }
  func.func @transform_8(%arg0: i32) -> (i32, i32) {
    %c0_i32 = arith.constant 0 : i32
    %c0_i32_0 = arith.constant 0 : i32
    %c0_i32_1 = arith.constant 0 : i32
    return %c0_i32, %c0_i32_0 : i32, i32
  }
  func.func @transform_9(%arg0: i32) -> (i32, i32) {
    %c0_i32 = arith.constant 0 : i32
    %c0_i32_0 = arith.constant 0 : i32
    %c0_i32_1 = arith.constant 0 : i32
    return %c0_i32, %c0_i32_0 : i32, i32
  }
  func.func @transform_10(%arg0: i32) -> (i32, i32) {
    %c0_i32 = arith.constant 0 : i32
    %c0_i32_0 = arith.constant 0 : i32
    %c0_i32_1 = arith.constant 0 : i32
    return %c0_i32, %c0_i32_0 : i32, i32
  }
  func.func @transform_11(%arg0: i32) -> (i32, i32) {
    %c0_i32 = arith.constant 0 : i32
    %c0_i32_0 = arith.constant 0 : i32
    %c0_i32_1 = arith.constant 0 : i32
    return %c0_i32, %c0_i32_0 : i32, i32
  }
  func.func @transform_12(%arg0: i32) -> (i32, i32) {
    %c0_i32 = arith.constant 0 : i32
    %c0_i32_0 = arith.constant 0 : i32
    %c0_i32_1 = arith.constant 0 : i32
    return %c0_i32, %c0_i32_0 : i32, i32
  }
  func.func @transform_13(%arg0: i32) -> (i32, i32) {
    %c0_i32 = arith.constant 0 : i32
    %c0_i32_0 = arith.constant 0 : i32
    %c0_i32_1 = arith.constant 0 : i32
    return %c0_i32, %c0_i32_0 : i32, i32
  }
  func.func @transform_14(%arg0: i32) -> (i32, i32) {
    %c0_i32 = arith.constant 0 : i32
    %c0_i32_0 = arith.constant 0 : i32
    %c0_i32_1 = arith.constant 0 : i32
    return %c0_i32, %c0_i32_0 : i32, i32
  }
  func.func @transform_15(%arg0: i32) -> (i32, i32) {
    %c0_i32 = arith.constant 0 : i32
    %c0_i32_0 = arith.constant 0 : i32
    %c0_i32_1 = arith.constant 0 : i32
    return %c0_i32, %c0_i32_0 : i32, i32
  }
  func.func @transform_16(%arg0: i32) -> (i32, i32) {
    %c0_i32 = arith.constant 0 : i32
    %c0_i32_0 = arith.constant 0 : i32
    %c0_i32_1 = arith.constant 0 : i32
    return %c0_i32, %c0_i32_0 : i32, i32
  }
  func.func @transform_17(%arg0: i32) -> (i32, i32, i32) {
    %c0_i32 = arith.constant 0 : i32
    %c0_i32_0 = arith.constant 0 : i32
    %c0_i32_1 = arith.constant 0 : i32
    return %arg0, %c0_i32, %c0_i32_0 : i32, i32, i32
  }
}

module attributes {stable_mosaic.version = 11 : i64} {
  func.func @_dense_block_kernel(%arg0: i32, %arg1: memref<1x64x16xf32, #tpu.memory_space<vmem>>, %arg2: memref<1x16xf32, #tpu.memory_space<vmem>>, %arg3: memref<1x16xf32, #tpu.memory_space<vmem>>, %arg4: memref<16x16xbf16, #tpu.memory_space<vmem>>, %arg5: memref<1x16xf32, #tpu.memory_space<vmem>>, %arg6: memref<1x16xf32, #tpu.memory_space<vmem>>, %arg7: memref<16x24xbf16, #tpu.memory_space<vmem>>, %arg8: memref<1x24xf32, #tpu.memory_space<vmem>>, %arg9: memref<1x24xf32, #tpu.memory_space<vmem>>, %arg10: memref<24x16xbf16, #tpu.memory_space<vmem>>, %arg11: memref<1x16xf32, #tpu.memory_space<vmem>>, %arg12: memref<1x16xf32, #tpu.memory_space<vmem>>, %arg13: memref<16x24xbf16, #tpu.memory_space<vmem>>, %arg14: memref<1x32xf32, #tpu.memory_space<vmem>>, %arg15: memref<1x32xf32, #tpu.memory_space<vmem>>, %arg16: memref<32x64xbf16, #tpu.memory_space<vmem>>, %arg17: memref<32x16xbf16, #tpu.memory_space<vmem>>, %arg18: memref<1x32x16xf32, #tpu.memory_space<vmem>>, %arg19: memref<64x32xf32, #tpu.memory_space<vmem>>) attributes {dimension_semantics = [#tpu.dimension_semantics<parallel>], iteration_bounds = array<i64: 2>, scalar_prefetch = 0 : i64, scratch_operands = 1 : i64, tpu.core_type = #tpu.core_type<tc>, window_params = [{transform_indices = @transform_0, window_bounds = array<i64: 1, 64, 16>}, {pipeline_mode = #tpu.pipeline_mode<synchronous>, transform_indices = @transform_1, window_bounds = array<i64: 1, 16>}, {pipeline_mode = #tpu.pipeline_mode<synchronous>, transform_indices = @transform_2, window_bounds = array<i64: 1, 16>}, {pipeline_mode = #tpu.pipeline_mode<synchronous>, transform_indices = @transform_3, window_bounds = array<i64: 16, 16>}, {pipeline_mode = #tpu.pipeline_mode<synchronous>, transform_indices = @transform_4, window_bounds = array<i64: 1, 16>}, {pipeline_mode = #tpu.pipeline_mode<synchronous>, transform_indices = @transform_5, window_bounds = array<i64: 1, 16>}, {pipeline_mode = #tpu.pipeline_mode<synchronous>, transform_indices = @transform_6, window_bounds = array<i64: 16, 24>}, {pipeline_mode = #tpu.pipeline_mode<synchronous>, transform_indices = @transform_7, window_bounds = array<i64: 1, 24>}, {pipeline_mode = #tpu.pipeline_mode<synchronous>, transform_indices = @transform_8, window_bounds = array<i64: 1, 24>}, {pipeline_mode = #tpu.pipeline_mode<synchronous>, transform_indices = @transform_9, window_bounds = array<i64: 24, 16>}, {pipeline_mode = #tpu.pipeline_mode<synchronous>, transform_indices = @transform_10, window_bounds = array<i64: 1, 16>}, {pipeline_mode = #tpu.pipeline_mode<synchronous>, transform_indices = @transform_11, window_bounds = array<i64: 1, 16>}, {pipeline_mode = #tpu.pipeline_mode<synchronous>, transform_indices = @transform_12, window_bounds = array<i64: 16, 24>}, {pipeline_mode = #tpu.pipeline_mode<synchronous>, transform_indices = @transform_13, window_bounds = array<i64: 1, 32>}, {pipeline_mode = #tpu.pipeline_mode<synchronous>, transform_indices = @transform_14, window_bounds = array<i64: 1, 32>}, {pipeline_mode = #tpu.pipeline_mode<synchronous>, transform_indices = @transform_15, window_bounds = array<i64: 32, 64>}, {pipeline_mode = #tpu.pipeline_mode<synchronous>, transform_indices = @transform_16, window_bounds = array<i64: 32, 16>}, {transform_indices = @transform_17, window_bounds = array<i64: 1, 32, 16>}]} {
    %c0 = arith.constant 0 : index
    %c0_0 = arith.constant 0 : index
    %c0_1 = arith.constant 0 : index
    %0 = vector.load %arg1[%c0, %c0_0, %c0_1] : memref<1x64x16xf32, #tpu.memory_space<vmem>>, vector<1x64x16xf32>
    %1 = vector.shape_cast %0 : vector<1x64x16xf32> to vector<64x16xf32>
    %c0_2 = arith.constant 0 : index
    %c0_3 = arith.constant 0 : index
    %2 = vector.load %arg19[%c0_2, %c0_3] : memref<64x32xf32, #tpu.memory_space<vmem>>, vector<64x16xf32>
    tpu.vector_store %arg19[%c0_2, %c0_3], %1 {strides = array<i32>} : memref<64x32xf32, #tpu.memory_space<vmem>>, vector<64x16xf32>,
    %c0_4 = arith.constant 0 : index
    %c0_5 = arith.constant 0 : index
    %3 = vector.load %arg19[%c0_4, %c0_5] : memref<64x32xf32, #tpu.memory_space<vmem>>, vector<64x16xf32>
    %c0_6 = arith.constant 0 : index
    %c0_7 = arith.constant 0 : index
    %4 = vector.load %arg2[%c0_6, %c0_7] : memref<1x16xf32, #tpu.memory_space<vmem>>, vector<1x16xf32>
    %5 = vector.broadcast %4 : vector<1x16xf32> to vector<64x16xf32>
    %6 = arith.mulf %3, %5 : vector<64x16xf32>
    %c0_8 = arith.constant 0 : index
    %c0_9 = arith.constant 0 : index
    %7 = vector.load %arg3[%c0_8, %c0_9] : memref<1x16xf32, #tpu.memory_space<vmem>>, vector<1x16xf32>
    %8 = vector.broadcast %7 : vector<1x16xf32> to vector<64x16xf32>
    %9 = arith.addf %6, %8 : vector<64x16xf32>
    %cst = arith.constant 0.000000e+00 : f32
    %10 = vector.broadcast %cst : f32 to vector<64x16xf32>
    %11 = arith.maximumf %9, %10 : vector<64x16xf32>
    %12 = arith.truncf %11 : vector<64x16xf32> to vector<64x16xbf16>
    %c0_10 = arith.constant 0 : index
    %c0_11 = arith.constant 0 : index
    %13 = vector.load %arg4[%c0_10, %c0_11] : memref<16x16xbf16, #tpu.memory_space<vmem>>, vector<16x16xbf16>
    %cst_12 = arith.constant dense<0.000000e+00> : vector<64x16xf32>
    %14 = tpu.matmul %12, %13, %cst_12 {dimension_numbers = #tpu.dot_dimension_numbers<[1], [0], [0], [1], [0, 0, 1, 1], [], []>} : vector<64x16xbf16>, vector<16x16xbf16>, vector<64x16xf32> -> vector<64x16xf32>
    %c0_13 = arith.constant 0 : index
    %c0_14 = arith.constant 0 : index
    %15 = vector.load %arg5[%c0_13, %c0_14] : memref<1x16xf32, #tpu.memory_space<vmem>>, vector<1x16xf32>
    %16 = vector.broadcast %15 : vector<1x16xf32> to vector<64x16xf32>
    %17 = arith.mulf %14, %16 : vector<64x16xf32>
    %c0_15 = arith.constant 0 : index
    %c0_16 = arith.constant 0 : index
    %18 = vector.load %arg6[%c0_15, %c0_16] : memref<1x16xf32, #tpu.memory_space<vmem>>, vector<1x16xf32>
    %19 = vector.broadcast %18 : vector<1x16xf32> to vector<64x16xf32>
    %20 = arith.addf %17, %19 : vector<64x16xf32>
    %cst_17 = arith.constant 0.000000e+00 : f32
    %21 = vector.broadcast %cst_17 : f32 to vector<64x16xf32>
    %22 = arith.maximumf %20, %21 : vector<64x16xf32>
    %23 = arith.truncf %22 : vector<64x16xf32> to vector<64x16xbf16>
    %c0_18 = arith.constant 0 : index
    %c0_19 = arith.constant 0 : index
    %24 = vector.load %arg7[%c0_18, %c0_19] : memref<16x24xbf16, #tpu.memory_space<vmem>>, vector<16x24xbf16>
    %cst_20 = arith.constant dense<0.000000e+00> : vector<64x24xf32>
    %25 = tpu.matmul %23, %24, %cst_20 {dimension_numbers = #tpu.dot_dimension_numbers<[1], [0], [0], [1], [0, 0, 1, 1], [], []>} : vector<64x16xbf16>, vector<16x24xbf16>, vector<64x24xf32> -> vector<64x24xf32>
    %cst_21 = arith.constant 0.000000e+00 : f32
    %26 = vector.broadcast %cst_21 : f32 to vector<1x24xf32>
    %27 = vector.extract_strided_slice %25 {offsets = [0, 0], sizes = [63, 24], strides = [1, 1]} : vector<64x24xf32> to vector<63x24xf32>
    %28 = tpu.concatenate %26, %27 in 0 : vector<1x24xf32>, vector<63x24xf32> -> vector<64x24xf32>
    %29 = vector.extract_strided_slice %25 {offsets = [1, 0], sizes = [63, 24], strides = [1, 1]} : vector<64x24xf32> to vector<63x24xf32>
    %30 = tpu.concatenate %29, %26 in 0 : vector<63x24xf32>, vector<1x24xf32> -> vector<64x24xf32>
    %31 = vector.extract_strided_slice %28 {offsets = [0, 0], sizes = [64, 8], strides = [1, 1]} : vector<64x24xf32> to vector<64x8xf32>
    %32 = vector.extract_strided_slice %25 {offsets = [0, 8], sizes = [64, 8], strides = [1, 1]} : vector<64x24xf32> to vector<64x8xf32>
    %33 = arith.addf %31, %32 : vector<64x8xf32>
    %34 = vector.extract_strided_slice %30 {offsets = [0, 16], sizes = [64, 8], strides = [1, 1]} : vector<64x24xf32> to vector<64x8xf32>
    %35 = arith.addf %33, %34 : vector<64x8xf32>
    %c0_22 = arith.constant 0 : index
    %c16 = arith.constant 16 : index
    %36 = vector.load %arg19[%c0_22, %c16] : memref<64x32xf32, #tpu.memory_space<vmem>>, vector<64x8xf32>
    tpu.vector_store %arg19[%c0_22, %c16], %35 {strides = array<i32>} : memref<64x32xf32, #tpu.memory_space<vmem>>, vector<64x8xf32>,
    %c0_23 = arith.constant 0 : index
    %c0_24 = arith.constant 0 : index
    %37 = vector.load %arg19[%c0_23, %c0_24] : memref<64x32xf32, #tpu.memory_space<vmem>>, vector<64x24xf32>
    %c0_25 = arith.constant 0 : index
    %c0_26 = arith.constant 0 : index
    %38 = vector.load %arg8[%c0_25, %c0_26] : memref<1x24xf32, #tpu.memory_space<vmem>>, vector<1x24xf32>
    %39 = vector.broadcast %38 : vector<1x24xf32> to vector<64x24xf32>
    %40 = arith.mulf %37, %39 : vector<64x24xf32>
    %c0_27 = arith.constant 0 : index
    %c0_28 = arith.constant 0 : index
    %41 = vector.load %arg9[%c0_27, %c0_28] : memref<1x24xf32, #tpu.memory_space<vmem>>, vector<1x24xf32>
    %42 = vector.broadcast %41 : vector<1x24xf32> to vector<64x24xf32>
    %43 = arith.addf %40, %42 : vector<64x24xf32>
    %cst_29 = arith.constant 0.000000e+00 : f32
    %44 = vector.broadcast %cst_29 : f32 to vector<64x24xf32>
    %45 = arith.maximumf %43, %44 : vector<64x24xf32>
    %46 = arith.truncf %45 : vector<64x24xf32> to vector<64x24xbf16>
    %c0_30 = arith.constant 0 : index
    %c0_31 = arith.constant 0 : index
    %47 = vector.load %arg10[%c0_30, %c0_31] : memref<24x16xbf16, #tpu.memory_space<vmem>>, vector<24x16xbf16>
    %cst_32 = arith.constant dense<0.000000e+00> : vector<64x16xf32>
    %48 = tpu.matmul %46, %47, %cst_32 {dimension_numbers = #tpu.dot_dimension_numbers<[1], [0], [0], [1], [0, 0, 1, 1], [], []>} : vector<64x24xbf16>, vector<24x16xbf16>, vector<64x16xf32> -> vector<64x16xf32>
    %c0_33 = arith.constant 0 : index
    %c0_34 = arith.constant 0 : index
    %49 = vector.load %arg11[%c0_33, %c0_34] : memref<1x16xf32, #tpu.memory_space<vmem>>, vector<1x16xf32>
    %50 = vector.broadcast %49 : vector<1x16xf32> to vector<64x16xf32>
    %51 = arith.mulf %48, %50 : vector<64x16xf32>
    %c0_35 = arith.constant 0 : index
    %c0_36 = arith.constant 0 : index
    %52 = vector.load %arg12[%c0_35, %c0_36] : memref<1x16xf32, #tpu.memory_space<vmem>>, vector<1x16xf32>
    %53 = vector.broadcast %52 : vector<1x16xf32> to vector<64x16xf32>
    %54 = arith.addf %51, %53 : vector<64x16xf32>
    %cst_37 = arith.constant 0.000000e+00 : f32
    %55 = vector.broadcast %cst_37 : f32 to vector<64x16xf32>
    %56 = arith.maximumf %54, %55 : vector<64x16xf32>
    %57 = arith.truncf %56 : vector<64x16xf32> to vector<64x16xbf16>
    %c0_38 = arith.constant 0 : index
    %c0_39 = arith.constant 0 : index
    %58 = vector.load %arg13[%c0_38, %c0_39] : memref<16x24xbf16, #tpu.memory_space<vmem>>, vector<16x24xbf16>
    %cst_40 = arith.constant dense<0.000000e+00> : vector<64x24xf32>
    %59 = tpu.matmul %57, %58, %cst_40 {dimension_numbers = #tpu.dot_dimension_numbers<[1], [0], [0], [1], [0, 0, 1, 1], [], []>} : vector<64x16xbf16>, vector<16x24xbf16>, vector<64x24xf32> -> vector<64x24xf32>
    %cst_41 = arith.constant 0.000000e+00 : f32
    %60 = vector.broadcast %cst_41 : f32 to vector<1x24xf32>
    %61 = vector.extract_strided_slice %59 {offsets = [0, 0], sizes = [63, 24], strides = [1, 1]} : vector<64x24xf32> to vector<63x24xf32>
    %62 = tpu.concatenate %60, %61 in 0 : vector<1x24xf32>, vector<63x24xf32> -> vector<64x24xf32>
    %63 = vector.extract_strided_slice %59 {offsets = [1, 0], sizes = [63, 24], strides = [1, 1]} : vector<64x24xf32> to vector<63x24xf32>
    %64 = tpu.concatenate %63, %60 in 0 : vector<63x24xf32>, vector<1x24xf32> -> vector<64x24xf32>
    %65 = vector.extract_strided_slice %62 {offsets = [0, 0], sizes = [64, 8], strides = [1, 1]} : vector<64x24xf32> to vector<64x8xf32>
    %66 = vector.extract_strided_slice %59 {offsets = [0, 8], sizes = [64, 8], strides = [1, 1]} : vector<64x24xf32> to vector<64x8xf32>
    %67 = arith.addf %65, %66 : vector<64x8xf32>
    %68 = vector.extract_strided_slice %64 {offsets = [0, 16], sizes = [64, 8], strides = [1, 1]} : vector<64x24xf32> to vector<64x8xf32>
    %69 = arith.addf %67, %68 : vector<64x8xf32>
    %c0_42 = arith.constant 0 : index
    %c24 = arith.constant 24 : index
    %70 = vector.load %arg19[%c0_42, %c24] : memref<64x32xf32, #tpu.memory_space<vmem>>, vector<64x8xf32>
    tpu.vector_store %arg19[%c0_42, %c24], %69 {strides = array<i32>} : memref<64x32xf32, #tpu.memory_space<vmem>>, vector<64x8xf32>,
    %c0_43 = arith.constant 0 : index
    %c0_44 = arith.constant 0 : index
    %71 = vector.load %arg19[%c0_43, %c0_44] : memref<64x32xf32, #tpu.memory_space<vmem>>, vector<64x32xf32>
    %c0_45 = arith.constant 0 : index
    %c0_46 = arith.constant 0 : index
    %72 = vector.load %arg14[%c0_45, %c0_46] : memref<1x32xf32, #tpu.memory_space<vmem>>, vector<1x32xf32>
    %73 = vector.broadcast %72 : vector<1x32xf32> to vector<64x32xf32>
    %74 = arith.mulf %71, %73 : vector<64x32xf32>
    %c0_47 = arith.constant 0 : index
    %c0_48 = arith.constant 0 : index
    %75 = vector.load %arg15[%c0_47, %c0_48] : memref<1x32xf32, #tpu.memory_space<vmem>>, vector<1x32xf32>
    %76 = vector.broadcast %75 : vector<1x32xf32> to vector<64x32xf32>
    %77 = arith.addf %74, %76 : vector<64x32xf32>
    %cst_49 = arith.constant 0.000000e+00 : f32
    %78 = vector.broadcast %cst_49 : f32 to vector<64x32xf32>
    %79 = arith.maximumf %77, %78 : vector<64x32xf32>
    %c0_50 = arith.constant 0 : index
    %c0_51 = arith.constant 0 : index
    %80 = vector.load %arg16[%c0_50, %c0_51] : memref<32x64xbf16, #tpu.memory_space<vmem>>, vector<32x64xbf16>
    %81 = arith.truncf %79 : vector<64x32xf32> to vector<64x32xbf16>
    %cst_52 = arith.constant dense<0.000000e+00> : vector<32x32xf32>
    %82 = tpu.matmul %80, %81, %cst_52 {dimension_numbers = #tpu.dot_dimension_numbers<[1], [0], [0], [1], [0, 0, 1, 1], [], []>} : vector<32x64xbf16>, vector<64x32xbf16>, vector<32x32xf32> -> vector<32x32xf32>
    %83 = arith.truncf %82 : vector<32x32xf32> to vector<32x32xbf16>
    %c0_53 = arith.constant 0 : index
    %c0_54 = arith.constant 0 : index
    %84 = vector.load %arg17[%c0_53, %c0_54] : memref<32x16xbf16, #tpu.memory_space<vmem>>, vector<32x16xbf16>
    %cst_55 = arith.constant dense<0.000000e+00> : vector<32x16xf32>
    %85 = tpu.matmul %83, %84, %cst_55 {dimension_numbers = #tpu.dot_dimension_numbers<[1], [0], [0], [1], [0, 0, 1, 1], [], []>} : vector<32x32xbf16>, vector<32x16xbf16>, vector<32x16xf32> -> vector<32x16xf32>
    %c0_56 = arith.constant 0 : index
    %c0_57 = arith.constant 0 : index
    %c0_58 = arith.constant 0 : index
    %86 = vector.load %arg18[%c0_56, %c0_57, %c0_58] : memref<1x32x16xf32, #tpu.memory_space<vmem>>, vector<1x32x16xf32>
    %87 = vector.shape_cast %86 : vector<1x32x16xf32> to vector<32x16xf32>
    %88 = vector.shape_cast %85 : vector<32x16xf32> to vector<1x32x16xf32>
    tpu.vector_store %arg18[%c0_56, %c0_57, %c0_58], %88 {strides = array<i32>} : memref<1x32x16xf32, #tpu.memory_space<vmem>>, vector<1x32x16xf32>,
    return
  }
  func.func @transform_0(%arg0: i32) -> (i32, i32, i32) {
    %c0_i32 = arith.constant 0 : i32
    %c0_i32_0 = arith.constant 0 : i32
    %c0_i32_1 = arith.constant 0 : i32
    return %arg0, %c0_i32, %c0_i32_0 : i32, i32, i32
  }
  func.func @transform_1(%arg0: i32) -> (i32, i32) {
    %c0_i32 = arith.constant 0 : i32
    %c0_i32_0 = arith.constant 0 : i32
    %c0_i32_1 = arith.constant 0 : i32
    return %c0_i32, %c0_i32_0 : i32, i32
  }
  func.func @transform_2(%arg0: i32) -> (i32, i32) {
    %c0_i32 = arith.constant 0 : i32
    %c0_i32_0 = arith.constant 0 : i32
    %c0_i32_1 = arith.constant 0 : i32
    return %c0_i32, %c0_i32_0 : i32, i32
  }
  func.func @transform_3(%arg0: i32) -> (i32, i32) {
    %c0_i32 = arith.constant 0 : i32
    %c0_i32_0 = arith.constant 0 : i32
    %c0_i32_1 = arith.constant 0 : i32
    return %c0_i32, %c0_i32_0 : i32, i32
  }
  func.func @transform_4(%arg0: i32) -> (i32, i32) {
    %c0_i32 = arith.constant 0 : i32
    %c0_i32_0 = arith.constant 0 : i32
    %c0_i32_1 = arith.constant 0 : i32
    return %c0_i32, %c0_i32_0 : i32, i32
  }
  func.func @transform_5(%arg0: i32) -> (i32, i32) {
    %c0_i32 = arith.constant 0 : i32
    %c0_i32_0 = arith.constant 0 : i32
    %c0_i32_1 = arith.constant 0 : i32
    return %c0_i32, %c0_i32_0 : i32, i32
  }
  func.func @transform_6(%arg0: i32) -> (i32, i32) {
    %c0_i32 = arith.constant 0 : i32
    %c0_i32_0 = arith.constant 0 : i32
    %c0_i32_1 = arith.constant 0 : i32
    return %c0_i32, %c0_i32_0 : i32, i32
  }
  func.func @transform_7(%arg0: i32) -> (i32, i32) {
    %c0_i32 = arith.constant 0 : i32
    %c0_i32_0 = arith.constant 0 : i32
    %c0_i32_1 = arith.constant 0 : i32
    return %c0_i32, %c0_i32_0 : i32, i32
  }
  func.func @transform_8(%arg0: i32) -> (i32, i32) {
    %c0_i32 = arith.constant 0 : i32
    %c0_i32_0 = arith.constant 0 : i32
    %c0_i32_1 = arith.constant 0 : i32
    return %c0_i32, %c0_i32_0 : i32, i32
  }
  func.func @transform_9(%arg0: i32) -> (i32, i32) {
    %c0_i32 = arith.constant 0 : i32
    %c0_i32_0 = arith.constant 0 : i32
    %c0_i32_1 = arith.constant 0 : i32
    return %c0_i32, %c0_i32_0 : i32, i32
  }
  func.func @transform_10(%arg0: i32) -> (i32, i32) {
    %c0_i32 = arith.constant 0 : i32
    %c0_i32_0 = arith.constant 0 : i32
    %c0_i32_1 = arith.constant 0 : i32
    return %c0_i32, %c0_i32_0 : i32, i32
  }
  func.func @transform_11(%arg0: i32) -> (i32, i32) {
    %c0_i32 = arith.constant 0 : i32
    %c0_i32_0 = arith.constant 0 : i32
    %c0_i32_1 = arith.constant 0 : i32
    return %c0_i32, %c0_i32_0 : i32, i32
  }
  func.func @transform_12(%arg0: i32) -> (i32, i32) {
    %c0_i32 = arith.constant 0 : i32
    %c0_i32_0 = arith.constant 0 : i32
    %c0_i32_1 = arith.constant 0 : i32
    return %c0_i32, %c0_i32_0 : i32, i32
  }
  func.func @transform_13(%arg0: i32) -> (i32, i32) {
    %c0_i32 = arith.constant 0 : i32
    %c0_i32_0 = arith.constant 0 : i32
    %c0_i32_1 = arith.constant 0 : i32
    return %c0_i32, %c0_i32_0 : i32, i32
  }
  func.func @transform_14(%arg0: i32) -> (i32, i32) {
    %c0_i32 = arith.constant 0 : i32
    %c0_i32_0 = arith.constant 0 : i32
    %c0_i32_1 = arith.constant 0 : i32
    return %c0_i32, %c0_i32_0 : i32, i32
  }
  func.func @transform_15(%arg0: i32) -> (i32, i32) {
    %c0_i32 = arith.constant 0 : i32
    %c0_i32_0 = arith.constant 0 : i32
    %c0_i32_1 = arith.constant 0 : i32
    return %c0_i32, %c0_i32_0 : i32, i32
  }
  func.func @transform_16(%arg0: i32) -> (i32, i32) {
    %c0_i32 = arith.constant 0 : i32
    %c0_i32_0 = arith.constant 0 : i32
    %c0_i32_1 = arith.constant 0 : i32
    return %c0_i32, %c0_i32_0 : i32, i32
  }
  func.func @transform_17(%arg0: i32) -> (i32, i32, i32) {
    %c0_i32 = arith.constant 0 : i32
    %c0_i32_0 = arith.constant 0 : i32
    %c0_i32_1 = arith.constant 0 : i32
    return %arg0, %c0_i32, %c0_i32_0 : i32, i32, i32
  }
}

module attributes {stable_mosaic.version = 11 : i64} {
  func.func @_dense_block_kernel(%arg0: i32, %arg1: memref<1x32x16xf32, #tpu.memory_space<vmem>>, %arg2: memref<1x16xf32, #tpu.memory_space<vmem>>, %arg3: memref<1x16xf32, #tpu.memory_space<vmem>>, %arg4: memref<16x16xbf16, #tpu.memory_space<vmem>>, %arg5: memref<1x16xf32, #tpu.memory_space<vmem>>, %arg6: memref<1x16xf32, #tpu.memory_space<vmem>>, %arg7: memref<16x24xbf16, #tpu.memory_space<vmem>>, %arg8: memref<1x24xf32, #tpu.memory_space<vmem>>, %arg9: memref<1x24xf32, #tpu.memory_space<vmem>>, %arg10: memref<24x16xbf16, #tpu.memory_space<vmem>>, %arg11: memref<1x16xf32, #tpu.memory_space<vmem>>, %arg12: memref<1x16xf32, #tpu.memory_space<vmem>>, %arg13: memref<16x24xbf16, #tpu.memory_space<vmem>>, %arg14: memref<1x32xf32, #tpu.memory_space<vmem>>, %arg15: memref<1x32xf32, #tpu.memory_space<vmem>>, %arg16: memref<16x32xbf16, #tpu.memory_space<vmem>>, %arg17: memref<32x16xbf16, #tpu.memory_space<vmem>>, %arg18: memref<1x16x16xf32, #tpu.memory_space<vmem>>, %arg19: memref<32x32xf32, #tpu.memory_space<vmem>>) attributes {dimension_semantics = [#tpu.dimension_semantics<parallel>], iteration_bounds = array<i64: 2>, scalar_prefetch = 0 : i64, scratch_operands = 1 : i64, tpu.core_type = #tpu.core_type<tc>, window_params = [{transform_indices = @transform_0, window_bounds = array<i64: 1, 32, 16>}, {pipeline_mode = #tpu.pipeline_mode<synchronous>, transform_indices = @transform_1, window_bounds = array<i64: 1, 16>}, {pipeline_mode = #tpu.pipeline_mode<synchronous>, transform_indices = @transform_2, window_bounds = array<i64: 1, 16>}, {pipeline_mode = #tpu.pipeline_mode<synchronous>, transform_indices = @transform_3, window_bounds = array<i64: 16, 16>}, {pipeline_mode = #tpu.pipeline_mode<synchronous>, transform_indices = @transform_4, window_bounds = array<i64: 1, 16>}, {pipeline_mode = #tpu.pipeline_mode<synchronous>, transform_indices = @transform_5, window_bounds = array<i64: 1, 16>}, {pipeline_mode = #tpu.pipeline_mode<synchronous>, transform_indices = @transform_6, window_bounds = array<i64: 16, 24>}, {pipeline_mode = #tpu.pipeline_mode<synchronous>, transform_indices = @transform_7, window_bounds = array<i64: 1, 24>}, {pipeline_mode = #tpu.pipeline_mode<synchronous>, transform_indices = @transform_8, window_bounds = array<i64: 1, 24>}, {pipeline_mode = #tpu.pipeline_mode<synchronous>, transform_indices = @transform_9, window_bounds = array<i64: 24, 16>}, {pipeline_mode = #tpu.pipeline_mode<synchronous>, transform_indices = @transform_10, window_bounds = array<i64: 1, 16>}, {pipeline_mode = #tpu.pipeline_mode<synchronous>, transform_indices = @transform_11, window_bounds = array<i64: 1, 16>}, {pipeline_mode = #tpu.pipeline_mode<synchronous>, transform_indices = @transform_12, window_bounds = array<i64: 16, 24>}, {pipeline_mode = #tpu.pipeline_mode<synchronous>, transform_indices = @transform_13, window_bounds = array<i64: 1, 32>}, {pipeline_mode = #tpu.pipeline_mode<synchronous>, transform_indices = @transform_14, window_bounds = array<i64: 1, 32>}, {pipeline_mode = #tpu.pipeline_mode<synchronous>, transform_indices = @transform_15, window_bounds = array<i64: 16, 32>}, {pipeline_mode = #tpu.pipeline_mode<synchronous>, transform_indices = @transform_16, window_bounds = array<i64: 32, 16>}, {transform_indices = @transform_17, window_bounds = array<i64: 1, 16, 16>}]} {
    %c0 = arith.constant 0 : index
    %c0_0 = arith.constant 0 : index
    %c0_1 = arith.constant 0 : index
    %0 = vector.load %arg1[%c0, %c0_0, %c0_1] : memref<1x32x16xf32, #tpu.memory_space<vmem>>, vector<1x32x16xf32>
    %1 = vector.shape_cast %0 : vector<1x32x16xf32> to vector<32x16xf32>
    %c0_2 = arith.constant 0 : index
    %c0_3 = arith.constant 0 : index
    %2 = vector.load %arg19[%c0_2, %c0_3] : memref<32x32xf32, #tpu.memory_space<vmem>>, vector<32x16xf32>
    tpu.vector_store %arg19[%c0_2, %c0_3], %1 {strides = array<i32>} : memref<32x32xf32, #tpu.memory_space<vmem>>, vector<32x16xf32>,
    %c0_4 = arith.constant 0 : index
    %c0_5 = arith.constant 0 : index
    %3 = vector.load %arg19[%c0_4, %c0_5] : memref<32x32xf32, #tpu.memory_space<vmem>>, vector<32x16xf32>
    %c0_6 = arith.constant 0 : index
    %c0_7 = arith.constant 0 : index
    %4 = vector.load %arg2[%c0_6, %c0_7] : memref<1x16xf32, #tpu.memory_space<vmem>>, vector<1x16xf32>
    %5 = vector.broadcast %4 : vector<1x16xf32> to vector<32x16xf32>
    %6 = arith.mulf %3, %5 : vector<32x16xf32>
    %c0_8 = arith.constant 0 : index
    %c0_9 = arith.constant 0 : index
    %7 = vector.load %arg3[%c0_8, %c0_9] : memref<1x16xf32, #tpu.memory_space<vmem>>, vector<1x16xf32>
    %8 = vector.broadcast %7 : vector<1x16xf32> to vector<32x16xf32>
    %9 = arith.addf %6, %8 : vector<32x16xf32>
    %cst = arith.constant 0.000000e+00 : f32
    %10 = vector.broadcast %cst : f32 to vector<32x16xf32>
    %11 = arith.maximumf %9, %10 : vector<32x16xf32>
    %12 = arith.truncf %11 : vector<32x16xf32> to vector<32x16xbf16>
    %c0_10 = arith.constant 0 : index
    %c0_11 = arith.constant 0 : index
    %13 = vector.load %arg4[%c0_10, %c0_11] : memref<16x16xbf16, #tpu.memory_space<vmem>>, vector<16x16xbf16>
    %cst_12 = arith.constant dense<0.000000e+00> : vector<32x16xf32>
    %14 = tpu.matmul %12, %13, %cst_12 {dimension_numbers = #tpu.dot_dimension_numbers<[1], [0], [0], [1], [0, 0, 1, 1], [], []>} : vector<32x16xbf16>, vector<16x16xbf16>, vector<32x16xf32> -> vector<32x16xf32>
    %c0_13 = arith.constant 0 : index
    %c0_14 = arith.constant 0 : index
    %15 = vector.load %arg5[%c0_13, %c0_14] : memref<1x16xf32, #tpu.memory_space<vmem>>, vector<1x16xf32>
    %16 = vector.broadcast %15 : vector<1x16xf32> to vector<32x16xf32>
    %17 = arith.mulf %14, %16 : vector<32x16xf32>
    %c0_15 = arith.constant 0 : index
    %c0_16 = arith.constant 0 : index
    %18 = vector.load %arg6[%c0_15, %c0_16] : memref<1x16xf32, #tpu.memory_space<vmem>>, vector<1x16xf32>
    %19 = vector.broadcast %18 : vector<1x16xf32> to vector<32x16xf32>
    %20 = arith.addf %17, %19 : vector<32x16xf32>
    %cst_17 = arith.constant 0.000000e+00 : f32
    %21 = vector.broadcast %cst_17 : f32 to vector<32x16xf32>
    %22 = arith.maximumf %20, %21 : vector<32x16xf32>
    %23 = arith.truncf %22 : vector<32x16xf32> to vector<32x16xbf16>
    %c0_18 = arith.constant 0 : index
    %c0_19 = arith.constant 0 : index
    %24 = vector.load %arg7[%c0_18, %c0_19] : memref<16x24xbf16, #tpu.memory_space<vmem>>, vector<16x24xbf16>
    %cst_20 = arith.constant dense<0.000000e+00> : vector<32x24xf32>
    %25 = tpu.matmul %23, %24, %cst_20 {dimension_numbers = #tpu.dot_dimension_numbers<[1], [0], [0], [1], [0, 0, 1, 1], [], []>} : vector<32x16xbf16>, vector<16x24xbf16>, vector<32x24xf32> -> vector<32x24xf32>
    %cst_21 = arith.constant 0.000000e+00 : f32
    %26 = vector.broadcast %cst_21 : f32 to vector<1x24xf32>
    %27 = vector.extract_strided_slice %25 {offsets = [0, 0], sizes = [31, 24], strides = [1, 1]} : vector<32x24xf32> to vector<31x24xf32>
    %28 = tpu.concatenate %26, %27 in 0 : vector<1x24xf32>, vector<31x24xf32> -> vector<32x24xf32>
    %29 = vector.extract_strided_slice %25 {offsets = [1, 0], sizes = [31, 24], strides = [1, 1]} : vector<32x24xf32> to vector<31x24xf32>
    %30 = tpu.concatenate %29, %26 in 0 : vector<31x24xf32>, vector<1x24xf32> -> vector<32x24xf32>
    %31 = vector.extract_strided_slice %28 {offsets = [0, 0], sizes = [32, 8], strides = [1, 1]} : vector<32x24xf32> to vector<32x8xf32>
    %32 = vector.extract_strided_slice %25 {offsets = [0, 8], sizes = [32, 8], strides = [1, 1]} : vector<32x24xf32> to vector<32x8xf32>
    %33 = arith.addf %31, %32 : vector<32x8xf32>
    %34 = vector.extract_strided_slice %30 {offsets = [0, 16], sizes = [32, 8], strides = [1, 1]} : vector<32x24xf32> to vector<32x8xf32>
    %35 = arith.addf %33, %34 : vector<32x8xf32>
    %c0_22 = arith.constant 0 : index
    %c16 = arith.constant 16 : index
    %36 = vector.load %arg19[%c0_22, %c16] : memref<32x32xf32, #tpu.memory_space<vmem>>, vector<32x8xf32>
    tpu.vector_store %arg19[%c0_22, %c16], %35 {strides = array<i32>} : memref<32x32xf32, #tpu.memory_space<vmem>>, vector<32x8xf32>,
    %c0_23 = arith.constant 0 : index
    %c0_24 = arith.constant 0 : index
    %37 = vector.load %arg19[%c0_23, %c0_24] : memref<32x32xf32, #tpu.memory_space<vmem>>, vector<32x24xf32>
    %c0_25 = arith.constant 0 : index
    %c0_26 = arith.constant 0 : index
    %38 = vector.load %arg8[%c0_25, %c0_26] : memref<1x24xf32, #tpu.memory_space<vmem>>, vector<1x24xf32>
    %39 = vector.broadcast %38 : vector<1x24xf32> to vector<32x24xf32>
    %40 = arith.mulf %37, %39 : vector<32x24xf32>
    %c0_27 = arith.constant 0 : index
    %c0_28 = arith.constant 0 : index
    %41 = vector.load %arg9[%c0_27, %c0_28] : memref<1x24xf32, #tpu.memory_space<vmem>>, vector<1x24xf32>
    %42 = vector.broadcast %41 : vector<1x24xf32> to vector<32x24xf32>
    %43 = arith.addf %40, %42 : vector<32x24xf32>
    %cst_29 = arith.constant 0.000000e+00 : f32
    %44 = vector.broadcast %cst_29 : f32 to vector<32x24xf32>
    %45 = arith.maximumf %43, %44 : vector<32x24xf32>
    %46 = arith.truncf %45 : vector<32x24xf32> to vector<32x24xbf16>
    %c0_30 = arith.constant 0 : index
    %c0_31 = arith.constant 0 : index
    %47 = vector.load %arg10[%c0_30, %c0_31] : memref<24x16xbf16, #tpu.memory_space<vmem>>, vector<24x16xbf16>
    %cst_32 = arith.constant dense<0.000000e+00> : vector<32x16xf32>
    %48 = tpu.matmul %46, %47, %cst_32 {dimension_numbers = #tpu.dot_dimension_numbers<[1], [0], [0], [1], [0, 0, 1, 1], [], []>} : vector<32x24xbf16>, vector<24x16xbf16>, vector<32x16xf32> -> vector<32x16xf32>
    %c0_33 = arith.constant 0 : index
    %c0_34 = arith.constant 0 : index
    %49 = vector.load %arg11[%c0_33, %c0_34] : memref<1x16xf32, #tpu.memory_space<vmem>>, vector<1x16xf32>
    %50 = vector.broadcast %49 : vector<1x16xf32> to vector<32x16xf32>
    %51 = arith.mulf %48, %50 : vector<32x16xf32>
    %c0_35 = arith.constant 0 : index
    %c0_36 = arith.constant 0 : index
    %52 = vector.load %arg12[%c0_35, %c0_36] : memref<1x16xf32, #tpu.memory_space<vmem>>, vector<1x16xf32>
    %53 = vector.broadcast %52 : vector<1x16xf32> to vector<32x16xf32>
    %54 = arith.addf %51, %53 : vector<32x16xf32>
    %cst_37 = arith.constant 0.000000e+00 : f32
    %55 = vector.broadcast %cst_37 : f32 to vector<32x16xf32>
    %56 = arith.maximumf %54, %55 : vector<32x16xf32>
    %57 = arith.truncf %56 : vector<32x16xf32> to vector<32x16xbf16>
    %c0_38 = arith.constant 0 : index
    %c0_39 = arith.constant 0 : index
    %58 = vector.load %arg13[%c0_38, %c0_39] : memref<16x24xbf16, #tpu.memory_space<vmem>>, vector<16x24xbf16>
    %cst_40 = arith.constant dense<0.000000e+00> : vector<32x24xf32>
    %59 = tpu.matmul %57, %58, %cst_40 {dimension_numbers = #tpu.dot_dimension_numbers<[1], [0], [0], [1], [0, 0, 1, 1], [], []>} : vector<32x16xbf16>, vector<16x24xbf16>, vector<32x24xf32> -> vector<32x24xf32>
    %cst_41 = arith.constant 0.000000e+00 : f32
    %60 = vector.broadcast %cst_41 : f32 to vector<1x24xf32>
    %61 = vector.extract_strided_slice %59 {offsets = [0, 0], sizes = [31, 24], strides = [1, 1]} : vector<32x24xf32> to vector<31x24xf32>
    %62 = tpu.concatenate %60, %61 in 0 : vector<1x24xf32>, vector<31x24xf32> -> vector<32x24xf32>
    %63 = vector.extract_strided_slice %59 {offsets = [1, 0], sizes = [31, 24], strides = [1, 1]} : vector<32x24xf32> to vector<31x24xf32>
    %64 = tpu.concatenate %63, %60 in 0 : vector<31x24xf32>, vector<1x24xf32> -> vector<32x24xf32>
    %65 = vector.extract_strided_slice %62 {offsets = [0, 0], sizes = [32, 8], strides = [1, 1]} : vector<32x24xf32> to vector<32x8xf32>
    %66 = vector.extract_strided_slice %59 {offsets = [0, 8], sizes = [32, 8], strides = [1, 1]} : vector<32x24xf32> to vector<32x8xf32>
    %67 = arith.addf %65, %66 : vector<32x8xf32>
    %68 = vector.extract_strided_slice %64 {offsets = [0, 16], sizes = [32, 8], strides = [1, 1]} : vector<32x24xf32> to vector<32x8xf32>
    %69 = arith.addf %67, %68 : vector<32x8xf32>
    %c0_42 = arith.constant 0 : index
    %c24 = arith.constant 24 : index
    %70 = vector.load %arg19[%c0_42, %c24] : memref<32x32xf32, #tpu.memory_space<vmem>>, vector<32x8xf32>
    tpu.vector_store %arg19[%c0_42, %c24], %69 {strides = array<i32>} : memref<32x32xf32, #tpu.memory_space<vmem>>, vector<32x8xf32>,
    %c0_43 = arith.constant 0 : index
    %c0_44 = arith.constant 0 : index
    %71 = vector.load %arg19[%c0_43, %c0_44] : memref<32x32xf32, #tpu.memory_space<vmem>>, vector<32x32xf32>
    %c0_45 = arith.constant 0 : index
    %c0_46 = arith.constant 0 : index
    %72 = vector.load %arg14[%c0_45, %c0_46] : memref<1x32xf32, #tpu.memory_space<vmem>>, vector<1x32xf32>
    %73 = vector.broadcast %72 : vector<1x32xf32> to vector<32x32xf32>
    %74 = arith.mulf %71, %73 : vector<32x32xf32>
    %c0_47 = arith.constant 0 : index
    %c0_48 = arith.constant 0 : index
    %75 = vector.load %arg15[%c0_47, %c0_48] : memref<1x32xf32, #tpu.memory_space<vmem>>, vector<1x32xf32>
    %76 = vector.broadcast %75 : vector<1x32xf32> to vector<32x32xf32>
    %77 = arith.addf %74, %76 : vector<32x32xf32>
    %cst_49 = arith.constant 0.000000e+00 : f32
    %78 = vector.broadcast %cst_49 : f32 to vector<32x32xf32>
    %79 = arith.maximumf %77, %78 : vector<32x32xf32>
    %c0_50 = arith.constant 0 : index
    %c0_51 = arith.constant 0 : index
    %80 = vector.load %arg16[%c0_50, %c0_51] : memref<16x32xbf16, #tpu.memory_space<vmem>>, vector<16x32xbf16>
    %81 = arith.truncf %79 : vector<32x32xf32> to vector<32x32xbf16>
    %cst_52 = arith.constant dense<0.000000e+00> : vector<16x32xf32>
    %82 = tpu.matmul %80, %81, %cst_52 {dimension_numbers = #tpu.dot_dimension_numbers<[1], [0], [0], [1], [0, 0, 1, 1], [], []>} : vector<16x32xbf16>, vector<32x32xbf16>, vector<16x32xf32> -> vector<16x32xf32>
    %83 = arith.truncf %82 : vector<16x32xf32> to vector<16x32xbf16>
    %c0_53 = arith.constant 0 : index
    %c0_54 = arith.constant 0 : index
    %84 = vector.load %arg17[%c0_53, %c0_54] : memref<32x16xbf16, #tpu.memory_space<vmem>>, vector<32x16xbf16>
    %cst_55 = arith.constant dense<0.000000e+00> : vector<16x16xf32>
    %85 = tpu.matmul %83, %84, %cst_55 {dimension_numbers = #tpu.dot_dimension_numbers<[1], [0], [0], [1], [0, 0, 1, 1], [], []>} : vector<16x32xbf16>, vector<32x16xbf16>, vector<16x16xf32> -> vector<16x16xf32>
    %c0_56 = arith.constant 0 : index
    %c0_57 = arith.constant 0 : index
    %c0_58 = arith.constant 0 : index
    %86 = vector.load %arg18[%c0_56, %c0_57, %c0_58] : memref<1x16x16xf32, #tpu.memory_space<vmem>>, vector<1x16x16xf32>
    %87 = vector.shape_cast %86 : vector<1x16x16xf32> to vector<16x16xf32>
    %88 = vector.shape_cast %85 : vector<16x16xf32> to vector<1x16x16xf32>
    tpu.vector_store %arg18[%c0_56, %c0_57, %c0_58], %88 {strides = array<i32>} : memref<1x16x16xf32, #tpu.memory_space<vmem>>, vector<1x16x16xf32>,
    return
  }
  func.func @transform_0(%arg0: i32) -> (i32, i32, i32) {
    %c0_i32 = arith.constant 0 : i32
    %c0_i32_0 = arith.constant 0 : i32
    %c0_i32_1 = arith.constant 0 : i32
    return %arg0, %c0_i32, %c0_i32_0 : i32, i32, i32
  }
  func.func @transform_1(%arg0: i32) -> (i32, i32) {
    %c0_i32 = arith.constant 0 : i32
    %c0_i32_0 = arith.constant 0 : i32
    %c0_i32_1 = arith.constant 0 : i32
    return %c0_i32, %c0_i32_0 : i32, i32
  }
  func.func @transform_2(%arg0: i32) -> (i32, i32) {
    %c0_i32 = arith.constant 0 : i32
    %c0_i32_0 = arith.constant 0 : i32
    %c0_i32_1 = arith.constant 0 : i32
    return %c0_i32, %c0_i32_0 : i32, i32
  }
  func.func @transform_3(%arg0: i32) -> (i32, i32) {
    %c0_i32 = arith.constant 0 : i32
    %c0_i32_0 = arith.constant 0 : i32
    %c0_i32_1 = arith.constant 0 : i32
    return %c0_i32, %c0_i32_0 : i32, i32
  }
  func.func @transform_4(%arg0: i32) -> (i32, i32) {
    %c0_i32 = arith.constant 0 : i32
    %c0_i32_0 = arith.constant 0 : i32
    %c0_i32_1 = arith.constant 0 : i32
    return %c0_i32, %c0_i32_0 : i32, i32
  }
  func.func @transform_5(%arg0: i32) -> (i32, i32) {
    %c0_i32 = arith.constant 0 : i32
    %c0_i32_0 = arith.constant 0 : i32
    %c0_i32_1 = arith.constant 0 : i32
    return %c0_i32, %c0_i32_0 : i32, i32
  }
  func.func @transform_6(%arg0: i32) -> (i32, i32) {
    %c0_i32 = arith.constant 0 : i32
    %c0_i32_0 = arith.constant 0 : i32
    %c0_i32_1 = arith.constant 0 : i32
    return %c0_i32, %c0_i32_0 : i32, i32
  }
  func.func @transform_7(%arg0: i32) -> (i32, i32) {
    %c0_i32 = arith.constant 0 : i32
    %c0_i32_0 = arith.constant 0 : i32
    %c0_i32_1 = arith.constant 0 : i32
    return %c0_i32, %c0_i32_0 : i32, i32
  }
  func.func @transform_8(%arg0: i32) -> (i32, i32) {
    %c0_i32 = arith.constant 0 : i32
    %c0_i32_0 = arith.constant 0 : i32
    %c0_i32_1 = arith.constant 0 : i32
    return %c0_i32, %c0_i32_0 : i32, i32
  }
  func.func @transform_9(%arg0: i32) -> (i32, i32) {
    %c0_i32 = arith.constant 0 : i32
    %c0_i32_0 = arith.constant 0 : i32
    %c0_i32_1 = arith.constant 0 : i32
    return %c0_i32, %c0_i32_0 : i32, i32
  }
  func.func @transform_10(%arg0: i32) -> (i32, i32) {
    %c0_i32 = arith.constant 0 : i32
    %c0_i32_0 = arith.constant 0 : i32
    %c0_i32_1 = arith.constant 0 : i32
    return %c0_i32, %c0_i32_0 : i32, i32
  }
  func.func @transform_11(%arg0: i32) -> (i32, i32) {
    %c0_i32 = arith.constant 0 : i32
    %c0_i32_0 = arith.constant 0 : i32
    %c0_i32_1 = arith.constant 0 : i32
    return %c0_i32, %c0_i32_0 : i32, i32
  }
  func.func @transform_12(%arg0: i32) -> (i32, i32) {
    %c0_i32 = arith.constant 0 : i32
    %c0_i32_0 = arith.constant 0 : i32
    %c0_i32_1 = arith.constant 0 : i32
    return %c0_i32, %c0_i32_0 : i32, i32
  }
  func.func @transform_13(%arg0: i32) -> (i32, i32) {
    %c0_i32 = arith.constant 0 : i32
    %c0_i32_0 = arith.constant 0 : i32
    %c0_i32_1 = arith.constant 0 : i32
    return %c0_i32, %c0_i32_0 : i32, i32
  }
  func.func @transform_14(%arg0: i32) -> (i32, i32) {
    %c0_i32 = arith.constant 0 : i32
    %c0_i32_0 = arith.constant 0 : i32
    %c0_i32_1 = arith.constant 0 : i32
    return %c0_i32, %c0_i32_0 : i32, i32
  }
  func.func @transform_15(%arg0: i32) -> (i32, i32) {
    %c0_i32 = arith.constant 0 : i32
    %c0_i32_0 = arith.constant 0 : i32
    %c0_i32_1 = arith.constant 0 : i32
    return %c0_i32, %c0_i32_0 : i32, i32
  }
  func.func @transform_16(%arg0: i32) -> (i32, i32) {
    %c0_i32 = arith.constant 0 : i32
    %c0_i32_0 = arith.constant 0 : i32
    %c0_i32_1 = arith.constant 0 : i32
    return %c0_i32, %c0_i32_0 : i32, i32
  }
  func.func @transform_17(%arg0: i32) -> (i32, i32, i32) {
    %c0_i32 = arith.constant 0 : i32
    %c0_i32_0 = arith.constant 0 : i32
    %c0_i32_1 = arith.constant 0 : i32
    return %arg0, %c0_i32, %c0_i32_0 : i32, i32, i32
  }
}

module attributes {stable_mosaic.version = 11 : i64} {
  func.func @_dense_block_kernel(%arg0: i32, %arg1: memref<1x16x16xf32, #tpu.memory_space<vmem>>, %arg2: memref<1x16xf32, #tpu.memory_space<vmem>>, %arg3: memref<1x16xf32, #tpu.memory_space<vmem>>, %arg4: memref<16x16xbf16, #tpu.memory_space<vmem>>, %arg5: memref<1x16xf32, #tpu.memory_space<vmem>>, %arg6: memref<1x16xf32, #tpu.memory_space<vmem>>, %arg7: memref<16x24xbf16, #tpu.memory_space<vmem>>, %arg8: memref<1x24xf32, #tpu.memory_space<vmem>>, %arg9: memref<1x24xf32, #tpu.memory_space<vmem>>, %arg10: memref<24x16xbf16, #tpu.memory_space<vmem>>, %arg11: memref<1x16xf32, #tpu.memory_space<vmem>>, %arg12: memref<1x16xf32, #tpu.memory_space<vmem>>, %arg13: memref<16x24xbf16, #tpu.memory_space<vmem>>, %arg14: memref<9x16xf32, #tpu.memory_space<vmem>>, %arg15: memref<1x9x32xf32, #tpu.memory_space<vmem>>, %arg16: memref<16x32xf32, #tpu.memory_space<vmem>>) attributes {dimension_semantics = [#tpu.dimension_semantics<parallel>], iteration_bounds = array<i64: 2>, scalar_prefetch = 0 : i64, scratch_operands = 1 : i64, tpu.core_type = #tpu.core_type<tc>, window_params = [{transform_indices = @transform_0, window_bounds = array<i64: 1, 16, 16>}, {pipeline_mode = #tpu.pipeline_mode<synchronous>, transform_indices = @transform_1, window_bounds = array<i64: 1, 16>}, {pipeline_mode = #tpu.pipeline_mode<synchronous>, transform_indices = @transform_2, window_bounds = array<i64: 1, 16>}, {pipeline_mode = #tpu.pipeline_mode<synchronous>, transform_indices = @transform_3, window_bounds = array<i64: 16, 16>}, {pipeline_mode = #tpu.pipeline_mode<synchronous>, transform_indices = @transform_4, window_bounds = array<i64: 1, 16>}, {pipeline_mode = #tpu.pipeline_mode<synchronous>, transform_indices = @transform_5, window_bounds = array<i64: 1, 16>}, {pipeline_mode = #tpu.pipeline_mode<synchronous>, transform_indices = @transform_6, window_bounds = array<i64: 16, 24>}, {pipeline_mode = #tpu.pipeline_mode<synchronous>, transform_indices = @transform_7, window_bounds = array<i64: 1, 24>}, {pipeline_mode = #tpu.pipeline_mode<synchronous>, transform_indices = @transform_8, window_bounds = array<i64: 1, 24>}, {pipeline_mode = #tpu.pipeline_mode<synchronous>, transform_indices = @transform_9, window_bounds = array<i64: 24, 16>}, {pipeline_mode = #tpu.pipeline_mode<synchronous>, transform_indices = @transform_10, window_bounds = array<i64: 1, 16>}, {pipeline_mode = #tpu.pipeline_mode<synchronous>, transform_indices = @transform_11, window_bounds = array<i64: 1, 16>}, {pipeline_mode = #tpu.pipeline_mode<synchronous>, transform_indices = @transform_12, window_bounds = array<i64: 16, 24>}, {pipeline_mode = #tpu.pipeline_mode<synchronous>, transform_indices = @transform_13, window_bounds = array<i64: 9, 16>}, {transform_indices = @transform_14, window_bounds = array<i64: 1, 9, 32>}]} {
    %c0 = arith.constant 0 : index
    %c0_0 = arith.constant 0 : index
    %c0_1 = arith.constant 0 : index
    %0 = vector.load %arg1[%c0, %c0_0, %c0_1] : memref<1x16x16xf32, #tpu.memory_space<vmem>>, vector<1x16x16xf32>
    %1 = vector.shape_cast %0 : vector<1x16x16xf32> to vector<16x16xf32>
    %c0_2 = arith.constant 0 : index
    %c0_3 = arith.constant 0 : index
    %2 = vector.load %arg16[%c0_2, %c0_3] : memref<16x32xf32, #tpu.memory_space<vmem>>, vector<16x16xf32>
    tpu.vector_store %arg16[%c0_2, %c0_3], %1 {strides = array<i32>} : memref<16x32xf32, #tpu.memory_space<vmem>>, vector<16x16xf32>,
    %c0_4 = arith.constant 0 : index
    %c0_5 = arith.constant 0 : index
    %3 = vector.load %arg16[%c0_4, %c0_5] : memref<16x32xf32, #tpu.memory_space<vmem>>, vector<16x16xf32>
    %c0_6 = arith.constant 0 : index
    %c0_7 = arith.constant 0 : index
    %4 = vector.load %arg2[%c0_6, %c0_7] : memref<1x16xf32, #tpu.memory_space<vmem>>, vector<1x16xf32>
    %5 = vector.broadcast %4 : vector<1x16xf32> to vector<16x16xf32>
    %6 = arith.mulf %3, %5 : vector<16x16xf32>
    %c0_8 = arith.constant 0 : index
    %c0_9 = arith.constant 0 : index
    %7 = vector.load %arg3[%c0_8, %c0_9] : memref<1x16xf32, #tpu.memory_space<vmem>>, vector<1x16xf32>
    %8 = vector.broadcast %7 : vector<1x16xf32> to vector<16x16xf32>
    %9 = arith.addf %6, %8 : vector<16x16xf32>
    %cst = arith.constant 0.000000e+00 : f32
    %10 = vector.broadcast %cst : f32 to vector<16x16xf32>
    %11 = arith.maximumf %9, %10 : vector<16x16xf32>
    %12 = arith.truncf %11 : vector<16x16xf32> to vector<16x16xbf16>
    %c0_10 = arith.constant 0 : index
    %c0_11 = arith.constant 0 : index
    %13 = vector.load %arg4[%c0_10, %c0_11] : memref<16x16xbf16, #tpu.memory_space<vmem>>, vector<16x16xbf16>
    %cst_12 = arith.constant dense<0.000000e+00> : vector<16x16xf32>
    %14 = tpu.matmul %12, %13, %cst_12 {dimension_numbers = #tpu.dot_dimension_numbers<[1], [0], [0], [1], [0, 0, 1, 1], [], []>} : vector<16x16xbf16>, vector<16x16xbf16>, vector<16x16xf32> -> vector<16x16xf32>
    %c0_13 = arith.constant 0 : index
    %c0_14 = arith.constant 0 : index
    %15 = vector.load %arg5[%c0_13, %c0_14] : memref<1x16xf32, #tpu.memory_space<vmem>>, vector<1x16xf32>
    %16 = vector.broadcast %15 : vector<1x16xf32> to vector<16x16xf32>
    %17 = arith.mulf %14, %16 : vector<16x16xf32>
    %c0_15 = arith.constant 0 : index
    %c0_16 = arith.constant 0 : index
    %18 = vector.load %arg6[%c0_15, %c0_16] : memref<1x16xf32, #tpu.memory_space<vmem>>, vector<1x16xf32>
    %19 = vector.broadcast %18 : vector<1x16xf32> to vector<16x16xf32>
    %20 = arith.addf %17, %19 : vector<16x16xf32>
    %cst_17 = arith.constant 0.000000e+00 : f32
    %21 = vector.broadcast %cst_17 : f32 to vector<16x16xf32>
    %22 = arith.maximumf %20, %21 : vector<16x16xf32>
    %23 = arith.truncf %22 : vector<16x16xf32> to vector<16x16xbf16>
    %c0_18 = arith.constant 0 : index
    %c0_19 = arith.constant 0 : index
    %24 = vector.load %arg7[%c0_18, %c0_19] : memref<16x24xbf16, #tpu.memory_space<vmem>>, vector<16x24xbf16>
    %cst_20 = arith.constant dense<0.000000e+00> : vector<16x24xf32>
    %25 = tpu.matmul %23, %24, %cst_20 {dimension_numbers = #tpu.dot_dimension_numbers<[1], [0], [0], [1], [0, 0, 1, 1], [], []>} : vector<16x16xbf16>, vector<16x24xbf16>, vector<16x24xf32> -> vector<16x24xf32>
    %cst_21 = arith.constant 0.000000e+00 : f32
    %26 = vector.broadcast %cst_21 : f32 to vector<1x24xf32>
    %27 = vector.extract_strided_slice %25 {offsets = [0, 0], sizes = [15, 24], strides = [1, 1]} : vector<16x24xf32> to vector<15x24xf32>
    %28 = tpu.concatenate %26, %27 in 0 : vector<1x24xf32>, vector<15x24xf32> -> vector<16x24xf32>
    %29 = vector.extract_strided_slice %25 {offsets = [1, 0], sizes = [15, 24], strides = [1, 1]} : vector<16x24xf32> to vector<15x24xf32>
    %30 = tpu.concatenate %29, %26 in 0 : vector<15x24xf32>, vector<1x24xf32> -> vector<16x24xf32>
    %31 = vector.extract_strided_slice %28 {offsets = [0, 0], sizes = [16, 8], strides = [1, 1]} : vector<16x24xf32> to vector<16x8xf32>
    %32 = vector.extract_strided_slice %25 {offsets = [0, 8], sizes = [16, 8], strides = [1, 1]} : vector<16x24xf32> to vector<16x8xf32>
    %33 = arith.addf %31, %32 : vector<16x8xf32>
    %34 = vector.extract_strided_slice %30 {offsets = [0, 16], sizes = [16, 8], strides = [1, 1]} : vector<16x24xf32> to vector<16x8xf32>
    %35 = arith.addf %33, %34 : vector<16x8xf32>
    %c0_22 = arith.constant 0 : index
    %c16 = arith.constant 16 : index
    %36 = vector.load %arg16[%c0_22, %c16] : memref<16x32xf32, #tpu.memory_space<vmem>>, vector<16x8xf32>
    tpu.vector_store %arg16[%c0_22, %c16], %35 {strides = array<i32>} : memref<16x32xf32, #tpu.memory_space<vmem>>, vector<16x8xf32>,
    %c0_23 = arith.constant 0 : index
    %c0_24 = arith.constant 0 : index
    %37 = vector.load %arg16[%c0_23, %c0_24] : memref<16x32xf32, #tpu.memory_space<vmem>>, vector<16x24xf32>
    %c0_25 = arith.constant 0 : index
    %c0_26 = arith.constant 0 : index
    %38 = vector.load %arg8[%c0_25, %c0_26] : memref<1x24xf32, #tpu.memory_space<vmem>>, vector<1x24xf32>
    %39 = vector.broadcast %38 : vector<1x24xf32> to vector<16x24xf32>
    %40 = arith.mulf %37, %39 : vector<16x24xf32>
    %c0_27 = arith.constant 0 : index
    %c0_28 = arith.constant 0 : index
    %41 = vector.load %arg9[%c0_27, %c0_28] : memref<1x24xf32, #tpu.memory_space<vmem>>, vector<1x24xf32>
    %42 = vector.broadcast %41 : vector<1x24xf32> to vector<16x24xf32>
    %43 = arith.addf %40, %42 : vector<16x24xf32>
    %cst_29 = arith.constant 0.000000e+00 : f32
    %44 = vector.broadcast %cst_29 : f32 to vector<16x24xf32>
    %45 = arith.maximumf %43, %44 : vector<16x24xf32>
    %46 = arith.truncf %45 : vector<16x24xf32> to vector<16x24xbf16>
    %c0_30 = arith.constant 0 : index
    %c0_31 = arith.constant 0 : index
    %47 = vector.load %arg10[%c0_30, %c0_31] : memref<24x16xbf16, #tpu.memory_space<vmem>>, vector<24x16xbf16>
    %cst_32 = arith.constant dense<0.000000e+00> : vector<16x16xf32>
    %48 = tpu.matmul %46, %47, %cst_32 {dimension_numbers = #tpu.dot_dimension_numbers<[1], [0], [0], [1], [0, 0, 1, 1], [], []>} : vector<16x24xbf16>, vector<24x16xbf16>, vector<16x16xf32> -> vector<16x16xf32>
    %c0_33 = arith.constant 0 : index
    %c0_34 = arith.constant 0 : index
    %49 = vector.load %arg11[%c0_33, %c0_34] : memref<1x16xf32, #tpu.memory_space<vmem>>, vector<1x16xf32>
    %50 = vector.broadcast %49 : vector<1x16xf32> to vector<16x16xf32>
    %51 = arith.mulf %48, %50 : vector<16x16xf32>
    %c0_35 = arith.constant 0 : index
    %c0_36 = arith.constant 0 : index
    %52 = vector.load %arg12[%c0_35, %c0_36] : memref<1x16xf32, #tpu.memory_space<vmem>>, vector<1x16xf32>
    %53 = vector.broadcast %52 : vector<1x16xf32> to vector<16x16xf32>
    %54 = arith.addf %51, %53 : vector<16x16xf32>
    %cst_37 = arith.constant 0.000000e+00 : f32
    %55 = vector.broadcast %cst_37 : f32 to vector<16x16xf32>
    %56 = arith.maximumf %54, %55 : vector<16x16xf32>
    %57 = arith.truncf %56 : vector<16x16xf32> to vector<16x16xbf16>
    %c0_38 = arith.constant 0 : index
    %c0_39 = arith.constant 0 : index
    %58 = vector.load %arg13[%c0_38, %c0_39] : memref<16x24xbf16, #tpu.memory_space<vmem>>, vector<16x24xbf16>
    %cst_40 = arith.constant dense<0.000000e+00> : vector<16x24xf32>
    %59 = tpu.matmul %57, %58, %cst_40 {dimension_numbers = #tpu.dot_dimension_numbers<[1], [0], [0], [1], [0, 0, 1, 1], [], []>} : vector<16x16xbf16>, vector<16x24xbf16>, vector<16x24xf32> -> vector<16x24xf32>
    %cst_41 = arith.constant 0.000000e+00 : f32
    %60 = vector.broadcast %cst_41 : f32 to vector<1x24xf32>
    %61 = vector.extract_strided_slice %59 {offsets = [0, 0], sizes = [15, 24], strides = [1, 1]} : vector<16x24xf32> to vector<15x24xf32>
    %62 = tpu.concatenate %60, %61 in 0 : vector<1x24xf32>, vector<15x24xf32> -> vector<16x24xf32>
    %63 = vector.extract_strided_slice %59 {offsets = [1, 0], sizes = [15, 24], strides = [1, 1]} : vector<16x24xf32> to vector<15x24xf32>
    %64 = tpu.concatenate %63, %60 in 0 : vector<15x24xf32>, vector<1x24xf32> -> vector<16x24xf32>
    %65 = vector.extract_strided_slice %62 {offsets = [0, 0], sizes = [16, 8], strides = [1, 1]} : vector<16x24xf32> to vector<16x8xf32>
    %66 = vector.extract_strided_slice %59 {offsets = [0, 8], sizes = [16, 8], strides = [1, 1]} : vector<16x24xf32> to vector<16x8xf32>
    %67 = arith.addf %65, %66 : vector<16x8xf32>
    %68 = vector.extract_strided_slice %64 {offsets = [0, 16], sizes = [16, 8], strides = [1, 1]} : vector<16x24xf32> to vector<16x8xf32>
    %69 = arith.addf %67, %68 : vector<16x8xf32>
    %c0_42 = arith.constant 0 : index
    %c24 = arith.constant 24 : index
    %70 = vector.load %arg16[%c0_42, %c24] : memref<16x32xf32, #tpu.memory_space<vmem>>, vector<16x8xf32>
    tpu.vector_store %arg16[%c0_42, %c24], %69 {strides = array<i32>} : memref<16x32xf32, #tpu.memory_space<vmem>>, vector<16x8xf32>,
    %c0_43 = arith.constant 0 : index
    %c0_44 = arith.constant 0 : index
    %71 = vector.load %arg16[%c0_43, %c0_44] : memref<16x32xf32, #tpu.memory_space<vmem>>, vector<16x32xf32>
    %c0_45 = arith.constant 0 : index
    %c0_46 = arith.constant 0 : index
    %72 = vector.load %arg14[%c0_45, %c0_46] : memref<9x16xf32, #tpu.memory_space<vmem>>, vector<9x16xf32>
    %cst_47 = arith.constant dense<0.000000e+00> : vector<9x32xf32>
    %73 = tpu.matmul %72, %71, %cst_47 {dimension_numbers = #tpu.dot_dimension_numbers<[1], [0], [0], [1], [0, 0, 1, 1], [], []>} : vector<9x16xf32>, vector<16x32xf32>, vector<9x32xf32> -> vector<9x32xf32>
    %c0_48 = arith.constant 0 : index
    %c0_49 = arith.constant 0 : index
    %c0_50 = arith.constant 0 : index
    %74 = vector.load %arg15[%c0_48, %c0_49, %c0_50] : memref<1x9x32xf32, #tpu.memory_space<vmem>>, vector<1x9x32xf32>
    %75 = vector.shape_cast %74 : vector<1x9x32xf32> to vector<9x32xf32>
    %76 = vector.shape_cast %73 : vector<9x32xf32> to vector<1x9x32xf32>
    tpu.vector_store %arg15[%c0_48, %c0_49, %c0_50], %76 {strides = array<i32>} : memref<1x9x32xf32, #tpu.memory_space<vmem>>, vector<1x9x32xf32>,
    return
  }
  func.func @transform_0(%arg0: i32) -> (i32, i32, i32) {
    %c0_i32 = arith.constant 0 : i32
    %c0_i32_0 = arith.constant 0 : i32
    %c0_i32_1 = arith.constant 0 : i32
    return %arg0, %c0_i32, %c0_i32_0 : i32, i32, i32
  }
  func.func @transform_1(%arg0: i32) -> (i32, i32) {
    %c0_i32 = arith.constant 0 : i32
    %c0_i32_0 = arith.constant 0 : i32
    %c0_i32_1 = arith.constant 0 : i32
    return %c0_i32, %c0_i32_0 : i32, i32
  }
  func.func @transform_2(%arg0: i32) -> (i32, i32) {
    %c0_i32 = arith.constant 0 : i32
    %c0_i32_0 = arith.constant 0 : i32
    %c0_i32_1 = arith.constant 0 : i32
    return %c0_i32, %c0_i32_0 : i32, i32
  }
  func.func @transform_3(%arg0: i32) -> (i32, i32) {
    %c0_i32 = arith.constant 0 : i32
    %c0_i32_0 = arith.constant 0 : i32
    %c0_i32_1 = arith.constant 0 : i32
    return %c0_i32, %c0_i32_0 : i32, i32
  }
  func.func @transform_4(%arg0: i32) -> (i32, i32) {
    %c0_i32 = arith.constant 0 : i32
    %c0_i32_0 = arith.constant 0 : i32
    %c0_i32_1 = arith.constant 0 : i32
    return %c0_i32, %c0_i32_0 : i32, i32
  }
  func.func @transform_5(%arg0: i32) -> (i32, i32) {
    %c0_i32 = arith.constant 0 : i32
    %c0_i32_0 = arith.constant 0 : i32
    %c0_i32_1 = arith.constant 0 : i32
    return %c0_i32, %c0_i32_0 : i32, i32
  }
  func.func @transform_6(%arg0: i32) -> (i32, i32) {
    %c0_i32 = arith.constant 0 : i32
    %c0_i32_0 = arith.constant 0 : i32
    %c0_i32_1 = arith.constant 0 : i32
    return %c0_i32, %c0_i32_0 : i32, i32
  }
  func.func @transform_7(%arg0: i32) -> (i32, i32) {
    %c0_i32 = arith.constant 0 : i32
    %c0_i32_0 = arith.constant 0 : i32
    %c0_i32_1 = arith.constant 0 : i32
    return %c0_i32, %c0_i32_0 : i32, i32
  }
  func.func @transform_8(%arg0: i32) -> (i32, i32) {
    %c0_i32 = arith.constant 0 : i32
    %c0_i32_0 = arith.constant 0 : i32
    %c0_i32_1 = arith.constant 0 : i32
    return %c0_i32, %c0_i32_0 : i32, i32
  }
  func.func @transform_9(%arg0: i32) -> (i32, i32) {
    %c0_i32 = arith.constant 0 : i32
    %c0_i32_0 = arith.constant 0 : i32
    %c0_i32_1 = arith.constant 0 : i32
    return %c0_i32, %c0_i32_0 : i32, i32
  }
  func.func @transform_10(%arg0: i32) -> (i32, i32) {
    %c0_i32 = arith.constant 0 : i32
    %c0_i32_0 = arith.constant 0 : i32
    %c0_i32_1 = arith.constant 0 : i32
    return %c0_i32, %c0_i32_0 : i32, i32
  }
  func.func @transform_11(%arg0: i32) -> (i32, i32) {
    %c0_i32 = arith.constant 0 : i32
    %c0_i32_0 = arith.constant 0 : i32
    %c0_i32_1 = arith.constant 0 : i32
    return %c0_i32, %c0_i32_0 : i32, i32
  }
  func.func @transform_12(%arg0: i32) -> (i32, i32) {
    %c0_i32 = arith.constant 0 : i32
    %c0_i32_0 = arith.constant 0 : i32
    %c0_i32_1 = arith.constant 0 : i32
    return %c0_i32, %c0_i32_0 : i32, i32
  }
  func.func @transform_13(%arg0: i32) -> (i32, i32) {
    %c0_i32 = arith.constant 0 : i32
    %c0_i32_0 = arith.constant 0 : i32
    %c0_i32_1 = arith.constant 0 : i32
    return %c0_i32, %c0_i32_0 : i32, i32
  }
  func.func @transform_14(%arg0: i32) -> (i32, i32, i32) {
    %c0_i32 = arith.constant 0 : i32
    %c0_i32_0 = arith.constant 0 : i32
    %c0_i32_1 = arith.constant 0 : i32
    return %arg0, %c0_i32, %c0_i32_0 : i32, i32, i32
  }
}

module attributes {stable_mosaic.version = 11 : i64} {
  func.func @_linear_kernel(%arg0: i32, %arg1: memref<2x384xf32, #tpu.memory_space<vmem>>, %arg2: memref<384x1024xbf16, #tpu.memory_space<vmem>>, %arg3: memref<1x1024xf32, #tpu.memory_space<vmem>>, %arg4: memref<2x1024xf32, #tpu.memory_space<vmem>>, %arg5: memref<2x1024xf32, #tpu.memory_space<vmem>>) attributes {dimension_semantics = [#tpu.dimension_semantics<arbitrary>], iteration_bounds = array<i64: 1>, scalar_prefetch = 0 : i64, scratch_operands = 1 : i64, tpu.core_type = #tpu.core_type<tc>, window_params = [{transform_indices = @transform_0, window_bounds = array<i64: 2, 384>}, {transform_indices = @transform_1, window_bounds = array<i64: 384, 1024>}, {pipeline_mode = #tpu.pipeline_mode<synchronous>, transform_indices = @transform_2, window_bounds = array<i64: 1, 1024>}, {pipeline_mode = #tpu.pipeline_mode<synchronous>, transform_indices = @transform_3, window_bounds = array<i64: 2, 1024>}]} {
    %c0_i32 = arith.constant 0 : i32
    %0 = arith.cmpi eq, %arg0, %c0_i32 : i32
    %1 = arith.extui %0 : i1 to i32
    %c0_i32_0 = arith.constant 0 : i32
    %2 = arith.cmpi ne, %1, %c0_i32_0 : i32
    scf.if %2 {
      %cst_10 = arith.constant 0.000000e+00 : f32
      %13 = vector.broadcast %cst_10 : f32 to vector<2x1024xf32>
      %c0_11 = arith.constant 0 : index
      %c0_12 = arith.constant 0 : index
      %14 = vector.load %arg5[%c0_11, %c0_12] : memref<2x1024xf32, #tpu.memory_space<vmem>>, vector<2x1024xf32>
      tpu.vector_store %arg5[%c0_11, %c0_12], %13 {strides = array<i32>} : memref<2x1024xf32, #tpu.memory_space<vmem>>, vector<2x1024xf32>,
    } else {
    }
    %c0 = arith.constant 0 : index
    %c0_1 = arith.constant 0 : index
    %3 = vector.load %arg5[%c0, %c0_1] : memref<2x1024xf32, #tpu.memory_space<vmem>>, vector<2x1024xf32>
    %c0_2 = arith.constant 0 : index
    %c0_3 = arith.constant 0 : index
    %4 = vector.load %arg1[%c0_2, %c0_3] : memref<2x384xf32, #tpu.memory_space<vmem>>, vector<2x384xf32>
    %5 = arith.truncf %4 : vector<2x384xf32> to vector<2x384xbf16>
    %c0_4 = arith.constant 0 : index
    %c0_5 = arith.constant 0 : index
    %6 = vector.load %arg2[%c0_4, %c0_5] : memref<384x1024xbf16, #tpu.memory_space<vmem>>, vector<384x1024xbf16>
    %cst = arith.constant dense<0.000000e+00> : vector<2x1024xf32>
    %7 = tpu.matmul %5, %6, %cst {dimension_numbers = #tpu.dot_dimension_numbers<[1], [0], [0], [1], [0, 0, 1, 1], [], []>} : vector<2x384xbf16>, vector<384x1024xbf16>, vector<2x1024xf32> -> vector<2x1024xf32>
    %8 = arith.addf %3, %7 : vector<2x1024xf32>
    %c0_6 = arith.constant 0 : index
    %c0_7 = arith.constant 0 : index
    %9 = vector.load %arg5[%c0_6, %c0_7] : memref<2x1024xf32, #tpu.memory_space<vmem>>, vector<2x1024xf32>
    tpu.vector_store %arg5[%c0_6, %c0_7], %8 {strides = array<i32>} : memref<2x1024xf32, #tpu.memory_space<vmem>>, vector<2x1024xf32>,
    %c0_i32_8 = arith.constant 0 : i32
    %10 = arith.cmpi eq, %arg0, %c0_i32_8 : i32
    %11 = arith.extui %10 : i1 to i32
    %c0_i32_9 = arith.constant 0 : i32
    %12 = arith.cmpi ne, %11, %c0_i32_9 : i32
    scf.if %12 {
      %c0_10 = arith.constant 0 : index
      %c0_11 = arith.constant 0 : index
      %13 = vector.load %arg5[%c0_10, %c0_11] : memref<2x1024xf32, #tpu.memory_space<vmem>>, vector<2x1024xf32>
      %c0_12 = arith.constant 0 : index
      %c0_13 = arith.constant 0 : index
      %14 = vector.load %arg3[%c0_12, %c0_13] : memref<1x1024xf32, #tpu.memory_space<vmem>>, vector<1x1024xf32>
      %15 = vector.broadcast %14 : vector<1x1024xf32> to vector<2x1024xf32>
      %16 = arith.addf %13, %15 : vector<2x1024xf32>
      %cst_14 = arith.constant 0.000000e+00 : f32
      %17 = vector.broadcast %cst_14 : f32 to vector<2x1024xf32>
      %18 = arith.maximumf %16, %17 : vector<2x1024xf32>
      %c0_15 = arith.constant 0 : index
      %c0_16 = arith.constant 0 : index
      %19 = vector.load %arg4[%c0_15, %c0_16] : memref<2x1024xf32, #tpu.memory_space<vmem>>, vector<2x1024xf32>
      tpu.vector_store %arg4[%c0_15, %c0_16], %18 {strides = array<i32>} : memref<2x1024xf32, #tpu.memory_space<vmem>>, vector<2x1024xf32>,
    } else {
    }
    return
  }
  func.func @transform_0(%arg0: i32) -> (i32, i32) {
    %c0_i32 = arith.constant 0 : i32
    %c0_i32_0 = arith.constant 0 : i32
    return %c0_i32, %arg0 : i32, i32
  }
  func.func @transform_1(%arg0: i32) -> (i32, i32) {
    %c0_i32 = arith.constant 0 : i32
    %c0_i32_0 = arith.constant 0 : i32
    return %arg0, %c0_i32 : i32, i32
  }
  func.func @transform_2(%arg0: i32) -> (i32, i32) {
    %c0_i32 = arith.constant 0 : i32
    %c0_i32_0 = arith.constant 0 : i32
    %c0_i32_1 = arith.constant 0 : i32
    return %c0_i32, %c0_i32_0 : i32, i32
  }
  func.func @transform_3(%arg0: i32) -> (i32, i32) {
    %c0_i32 = arith.constant 0 : i32
    %c0_i32_0 = arith.constant 0 : i32
    %c0_i32_1 = arith.constant 0 : i32
    return %c0_i32, %c0_i32_0 : i32, i32
  }
}

module attributes {stable_mosaic.version = 11 : i64} {
  func.func @_linear_kernel(%arg0: i32, %arg1: memref<2x512xf32, #tpu.memory_space<vmem>>, %arg2: memref<512x512xbf16, #tpu.memory_space<vmem>>, %arg3: memref<1x512xf32, #tpu.memory_space<vmem>>, %arg4: memref<2x512xf32, #tpu.memory_space<vmem>>, %arg5: memref<2x512xf32, #tpu.memory_space<vmem>>) attributes {dimension_semantics = [#tpu.dimension_semantics<arbitrary>], iteration_bounds = array<i64: 2>, scalar_prefetch = 0 : i64, scratch_operands = 1 : i64, tpu.core_type = #tpu.core_type<tc>, window_params = [{transform_indices = @transform_0, window_bounds = array<i64: 2, 512>}, {transform_indices = @transform_1, window_bounds = array<i64: 512, 512>}, {pipeline_mode = #tpu.pipeline_mode<synchronous>, transform_indices = @transform_2, window_bounds = array<i64: 1, 512>}, {pipeline_mode = #tpu.pipeline_mode<synchronous>, transform_indices = @transform_3, window_bounds = array<i64: 2, 512>}]} {
    %c0_i32 = arith.constant 0 : i32
    %0 = arith.cmpi eq, %arg0, %c0_i32 : i32
    %1 = arith.extui %0 : i1 to i32
    %c0_i32_0 = arith.constant 0 : i32
    %2 = arith.cmpi ne, %1, %c0_i32_0 : i32
    scf.if %2 {
      %cst_9 = arith.constant 0.000000e+00 : f32
      %13 = vector.broadcast %cst_9 : f32 to vector<2x512xf32>
      %c0_10 = arith.constant 0 : index
      %c0_11 = arith.constant 0 : index
      %14 = vector.load %arg5[%c0_10, %c0_11] : memref<2x512xf32, #tpu.memory_space<vmem>>, vector<2x512xf32>
      tpu.vector_store %arg5[%c0_10, %c0_11], %13 {strides = array<i32>} : memref<2x512xf32, #tpu.memory_space<vmem>>, vector<2x512xf32>,
    } else {
    }
    %c0 = arith.constant 0 : index
    %c0_1 = arith.constant 0 : index
    %3 = vector.load %arg5[%c0, %c0_1] : memref<2x512xf32, #tpu.memory_space<vmem>>, vector<2x512xf32>
    %c0_2 = arith.constant 0 : index
    %c0_3 = arith.constant 0 : index
    %4 = vector.load %arg1[%c0_2, %c0_3] : memref<2x512xf32, #tpu.memory_space<vmem>>, vector<2x512xf32>
    %5 = arith.truncf %4 : vector<2x512xf32> to vector<2x512xbf16>
    %c0_4 = arith.constant 0 : index
    %c0_5 = arith.constant 0 : index
    %6 = vector.load %arg2[%c0_4, %c0_5] : memref<512x512xbf16, #tpu.memory_space<vmem>>, vector<512x512xbf16>
    %cst = arith.constant dense<0.000000e+00> : vector<2x512xf32>
    %7 = tpu.matmul %5, %6, %cst {dimension_numbers = #tpu.dot_dimension_numbers<[1], [0], [0], [1], [0, 0, 1, 1], [], []>} : vector<2x512xbf16>, vector<512x512xbf16>, vector<2x512xf32> -> vector<2x512xf32>
    %8 = arith.addf %3, %7 : vector<2x512xf32>
    %c0_6 = arith.constant 0 : index
    %c0_7 = arith.constant 0 : index
    %9 = vector.load %arg5[%c0_6, %c0_7] : memref<2x512xf32, #tpu.memory_space<vmem>>, vector<2x512xf32>
    tpu.vector_store %arg5[%c0_6, %c0_7], %8 {strides = array<i32>} : memref<2x512xf32, #tpu.memory_space<vmem>>, vector<2x512xf32>,
    %c1_i32 = arith.constant 1 : i32
    %10 = arith.cmpi eq, %arg0, %c1_i32 : i32
    %11 = arith.extui %10 : i1 to i32
    %c0_i32_8 = arith.constant 0 : i32
    %12 = arith.cmpi ne, %11, %c0_i32_8 : i32
    scf.if %12 {
      %c0_9 = arith.constant 0 : index
      %c0_10 = arith.constant 0 : index
      %13 = vector.load %arg5[%c0_9, %c0_10] : memref<2x512xf32, #tpu.memory_space<vmem>>, vector<2x512xf32>
      %c0_11 = arith.constant 0 : index
      %c0_12 = arith.constant 0 : index
      %14 = vector.load %arg3[%c0_11, %c0_12] : memref<1x512xf32, #tpu.memory_space<vmem>>, vector<1x512xf32>
      %15 = vector.broadcast %14 : vector<1x512xf32> to vector<2x512xf32>
      %16 = arith.addf %13, %15 : vector<2x512xf32>
      %cst_13 = arith.constant 0.000000e+00 : f32
      %17 = vector.broadcast %cst_13 : f32 to vector<2x512xf32>
      %18 = arith.maximumf %16, %17 : vector<2x512xf32>
      %c0_14 = arith.constant 0 : index
      %c0_15 = arith.constant 0 : index
      %19 = vector.load %arg4[%c0_14, %c0_15] : memref<2x512xf32, #tpu.memory_space<vmem>>, vector<2x512xf32>
      tpu.vector_store %arg4[%c0_14, %c0_15], %18 {strides = array<i32>} : memref<2x512xf32, #tpu.memory_space<vmem>>, vector<2x512xf32>,
    } else {
    }
    return
  }
  func.func @transform_0(%arg0: i32) -> (i32, i32) {
    %c0_i32 = arith.constant 0 : i32
    %c0_i32_0 = arith.constant 0 : i32
    return %c0_i32, %arg0 : i32, i32
  }
  func.func @transform_1(%arg0: i32) -> (i32, i32) {
    %c0_i32 = arith.constant 0 : i32
    %c0_i32_0 = arith.constant 0 : i32
    return %arg0, %c0_i32 : i32, i32
  }
  func.func @transform_2(%arg0: i32) -> (i32, i32) {
    %c0_i32 = arith.constant 0 : i32
    %c0_i32_0 = arith.constant 0 : i32
    %c0_i32_1 = arith.constant 0 : i32
    return %c0_i32, %c0_i32_0 : i32, i32
  }
  func.func @transform_3(%arg0: i32) -> (i32, i32) {
    %c0_i32 = arith.constant 0 : i32
    %c0_i32_0 = arith.constant 0 : i32
    %c0_i32_1 = arith.constant 0 : i32
    return %c0_i32, %c0_i32_0 : i32, i32
  }
}

module attributes {stable_mosaic.version = 11 : i64} {
  func.func @_linear_kernel(%arg0: i32, %arg1: memref<2x512xf32, #tpu.memory_space<vmem>>, %arg2: memref<512x2xbf16, #tpu.memory_space<vmem>>, %arg3: memref<1x2xf32, #tpu.memory_space<vmem>>, %arg4: memref<2x2xf32, #tpu.memory_space<vmem>>, %arg5: memref<2x2xf32, #tpu.memory_space<vmem>>) attributes {dimension_semantics = [#tpu.dimension_semantics<arbitrary>], iteration_bounds = array<i64: 1>, scalar_prefetch = 0 : i64, scratch_operands = 1 : i64, tpu.core_type = #tpu.core_type<tc>, window_params = [{transform_indices = @transform_0, window_bounds = array<i64: 2, 512>}, {transform_indices = @transform_1, window_bounds = array<i64: 512, 2>}, {pipeline_mode = #tpu.pipeline_mode<synchronous>, transform_indices = @transform_2, window_bounds = array<i64: 1, 2>}, {pipeline_mode = #tpu.pipeline_mode<synchronous>, transform_indices = @transform_3, window_bounds = array<i64: 2, 2>}]} {
    %c0_i32 = arith.constant 0 : i32
    %0 = arith.cmpi eq, %arg0, %c0_i32 : i32
    %1 = arith.extui %0 : i1 to i32
    %c0_i32_0 = arith.constant 0 : i32
    %2 = arith.cmpi ne, %1, %c0_i32_0 : i32
    scf.if %2 {
      %cst_10 = arith.constant 0.000000e+00 : f32
      %13 = vector.broadcast %cst_10 : f32 to vector<2x2xf32>
      %c0_11 = arith.constant 0 : index
      %c0_12 = arith.constant 0 : index
      %14 = vector.load %arg5[%c0_11, %c0_12] : memref<2x2xf32, #tpu.memory_space<vmem>>, vector<2x2xf32>
      tpu.vector_store %arg5[%c0_11, %c0_12], %13 {strides = array<i32>} : memref<2x2xf32, #tpu.memory_space<vmem>>, vector<2x2xf32>,
    } else {
    }
    %c0 = arith.constant 0 : index
    %c0_1 = arith.constant 0 : index
    %3 = vector.load %arg5[%c0, %c0_1] : memref<2x2xf32, #tpu.memory_space<vmem>>, vector<2x2xf32>
    %c0_2 = arith.constant 0 : index
    %c0_3 = arith.constant 0 : index
    %4 = vector.load %arg1[%c0_2, %c0_3] : memref<2x512xf32, #tpu.memory_space<vmem>>, vector<2x512xf32>
    %5 = arith.truncf %4 : vector<2x512xf32> to vector<2x512xbf16>
    %c0_4 = arith.constant 0 : index
    %c0_5 = arith.constant 0 : index
    %6 = vector.load %arg2[%c0_4, %c0_5] : memref<512x2xbf16, #tpu.memory_space<vmem>>, vector<512x2xbf16>
    %cst = arith.constant dense<0.000000e+00> : vector<2x2xf32>
    %7 = tpu.matmul %5, %6, %cst {dimension_numbers = #tpu.dot_dimension_numbers<[1], [0], [0], [1], [0, 0, 1, 1], [], []>} : vector<2x512xbf16>, vector<512x2xbf16>, vector<2x2xf32> -> vector<2x2xf32>
    %8 = arith.addf %3, %7 : vector<2x2xf32>
    %c0_6 = arith.constant 0 : index
    %c0_7 = arith.constant 0 : index
    %9 = vector.load %arg5[%c0_6, %c0_7] : memref<2x2xf32, #tpu.memory_space<vmem>>, vector<2x2xf32>
    tpu.vector_store %arg5[%c0_6, %c0_7], %8 {strides = array<i32>} : memref<2x2xf32, #tpu.memory_space<vmem>>, vector<2x2xf32>,
    %c0_i32_8 = arith.constant 0 : i32
    %10 = arith.cmpi eq, %arg0, %c0_i32_8 : i32
    %11 = arith.extui %10 : i1 to i32
    %c0_i32_9 = arith.constant 0 : i32
    %12 = arith.cmpi ne, %11, %c0_i32_9 : i32
    scf.if %12 {
      %c0_10 = arith.constant 0 : index
      %c0_11 = arith.constant 0 : index
      %13 = vector.load %arg5[%c0_10, %c0_11] : memref<2x2xf32, #tpu.memory_space<vmem>>, vector<2x2xf32>
      %c0_12 = arith.constant 0 : index
      %c0_13 = arith.constant 0 : index
      %14 = vector.load %arg3[%c0_12, %c0_13] : memref<1x2xf32, #tpu.memory_space<vmem>>, vector<1x2xf32>
      %15 = vector.broadcast %14 : vector<1x2xf32> to vector<2x2xf32>
      %16 = arith.addf %13, %15 : vector<2x2xf32>
      %c0_14 = arith.constant 0 : index
      %c0_15 = arith.constant 0 : index
      %17 = vector.load %arg4[%c0_14, %c0_15] : memref<2x2xf32, #tpu.memory_space<vmem>>, vector<2x2xf32>
      tpu.vector_store %arg4[%c0_14, %c0_15], %16 {strides = array<i32>} : memref<2x2xf32, #tpu.memory_space<vmem>>, vector<2x2xf32>,
    } else {
    }
    return
  }
  func.func @transform_0(%arg0: i32) -> (i32, i32) {
    %c0_i32 = arith.constant 0 : i32
    %c0_i32_0 = arith.constant 0 : i32
    return %c0_i32, %arg0 : i32, i32
  }
  func.func @transform_1(%arg0: i32) -> (i32, i32) {
    %c0_i32 = arith.constant 0 : i32
    %c0_i32_0 = arith.constant 0 : i32
    return %arg0, %c0_i32 : i32, i32
  }
  func.func @transform_2(%arg0: i32) -> (i32, i32) {
    %c0_i32 = arith.constant 0 : i32
    %c0_i32_0 = arith.constant 0 : i32
    %c0_i32_1 = arith.constant 0 : i32
    return %c0_i32, %c0_i32_0 : i32, i32
  }
  func.func @transform_3(%arg0: i32) -> (i32, i32) {
    %c0_i32 = arith.constant 0 : i32
    %c0_i32_0 = arith.constant 0 : i32
    %c0_i32_1 = arith.constant 0 : i32
    return %c0_i32, %c0_i32_0 : i32, i32
  }
}

</mosaic_0001>

<bundles_post_ra>
// kernel: densenet_forward.8
= control target key start
LH: loop header
LB: loop body
LE: loop exit
PB: predicated region body
PF: predicated region fallthrough
CT: control target
= control target key end

     0   :  { %s1417_s15 = smov 0   ;;  %s1971_s0 = inlined_call_operand.vmem [shape: f32[2,256,7], index: 0, kind: input, shape index: {}]   ;;  %s1972_s1 = inlined_call_operand.vmem [shape: f32[7,16], index: 1, kind: input, shape index: {}]   ;;  %s1973_s2 = inlined_call_operand.vmem [shape: f32[1,16], index: 2, kind: input, shape index: {}]   ;;  %s1974_s3 = inlined_call_operand.vmem [shape: f32[128,256], index: 3, kind: input, shape index: {}]   ;;  %s1975_s4 = inlined_call_operand.vmem [shape: f32[2,128,16], index: 4, kind: output, shape index: {}]  }
   0x1 LB: > { %s1134_s16 = sadd.s32 4294967295, %s1390_s15   ;;  %p1138_p0 = scmp.ge.s32.totalorder %s1390_s15, 1  ;;  %s1390_s15 = sphi %s1417_s15, %s14_s15  }
   0x2   : > { %p162_p1 = scmp.lt.s32.totalorder %s1390_s15, 3 }
   0x4   : > { %p163_p2 = pnand %p1138_p0, %p162_p1 }
   0x6   : > { %166 = sbr.rel (%p163_p2) target bundleno = 562 (0x232), region = 36 }
   0xb   : > { %v230_v0 = vld [vmem:[%s1972_s1] sm:$0x7f]  ;;  %vm335_vm0 = vcmask 1046528   ;;  %p188_p3 = scmp.lt.s32.totalorder %s1134_s16, 1  ;;  %vm238_vm1 = vcmask 56320   ;;  %v892_v33 = vld [vmem:[%s1974_s3 + $0x38] sm:$0xff] }
   0xc   : > { %1294 = vmatprep.subr.msk.mxu0 %vm335_vm0, %v230_v0  ;;  %996 = vmatprep.mubr.f32.mxu1 %v892_v33  ;;  %v1508_v34 = vld [vmem:[%s1973_s2] ss:$0 sm:$0xff]  ;;  %vm628_vm2 = vcmask 1040384   ;;  %vm1062_vm3 = vcmask 130048  }
   0xd   : > { %1295 = vmatpush3.msk.msra.mxu0 %vm335_vm0, %v230_v0  ;;  %s1989_s16 = smov (!%p188_p3, %s1134_s16), 1 }
   0xe   : > { %s1179_s19 = sshll.u32 %s1989_s16, 8  ;;  %s1180_s17 = sshll.u32 %s1989_s16, 7 }
   0xf   : > { %s1436_s22 = scalar_lea.vmem %s1971_s0, %s1179_s19  ;;  %s1934_s20 = scalar_lea.vmem %s1975_s4, %s1180_s17 }
  0x10   : > { %v198_v1 = vld [vmem:[%s1436_s22] sm:$0xff]  ;;  %v199_v2 = vld [vmem:[%s1436_s22 + $0x8] sm:$0xff]  ;;  %v200_v3 = vld [vmem:[%s1436_s22 + $0x10] sm:$0xff] }
  0x11   : > { %1296 = vmatprep.mubr.msk.f32.mxu0 %vm238_vm1, %v198_v1  ;;  %v201_v4 = vld [vmem:[%s1436_s22 + $0x18] sm:$0xff]  ;;  %v202_v5 = vld [vmem:[%s1436_s22 + $0x20] sm:$0xff]  ;;  %v203_v6 = vld [vmem:[%s1436_s22 + $0x28] sm:$0xff] }
  0x12   : > { %1297 = vmatmul.mubr.msk.f32.vlgmr.msra.gmra.mxu0 %vm238_vm1, %v199_v2  ;;  %v204_v7 = vld [vmem:[%s1436_s22 + $0x30] sm:$0xff]  ;;  %v205_v8 = vld [vmem:[%s1436_s22 + $0x38] sm:$0xff]  ;;  %v206_v9 = vld [vmem:[%s1436_s22 + $0x40] sm:$0xff] }
  0x13   : > { %1299 = vmatprep.mubr.msk.f32.mxu0 %vm238_vm1, %v200_v3  ;;  %v207_v10 = vld [vmem:[%s1436_s22 + $0x48] sm:$0xff]  ;;  %v208_v11 = vld [vmem:[%s1436_s22 + $0x50] sm:$0xff]  ;;  %v209_v12 = vld [vmem:[%s1436_s22 + $0x58] sm:$0xff] }
  0x14   : > { %v210_v13 = vld [vmem:[%s1436_s22 + $0x60] sm:$0xff]  ;;  %v211_v14 = vld [vmem:[%s1436_s22 + $0x68] sm:$0xff]  ;;  %v212_v15 = vld [vmem:[%s1436_s22 + $0x70] sm:$0xff] }
  0x15   : > { %v213_v16 = vld [vmem:[%s1436_s22 + $0x78] sm:$0xff]  ;;  %v214_v17 = vld [vmem:[%s1436_s22 + $0x80] sm:$0xff]  ;;  %v215_v18 = vld [vmem:[%s1436_s22 + $0x88] sm:$0xff] }
  0x16   : > { %1300 = vmatmul.mubr.msk.f32.gmra.mxu0 %vm238_vm1, %v201_v4  ;;  %v216_v19 = vld [vmem:[%s1436_s22 + $0x90] sm:$0xff]  ;;  %v217_v20 = vld [vmem:[%s1436_s22 + $0x98] sm:$0xff]  ;;  %v218_v21 = vld [vmem:[%s1436_s22 + $0xa0] sm:$0xff] }
  0x17   : > { %1302 = vmatprep.mubr.msk.f32.mxu0 %vm238_vm1, %v202_v5  ;;  %v219_v22 = vld [vmem:[%s1436_s22 + $0xa8] sm:$0xff]  ;;  %v220_v23 = vld [vmem:[%s1436_s22 + $0xb0] sm:$0xff]  ;;  %v221_v24 = vld [vmem:[%s1436_s22 + $0xb8] sm:$0xff] }
  0x18   : > { %v222_v25 = vld [vmem:[%s1436_s22 + $0xc0] sm:$0xff]  ;;  %v223_v26 = vld [vmem:[%s1436_s22 + $0xc8] sm:$0xff]  ;;  %v224_v27 = vld [vmem:[%s1436_s22 + $0xd0] sm:$0xff] }
  0x19   : > { %v225_v28 = vld [vmem:[%s1436_s22 + $0xd8] sm:$0xff]  ;;  %v226_v29 = vld [vmem:[%s1436_s22 + $0xe0] sm:$0xff]  ;;  %v227_v30 = vld [vmem:[%s1436_s22 + $0xe8] sm:$0xff] }
  0x1a   : > { %1303 = vmatmul.mubr.msk.f32.gmra.mxu0 %vm238_vm1, %v203_v6  ;;  %v228_v31 = vld [vmem:[%s1436_s22 + $0xf0] sm:$0xff]  ;;  %v229_v32 = vld [vmem:[%s1436_s22 + $0xf8] sm:$0xff] }
  0x1b   : > { %1305 = vmatprep.mubr.msk.f32.mxu0 %vm238_vm1, %v204_v7 }
  0x1e   : > { %1306 = vmatmul.mubr.msk.f32.gmra.mxu0 %vm238_vm1, %v205_v8 }
  0x1f   : > { %1308 = vmatprep.mubr.msk.f32.mxu0 %vm238_vm1, %v206_v9 }
  0x22   : > { %1309 = vmatmul.mubr.msk.f32.gmra.mxu0 %vm238_vm1, %v207_v10 }
  0x23   : > { %1311 = vmatprep.mubr.msk.f32.mxu0 %vm238_vm1, %v208_v11 }
  0x26   : > { %1312 = vmatmul.mubr.msk.f32.gmra.mxu0 %vm238_vm1, %v209_v12 }
  0x27   : > { %1314 = vmatprep.mubr.msk.f32.mxu0 %vm238_vm1, %v210_v13  ;;  %v886_v13 = vld [vmem:[%s1974_s3 + $0x8] sm:$0xff] }
  0x2a   : > { %1315 = vmatmul.mubr.msk.f32.gmra.mxu0 %vm238_vm1, %v211_v14 }
  0x2b   : > { %1317 = vmatprep.mubr.msk.f32.mxu0 %vm238_vm1, %v212_v15 }
  0x2e   : > { %1318 = vmatmul.mubr.msk.f32.gmra.mxu0 %vm238_vm1, %v213_v16 }
  0x2f   : > { %1320 = vmatprep.mubr.msk.f32.mxu0 %vm238_vm1, %v214_v17 }
  0x32   : > { %1321 = vmatmul.mubr.msk.f32.gmra.mxu0 %vm238_vm1, %v215_v18 }
  0x33   : > { %1323 = vmatprep.mubr.msk.f32.mxu0 %vm238_vm1, %v216_v19 }
  0x36   : > { %1324 = vmatmul.mubr.msk.f32.gmra.mxu0 %vm238_vm1, %v217_v20 }
  0x37   : > { %1326 = vmatprep.mubr.msk.f32.mxu0 %vm238_vm1, %v218_v21 }
  0x3a   : > { %1327 = vmatmul.mubr.msk.f32.gmra.mxu0 %vm238_vm1, %v219_v22 }
  0x3b   : > { %1329 = vmatprep.mubr.msk.f32.mxu0 %vm238_vm1, %v220_v23 }
  0x3e   : > { %1330 = vmatmul.mubr.msk.f32.gmra.mxu0 %vm238_vm1, %v221_v24 }
  0x3f   : > { %1332 = vmatprep.mubr.msk.f32.mxu0 %vm238_vm1, %v222_v25 }
  0x42   : > { %1333 = vmatmul.mubr.msk.f32.gmra.mxu0 %vm238_vm1, %v223_v26 }
  0x43   : > { %1335 = vmatprep.mubr.msk.f32.mxu0 %vm238_vm1, %v224_v27 }
  0x46   : > { %1336 = vmatmul.mubr.msk.f32.gmra.mxu0 %vm238_vm1, %v225_v28 }
  0x47   : > { %1338 = vmatprep.mubr.msk.f32.mxu0 %vm238_vm1, %v226_v29 }
  0x4a   : > { %1339 = vmatmul.mubr.msk.f32.gmra.mxu0 %vm238_vm1, %v227_v30 }
  0x4b   : > { %1341 = vmatprep.mubr.msk.f32.mxu0 %vm238_vm1, %v228_v31 }
  0x4e   : > { %1342 = vmatmul.mubr.msk.f32.gmra.mxu0 %vm238_vm1, %v229_v32 }
  0x4f   : > { %981 = vmatprep.mubr.f32.mxu0 %v886_v13 }
  0xd2   : > { %v1298_v35 = vpop.f32.mrf.mxu0 }
  0xd3   : > { %v411_v36 = vadd.f32 %v1298_v35, %v1508_v34 }
  0xd4   : > { %v405_v37 = vpop.f32.mrf.mxu0 }
  0xd5   : > { %v1511_v38 = vmax.f32 %v411_v36, 0.0  ;;  %v406_v39 = vadd.f32 %v1508_v34, %v405_v37 }
  0xd6   : > { %v1301_v40 = vpop.f32.mrf.mxu0 }
  0xd7   : > { %v564_v41 = vmax.f32 %v406_v39, 0.0  ;;  %v421_v42 = vadd.f32 %v1301_v40, %v1508_v34  ;;  %v630_v43 = vrot.slane %v1511_v38, 7  ;;  %v726_v50 = vrot.slane %v1511_v38, 1 }
  0xd8   : > { %v415_v44 = vpop.f32.mrf.mxu0 }
  0xd9   : > { %v629_v45 = vrot.slane %v564_v41, 7  ;;  %v725_v46 = vrot.slane %v564_v41, 1  ;;  %v567_v47 = vmax.f32 %v421_v42, 0.0  ;;  %v416_v48 = vadd.f32 %v1508_v34, %v415_v44 }
  0xda   : > { %v1304_v49 = vpop.f32.mrf.mxu0 }
  0xdb   : > { %v631_v51 = vsel %vm628_vm2, %v629_v45, %v630_v43  ;;  %v724_v52 = vsel %vm628_vm2, 0.0, %v629_v45  ;;  %v566_v54 = vmax.f32 %v416_v48, 0.0  ;;  %v431_v55 = vadd.f32 %v1304_v49, %v1508_v34 }
  0xdc   : > { %v821_v53 = vmax.f32 %v724_v52, %v564_v41  ;;  %v425_v56 = vpop.f32.mrf.mxu0  ;;  %v822_v57 = vmax.f32 %v631_v51, %v1511_v38  ;;  %v634_v58 = vrot.slane %v567_v47, 7  ;;  %v727_v60 = vsel %vm335_vm0, %v725_v46, %v726_v50 }
  0xdd   : > { %v426_v59 = vadd.f32 %v1508_v34, %v425_v56  ;;  %v632_v61 = vrot.slane %v566_v54, 7  ;;  %v728_v62 = vrot.slane %v566_v54, 1  ;;  %v569_v63 = vmax.f32 %v431_v55, 0.0 }
  0xde   : > { %v1307_v0 = vpop.f32.mrf.mxu0  ;;  %v1524_v1 = vmax.f32 %v821_v53, %v727_v60  ;;  %v730_v4 = vrot.slane %v567_v47, 1 }
  0xdf   : > { %v568_v2 = vmax.f32 %v426_v59, 0.0  ;;  %v441_v3 = vadd.f32 %v1307_v0, %v1508_v34  ;;  %v633_v5 = vsel %vm628_vm2, %v630_v43, %v632_v61  ;;  %v635_v6 = vsel %vm628_vm2, %v632_v61, %v634_v58 }
  0xe0   : > { %1979 = vst [vmem:[#allocation2_spill] sm:$0xff] %v1524_v1  ;;  %v638_v7 = vrot.slane %v569_v63, 7  ;;  %v435_v8 = vpop.f32.mrf.mxu0  ;;  %v823_v9 = vmax.f32 %v633_v5, %v566_v54  ;;  %v824_v16 = vmax.f32 %v635_v6, %v567_v47  ;;  %v731_v17 = vsel %vm335_vm0, %v728_v62, %v730_v4 }
  0xe1   : > { %v636_v10 = vrot.slane %v568_v2, 7  ;;  %v732_v11 = vrot.slane %v568_v2, 1  ;;  %v1529_v12 = vmax.f32 %v441_v3, 0.0  ;;  %v436_v14 = vadd.f32 %v1508_v34, %v435_v8 }
  0xe2   : > { %v1310_v15 = vpop.f32.mrf.mxu0  ;;  %v729_v18 = vsel %vm335_vm0, %v726_v50, %v728_v62  ;;  %v734_v19 = vrot.slane %v569_v63, 1  ;;  %v1542_v29 = vmax.f32 %v823_v9, %v731_v17 }
  0xe3   : > { %v637_v20 = vsel %vm628_vm2, %v634_v58, %v636_v10  ;;  %v639_v21 = vsel %vm628_vm2, %v636_v10, %v638_v7  ;;  %v570_v23 = vmax.f32 %v436_v14, 0.0  ;;  %v733_v28 = vsel %vm335_vm0, %v730_v4, %v732_v11 }
  0xe4   : > { %v825_v22 = vmax.f32 %v637_v20, %v568_v2  ;;  %v445_v24 = vpop.f32.mrf.mxu0  ;;  %v826_v25 = vmax.f32 %v639_v21, %v569_v63  ;;  %v735_v27 = vsel %vm335_vm0, %v732_v11, %v734_v19  ;;  %v642_v30 = vrot.slane %v1529_v12, 7 }
  0xe5   : > { %v446_v26 = vadd.f32 %v1508_v34, %v445_v24  ;;  %v640_v31 = vrot.slane %v570_v23, 7  ;;  %v736_v32 = vrot.slane %v570_v23, 1  ;;  %v1549_v37 = vmax.f32 %v824_v16, %v733_v28 }
  0xe6   : > { %v1313_v33 = vpop.f32.mrf.mxu0  ;;  %v1545_v35 = vmax.f32 %v825_v22, %v735_v27  ;;  %v1551_v38 = vmax.f32 %v822_v57, %v729_v18  ;;  %v738_v39 = vrot.slane %v1529_v12, 1  ;;  %v451_v63 = vadd.f32 %v1310_v15, %v1508_v34 }
  0xe7   : > { %v1547_v36 = vmax.f32 %v446_v26, 0.0  ;;  %v641_v40 = vsel %vm628_vm2, %v638_v7, %v640_v31  ;;  %v643_v41 = vsel %vm628_vm2, %v640_v31, %v642_v30  ;;  %v737_v48 = vsel %vm335_vm0, %v734_v19, %v736_v32 }
  0xe8   : > { %v455_v42 = vpop.f32.mrf.mxu0  ;;  %v827_v43 = vmax.f32 %v641_v40, %v570_v23  ;;  %v828_v46 = vmax.f32 %v643_v41, %v1529_v12  ;;  %v739_v47 = vsel %vm335_vm0, %v736_v32, %v738_v39  ;;  %v1565_v54 = vmax.f32 %v826_v25, %v737_v48 }
  0xe9   : > { %v740_v44 = vrot.slane %v1547_v36, 1  ;;  %v456_v61 = vadd.f32 %v1508_v34, %v455_v42  ;;  %v461_v3 = vadd.f32 %v1313_v33, %v1508_v34  ;;  %v1585_v6 = vmax.f32 %v451_v63, 0.0 }
  0xea   : > { %v1316_v45 = vpop.f32.mrf.mxu0  ;;  %v1561_v51 = vmax.f32 %v827_v43, %v739_v47  ;;  %v644_v7 = vrot.slane %v1547_v36, 7 }
  0xeb   : > { %v741_v50 = vsel %vm335_vm0, %v738_v39, %v740_v44  ;;  %v1581_v4 = vmax.f32 %v456_v61, 0.0  ;;  %v471_v8 = vadd.f32 %v1316_v45, %v1508_v34  ;;  %v1591_v11 = vmax.f32 %v461_v3, 0.0 }
  0xec   : > { %v465_v49 = vpop.f32.mrf.mxu0  ;;  %v1563_v53 = vmax.f32 %v828_v46, %v741_v50  ;;  %v646_v15 = vrot.slane %v1585_v6, 7  ;;  %v1599_v16 = vsel %vm628_vm2, %v642_v30, %v644_v7  ;;  %v742_v23 = vrot.slane %v1585_v6, 1 }
  0xed   : > { %v466_v0 = vadd.f32 %v1508_v34, %v465_v49  ;;  %v648_v12 = vrot.slane %v1581_v4, 7  ;;  %v1601_v17 = vmax.f32 %v471_v8, 0.0  ;;  %v650_v22 = vrot.slane %v1591_v11, 7 }
  0xee   : > { %v1319_v52 = vpop.f32.mrf.mxu0  ;;  %v1605_v21 = vsel %vm628_vm2, %v644_v7, %v646_v15  ;;  %v744_v25 = vrot.slane %v1581_v4, 1  ;;  %v746_v30 = vrot.slane %v1591_v11, 1  ;;  %v1632_v47 = vsel %vm335_vm0, %v740_v44, %v742_v23 }
  0xef   : > { %v576_v9 = vmax.f32 %v466_v0, 0.0  ;;  %v481_v19 = vadd.f32 %v1319_v52, %v1508_v34  ;;  %v1610_v24 = vsel %vm628_vm2, %v646_v15, %v648_v12  ;;  %v1619_v31 = vsel %vm628_vm2, %v648_v12, %v650_v22 }
  0xf0   : > { %v475_v55 = vpop.f32.mrf.mxu0  ;;  %v654_v33 = vrot.slane %v1601_v17, 7  ;;  %v750_v45 = vrot.slane %v1601_v17, 1  ;;  %v1647_v44 = vsel %vm335_vm0, %v742_v23, %v744_v25 }
  0xf1   : > { %v476_v13 = vadd.f32 %v1508_v34, %v475_v55  ;;  %v652_v18 = vrot.slane %v576_v9, 7  ;;  %v1624_v40 = vmax.f32 %v481_v19, 0.0  ;;  %v748_v46 = vrot.slane %v576_v9, 1 }
  0xf2   : > { %v1322_v56 = vpop.f32.mrf.mxu0  ;;  %v1641_v55 = vsel %vm335_vm0, %v744_v25, %v746_v30 }
  0xf3   : > { %v1613_v26 = vmax.f32 %v476_v13, 0.0  ;;  %v653_v39 = vsel %vm628_vm2, %v650_v22, %v652_v18  ;;  %v1635_v48 = vsel %vm628_vm2, %v652_v18, %v654_v33  ;;  %v1976_v0 = vrot.slane %v1624_v40, 7 }
  0xf4   : > { %v485_v57 = vpop.f32.mrf.mxu0  ;;  %v754_v3 = vrot.slane %v1624_v40, 1  ;;  %v1652_v7 = vadd.f32 %v1322_v56, %v1508_v34  ;;  %v751_v18 = vsel %vm335_vm0, %v748_v46, %v750_v45  ;;  %v1666_v25 = vsel %vm335_vm0, %v746_v30, %v748_v46 }
  0xf5   : > { %v486_v32 = vadd.f32 %v1508_v34, %v485_v57  ;;  %v656_v49 = vrot.slane %v1613_v26, 7  ;;  %v833_v57 = vmax.f32 %v653_v39, %v576_v9  ;;  %v752_v13 = vrot.slane %v1613_v26, 1 }
  0xf6   : > { %v1567_v58 = vpop.f32.mrf.mxu0 }
  0xf7   : > { %v1643_v61 = vmax.f32 %v486_v32, 0.0  ;;  %v657_v19 = vsel %vm628_vm2, %v654_v33, %v656_v49  ;;  %v659_v22 = vsel %vm628_vm2, %v656_v49, %v1976_v0  ;;  %v1676_v33 = vadd.f32 %v1567_v58, %v1508_v34 }
  0xf8   : > { %v1569_v59 = vpop.f32.mrf.mxu0  ;;  %v835_v30 = vmax.f32 %v657_v19, %v1613_v26 }
  0xf9   : > { %v1977_v32 = vrot.slane %v1643_v61, 1 }
  0xfa   : > { %v1571_v60 = vpop.f32.mrf.mxu0 }
  0xfc   : > { %v1574_v62 = vpop.f32.mrf.mxu0 }
  0xfe   : > { %v1578_v2 = vpop.f32.mrf.mxu0 }
 0x100   : > { %v1583_v5 = vpop.f32.mrf.mxu0 }
 0x102   : > { %v1589_v10 = vpop.f32.mrf.mxu0 }
 0x103   : > { %v531_v46 = vadd.f32 %v1589_v10, %v1508_v34  ;;  %v757_v10 = vsel %vm335_vm0, %v754_v3, %v1977_v32 }
 0x104   : > { %v1595_v14 = vpop.f32.mrf.mxu0 }
 0x106   : > { %v1337_v20 = vpop.f32.mrf.mxu0 }
 0x107   : > { %v541_v56 = vadd.f32 %v1337_v20, %v1508_v34 }
 0x108   : > { %v535_v27 = vpop.f32.mrf.mxu0 }
 0x109   : > { %v536_v39 = vadd.f32 %v1508_v34, %v535_v27  ;;  %v836_v27 = vmax.f32 %v659_v22, %v1624_v40 }
 0x10a   : > { %v1340_v41 = vpop.f32.mrf.mxu0 }
 0x10b   : > { %v551_v63 = vadd.f32 %v1340_v41, %v1508_v34 }
 0x10c   : > { %v545_v50 = vpop.f32.mrf.mxu0 }
 0x10d   : > { %v546_v8 = vadd.f32 %v1508_v34, %v545_v50  ;;  %v1670_v41 = vmax.f32 %v551_v63, 0.0  ;;  %v1672_v50 = vmax.f32 %v833_v57, %v751_v18  ;;  %v755_v63 = vsel %vm335_vm0, %v752_v13, %v754_v3 }
 0x10e   : > { %v1343_v12 = vpop.f32.mrf.mxu0  ;;  %v511_v57 = vadd.f32 %v1571_v60, %v1508_v34  ;;  %v1688_v18 = vmax.f32 %v541_v56, 0.0 }
 0x10f   : > { %v561_v9 = vadd.f32 %v1343_v12, %v1508_v34  ;;  %v1678_v12 = vmax.f32 %v546_v8, 0.0  ;;  %v753_v8 = vsel %vm335_vm0, %v750_v45, %v752_v13  ;;  %v686_v26 = vrot.slane %v1670_v41, 7 }
 0x110   : > { %v555_v23 = vpop.f32.mrf.mxu0  ;;  %v516_v45 = vadd.f32 %v1508_v34, %v1583_v5  ;;  %v867_v13 = vmax.f32 %v835_v30, %v755_v63  ;;  %v506_v63 = vadd.f32 %v1508_v34, %v1574_v62 }
 0x111   : > { %v595_v49 = vmax.f32 %v561_v9, 0.0  ;;  %v556_v20 = vadd.f32 %v1508_v34, %v555_v23  ;;  %v526_v9 = vadd.f32 %v1508_v34, %v1595_v14  ;;  %v1693_v23 = vmax.f32 %v536_v39, 0.0 }
 0x112   : > { %v684_v19 = vrot.slane %v1678_v12, 7  ;;  %v1704_v14 = vmax.f32 %v531_v46, 0.0  ;;  %v682_v39 = vrot.slane %v1688_v18, 7 }
 0x113   : > { %v594_v58 = vmax.f32 %v556_v20, 0.0  ;;  %v690_v22 = vrot.slane %v595_v49, 7  ;;  %v786_v60 = vrot.slane %v595_v49, 1  ;;  %v521_v20 = vadd.f32 %v1578_v2, %v1508_v34 }
 0x114   : > { %v1709_v32 = vmax.f32 %v526_v9, 0.0  ;;  %v680_v42 = vrot.slane %v1693_v23, 7  ;;  %v782_v2 = vrot.slane %v1670_v41, 1  ;;  %v685_v5 = vsel %vm628_vm2, %v682_v39, %v684_v19 }
 0x115   : > { %v688_v56 = vrot.slane %v594_v58, 7  ;;  %v784_v28 = vrot.slane %v594_v58, 1  ;;  %v820_v46 = vsel %vm335_vm0, %v786_v60, 0.0  ;;  %v687_v30 = vsel %vm628_vm2, %v684_v19, %v686_v26 }
 0x116   : > { %v1718_v15 = vmax.f32 %v521_v20, 0.0  ;;  %v868_v9 = vmax.f32 %v836_v27, %v757_v10  ;;  %v849_v1 = vmax.f32 %v685_v5, %v1678_v12  ;;  %v850_v62 = vmax.f32 %v687_v30, %v1670_v41 }
 0x117   : > { %v689_v0 = vsel %vm628_vm2, %v686_v26, %v688_v56  ;;  %v691_v3 = vsel %vm628_vm2, %v688_v56, %v690_v22  ;;  %v678_v56 = vrot.slane %v1704_v14, 7  ;;  %v778_v27 = vrot.slane %v1688_v18, 1 }
 0x118   : > { %v851_v43 = vmax.f32 %v689_v0, %v594_v58  ;;  %v852_v52 = vmax.f32 %v691_v3, %v595_v49  ;;  %v780_v0 = vrot.slane %v1678_v12, 1  ;;  %v787_v49 = vsel %vm335_vm0, %v784_v28, %v786_v60 }
 0x119   : > { %v785_v58 = vsel %vm335_vm0, %v782_v2, %v784_v28  ;;  %v1724_v3 = vmax.f32 %v516_v45, 0.0  ;;  %v681_v10 = vsel %vm628_vm2, %v678_v56, %v680_v42  ;;  %v683_v19 = vsel %vm628_vm2, %v680_v42, %v682_v39 }
 0x11a   : > { %v884_v22 = vmax.f32 %v852_v52, %v820_v46  ;;  %v883_v26 = vmax.f32 %v851_v43, %v787_v49  ;;  %v676_v52 = vrot.slane %v1709_v32, 7  ;;  %v496_v28 = vadd.f32 %v1508_v34, %v1569_v59 }
 0x11b   : > { %v1734_v60 = vmax.f32 %v511_v57, 0.0  ;;  %v882_v43 = vmax.f32 %v850_v62, %v785_v58  ;;  %v1980_v41 = vmax.f32 %v1635_v48, %v1601_v17  ;;  %v674_v20 = vrot.slane %v1718_v15, 7 }
 0x11c   : > { %1214 = vmatprep.subr.mxu0 %v884_v22  ;;  %1344 = vmatprep.subr.mxu1 %v884_v22  ;;  %v776_v45 = vrot.slane %v1693_v23, 1  ;;  %v783_v42 = vsel %vm335_vm0, %v780_v0, %v782_v2  ;;  %v781_v39 = vsel %vm335_vm0, %v778_v27, %v780_v0  ;;  %v1743_v34 = vmax.f32 %v506_v63, 0.0 }
 0x11d   : > { %1215 = vmatpush3.msra.mxu0 %v868_v9  ;;  %1360 = vmatpush3.msra.mxu1 %v868_v9  ;;  %v866_v12 = vmax.f32 %v1980_v41, %v753_v8  ;;  %v847_v59 = vmax.f32 %v681_v10, %v1693_v23  ;;  %v881_v57 = vmax.f32 %v849_v1, %v783_v42  ;;  %v672_v48 = vrot.slane %v1724_v3, 7 }
 0x11e   : > { %1216 = vmatprep.subr.mxu0 %v883_v26  ;;  %1345 = vmatprep.subr.mxu1 %v883_v26  ;;  %v848_v17 = vmax.f32 %v683_v19, %v1688_v18  ;;  %v774_v8 = vrot.slane %v1704_v14, 1  ;;  %v677_v5 = vsel %vm628_vm2, %v674_v20, %v676_v52  ;;  %v1752_v2 = vmax.f32 %v1676_v33, 0.0 }
 0x11f   : > { %1217 = vmatpush3.msra.mxu0 %v867_v13  ;;  %1361 = vmatpush3.msra.mxu1 %v867_v13  ;;  %v679_v13 = vsel %vm628_vm2, %v676_v52, %v678_v56  ;;  %v1981_v1 = vmax.f32 %v1619_v31, %v1591_v11  ;;  %v1982_v46 = vmax.f32 %v1610_v24, %v1581_v4  ;;  %v670_v63 = vrot.slane %v1734_v60, 7 }
 0x120   : > { %1218 = vmatprep.subr.mxu0 %v882_v43  ;;  %1346 = vmatprep.subr.mxu1 %v882_v43  ;;  %v880_v23 = vmax.f32 %v848_v17, %v781_v39  ;;  %v772_v22 = vrot.slane %v1709_v32, 1  ;;  %v779_v33 = vsel %vm335_vm0, %v776_v45, %v778_v27  ;;  %v777_v9 = vsel %vm335_vm0, %v774_v8, %v776_v45 }
 0x121   : > { %1219 = vmatpush3.msra.mxu0 %v866_v12  ;;  %1362 = vmatpush3.msra.mxu1 %v866_v12  ;;  %v864_v18 = vmax.f32 %v1981_v1, %v1666_v25  ;;  %v863_v30 = vmax.f32 %v1982_v46, %v1641_v55  ;;  %v1768_v56 = vmax.f32 %v496_v28, 0.0  ;;  %v845_v11 = vmax.f32 %v677_v5, %v1709_v32 }
 0x122   : > { %1220 = vmatprep.subr.mxu0 %v881_v57  ;;  %1347 = vmatprep.subr.mxu1 %v881_v57  ;;  %v879_v4 = vmax.f32 %v847_v59, %v779_v33  ;;  %v846_v24 = vmax.f32 %v679_v13, %v1704_v14  ;;  %v668_v31 = vrot.slane %v1743_v34, 7  ;;  %v770_v55 = vrot.slane %v1718_v15, 1  ;;  %v885_v33 = vld [vmem:[%s1974_s3] sm:$0xff] }
 0x123   : > { %1221 = vmatpush3.msra.mxu0 %v1672_v50  ;;  %1363 = vmatpush3.msra.mxu1 %v1672_v50  ;;  %v673_v25 = vsel %vm628_vm2, %v670_v63, %v672_v48  ;;  %v675_v50 = vsel %vm628_vm2, %v672_v48, %v674_v20  ;;  %v1777_v0 = vmax.f32 %v1652_v7, 0.0  ;;  %v1983_v14 = vmax.f32 %v1605_v21, %v1585_v6 }
 0x124   : > { %1222 = vmatprep.subr.mxu0 %v880_v23  ;;  %1348 = vmatprep.subr.mxu1 %v880_v23  ;;  %v878_v32 = vmax.f32 %v846_v24, %v777_v9  ;;  %v1984_v58 = vmax.f32 %v1599_v16, %v1547_v36  ;;  %v666_v62 = vrot.slane %v1752_v2, 7  ;;  %v768_v52 = vrot.slane %v1724_v3, 1  ;;  %v1987_v9 = vld [vmem:[#allocation2_spill] sm:$0xff]  ;;  %v895_v24 = vld [vmem:[%s1974_s3 + $0x50] sm:$0xff] }
 0x125   : > { %1223 = vmatpush3.msra.mxu0 %v864_v18  ;;  %1364 = vmatpush3.msra.mxu1 %v864_v18  ;;  %v862_v49 = vmax.f32 %v1983_v14, %v1647_v44  ;;  %v775_v7 = vsel %vm335_vm0, %v772_v22, %v774_v8  ;;  %v773_v27 = vsel %vm335_vm0, %v770_v55, %v772_v22  ;;  %v664_v36 = vrot.slane %v1768_v56, 7  ;;  %v901_v14 = vld [vmem:[%s1974_s3 + $0x80] sm:$0xff] }
 0x126   : > { %1224 = vmatprep.subr.mxu0 %v879_v4  ;;  %1349 = vmatprep.subr.mxu1 %v879_v4  ;;  %v861_v26 = vmax.f32 %v1984_v58, %v1632_v47  ;;  %v843_v10 = vmax.f32 %v673_v25, %v1724_v3  ;;  %v877_v6 = vmax.f32 %v845_v11, %v775_v7  ;;  %v766_v16 = vrot.slane %v1734_v60, 1  ;;  %v896_v11 = vld [vmem:[%s1974_s3 + $0x58] sm:$0xff]  ;;  %v890_v4 = vld [vmem:[%s1974_s3 + $0x28] sm:$0xff]  ;;  %v897_v25 = vld [vmem:[%s1974_s3 + $0x60] sm:$0xff] }
 0x127   : > { %1225 = vmatpush3.msra.mxu0 %v863_v30  ;;  %1365 = vmatpush3.msra.mxu1 %v863_v30  ;;  %v844_v21 = vmax.f32 %v675_v50, %v1718_v15  ;;  %v669_v47 = vsel %vm628_vm2, %v666_v62, %v668_v31  ;;  %v671_v44 = vsel %vm628_vm2, %v668_v31, %v670_v63  ;;  %v662_v3 = vrot.slane %v1777_v0, 7  ;;  %v889_v31 = vld [vmem:[%s1974_s3 + $0x20] sm:$0xff]  ;;  %v900_v50 = vld [vmem:[%s1974_s3 + $0x78] sm:$0xff]  ;;  %v903_v58 = vld [vmem:[%s1974_s3 + $0x90] sm:$0xff] }
 0x128   : > { %1226 = vmatprep.subr.mxu0 %v878_v32  ;;  %1350 = vmatprep.subr.mxu1 %v878_v32  ;;  %v764_v28 = vrot.slane %v1743_v34, 1  ;;  %v771_v15 = vsel %vm335_vm0, %v768_v52, %v770_v55  ;;  %v769_v43 = vsel %vm335_vm0, %v766_v16, %v768_v52  ;;  %v841_v41 = vmax.f32 %v669_v47, %v1743_v34  ;;  %v898_v55 = vld [vmem:[%s1974_s3 + $0x68] sm:$0xff]  ;;  %v908_v52 = vld [vmem:[%s1974_s3 + $0xb8] sm:$0xff]  ;;  %v907_v7 = vld [vmem:[%s1974_s3 + $0xb0] sm:$0xff] }
 0x129   : > { %1227 = vmatpush3.msra.mxu0 %v862_v49  ;;  %1366 = vmatpush3.msra.mxu1 %v862_v49  ;;  %v876_v19 = vmax.f32 %v844_v21, %v773_v27  ;;  %v875_v12 = vmax.f32 %v843_v10, %v771_v15  ;;  %v842_v20 = vmax.f32 %v671_v44, %v1734_v60  ;;  %v660_v45 = vrot.slane %v1643_v61, 7  ;;  %v902_v32 = vld [vmem:[%s1974_s3 + $0x88] sm:$0xff]  ;;  %v904_v49 = vld [vmem:[%s1974_s3 + $0x98] sm:$0xff]  ;;  %v909_v10 = vld [vmem:[%s1974_s3 + $0xc0] sm:$0xff] }
 0x12a   : > { %1228 = vmatprep.subr.mxu0 %v877_v6  ;;  %1351 = vmatprep.subr.mxu1 %v877_v6  ;;  %v762_v42 = vrot.slane %v1752_v2, 1  ;;  %v665_v39 = vsel %vm628_vm2, %v662_v3, %v664_v36  ;;  %v667_v59 = vsel %vm628_vm2, %v664_v36, %v666_v62  ;;  %v760_v57 = vrot.slane %v1768_v56, 1  ;;  %v905_v62 = vld [vmem:[%s1974_s3 + $0xa0] sm:$0xff]  ;;  %v910_v27 = vld [vmem:[%s1974_s3 + $0xc8] sm:$0xff]  ;;  %v912_v6 = vld [vmem:[%s1974_s3 + $0xd8] sm:$0xff] }
 0x12b   : > { %1229 = vmatpush3.msra.mxu0 %v861_v26  ;;  %1367 = vmatpush3.msra.mxu1 %v861_v26  ;;  %v874_v34 = vmax.f32 %v842_v20, %v769_v43  ;;  %v767_v60 = vsel %vm335_vm0, %v764_v28, %v766_v16  ;;  %v839_v48 = vmax.f32 %v665_v39, %v1768_v56  ;;  %v758_v5 = vrot.slane %v1777_v0, 1  ;;  %v887_v56 = vld [vmem:[%s1974_s3 + $0x10] sm:$0xff]  ;;  %v906_v26 = vld [vmem:[%s1974_s3 + $0xa8] sm:$0xff]  ;;  %v913_v16 = vld [vmem:[%s1974_s3 + $0xe0] sm:$0xff] }
 0x12c   : > { %1230 = vmatprep.subr.mxu0 %v876_v19  ;;  %1352 = vmatprep.subr.mxu1 %v876_v19  ;;  %v765_v17 = vsel %vm335_vm0, %v762_v42, %v764_v28  ;;  %v840_v8 = vmax.f32 %v667_v59, %v1752_v2  ;;  %v1985_v13 = vrot.slane %v1624_v40, 7  ;;  %v763_v2 = vsel %vm335_vm0, %v760_v57, %v762_v42  ;;  %v911_v21 = vld [vmem:[%s1974_s3 + $0xd0] sm:$0xff]  ;;  %v914_v36 = vld [vmem:[%s1974_s3 + $0xe8] sm:$0xff]  ;;  %v916_v47 = vld [vmem:[%s1974_s3 + $0xf8] sm:$0xff] }
 0x12d   : > { %1231 = vmatpush3.msra.mxu0 %v1563_v53  ;;  %1368 = vmatpush3.msra.mxu1 %v1563_v53  ;;  %v873_v53 = vmax.f32 %v841_v41, %v767_v60  ;;  %v761_v18 = vsel %vm335_vm0, %v758_v5, %v760_v57  ;;  %v871_v46 = vmax.f32 %v839_v48, %v763_v2  ;;  %v915_v44 = vld [vmem:[%s1974_s3 + $0xf0] sm:$0xff] }
 0x12e   : > { %1232 = vmatprep.subr.mxu0 %v875_v12  ;;  %1353 = vmatprep.subr.mxu1 %v875_v12  ;;  %v661_v23 = vsel %vm628_vm2, %v1985_v13, %v660_v45  ;;  %v872_v1 = vmax.f32 %v840_v8, %v765_v17 }
 0x12f   : > { %1233 = vmatpush3.msra.mxu0 %v1561_v51  ;;  %1369 = vmatpush3.msra.mxu1 %v1561_v51  ;;  %v663_v51 = vsel %vm628_vm2, %v660_v45, %v662_v3  ;;  %v837_v40 = vmax.f32 %v661_v23, %v1643_v61 }
 0x130   : > { %1234 = vmatprep.subr.mxu0 %v874_v34  ;;  %1354 = vmatprep.subr.mxu1 %v874_v34 }
 0x131   : > { %1235 = vmatpush3.msra.mxu0 %v1565_v54  ;;  %1370 = vmatpush3.msra.mxu1 %v1565_v54  ;;  %v838_v54 = vmax.f32 %v663_v51, %v1777_v0  ;;  %v899_v0 = vld [vmem:[%s1974_s3 + $0x70] sm:$0xff] }
 0x132   : > { %1236 = vmatprep.subr.mxu0 %v873_v53  ;;  %1355 = vmatprep.subr.mxu1 %v873_v53 }
 0x133   : > { %1237 = vmatpush3.msra.mxu0 %v1545_v35  ;;  %1371 = vmatpush3.msra.mxu1 %v1545_v35  ;;  %v870_v30 = vmax.f32 %v838_v54, %v761_v18  ;;  %v1986_v35 = vrot.slane %v1643_v61, 1  ;;  %v888_v61 = vld [vmem:[%s1974_s3 + $0x18] sm:$0xff] }
 0x134   : > { %1238 = vmatprep.subr.mxu0 %v872_v1  ;;  %1356 = vmatprep.subr.mxu1 %v872_v1 }
 0x135   : > { %1239 = vmatpush3.msra.mxu0 %v1549_v37  ;;  %1372 = vmatpush3.msra.mxu1 %v1549_v37  ;;  %v759_v63 = vsel %vm335_vm0, %v1986_v35, %v758_v5  ;;  %v891_v37 = vld [vmem:[%s1974_s3 + $0x30] sm:$0xff] }
 0x136   : > { %1240 = vmatprep.subr.mxu0 %v871_v46  ;;  %1357 = vmatprep.subr.mxu1 %v871_v46  ;;  %v869_v22 = vmax.f32 %v837_v40, %v759_v63 }
 0x137   : > { %1241 = vmatpush3.msra.mxu0 %v1542_v29  ;;  %1373 = vmatpush3.msra.mxu1 %v1542_v29  ;;  %v894_v29 = vld [vmem:[%s1974_s3 + $0x48] sm:$0xff] }
 0x138   : > { %1242 = vmatprep.subr.mxu0 %v870_v30  ;;  %1358 = vmatprep.subr.mxu1 %v870_v30 }
 0x139   : > { %1243 = vmatpush3.msra.mxu0 %v1551_v38  ;;  %1374 = vmatpush3.msra.mxu1 %v1551_v38  ;;  %v893_v38 = vld [vmem:[%s1974_s3 + $0x40] sm:$0xff] }
 0x13a   : > { %1244 = vmatprep.subr.mxu0 %v869_v22  ;;  %1359 = vmatprep.subr.mxu1 %v869_v22 }
 0x13b   : > { %1245 = vmatpush3.msra.mxu0 %v1987_v9  ;;  %1375 = vmatpush3.msra.mxu1 %v1987_v9 }
 0x13c   : > { %997 = vmatmul.mubr.f32.vlgmr.msra.gmra.mxu1 %v891_v37  ;;  %982 = vmatmul.mubr.f32.vlgmr.msra.gmra.mxu0 %v885_v33 }
 0x13d   : > { %1001 = vmatprep.mubr.f32.mxu1 %v894_v29  ;;  %986 = vmatprep.mubr.f32.mxu0 %v888_v61 }
 0x140   : > { %1002 = vmatmul.mubr.f32.gmra.mxu1 %v893_v38  ;;  %987 = vmatmul.mubr.f32.gmra.mxu0 %v887_v56 }
 0x141   : > { %1006 = vmatprep.mubr.f32.mxu1 %v896_v11  ;;  %991 = vmatprep.mubr.f32.mxu0 %v890_v4 }
 0x144   : > { %1007 = vmatmul.mubr.f32.gmra.mxu1 %v895_v24  ;;  %992 = vmatmul.mubr.f32.gmra.mxu0 %v889_v31 }
 0x145   : > { %1011 = vmatprep.mubr.f32.mxu1 %v898_v55 }
 0x148   : > { %1012 = vmatmul.mubr.f32.gmra.mxu1 %v897_v25 }
 0x149   : > { %1016 = vmatprep.mubr.f32.mxu1 %v900_v50 }
 0x14c   : > { %1017 = vmatmul.mubr.f32.gmra.mxu1 %v899_v0 }
 0x14d   : > { %1021 = vmatprep.mubr.f32.mxu1 %v902_v32 }
 0x150   : > { %1022 = vmatmul.mubr.f32.gmra.mxu1 %v901_v14 }
 0x151   : > { %1026 = vmatprep.mubr.f32.mxu1 %v904_v49 }
 0x154   : > { %1027 = vmatmul.mubr.f32.gmra.mxu1 %v903_v58 }
 0x155   : > { %1031 = vmatprep.mubr.f32.mxu1 %v906_v26 }
 0x158   : > { %1032 = vmatmul.mubr.f32.gmra.mxu1 %v905_v62 }
 0x159   : > { %1036 = vmatprep.mubr.f32.mxu1 %v908_v52 }
 0x15c   : > { %1037 = vmatmul.mubr.f32.gmra.mxu1 %v907_v7 }
 0x15d   : > { %1041 = vmatprep.mubr.f32.mxu1 %v910_v27 }
 0x160   : > { %1042 = vmatmul.mubr.f32.gmra.mxu1 %v909_v10 }
 0x161   : > { %1046 = vmatprep.mubr.f32.mxu1 %v912_v6 }
 0x164   : > { %1047 = vmatmul.mubr.f32.gmra.mxu1 %v911_v21 }
 0x165   : > { %1051 = vmatprep.mubr.f32.mxu1 %v914_v36 }
 0x168   : > { %1052 = vmatmul.mubr.f32.gmra.mxu1 %v913_v16 }
 0x169   : > { %1056 = vmatprep.mubr.f32.mxu1 %v916_v47 }
 0x16c   : > { %1057 = vmatmul.mubr.f32.gmra.mxu1 %v915_v44 }
 0x1fc   : > { %v1255_v19 = vpop.f32.mrf.mxu1  ;;  %v1246_v3 = vpop.f32.mrf.mxu0 }
 0x1fe   : > { %v1256_v28 = vpop.f32.mrf.mxu1  ;;  %v1247_v15 = vpop.f32.mrf.mxu0 }
 0x1ff   : > { %v1257_v43 = vadd.f32 %v1256_v28, %v1255_v19  ;;  %v1248_v41 = vadd.f32 %v1247_v15, %v1246_v3 }
 0x200   : > { %v1258_v12 = vpop.f32.mrf.mxu1  ;;  %v1249_v20 = vpop.f32.mrf.mxu0 }
 0x201   : > { %1066 = vst.msk [vmem:[%s1934_s20 + $0x18] sm:$0xff] %vm1062_vm3, %v1257_v43  ;;  %1063 = vst.msk [vmem:[%s1934_s20] sm:$0xff] %vm1062_vm3, %v1248_v41 }
 0x202   : > { %v1259_v45 = vpop.f32.mrf.mxu1  ;;  %v1250_v42 = vpop.f32.mrf.mxu0 }
 0x203   : > { %v1260_v39 = vadd.f32 %v1259_v45, %v1258_v12  ;;  %v1251_v59 = vadd.f32 %v1250_v42, %v1249_v20 }
 0x204   : > { %v1261_v34 = vpop.f32.mrf.mxu1  ;;  %v1252_v57 = vpop.f32.mrf.mxu0 }
 0x205   : > { %1067 = vst.msk [vmem:[%s1934_s20 + $0x20] sm:$0xff] %vm1062_vm3, %v1260_v39  ;;  %1064 = vst.msk [vmem:[%s1934_s20 + $0x8] sm:$0xff] %vm1062_vm3, %v1251_v59 }
 0x206   : > { %v1262_v60 = vpop.f32.mrf.mxu1  ;;  %v1253_v17 = vpop.f32.mrf.mxu0 }
 0x207   : > { %v1263_v48 = vadd.f32 %v1262_v60, %v1261_v34  ;;  %v1254_v53 = vadd.f32 %v1253_v17, %v1252_v57 }
 0x208   : > { %v1264_v8 = vpop.f32.mrf.mxu1 }
 0x209   : > { %1068 = vst.msk [vmem:[%s1934_s20 + $0x28] sm:$0xff] %vm1062_vm3, %v1263_v48  ;;  %1065 = vst.msk [vmem:[%s1934_s20 + $0x10] sm:$0xff] %vm1062_vm3, %v1254_v53 }
 0x20a   : > { %v1265_v5 = vpop.f32.mrf.mxu1 }
 0x20b   : > { %v1266_v13 = vadd.f32 %v1265_v5, %v1264_v8 }
 0x20c   : > { %v1267_v23 = vpop.f32.mrf.mxu1 }
 0x20d   : > { %1069 = vst.msk [vmem:[%s1934_s20 + $0x30] sm:$0xff] %vm1062_vm3, %v1266_v13 }
 0x20e   : > { %v1268_v51 = vpop.f32.mrf.mxu1 }
 0x20f   : > { %v1269_v1 = vadd.f32 %v1268_v51, %v1267_v23 }
 0x210   : > { %v1270_v2 = vpop.f32.mrf.mxu1 }
 0x211   : > { %1070 = vst.msk [vmem:[%s1934_s20 + $0x38] sm:$0xff] %vm1062_vm3, %v1269_v1 }
 0x212   : > { %v1271_v18 = vpop.f32.mrf.mxu1 }
 0x213   : > { %v1272_v40 = vadd.f32 %v1271_v18, %v1270_v2 }
 0x214   : > { %v1273_v46 = vpop.f32.mrf.mxu1 }
 0x215   : > { %1071 = vst.msk [vmem:[%s1934_s20 + $0x40] sm:$0xff] %vm1062_vm3, %v1272_v40 }
 0x216   : > { %v1274_v54 = vpop.f32.mrf.mxu1 }
 0x217   : > { %v1275_v30 = vadd.f32 %v1274_v54, %v1273_v46 }
 0x218   : > { %v1276_v35 = vpop.f32.mrf.mxu1 }
 0x219   : > { %1072 = vst.msk [vmem:[%s1934_s20 + $0x48] sm:$0xff] %vm1062_vm3, %v1275_v30 }
 0x21a   : > { %v1277_v63 = vpop.f32.mrf.mxu1 }
 0x21b   : > { %v1278_v22 = vadd.f32 %v1277_v63, %v1276_v35 }
 0x21c   : > { %v1279_v37 = vpop.f32.mrf.mxu1 }
 0x21d   : > { %1073 = vst.msk [vmem:[%s1934_s20 + $0x50] sm:$0xff] %vm1062_vm3, %v1278_v22 }
 0x21e   : > { %v1280_v33 = vpop.f32.mrf.mxu1 }
 0x21f   : > { %v1281_v29 = vadd.f32 %v1280_v33, %v1279_v37 }
 0x220   : > { %v1282_v61 = vpop.f32.mrf.mxu1 }
 0x221   : > { %1074 = vst.msk [vmem:[%s1934_s20 + $0x58] sm:$0xff] %vm1062_vm3, %v1281_v29 }
 0x222   : > { %v1283_v9 = vpop.f32.mrf.mxu1 }
 0x223   : > { %v1284_v38 = vadd.f32 %v1283_v9, %v1282_v61 }
 0x224   : > { %v1285_v56 = vpop.f32.mrf.mxu1 }
 0x225   : > { %1075 = vst.msk [vmem:[%s1934_s20 + $0x60] sm:$0xff] %vm1062_vm3, %v1284_v38 }
 0x226   : > { %v1286_v11 = vpop.f32.mrf.mxu1 }
 0x227   : > { %v1287_v4 = vadd.f32 %v1286_v11, %v1285_v56 }
 0x228   : > { %v1288_v24 = vpop.f32.mrf.mxu1 }
 0x229   : > { %1076 = vst.msk [vmem:[%s1934_s20 + $0x68] sm:$0xff] %vm1062_vm3, %v1287_v4 }
 0x22a   : > { %v1289_v31 = vpop.f32.mrf.mxu1 }
 0x22b   : > { %v1290_v55 = vadd.f32 %v1289_v31, %v1288_v24 }
 0x22c   : > { %v1291_v25 = vpop.f32.mrf.mxu1 }
 0x22d   : > { %1077 = vst.msk [vmem:[%s1934_s20 + $0x70] sm:$0xff] %vm1062_vm3, %v1290_v55 }
 0x22e   : > { %v1292_v50 = vpop.f32.mrf.mxu1 }
 0x22f   : > { %v1293_v0 = vadd.f32 %v1292_v50, %v1291_v25 }
 0x231   : > { %1078 = vst.msk [vmem:[%s1934_s20 + $0x78] sm:$0xff] %vm1062_vm3, %v1293_v0 }
 0x232 PF: > { %s14_s15 = sadd.s32 1, %s1390_s15  }
 0x233   : > { %p11_p4 = scmp.ge.s32.totalorder %s14_s15, 4  }
 0x235   :  { %13 = sbr.rel (!%p11_p4) target bundleno = 1 (0x1), region = 66 }

// kernel: densenet_forward.9
= control target key start
LH: loop header
LB: loop body
LE: loop exit
PB: predicated region body
PF: predicated region fallthrough
CT: control target
= control target key end

     0   :  { %s2741_s24 = smov 0   ;;  %s3438_s0 = inlined_call_operand.vmem [shape: f32[2,128,16], index: 0, kind: input, shape index: {}]   ;;  %s3439_s1 = inlined_call_operand.vmem [shape: f32[1,16], index: 1, kind: input, shape index: {}]   ;;  %s3440_s2 = inlined_call_operand.vmem [shape: f32[1,16], index: 2, kind: input, shape index: {}]   ;;  %s3441_s3 = inlined_call_operand.vmem [shape: bf16[16,16], index: 3, kind: input, shape index: {}]   ;;  %s3442_s4 = inlined_call_operand.vmem [shape: f32[1,16], index: 4, kind: input, shape index: {}]   ;;  %s3443_s5 = inlined_call_operand.vmem [shape: f32[1,16], index: 5, kind: input, shape index: {}]   ;;  %s3444_s6 = inlined_call_operand.vmem [shape: bf16[16,24], index: 6, kind: input, shape index: {}]   ;;  %s3445_s7 = inlined_call_operand.vmem [shape: f32[1,24], index: 7, kind: input, shape index: {}]   ;;  %s3446_s8 = inlined_call_operand.vmem [shape: f32[1,24], index: 8, kind: input, shape index: {}]   ;;  %s3447_s9 = inlined_call_operand.vmem [shape: bf16[24,16], index: 9, kind: input, shape index: {}]   ;;  %s3448_s10 = inlined_call_operand.vmem [shape: f32[1,16], index: 10, kind: input, shape index: {}]   ;;  %s3449_s11 = inlined_call_operand.vmem [shape: f32[1,16], index: 11, kind: input, shape index: {}]   ;;  %s3450_s12 = inlined_call_operand.vmem [shape: bf16[16,24], index: 12, kind: input, shape index: {}]   ;;  %s3451_s13 = inlined_call_operand.vmem [shape: f32[1,32], index: 13, kind: input, shape index: {}]   ;;  %s3452_s14 = inlined_call_operand.vmem [shape: f32[1,32], index: 14, kind: input, shape index: {}]   ;;  %s3453_s15 = inlined_call_operand.vmem [shape: bf16[64,128], index: 15, kind: input, shape index: {}]   ;;  %s3454_s16 = inlined_call_operand.vmem [shape: bf16[32,16], index: 16, kind: input, shape index: {}]   ;;  %s3455_s17 = inlined_call_operand.vmem [shape: f32[2,64,16], index: 17, kind: output, shape index: {}]  }
   0x1   :  { %3456 = sst [smem:[#allocation3_spill]] %s3438_s0 }
   0x2   :  { %3457 = sst [smem:[#allocation4_spill]] %s3439_s1 }
   0x3 LB: > { %s2380_s25 = sadd.s32 4294967295, %s2645_s24   ;;  %p2384_p0 = scmp.ge.s32.totalorder %s2645_s24, 1  ;;  %s2645_s24 = sphi %s2741_s24, %s27_s24  }
   0x4   : > { %p487_p1 = scmp.lt.s32.totalorder %s2645_s24, 3 }
   0x6   : > { %p488_p2 = pnand %p2384_p0, %p487_p1 }
   0x7   : > { %p539_p3 = scmp.lt.s32.totalorder (!%p488_p2), %s2380_s25, 1  ;;  %s3458_s30 = sld [smem:[#allocation3_spill]] (!%p488_p2) }
   0x8   : > { %491 = sbr.rel (%p488_p2) target bundleno = 1860 (0x744), region = 88  ;;  %s3459_s20 = sld [smem:[#allocation4_spill]] (!%p488_p2) }
   0x9   : > { %s2649_s19 = smov (!%p488_p2), 16  }
   0xd   : > { %v2628_v0 = vld [vmem:[%s3441_s3] sm:$0xff]   ;;  %s3461_s25 = smov (!%p539_p3, %s2380_s25), 1  ;;  %vm566_vm0 = vcmask 130048   ;;  %vm1062_vm1 = vcmask 1046528   ;;  %vm1013_vm2 = vcmask 1040384   ;;  %vm1429_vm3 = vcmask 1043456  }
   0xe   : > { %2505 = vmatprep.subr.bf16.mxu0 %v2628_v0  ;;  %s2448_s28 = sshll.u32 %s3461_s25, 7  ;;  %v2784_v13 = vld [vmem:[%s3459_s20] ss:$0 sm:$0xff]  ;;  %vm1289_vm4 = vcmask 195712   ;;  %vm1404_vm5 = vcmask 195584   ;;  %vm2019_vm6 = vcmask 261312  }
   0xf   : > { %2506 = vmatpush3.bf16.msra.mxu0 %v2628_v0  ;;  %s2758_s18 = scalar_lea.vmem %s3458_s30, %s2448_s28  ;;  %v2799_v18 = vld [vmem:[%s3440_s2] ss:$0 sm:$0xff]  ;;  %s2647_s30 = smov 120   ;;  %vm2239_vm7 = vcmask 261120  }
  0x10   : > { %v550_v1 = vld [vmem:[%s2758_s18] sm:$0xff]  ;;  %v551_v2 = vld [vmem:[%s2758_s18 + $0x8] sm:$0xff]  ;;  %v552_v3 = vld [vmem:[%s2758_s18 + $0x10] sm:$0xff]  ;;  %s2449_s26 = sshll.u32 %s3461_s25, 6 }
  0x11   : > { %567 = vst.msk [vmem:[#allocation2] sm:$0xff] %vm566_vm0, %v550_v1  ;;  %568 = vst.msk [vmem:[#allocation2 + $0x8] sm:$0xff] %vm566_vm0, %v551_v2  ;;  %v553_v4 = vld [vmem:[%s2758_s18 + $0x18] sm:$0xff]  ;;  %v554_v5 = vld [vmem:[%s2758_s18 + $0x20] sm:$0xff]  ;;  %s548_s29 = scalar_lea.vmem %s3455_s17, %s2449_s26 }
  0x12   : > { %569 = vst.msk [vmem:[#allocation2 + $0x10] sm:$0xff] %vm566_vm0, %v552_v3  ;;  %v555_v6 = vld [vmem:[%s2758_s18 + $0x28] sm:$0xff]  ;;  %570 = vst.msk [vmem:[#allocation2 + $0x18] sm:$0xff] %vm566_vm0, %v553_v4  ;;  %v556_v7 = vld [vmem:[%s2758_s18 + $0x30] sm:$0xff] }
  0x13   : > { %571 = vst.msk [vmem:[#allocation2 + $0x20] sm:$0xff] %vm566_vm0, %v554_v5  ;;  %572 = vst.msk [vmem:[#allocation2 + $0x28] sm:$0xff] %vm566_vm0, %v555_v6  ;;  %v557_v8 = vld [vmem:[%s2758_s18 + $0x38] sm:$0xff]  ;;  %v558_v9 = vld [vmem:[%s2758_s18 + $0x40] sm:$0xff] }
  0x14   : > { %573 = vst.msk [vmem:[#allocation2 + $0x30] sm:$0xff] %vm566_vm0, %v556_v7  ;;  %574 = vst.msk [vmem:[#allocation2 + $0x38] sm:$0xff] %vm566_vm0, %v557_v8  ;;  %v559_v10 = vld [vmem:[%s2758_s18 + $0x48] sm:$0xff]  ;;  %v560_v11 = vld [vmem:[%s2758_s18 + $0x50] sm:$0xff] }
  0x15   : > { %575 = vst.msk [vmem:[#allocation2 + $0x40] sm:$0xff] %vm566_vm0, %v558_v9  ;;  %v561_v12 = vld [vmem:[%s2758_s18 + $0x58] sm:$0xff]  ;;  %576 = vst.msk [vmem:[#allocation2 + $0x48] sm:$0xff] %vm566_vm0, %v559_v10  ;;  %v562_v14 = vld [vmem:[%s2758_s18 + $0x60] sm:$0xff] }
  0x16   : > { %577 = vst.msk [vmem:[#allocation2 + $0x50] sm:$0xff] %vm566_vm0, %v560_v11  ;;  %578 = vst.msk [vmem:[#allocation2 + $0x58] sm:$0xff] %vm566_vm0, %v561_v12  ;;  %v563_v15 = vld [vmem:[%s2758_s18 + $0x68] sm:$0xff]  ;;  %v564_v16 = vld [vmem:[%s2758_s18 + $0x70] sm:$0xff] }
  0x17   : > { %579 = vst.msk [vmem:[#allocation2 + $0x60] sm:$0xff] %vm566_vm0, %v562_v14  ;;  %580 = vst.msk [vmem:[#allocation2 + $0x68] sm:$0xff] %vm566_vm0, %v563_v15  ;;  %v565_v17 = vld [vmem:[%s2758_s18 + $0x78] sm:$0xff]  ;;  %s2648_s18 = smov 112  }
  0x18   : > { %581 = vst.msk [vmem:[#allocation2 + $0x70] sm:$0xff] %vm566_vm0, %v564_v16  ;;  %582 = vst.msk [vmem:[#allocation2 + $0x78] sm:$0xff] %vm566_vm0, %v565_v17  ;;  %v583_v19 = vld [vmem:[#allocation2] sm:$0xff]  ;;  %v584_v20 = vld [vmem:[#allocation2 + $0x8] sm:$0xff] }
  0x19   : > { %v585_v21 = vld [vmem:[#allocation2 + $0x10] sm:$0xff]  ;;  %v606_v22 = vmul.f32 %v2784_v13, %v583_v19  ;;  %v607_v23 = vmul.f32 %v2784_v13, %v584_v20  ;;  %v586_v24 = vld [vmem:[#allocation2 + $0x18] sm:$0xff] }
  0x1a   : > { %v608_v25 = vmul.f32 %v2784_v13, %v585_v21  ;;  %v587_v26 = vld [vmem:[#allocation2 + $0x20] sm:$0xff]  ;;  %v588_v27 = vld [vmem:[#allocation2 + $0x28] sm:$0xff]  ;;  %v609_v28 = vmul.f32 %v2784_v13, %v586_v24 }
  0x1b   : > { %v610_v29 = vmul.f32 %v2784_v13, %v587_v26  ;;  %v611_v30 = vmul.f32 %v2784_v13, %v588_v27  ;;  %v589_v31 = vld [vmem:[#allocation2 + $0x30] sm:$0xff]  ;;  %v590_v32 = vld [vmem:[#allocation2 + $0x38] sm:$0xff]  ;;  %v629_v33 = vadd.f32 %v2799_v18, %v606_v22  ;;  %v630_v34 = vadd.f32 %v2799_v18, %v607_v23 }
  0x1c   : > { %v631_v35 = vadd.f32 %v2799_v18, %v608_v25  ;;  %v612_v36 = vmul.f32 %v2784_v13, %v589_v31  ;;  %v632_v37 = vadd.f32 %v2799_v18, %v609_v28  ;;  %v613_v40 = vmul.f32 %v2784_v13, %v590_v32  ;;  %v591_v41 = vld [vmem:[#allocation2 + $0x40] sm:$0xff]  ;;  %v592_v42 = vld [vmem:[#allocation2 + $0x48] sm:$0xff] }
  0x1d   : > { %v633_v38 = vadd.f32 %v2799_v18, %v610_v29  ;;  %v634_v39 = vadd.f32 %v2799_v18, %v611_v30  ;;  %v645_v43 = vmax.f32 %v629_v33, 0.0  ;;  %v646_v44 = vmax.f32 %v630_v34, 0.0  ;;  %v593_v54 = vld [vmem:[#allocation2 + $0x50] sm:$0xff]  ;;  %v594_v55 = vld [vmem:[#allocation2 + $0x58] sm:$0xff]  ;;  %v2855_v34 = vld [vmem:[%s3443_s5] ss:$0 sm:$0xff] }
  0x1e   : > { %v647_v45 = vmax.f32 %v631_v35, 0.0  ;;  %v635_v46 = vadd.f32 %v2799_v18, %v612_v36  ;;  %v648_v47 = vmax.f32 %v632_v37, 0.0  ;;  %v636_v50 = vadd.f32 %v2799_v18, %v613_v40  ;;  %v595_v58 = vld [vmem:[#allocation2 + $0x60] sm:$0xff]  ;;  %v596_v59 = vld [vmem:[#allocation2 + $0x68] sm:$0xff] }
  0x1f   : > { %v649_v48 = vmax.f32 %v633_v38, 0.0  ;;  %v650_v49 = vmax.f32 %v634_v39, 0.0  ;;  %v661_v51 = vpack.c.bf16 %v646_v44, %v645_v43  ;;  %v614_v52 = vmul.f32 %v2784_v13, %v591_v41  ;;  %v597_v12 = vld [vmem:[#allocation2 + $0x70] sm:$0xff]  ;;  %v598_v14 = vld [vmem:[#allocation2 + $0x78] sm:$0xff] }
  0x20   : > { %v615_v53 = vmul.f32 %v2784_v13, %v592_v42  ;;  %v662_v56 = vpack.c.bf16 %v648_v47, %v647_v45  ;;  %v651_v62 = vmax.f32 %v635_v46, 0.0  ;;  %v652_v63 = vmax.f32 %v636_v50, 0.0 }
  0x21   : > { %v663_v57 = vpack.c.bf16 %v650_v49, %v649_v48  ;;  %2507 = vmatprep.mubr.msk.bf16.mxu0 %vm566_vm0, %v661_v51  ;;  %v637_v60 = vadd.f32 %v2799_v18, %v614_v52  ;;  %v616_v0 = vmul.f32 %v2784_v13, %v593_v54  ;;  %v617_v1 = vmul.f32 %v2784_v13, %v594_v55 }
  0x22   : > { %v638_v61 = vadd.f32 %v2799_v18, %v615_v53  ;;  %2508 = vmatmul.mubr.msk.bf16.vlgmr.msra.gmra.mxu0 %vm566_vm0, %v662_v56  ;;  %v618_v4 = vmul.f32 %v2784_v13, %v595_v58  ;;  %v619_v5 = vmul.f32 %v2784_v13, %v596_v59  ;;  %v664_v6 = vpack.c.bf16 %v652_v63, %v651_v62 }
  0x23   : > { %2511 = vmatprep.mubr.msk.bf16.mxu0 %vm566_vm0, %v663_v57  ;;  %v653_v2 = vmax.f32 %v637_v60, 0.0  ;;  %v639_v7 = vadd.f32 %v2799_v18, %v616_v0  ;;  %v640_v8 = vadd.f32 %v2799_v18, %v617_v1  ;;  %v620_v17 = vmul.f32 %v2784_v13, %v597_v12 }
  0x24   : > { %v654_v3 = vmax.f32 %v638_v61, 0.0  ;;  %v641_v10 = vadd.f32 %v2799_v18, %v618_v4  ;;  %v642_v11 = vadd.f32 %v2799_v18, %v619_v5  ;;  %v621_v19 = vmul.f32 %v2784_v13, %v598_v14  ;;  %v2629_v13 = vld [vmem:[%s3444_s6] sm:$0xff]  }
  0x25   : > { %v655_v15 = vmax.f32 %v639_v7, 0.0  ;;  %v656_v16 = vmax.f32 %v640_v8, 0.0  ;;  %v643_v23 = vadd.f32 %v2799_v18, %v620_v17  ;;  %2523 = vmatprep.subr.bf16.mxu1 %v2629_v13 }
  0x26   : > { %v665_v9 = vpack.c.bf16 %v654_v3, %v653_v2  ;;  %v657_v20 = vmax.f32 %v641_v10, 0.0  ;;  %v658_v21 = vmax.f32 %v642_v11, 0.0  ;;  %v644_v24 = vadd.f32 %v2799_v18, %v621_v19  ;;  %2524 = vmatpush3.bf16.msra.mxu1 %v2629_v13  ;;  %v2848_v18 = vld [vmem:[%s3442_s4] ss:$0 sm:$0xff] }
  0x27   : > { %v666_v22 = vpack.c.bf16 %v656_v16, %v655_v15  ;;  %v659_v26 = vmax.f32 %v643_v23, 0.0 }
  0x28   : > { %v667_v25 = vpack.c.bf16 %v658_v21, %v657_v20  ;;  %v660_v27 = vmax.f32 %v644_v24, 0.0 }
  0x2a   : > { %2512 = vmatmul.mubr.msk.bf16.gmra.mxu0 %vm566_vm0, %v664_v6  ;;  %v668_v28 = vpack.c.bf16 %v660_v27, %v659_v26 }
  0x2b   : > { %2515 = vmatprep.mubr.msk.bf16.mxu0 %vm566_vm0, %v665_v9 }
  0x32   : > { %2516 = vmatmul.mubr.msk.bf16.gmra.mxu0 %vm566_vm0, %v666_v22 }
  0x33   : > { %2519 = vmatprep.mubr.msk.bf16.mxu0 %vm566_vm0, %v667_v25 }
  0x3a   : > { %2520 = vmatmul.mubr.msk.bf16.gmra.mxu0 %vm566_vm0, %v668_v28 }
  0xe2   : > { %v2509_v29 = vpop.f32.mrf.mxu0 }
  0xe3   : > { %v807_v32 = vmul.f32 %v2509_v29, %v2848_v18 }
  0xe4   : > { %v735_v30 = vpop.f32.mrf.mxu0 }
  0xe5   : > { %v805_v31 = vmul.f32 %v2848_v18, %v735_v30  ;;  %v830_v40 = vadd.f32 %v2855_v34, %v807_v32 }
  0xe6   : > { %v2510_v33 = vpop.f32.mrf.mxu0 }
  0xe7   : > { %v808_v35 = vmul.f32 %v2510_v33, %v2848_v18  ;;  %v828_v37 = vadd.f32 %v2855_v34, %v805_v31  ;;  %v846_v49 = vmax.f32 %v830_v40, 0.0 }
  0xe8   : > { %v738_v36 = vpop.f32.mrf.mxu0 }
  0xe9   : > { %v831_v38 = vadd.f32 %v2855_v34, %v808_v35  ;;  %v806_v39 = vmul.f32 %v2848_v18, %v738_v36  ;;  %v844_v46 = vmax.f32 %v828_v37, 0.0 }
  0xea   : > { %v2513_v41 = vpop.f32.mrf.mxu0 }
  0xeb   : > { %v829_v42 = vadd.f32 %v2855_v34, %v806_v39  ;;  %v811_v43 = vmul.f32 %v2513_v41, %v2848_v18  ;;  %v847_v44 = vmax.f32 %v831_v38, 0.0 }
  0xec   : > { %v751_v45 = vpop.f32.mrf.mxu0 }
  0xed   : > { %v845_v47 = vmax.f32 %v829_v42, 0.0  ;;  %v809_v48 = vmul.f32 %v2848_v18, %v751_v45  ;;  %v834_v50 = vadd.f32 %v2855_v34, %v811_v43  ;;  %v861_v55 = vpack.c.bf16 %v847_v44, %v846_v49 }
  0xee   : > { %v2514_v51 = vpop.f32.mrf.mxu0 }
  0xef   : > { %v832_v52 = vadd.f32 %v2855_v34, %v809_v48  ;;  %v812_v53 = vmul.f32 %v2514_v51, %v2848_v18  ;;  %v860_v54 = vpack.c.bf16 %v845_v47, %v844_v46  ;;  %v850_v59 = vmax.f32 %v834_v50, 0.0 }
  0xf0   : > { %v754_v56 = vpop.f32.mrf.mxu0 }
  0xf1   : > { %v835_v57 = vadd.f32 %v2855_v34, %v812_v53  ;;  %v810_v58 = vmul.f32 %v2848_v18, %v754_v56  ;;  %2525 = vmatprep.mubr.msk.bf16.mxu1 %vm566_vm0, %v860_v54  ;;  %v848_v61 = vmax.f32 %v832_v52, 0.0 }
  0xf2   : > { %v2517_v60 = vpop.f32.mrf.mxu0  ;;  %2526 = vmatmul.mubr.msk.bf16.vlgmr.msra.gmra.mxu1 %vm566_vm0, %v861_v55 }
  0xf3   : > { %v851_v62 = vmax.f32 %v835_v57, 0.0  ;;  %v833_v63 = vadd.f32 %v2855_v34, %v810_v58  ;;  %v815_v0 = vmul.f32 %v2517_v60, %v2848_v18 }
  0xf4   : > { %v767_v1 = vpop.f32.mrf.mxu0 }
  0xf5   : > { %v849_v2 = vmax.f32 %v833_v63, 0.0  ;;  %v813_v3 = vmul.f32 %v2848_v18, %v767_v1  ;;  %v863_v4 = vpack.c.bf16 %v851_v62, %v850_v59  ;;  %v838_v5 = vadd.f32 %v2855_v34, %v815_v0 }
  0xf6   : > { %v2518_v6 = vpop.f32.mrf.mxu0 }
  0xf7   : > { %v862_v7 = vpack.c.bf16 %v849_v2, %v848_v61  ;;  %v836_v8 = vadd.f32 %v2855_v34, %v813_v3  ;;  %v816_v9 = vmul.f32 %v2518_v6, %v2848_v18  ;;  %v854_v14 = vmax.f32 %v838_v5, 0.0 }
  0xf8   : > { %v770_v10 = vpop.f32.mrf.mxu0 }
  0xf9   : > { %v839_v11 = vadd.f32 %v2855_v34, %v816_v9  ;;  %v814_v12 = vmul.f32 %v2848_v18, %v770_v10  ;;  %2529 = vmatprep.mubr.msk.bf16.mxu1 %vm566_vm0, %v862_v7  ;;  %v852_v16 = vmax.f32 %v836_v8, 0.0 }
  0xfa   : > { %v2521_v15 = vpop.f32.mrf.mxu0  ;;  %2530 = vmatmul.mubr.msk.bf16.gmra.mxu1 %vm566_vm0, %v863_v4 }
  0xfb   : > { %v855_v17 = vmax.f32 %v839_v11, 0.0  ;;  %v837_v19 = vadd.f32 %v2855_v34, %v814_v12  ;;  %v819_v20 = vmul.f32 %v2521_v15, %v2848_v18 }
  0xfc   : > { %v783_v21 = vpop.f32.mrf.mxu0 }
  0xfd   : > { %v853_v22 = vmax.f32 %v837_v19, 0.0  ;;  %v817_v23 = vmul.f32 %v2848_v18, %v783_v21  ;;  %v865_v24 = vpack.c.bf16 %v855_v17, %v854_v14  ;;  %v842_v25 = vadd.f32 %v2855_v34, %v819_v20 }
  0xfe   : > { %v2522_v26 = vpop.f32.mrf.mxu0 }
  0xff   : > { %v864_v27 = vpack.c.bf16 %v853_v22, %v852_v16  ;;  %v840_v28 = vadd.f32 %v2855_v34, %v817_v23  ;;  %v820_v13 = vmul.f32 %v2522_v26, %v2848_v18  ;;  %v858_v32 = vmax.f32 %v842_v25, 0.0 }
 0x100   : > { %v786_v29 = vpop.f32.mrf.mxu0 }
 0x101   : > { %v843_v30 = vadd.f32 %v2855_v34, %v820_v13  ;;  %v818_v31 = vmul.f32 %v2848_v18, %v786_v29  ;;  %2533 = vmatprep.mubr.msk.bf16.mxu1 %vm566_vm0, %v864_v27  ;;  %v856_v33 = vmax.f32 %v840_v28, 0.0 }
 0x102   : > { %2534 = vmatmul.mubr.msk.bf16.gmra.mxu1 %vm566_vm0, %v865_v24 }
 0x103   : > { %v859_v35 = vmax.f32 %v843_v30, 0.0  ;;  %v841_v36 = vadd.f32 %v2855_v34, %v818_v31 }
 0x105   : > { %v857_v37 = vmax.f32 %v841_v36, 0.0  ;;  %v867_v38 = vpack.c.bf16 %v859_v35, %v858_v32 }
 0x107   : > { %v866_v39 = vpack.c.bf16 %v857_v37, %v856_v33 }
 0x109   : > { %2537 = vmatprep.mubr.msk.bf16.mxu1 %vm566_vm0, %v866_v39 }
 0x10a   : > { %2538 = vmatmul.mubr.msk.bf16.gmra.mxu1 %vm566_vm0, %v867_v38 }
 0x1b2   : > { %v2527_v40 = vpop.f32.mrf.mxu1 }
 0x1b3   : > { %1100 = vrot.lane.b32.xlu1 %v2527_v40, %s2647_s30  ;;  %v1017_v42 = vrot.slane %v2527_v40, 7  ;;  %v1066_v45 = vrot.slane %v2527_v40, 1 }
 0x1b4   : > { %v2896_v18 = vpop.f32.mrf.mxu1 }
 0x1b5   : > { %1096 = vrot.lane.b32.xlu0 %v2896_v18, %s2647_s30  ;;  %v1014_v50 = vrot.slane %v2896_v18, 7  ;;  %v1063_v1 = vrot.slane %v2896_v18, 1  ;;  %v2631_v18 = vld [vmem:[%s3447_s9] sm:$0xff]  }
 0x1b6   : > { %v2528_v41 = vpop.f32.mrf.mxu1 }
 0x1b7   : > { %v1019_v43 = vrot.slane %v2528_v41, 7  ;;  %1102 = vrot.lane.b32.xlu1 %v2528_v41, %s2647_s30  ;;  %v1068_v34 = vrot.slane %v2528_v41, 1 }
 0x1b8   : > { %v937_v44 = vpop.f32.mrf.mxu1 }
 0x1b9   : > { %v1015_v46 = vrot.slane %v937_v44, 7  ;;  %v1064_v47 = vrot.slane %v937_v44, 1  ;;  %1098 = vrot.lane.b32.xlu0 %v937_v44, %s2647_s30  ;;  %v2903_v48 = vsel %vm1013_vm2, %v1017_v42, %v1019_v43  ;;  %v1069_v53 = vsel %vm1062_vm1, %v1066_v45, %v1068_v34 }
 0x1ba   : > { %v2531_v49 = vpop.f32.mrf.mxu1 }
 0x1bb   : > { %v1067_v51 = vsel %vm1062_vm1, %v1064_v47, %v1066_v45  ;;  %v2910_v54 = vsel %vm1013_vm2, %v1015_v46, %v1017_v42  ;;  %v2915_v55 = vsel %vm1013_vm2, %v1014_v50, %v1015_v46  ;;  %v1025_v58 = vrot.slane %v2531_v49, 7 }
 0x1bc   : > { %1163 = vrot.lane.b32.xlu1 %v1067_v51, %s2648_s18  ;;  %v950_v52 = vpop.f32.mrf.mxu1  ;;  %v1065_v5 = vsel %vm1062_vm1, %v1063_v1, %v1064_v47  ;;  %v1074_v17 = vrot.slane %v2531_v49, 1  ;;  %v2630_v1 = vld [vmem:[%s3447_s9 + $0x8] ss:$0 sps:$4 sm:$0xff]  }
 0x1bd   : > { %v1021_v56 = vrot.slane %v950_v52, 7  ;;  %1165 = vrot.lane.b32.xlu0 %v1069_v53, %s2648_s18  ;;  %v1070_v59 = vrot.slane %v950_v52, 1  ;;  %2615 = vmatprep.subr.msk.bf16.mxu0 %vm1429_vm3, %v2630_v1 }
 0x1be   : > { %v2532_v57 = vpop.f32.mrf.mxu1 }
 0x1bf   : > { %v1027_v60 = vrot.slane %v2532_v57, 7  ;;  %v2919_v61 = vsel %vm1013_vm2, %v1019_v43, %v1021_v56  ;;  %v1071_v3 = vsel %vm1062_vm1, %v1068_v34, %v1070_v59  ;;  %v1076_v15 = vrot.slane %v2532_v57, 1 }
 0x1c0   : > { %1110 = vrot.lane.b32.xlu1 %v2532_v57, %s2647_s30  ;;  %v953_v62 = vpop.f32.mrf.mxu1 }
 0x1c1   : > { %v1023_v63 = vrot.slane %v953_v62, 7  ;;  %1108 = vrot.lane.b32.xlu0 %v2531_v49, %s2647_s30  ;;  %v2924_v0 = vsel %vm1013_vm2, %v1025_v58, %v1027_v60  ;;  %v1072_v11 = vrot.slane %v953_v62, 1  ;;  %v1077_v24 = vsel %vm1062_vm1, %v1074_v17, %v1076_v15 }
 0x1c2   : > { %v2535_v2 = vpop.f32.mrf.mxu1 }
 0x1c3   : > { %v2931_v6 = vsel %vm1013_vm2, %v1023_v63, %v1025_v58  ;;  %v2934_v7 = vsel %vm1013_vm2, %v1021_v56, %v1023_v63  ;;  %v1033_v8 = vrot.slane %v2535_v2, 7  ;;  %v1075_v22 = vsel %vm1062_vm1, %v1072_v11, %v1074_v17 }
 0x1c4   : > { %1167 = vrot.lane.b32.xlu1 %v1071_v3, %s2648_s18  ;;  %v966_v4 = vpop.f32.mrf.mxu1  ;;  %v1073_v35 = vsel %vm1062_vm1, %v1070_v59, %v1072_v11  ;;  %v1082_v36 = vrot.slane %v2535_v2, 1 }
 0x1c5   : > { %v1029_v9 = vrot.slane %v966_v4, 7  ;;  %1161 = vrot.lane.b32.xlu0 %v1065_v5, %s2648_s18  ;;  %v1078_v29 = vrot.slane %v966_v4, 1 }
 0x1c6   : > { %v2536_v10 = vpop.f32.mrf.mxu1 }
 0x1c7   : > { %v1035_v12 = vrot.slane %v2536_v10, 7  ;;  %v2938_v14 = vsel %vm1013_vm2, %v1027_v60, %v1029_v9  ;;  %v1079_v33 = vsel %vm1062_vm1, %v1076_v15, %v1078_v29  ;;  %v1084_v38 = vrot.slane %v2536_v10, 1 }
 0x1c8   : > { %1106 = vrot.lane.b32.xlu1 %v953_v62, %s2647_s30  ;;  %v969_v16 = vpop.f32.mrf.mxu1 }
 0x1c9   : > { %v1031_v19 = vrot.slane %v969_v16, 7  ;;  %1104 = vrot.lane.b32.xlu0 %v950_v52, %s2647_s30  ;;  %v2943_v20 = vsel %vm1013_vm2, %v1033_v8, %v1035_v12  ;;  %v1080_v37 = vrot.slane %v969_v16, 1  ;;  %v1085_v40 = vsel %vm1062_vm1, %v1082_v36, %v1084_v38 }
 0x1ca   : > { %v2945_v21 = vpop.f32.mrf.mxu1 }
 0x1cb   : > { %v2953_v25 = vsel %vm1013_vm2, %v1031_v19, %v1033_v8  ;;  %v2956_v26 = vsel %vm1013_vm2, %v1029_v9, %v1031_v19  ;;  %v1041_v28 = vrot.slane %v2945_v21, 7  ;;  %v1083_v39 = vsel %vm1062_vm1, %v1080_v37, %v1082_v36 }
 0x1cc   : > { %1171 = vrot.lane.b32.xlu1 %v1075_v22, %s2648_s18  ;;  %v2949_v23 = vpop.f32.mrf.mxu1  ;;  %v1081_v34 = vsel %vm1062_vm1, %v1078_v29, %v1080_v37  ;;  %v1090_v44 = vrot.slane %v2945_v21, 1 }
 0x1cd   : > { %v1037_v27 = vrot.slane %v2949_v23, 7  ;;  %1173 = vrot.lane.b32.xlu0 %v1077_v24, %s2648_s18  ;;  %v1086_v41 = vrot.slane %v2949_v23, 1 }
 0x1ce   : > { %v2540_v13 = vpop.f32.mrf.mxu1 }
 0x1cf   : > { %v1043_v30 = vrot.slane %v2540_v13, 7  ;;  %v2964_v31 = vsel %vm1013_vm2, %v1035_v12, %v1037_v27  ;;  %v1087_v42 = vsel %vm1062_vm1, %v1084_v38, %v1086_v41  ;;  %v1092_v46 = vrot.slane %v2540_v13, 1 }
 0x1d0   : > { %1118 = vrot.lane.b32.xlu1 %v2536_v10, %s2647_s30  ;;  %v2988_v43 = vpop.f32.mrf.mxu1 }
 0x1d1   : > { %1116 = vrot.lane.b32.xlu0 %v2535_v2, %s2647_s30  ;;  %v2971_v32 = vsel %vm1013_vm2, %v1041_v28, %v1043_v30  ;;  %v1088_v45 = vrot.slane %v2988_v43, 1  ;;  %v1095_v51 = vsel %vm1062_vm1, %v1092_v46, 0.0  ;;  %v1093_v52 = vsel %vm1062_vm1, %v1090_v44, %v1092_v46 }
 0x1d3   : > { %v1091_v47 = vsel %vm1062_vm1, %v1088_v45, %v1090_v44  ;;  %v1089_v49 = vsel %vm1062_vm1, %v1086_v41, %v1088_v45 }
 0x1d4   : > { %1175 = vrot.lane.b32.xlu1 %v1079_v33, %s2648_s18 }
 0x1d5   : > { %1169 = vrot.lane.b32.xlu0 %v1073_v35, %s2648_s18 }
 0x1d8   : > { %1114 = vrot.lane.b32.xlu1 %v969_v16, %s2647_s30 }
 0x1d9   : > { %1112 = vrot.lane.b32.xlu0 %v966_v4, %s2647_s30  ;;  %v1431_v4 = vsel %vm1429_vm3, %v2630_v1, 0 }
 0x1da   : > { %2542 = vmatpush3.bf16.msra.mxu0 %v1431_v4  ;;  %v3058_v4 = vld [vmem:[%s3445_s7] ss:$0 sm:$0xff] }
 0x1db   : > { %2543 = vmatprep.subr.bf16.mxu0 %v2631_v18 }
 0x1dc   : > { %1179 = vrot.lane.b32.xlu1 %v1083_v39, %s2648_s18 }
 0x1dd   : > { %1181 = vrot.lane.b32.xlu0 %v1085_v40, %s2648_s18 }
 0x1de   : > { %2544 = vmatpush3.bf16.msra.mxu0 %v2631_v18 }
 0x1e0   : > { %1126 = vrot.lane.b32.xlu1 %v2540_v13, %s2647_s30 }
 0x1e1   : > { %1124 = vrot.lane.b32.xlu0 %v2945_v21, %s2647_s30 }
 0x1e4   : > { %1183 = vrot.lane.b32.xlu1 %v1087_v42, %s2648_s18 }
 0x1e5   : > { %1177 = vrot.lane.b32.xlu0 %v1081_v34, %s2648_s18 }
 0x1e8   : > { %1122 = vrot.lane.b32.xlu1 %v2988_v43, %s2647_s30 }
 0x1e9   : > { %1120 = vrot.lane.b32.xlu0 %v2949_v23, %s2647_s30 }
 0x1ec   : > { %1187 = vrot.lane.b32.xlu1 %v1091_v47, %s2648_s18 }
 0x1ed   : > { %1185 = vrot.lane.b32.xlu0 %v1089_v49, %s2648_s18 }
 0x1f0   : > { %1191 = vrot.lane.b32.xlu1 %v1095_v51, %s2648_s18  ;;  %v1039_v51 = vrot.slane %v2988_v43, 7 }
 0x1f1   : > { %1189 = vrot.lane.b32.xlu0 %v1093_v52, %s2648_s18 }
 0x225   : > { %v1101_v53 = vpop.permute.xlu1 %1100 }
 0x226   : > { %v1146_v15 = vadd.f32 %v1101_v53, %v2910_v54 }
 0x227   : > { %v1097_v56 = vpop.permute.xlu0 %1096 }
 0x229   : > { %v1103_v57 = vpop.permute.xlu1 %1102 }
 0x22a   : > { %v1147_v5 = vadd.f32 %v1103_v57, %v2903_v48 }
 0x22b   : > { %v1099_v58 = vpop.permute.xlu0 %1098 }
 0x22c   : > { %v1145_v59 = vadd.f32 %v1099_v58, %v2915_v55  ;;  %v1061_v55 = vsel %vm1013_vm2, 0.0, %v1014_v50 }
 0x22d   : > { %v1144_v8 = vadd.f32 %v1097_v56, %v1061_v55 }
 0x22e   : > { %v1164_v60 = vpop.permute.xlu1 %1163 }
 0x22f   : > { %v1210_v62 = vadd.f32 %v1164_v60, %v1145_v59  ;;  %v1166_v63 = vpop.permute.xlu0 %1165 }
 0x230   : > { %v1211_v19 = vadd.f32 %v1166_v63, %v1146_v15  ;;  %v1042_v63 = vsel %vm1013_vm2, %v1039_v51, %v1041_v28 }
 0x231   : > { %1243 = vrot.lane.b32.xlu1 %v1210_v62, %s2649_s19 }
 0x232   : > { %v1111_v2 = vpop.permute.xlu1 %1110 }
 0x233   : > { %v1109_v3 = vpop.permute.xlu0 %1108  ;;  %v1151_v29 = vadd.f32 %v1111_v2, %v2924_v0 }
 0x236   : > { %v1168_v9 = vpop.permute.xlu1 %1167 }
 0x237   : > { %v1212_v10 = vadd.f32 %v1168_v9, %v1147_v5  ;;  %v1162_v11 = vpop.permute.xlu0 %1161 }
 0x238   : > { %v1209_v12 = vadd.f32 %v1162_v11, %v1144_v8  ;;  %v3065_v8 = vld [vmem:[%s3446_s8] ss:$0 sm:$0xff] }
 0x239   : > { %1247 = vrot.lane.b32.xlu1 %v1212_v10, %s2649_s19 }
 0x23a   : > { %v1107_v16 = vpop.permute.xlu1 %1106  ;;  %1241 = vrot.lane.b32.xlu0 %v1209_v12, %s2649_s19 }
 0x23b   : > { %v1105_v17 = vpop.permute.xlu0 %1104  ;;  %v1149_v48 = vadd.f32 %v1107_v16, %v2934_v7  ;;  %v1150_v7 = vadd.f32 %v1109_v3, %v2931_v6 }
 0x23c   : > { %v1148_v30 = vadd.f32 %v1105_v17, %v2919_v61 }
 0x23e   : > { %v1172_v50 = vpop.permute.xlu1 %1171  ;;  %1245 = vrot.lane.b32.xlu0 %v1211_v19, %s2649_s19 }
 0x23f   : > { %v1214_v22 = vadd.f32 %v1172_v50, %v1149_v48  ;;  %v1174_v24 = vpop.permute.xlu0 %1173 }
 0x240   : > { %v1215_v40 = vadd.f32 %v1174_v24, %v1150_v7 }
 0x241   : > { %1251 = vrot.lane.b32.xlu1 %v1214_v22, %s2649_s19 }
 0x242   : > { %v1119_v54 = vpop.permute.xlu1 %1118 }
 0x243   : > { %v1117_v13 = vpop.permute.xlu0 %1116  ;;  %v1155_v45 = vadd.f32 %v1119_v54, %v2943_v20  ;;  %v1040_v20 = vsel %vm1013_vm2, %v1037_v27, %v1039_v51 }
 0x246   : > { %v1176_v33 = vpop.permute.xlu1 %1175 }
 0x247   : > { %v1216_v35 = vadd.f32 %v1176_v33, %v1151_v29  ;;  %v1170_v36 = vpop.permute.xlu0 %1169 }
 0x248   : > { %v1213_v37 = vadd.f32 %v1170_v36, %v1148_v30 }
 0x249   : > { %1255 = vrot.lane.b32.xlu1 %v1216_v35, %s2649_s19 }
 0x24a   : > { %v1115_v38 = vpop.permute.xlu1 %1114  ;;  %1249 = vrot.lane.b32.xlu0 %v1213_v37, %s2649_s19 }
 0x24b   : > { %v1113_v39 = vpop.permute.xlu0 %1112  ;;  %v1153_v41 = vadd.f32 %v1115_v38, %v2956_v26  ;;  %v1154_v26 = vadd.f32 %v1117_v13, %v2953_v25 }
 0x24c   : > { %v1152_v6 = vadd.f32 %v1113_v39, %v2938_v14 }
 0x24e   : > { %v1180_v42 = vpop.permute.xlu1 %1179  ;;  %1253 = vrot.lane.b32.xlu0 %v1215_v40, %s2649_s19 }
 0x24f   : > { %v1218_v0 = vadd.f32 %v1180_v42, %v1153_v41  ;;  %v1182_v61 = vpop.permute.xlu0 %1181 }
 0x250   : > { %v1219_v57 = vadd.f32 %v1182_v61, %v1154_v26 }
 0x251   : > { %1259 = vrot.lane.b32.xlu1 %v1218_v0, %s2649_s19 }
 0x252   : > { %v1127_v34 = vpop.permute.xlu1 %1126 }
 0x253   : > { %v1125_v44 = vpop.permute.xlu0 %1124  ;;  %v1159_v25 = vadd.f32 %v1127_v34, %v2971_v32 }
 0x254   : > { %v1158_v23 = vadd.f32 %v1125_v44, %v1042_v63 }
 0x256   : > { %v1184_v46 = vpop.permute.xlu1 %1183 }
 0x257   : > { %v1220_v47 = vadd.f32 %v1184_v46, %v1155_v45  ;;  %v1178_v49 = vpop.permute.xlu0 %1177 }
 0x258   : > { %v1217_v52 = vadd.f32 %v1178_v49, %v1152_v6 }
 0x259   : > { %1263 = vrot.lane.b32.xlu1 %v1220_v47, %s2649_s19 }
 0x25a   : > { %v1123_v53 = vpop.permute.xlu1 %1122  ;;  %1257 = vrot.lane.b32.xlu0 %v1217_v52, %s2649_s19 }
 0x25b   : > { %v1121_v56 = vpop.permute.xlu0 %1120  ;;  %v1157_v14 = vadd.f32 %v1123_v53, %v1040_v20 }
 0x25c   : > { %v1156_v58 = vadd.f32 %v1121_v56, %v2964_v31 }
 0x25e   : > { %v1188_v59 = vpop.permute.xlu1 %1187  ;;  %1261 = vrot.lane.b32.xlu0 %v1219_v57, %s2649_s19 }
 0x25f   : > { %v1222_v43 = vadd.f32 %v1188_v59, %v1157_v14  ;;  %v1186_v60 = vpop.permute.xlu0 %1185 }
 0x260   : > { %v1221_v62 = vadd.f32 %v1186_v60, %v1156_v58 }
 0x261   : > { %1267 = vrot.lane.b32.xlu1 %v1222_v43, %s2649_s19 }
 0x262   : > { %v1192_v1 = vpop.permute.xlu1 %1191  ;;  %1265 = vrot.lane.b32.xlu0 %v1221_v62, %s2649_s19 }
 0x263   : > { %v1224_v27 = vadd.f32 %v1192_v1, %v1159_v25  ;;  %v1190_v31 = vpop.permute.xlu0 %1189 }
 0x264   : > { %v1223_v2 = vadd.f32 %v1190_v31, %v1158_v23 }
 0x265   : > { %1271 = vrot.lane.b32.xlu1 %v1224_v27, %s2649_s19 }
 0x266   : > { %1269 = vrot.lane.b32.xlu0 %v1223_v2, %s2649_s19 }
 0x2a3   : > { %v1244_v3 = vpop.permute.xlu1 %1243 }
 0x2a4   : > { %1291 = vst.msk [vmem:[#allocation2 + $0x8] sm:$0xff] %vm1289_vm4, %v1244_v3 }
 0x2ab   : > { %v1248_v21 = vpop.permute.xlu1 %1247  ;;  %v1307_v32 = vld [vmem:[#allocation2 + $0x8] sm:$0xff] }
 0x2ac   : > { %1293 = vst.msk [vmem:[#allocation2 + $0x18] sm:$0xff] %vm1289_vm4, %v1248_v21  ;;  %v1242_v28 = vpop.permute.xlu0 %1241  ;;  %v1330_v5 = vmul.f32 %v3058_v4, %v1307_v32 }
 0x2ad   : > { %1290 = vst.msk [vmem:[#allocation2] sm:$0xff] %vm1289_vm4, %v1242_v28 }
 0x2ae   : > { %v1353_v15 = vadd.f32 %v3065_v8, %v1330_v5 }
 0x2b0   : > { %v1246_v55 = vpop.permute.xlu0 %1245  ;;  %v1369_v48 = vmax.f32 %v1353_v15, 0.0 }
 0x2b1   : > { %1292 = vst.msk [vmem:[#allocation2 + $0x10] sm:$0xff] %vm1289_vm4, %v1246_v55 }
 0x2b3   : > { %v1252_v9 = vpop.permute.xlu1 %1251  ;;  %v1309_v10 = vld [vmem:[#allocation2 + $0x18] sm:$0xff] }
 0x2b4   : > { %1295 = vst.msk [vmem:[#allocation2 + $0x28] sm:$0xff] %vm1289_vm4, %v1252_v9  ;;  %v1306_v11 = vld [vmem:[#allocation2] sm:$0xff]  ;;  %v1332_v16 = vmul.f32 %v3058_v4, %v1309_v10 }
 0x2b5   : > { %v1329_v12 = vmul.f32 %v3058_v4, %v1306_v11 }
 0x2b6   : > { %v1355_v22 = vadd.f32 %v3065_v8, %v1332_v16 }
 0x2b7   : > { %v1352_v17 = vadd.f32 %v3065_v8, %v1329_v12 }
 0x2b8   : > { %v1308_v19 = vld [vmem:[#allocation2 + $0x10] sm:$0xff]  ;;  %v1371_v33 = vmax.f32 %v1355_v22, 0.0 }
 0x2b9   : > { %v1368_v18 = vmax.f32 %v1352_v17, 0.0  ;;  %v1331_v50 = vmul.f32 %v3058_v4, %v1308_v19 }
 0x2bb   : > { %v1256_v24 = vpop.permute.xlu1 %1255  ;;  %v1384_v54 = vpack.c.bf16 %v1369_v48, %v1368_v18  ;;  %v1354_v13 = vadd.f32 %v3065_v8, %v1331_v50  ;;  %v1311_v35 = vld [vmem:[#allocation2 + $0x28] sm:$0xff] }
 0x2bc   : > { %1297 = vst.msk [vmem:[#allocation2 + $0x38] sm:$0xff] %vm1289_vm4, %v1256_v24  ;;  %v1250_v29 = vpop.permute.xlu0 %1249  ;;  %v1334_v7 = vmul.f32 %v3058_v4, %v1311_v35 }
 0x2bd   : > { %1294 = vst.msk [vmem:[#allocation2 + $0x20] sm:$0xff] %vm1289_vm4, %v1250_v29  ;;  %2545 = vmatprep.mubr.msk.bf16.mxu0 %vm1404_vm5, %v1384_v54  ;;  %v1370_v30 = vmax.f32 %v1354_v13, 0.0 }
 0x2be   : > { %v1357_v42 = vadd.f32 %v3065_v8, %v1334_v7 }
 0x2bf   : > { %v1385_v36 = vpack.c.bf16 %v1371_v33, %v1370_v30 }
 0x2c0   : > { %v1254_v37 = vpop.permute.xlu0 %1253  ;;  %v1373_v45 = vmax.f32 %v1357_v42, 0.0 }
 0x2c1   : > { %1296 = vst.msk [vmem:[#allocation2 + $0x30] sm:$0xff] %vm1289_vm4, %v1254_v37  ;;  %2546 = vmatmul.mubr.msk.bf16.vlgmr.msra.gmra.mxu0 %vm1404_vm5, %v1385_v36  ;;  %v2632_v37 = vld [vmem:[%s3450_s12] sm:$0xff]  }
 0x2c2   : > { %2561 = vmatprep.subr.bf16.mxu1 %v2632_v37 }
 0x2c3   : > { %v1260_v38 = vpop.permute.xlu1 %1259  ;;  %v1313_v39 = vld [vmem:[#allocation2 + $0x38] sm:$0xff]  ;;  %2562 = vmatpush3.bf16.msra.mxu1 %v2632_v37 }
 0x2c4   : > { %1299 = vst.msk [vmem:[#allocation2 + $0x48] sm:$0xff] %vm1289_vm4, %v1260_v38  ;;  %v1310_v40 = vld [vmem:[#allocation2 + $0x20] sm:$0xff]  ;;  %v1336_v0 = vmul.f32 %v3058_v4, %v1313_v39 }
 0x2c5   : > { %v1333_v41 = vmul.f32 %v3058_v4, %v1310_v40 }
 0x2c6   : > { %v1359_v46 = vadd.f32 %v3065_v8, %v1336_v0 }
 0x2c7   : > { %v1356_v61 = vadd.f32 %v3065_v8, %v1333_v41  ;;  %v3131_v41 = vld [vmem:[%s3449_s11] ss:$0 sm:$0xff] }
 0x2c8   : > { %v1312_v34 = vld [vmem:[#allocation2 + $0x30] sm:$0xff]  ;;  %v1375_v53 = vmax.f32 %v1359_v46, 0.0 }
 0x2c9   : > { %v1372_v44 = vmax.f32 %v1356_v61, 0.0  ;;  %v1335_v6 = vmul.f32 %v3058_v4, %v1312_v34 }
 0x2cb   : > { %v1264_v47 = vpop.permute.xlu1 %1263  ;;  %v1386_v49 = vpack.c.bf16 %v1373_v45, %v1372_v44  ;;  %v1358_v51 = vadd.f32 %v3065_v8, %v1335_v6  ;;  %v1315_v56 = vld [vmem:[#allocation2 + $0x48] sm:$0xff] }
 0x2cc   : > { %1301 = vst.msk [vmem:[#allocation2 + $0x58] sm:$0xff] %vm1289_vm4, %v1264_v47  ;;  %v1258_v52 = vpop.permute.xlu0 %1257  ;;  %v1338_v14 = vmul.f32 %v3058_v4, %v1315_v56 }
 0x2cd   : > { %1298 = vst.msk [vmem:[#allocation2 + $0x40] sm:$0xff] %vm1289_vm4, %v1258_v52  ;;  %2549 = vmatprep.mubr.msk.bf16.mxu0 %vm1404_vm5, %v1386_v49  ;;  %v1374_v26 = vmax.f32 %v1358_v51, 0.0 }
 0x2ce   : > { %v1361_v25 = vadd.f32 %v3065_v8, %v1338_v14 }
 0x2cf   : > { %v1387_v57 = vpack.c.bf16 %v1375_v53, %v1374_v26 }
 0x2d0   : > { %v1262_v20 = vpop.permute.xlu0 %1261  ;;  %v1377_v3 = vmax.f32 %v1361_v25, 0.0 }
 0x2d1   : > { %1300 = vst.msk [vmem:[#allocation2 + $0x50] sm:$0xff] %vm1289_vm4, %v1262_v20  ;;  %2550 = vmatmul.mubr.msk.bf16.gmra.mxu0 %vm1404_vm5, %v1387_v57 }
 0x2d3   : > { %v1268_v58 = vpop.permute.xlu1 %1267  ;;  %v1317_v59 = vld [vmem:[#allocation2 + $0x58] sm:$0xff] }
 0x2d4   : > { %1303 = vst.msk [vmem:[#allocation2 + $0x68] sm:$0xff] %vm1289_vm4, %v1268_v58  ;;  %v1266_v43 = vpop.permute.xlu0 %1265  ;;  %v1314_v60 = vld [vmem:[#allocation2 + $0x40] sm:$0xff]  ;;  %v1340_v63 = vmul.f32 %v3058_v4, %v1317_v59 }
 0x2d5   : > { %1302 = vst.msk [vmem:[#allocation2 + $0x60] sm:$0xff] %vm1289_vm4, %v1266_v43  ;;  %v1337_v62 = vmul.f32 %v3058_v4, %v1314_v60 }
 0x2d6   : > { %v1363_v28 = vadd.f32 %v3065_v8, %v1340_v63 }
 0x2d7   : > { %v1272_v23 = vpop.permute.xlu1 %1271  ;;  %v1360_v1 = vadd.f32 %v3065_v8, %v1337_v62 }
 0x2d8   : > { %1305 = vst.msk [vmem:[#allocation2 + $0x78] sm:$0xff] %vm1289_vm4, %v1272_v23  ;;  %v1270_v27 = vpop.permute.xlu0 %1269  ;;  %v1316_v31 = vld [vmem:[#allocation2 + $0x50] sm:$0xff]  ;;  %v1379_v12 = vmax.f32 %v1363_v28, 0.0 }
 0x2d9   : > { %1304 = vst.msk [vmem:[#allocation2 + $0x70] sm:$0xff] %vm1289_vm4, %v1270_v27  ;;  %v1376_v2 = vmax.f32 %v1360_v1, 0.0  ;;  %v1339_v21 = vmul.f32 %v3058_v4, %v1316_v31 }
 0x2db   : > { %v1388_v32 = vpack.c.bf16 %v1377_v3, %v1376_v2  ;;  %v1362_v55 = vadd.f32 %v3065_v8, %v1339_v21  ;;  %v1319_v5 = vld [vmem:[#allocation2 + $0x68] sm:$0xff] }
 0x2dc   : > { %v1318_v9 = vld [vmem:[#allocation2 + $0x60] sm:$0xff]  ;;  %v1342_v10 = vmul.f32 %v3058_v4, %v1319_v5 }
 0x2dd   : > { %2553 = vmatprep.mubr.msk.bf16.mxu0 %vm1404_vm5, %v1388_v32  ;;  %v1378_v11 = vmax.f32 %v1362_v55, 0.0  ;;  %v1341_v15 = vmul.f32 %v3058_v4, %v1318_v9 }
 0x2de   : > { %v1365_v16 = vadd.f32 %v3065_v8, %v1342_v10 }
 0x2df   : > { %v1389_v17 = vpack.c.bf16 %v1379_v12, %v1378_v11  ;;  %v1364_v19 = vadd.f32 %v3065_v8, %v1341_v15  ;;  %v1321_v18 = vld [vmem:[#allocation2 + $0x78] sm:$0xff] }
 0x2e0   : > { %v1381_v48 = vmax.f32 %v1365_v16, 0.0  ;;  %v1320_v50 = vld [vmem:[#allocation2 + $0x70] sm:$0xff]  ;;  %v1344_v22 = vmul.f32 %v3058_v4, %v1321_v18 }
 0x2e1   : > { %2554 = vmatmul.mubr.msk.bf16.gmra.mxu0 %vm1404_vm5, %v1389_v17  ;;  %v1380_v24 = vmax.f32 %v1364_v19, 0.0  ;;  %v1343_v54 = vmul.f32 %v3058_v4, %v1320_v50  ;;  %v3124_v4 = vld [vmem:[%s3448_s10] ss:$0 sm:$0xff] }
 0x2e2   : > { %v1367_v13 = vadd.f32 %v3065_v8, %v1344_v22 }
 0x2e3   : > { %v1390_v29 = vpack.c.bf16 %v1381_v48, %v1380_v24  ;;  %v1366_v30 = vadd.f32 %v3065_v8, %v1343_v54 }
 0x2e4   : > { %v1383_v33 = vmax.f32 %v1367_v13, 0.0 }
 0x2e5   : > { %2557 = vmatprep.mubr.msk.bf16.mxu0 %vm1404_vm5, %v1390_v29  ;;  %v1382_v35 = vmax.f32 %v1366_v30, 0.0 }
 0x2e7   : > { %v1391_v36 = vpack.c.bf16 %v1383_v33, %v1382_v35 }
 0x2e9   : > { %2558 = vmatmul.mubr.msk.bf16.gmra.mxu0 %vm1404_vm5, %v1391_v36 }
 0x381   : > { %v2547_v7 = vpop.f32.mrf.mxu0 }
 0x382   : > { %v1539_v39 = vmul.f32 %v2547_v7, %v3124_v4 }
 0x383   : > { %v1467_v8 = vpop.f32.mrf.mxu0 }
 0x384   : > { %v1537_v38 = vmul.f32 %v3124_v4, %v1467_v8  ;;  %v1562_v45 = vadd.f32 %v3131_v41, %v1539_v39 }
 0x385   : > { %v2548_v40 = vpop.f32.mrf.mxu0 }
 0x386   : > { %v1540_v42 = vmul.f32 %v2548_v40, %v3124_v4  ;;  %v1560_v61 = vadd.f32 %v3131_v41, %v1537_v38  ;;  %v1578_v51 = vmax.f32 %v1562_v45, 0.0 }
 0x387   : > { %v1470_v0 = vpop.f32.mrf.mxu0 }
 0x388   : > { %v1563_v34 = vadd.f32 %v3131_v41, %v1540_v42  ;;  %v1538_v44 = vmul.f32 %v3124_v4, %v1470_v0  ;;  %v1576_v47 = vmax.f32 %v1560_v61, 0.0 }
 0x38a   : > { %v1561_v6 = vadd.f32 %v3131_v41, %v1538_v44  ;;  %v1579_v46 = vmax.f32 %v1563_v34, 0.0 }
 0x38c   : > { %v1577_v49 = vmax.f32 %v1561_v6, 0.0  ;;  %v1593_v26 = vpack.c.bf16 %v1579_v46, %v1578_v51 }
 0x38e   : > { %v1592_v52 = vpack.c.bf16 %v1577_v49, %v1576_v47 }
 0x390   : > { %2563 = vmatprep.mubr.msk.bf16.mxu1 %vm566_vm0, %v1592_v52 }
 0x391   : > { %v2551_v53 = vpop.f32.mrf.mxu0  ;;  %2564 = vmatmul.mubr.msk.bf16.vlgmr.msra.gmra.mxu1 %vm566_vm0, %v1593_v26 }
 0x392   : > { %v1543_v20 = vmul.f32 %v2551_v53, %v3124_v4 }
 0x393   : > { %v1483_v56 = vpop.f32.mrf.mxu0 }
 0x394   : > { %v1541_v57 = vmul.f32 %v3124_v4, %v1483_v56  ;;  %v1566_v25 = vadd.f32 %v3131_v41, %v1543_v20 }
 0x395   : > { %v2552_v14 = vpop.f32.mrf.mxu0 }
 0x396   : > { %v1544_v58 = vmul.f32 %v2552_v14, %v3124_v4  ;;  %v1564_v43 = vadd.f32 %v3131_v41, %v1541_v57  ;;  %v1582_v31 = vmax.f32 %v1566_v25, 0.0 }
 0x397   : > { %v1486_v59 = vpop.f32.mrf.mxu0 }
 0x398   : > { %v1567_v60 = vadd.f32 %v3131_v41, %v1544_v58  ;;  %v1542_v62 = vmul.f32 %v3124_v4, %v1486_v59  ;;  %v1580_v1 = vmax.f32 %v1564_v43, 0.0 }
 0x39a   : > { %v1565_v63 = vadd.f32 %v3131_v41, %v1542_v62  ;;  %v1583_v23 = vmax.f32 %v1567_v60, 0.0 }
 0x39c   : > { %v1581_v27 = vmax.f32 %v1565_v63, 0.0  ;;  %v1595_v3 = vpack.c.bf16 %v1583_v23, %v1582_v31 }
 0x39e   : > { %v1594_v2 = vpack.c.bf16 %v1581_v27, %v1580_v1 }
 0x3a0   : > { %2567 = vmatprep.mubr.msk.bf16.mxu1 %vm566_vm0, %v1594_v2 }
 0x3a1   : > { %v2555_v21 = vpop.f32.mrf.mxu0  ;;  %2568 = vmatmul.mubr.msk.bf16.gmra.mxu1 %vm566_vm0, %v1595_v3 }
 0x3a2   : > { %v1547_v55 = vmul.f32 %v2555_v21, %v3124_v4 }
 0x3a3   : > { %v1499_v28 = vpop.f32.mrf.mxu0 }
 0x3a4   : > { %v1545_v32 = vmul.f32 %v3124_v4, %v1499_v28  ;;  %v1570_v16 = vadd.f32 %v3131_v41, %v1547_v55 }
 0x3a5   : > { %v2556_v5 = vpop.f32.mrf.mxu0 }
 0x3a6   : > { %v1548_v9 = vmul.f32 %v2556_v5, %v3124_v4  ;;  %v1568_v11 = vadd.f32 %v3131_v41, %v1545_v32  ;;  %v1586_v54 = vmax.f32 %v1570_v16, 0.0 }
 0x3a7   : > { %v1502_v10 = vpop.f32.mrf.mxu0 }
 0x3a8   : > { %v1571_v12 = vadd.f32 %v3131_v41, %v1548_v9  ;;  %v1546_v15 = vmul.f32 %v3124_v4, %v1502_v10  ;;  %v1584_v50 = vmax.f32 %v1568_v11, 0.0 }
 0x3a9   : > { %v2559_v17 = vpop.f32.mrf.mxu0 }
 0x3aa   : > { %v1569_v19 = vadd.f32 %v3131_v41, %v1546_v15  ;;  %v1587_v18 = vmax.f32 %v1571_v12, 0.0  ;;  %v1551_v13 = vmul.f32 %v2559_v17, %v3124_v4 }
 0x3ab   : > { %v1515_v48 = vpop.f32.mrf.mxu0 }
 0x3ac   : > { %v1585_v22 = vmax.f32 %v1569_v19, 0.0  ;;  %v1549_v24 = vmul.f32 %v3124_v4, %v1515_v48  ;;  %v1597_v35 = vpack.c.bf16 %v1587_v18, %v1586_v54  ;;  %v1574_v38 = vadd.f32 %v3131_v41, %v1551_v13 }
 0x3ad   : > { %v2560_v29 = vpop.f32.mrf.mxu0 }
 0x3ae   : > { %v1596_v30 = vpack.c.bf16 %v1585_v22, %v1584_v50  ;;  %v1552_v33 = vmul.f32 %v2560_v29, %v3124_v4  ;;  %v1572_v37 = vadd.f32 %v3131_v41, %v1549_v24  ;;  %v1590_v61 = vmax.f32 %v1574_v38, 0.0 }
 0x3af   : > { %v1518_v36 = vpop.f32.mrf.mxu0 }
 0x3b0   : > { %v1575_v7 = vadd.f32 %v3131_v41, %v1552_v33  ;;  %v1550_v8 = vmul.f32 %v3124_v4, %v1518_v36  ;;  %2571 = vmatprep.mubr.msk.bf16.mxu1 %vm566_vm0, %v1596_v30  ;;  %v1588_v42 = vmax.f32 %v1572_v37, 0.0 }
 0x3b1   : > { %2572 = vmatmul.mubr.msk.bf16.gmra.mxu1 %vm566_vm0, %v1597_v35 }
 0x3b2   : > { %v1573_v39 = vadd.f32 %v3131_v41, %v1550_v8  ;;  %v1591_v40 = vmax.f32 %v1575_v7, 0.0 }
 0x3b4   : > { %v1589_v0 = vmax.f32 %v1573_v39, 0.0  ;;  %v1599_v44 = vpack.c.bf16 %v1591_v40, %v1590_v61 }
 0x3b6   : > { %v1598_v34 = vpack.c.bf16 %v1589_v0, %v1588_v42 }
 0x3b8   : > { %2575 = vmatprep.mubr.msk.bf16.mxu1 %vm566_vm0, %v1598_v34 }
 0x3b9   : > { %2576 = vmatmul.mubr.msk.bf16.gmra.mxu1 %vm566_vm0, %v1599_v44 }
 0x451   : > { %v3171_v45 = vpop.f32.mrf.mxu1 }
 0x452   : > { %v1796_v0 = vrot.slane %v3171_v45, 1 }
 0x453   : > { %v3173_v4 = vpop.f32.mrf.mxu1 }
 0x455   : > { %v3175_v6 = vpop.f32.mrf.mxu1 }
 0x456   : > { %v1798_v42 = vrot.slane %v3175_v6, 1 }
 0x457   : > { %v3177_v46 = vpop.f32.mrf.mxu1 }
 0x458   : > { %v1799_v34 = vsel %vm1062_vm1, %v1796_v0, %v1798_v42  ;;  %v1794_v44 = vrot.slane %v3177_v46, 1 }
 0x461   : > { %v3179_v47 = vpop.f32.mrf.mxu1 }
 0x462   : > { %1838 = vrot.lane.b32.xlu0 %v3179_v47, %s2647_s30  ;;  %v1756_v51 = vrot.slane %v3179_v47, 7  ;;  %v1804_v52 = vrot.slane %v3179_v47, 1 }
 0x463   : > { %v3183_v41 = vpop.f32.mrf.mxu1 }
 0x464   : > { %v1752_v57 = vrot.slane %v3183_v41, 7  ;;  %v1800_v38 = vrot.slane %v3183_v41, 1 }
 0x465   : > { %v2570_v49 = vpop.f32.mrf.mxu1 }
 0x466   : > { %v1758_v26 = vrot.slane %v2570_v49, 7  ;;  %v1806_v53 = vrot.slane %v2570_v49, 1  ;;  %1840 = vrot.lane.b32.xlu1 %v2570_v49, %s2647_s30  ;;  %v1793_v49 = vrot.slane %v3173_v4, 1  ;;  %v1801_v47 = vsel %vm1062_vm1, %v1798_v42, %v1800_v38 }
 0x467   : > { %v3188_v56 = vpop.f32.mrf.mxu1  ;;  %v1746_v42 = vrot.slane %v3177_v46, 7 }
 0x468   : > { %v1754_v20 = vrot.slane %v3188_v56, 7  ;;  %v1807_v14 = vsel %vm1062_vm1, %v1804_v52, %v1806_v53  ;;  %v3196_v58 = vsel %vm1013_vm2, %v1756_v51, %v1758_v26  ;;  %v1802_v7 = vrot.slane %v3188_v56, 1 }
 0x469   : > { %1903 = vrot.lane.b32.xlu0 %v1807_v14, %s2648_s18 }
 0x46a   : > { %v3200_v59 = vsel %vm1013_vm2, %v1754_v20, %v1756_v51  ;;  %v3205_v43 = vsel %vm1013_vm2, %v1752_v57, %v1754_v20  ;;  %v1803_v40 = vsel %vm1062_vm1, %v1800_v38, %v1802_v7  ;;  %v1805_v61 = vsel %vm1062_vm1, %v1802_v7, %v1804_v52 }
 0x46b   : > { %v1795_v51 = vsel %vm1062_vm1, %v1793_v49, %v1794_v44  ;;  %v1797_v52 = vsel %vm1062_vm1, %v1794_v44, %v1796_v0 }
 0x471   : > { %v2573_v60 = vpop.f32.mrf.mxu1 }
 0x472   : > { %1846 = vrot.lane.b32.xlu0 %v2573_v60, %s2647_s30  ;;  %v1764_v63 = vrot.slane %v2573_v60, 7  ;;  %v1812_v27 = vrot.slane %v2573_v60, 1 }
 0x473   : > { %v1698_v62 = vpop.f32.mrf.mxu1 }
 0x474   : > { %v1760_v25 = vrot.slane %v1698_v62, 7  ;;  %v1808_v23 = vrot.slane %v1698_v62, 1 }
 0x475   : > { %v2574_v1 = vpop.f32.mrf.mxu1 }
 0x476   : > { %v1766_v31 = vrot.slane %v2574_v1, 7  ;;  %v1814_v2 = vrot.slane %v2574_v1, 1  ;;  %1842 = vrot.lane.b32.xlu0 %v1698_v62, %s2647_s30  ;;  %1848 = vrot.lane.b32.xlu1 %v2574_v1, %s2647_s30  ;;  %v3211_v3 = vsel %vm1013_vm2, %v1758_v26, %v1760_v25  ;;  %v1809_v9 = vsel %vm1062_vm1, %v1806_v53, %v1808_v23 }
 0x477   : > { %v1701_v21 = vpop.f32.mrf.mxu1 }
 0x478   : > { %v1762_v28 = vrot.slane %v1701_v21, 7  ;;  %v1815_v32 = vsel %vm1062_vm1, %v1812_v27, %v1814_v2  ;;  %v3215_v55 = vsel %vm1013_vm2, %v1764_v63, %v1766_v31  ;;  %v1810_v16 = vrot.slane %v1701_v21, 1 }
 0x479   : > { %v3217_v5 = vpop.f32.mrf.mxu1 }
 0x47a   : > { %1911 = vrot.lane.b32.xlu0 %v1815_v32, %s2648_s18  ;;  %1905 = vrot.lane.b32.xlu1 %v1809_v9, %s2648_s18  ;;  %v3225_v11 = vsel %vm1013_vm2, %v1762_v28, %v1764_v63  ;;  %v3228_v12 = vsel %vm1013_vm2, %v1760_v25, %v1762_v28  ;;  %v1772_v48 = vrot.slane %v3217_v5, 7  ;;  %v1813_v50 = vsel %vm1062_vm1, %v1810_v16, %v1812_v27 }
 0x47b   : > { %v3222_v10 = vpop.f32.mrf.mxu1  ;;  %v1811_v22 = vsel %vm1062_vm1, %v1808_v23, %v1810_v16  ;;  %v1820_v30 = vrot.slane %v3217_v5, 1 }
 0x47c   : > { %v1768_v15 = vrot.slane %v3222_v10, 7  ;;  %v1816_v54 = vrot.slane %v3222_v10, 1 }
 0x47d   : > { %v2578_v17 = vpop.f32.mrf.mxu1 }
 0x47e   : > { %v1774_v19 = vrot.slane %v2578_v17, 7  ;;  %1844 = vrot.lane.b32.xlu1 %v1701_v21, %s2647_s30  ;;  %1854 = vrot.lane.b32.xlu0 %v3217_v5, %s2647_s30  ;;  %v3237_v18 = vsel %vm1013_vm2, %v1766_v31, %v1768_v15  ;;  %v1822_v13 = vrot.slane %v2578_v17, 1  ;;  %v1817_v35 = vsel %vm1062_vm1, %v1814_v2, %v1816_v54 }
 0x47f   : > { %v3250_v29 = vpop.f32.mrf.mxu1 }
 0x480   : > { %v3245_v24 = vsel %vm1013_vm2, %v1772_v48, %v1774_v19  ;;  %v1818_v33 = vrot.slane %v3250_v29, 1  ;;  %v1823_v36 = vsel %vm1062_vm1, %v1820_v30, %v1822_v13  ;;  %v1825_v8 = vsel %vm1062_vm1, %v1822_v13, 0.0 }
 0x481   : > { %v1770_v31 = vrot.slane %v3250_v29, 7 }
 0x482   : > { %1909 = vrot.lane.b32.xlu1 %v1813_v50, %s2648_s18  ;;  %1907 = vrot.lane.b32.xlu0 %v1811_v22, %s2648_s18  ;;  %v1819_v37 = vsel %vm1062_vm1, %v1816_v54, %v1818_v33  ;;  %v1821_v39 = vsel %vm1062_vm1, %v1818_v33, %v1820_v30 }
 0x483   : > { %v1773_v28 = vsel %vm1013_vm2, %v1770_v31, %v1772_v48 }
 0x486   : > { %1850 = vrot.lane.b32.xlu0 %v3222_v10, %s2647_s30  ;;  %1856 = vrot.lane.b32.xlu1 %v2578_v17, %s2647_s30  ;;  %v1750_v10 = vrot.slane %v3175_v6, 7 }
 0x488   : > { %v1753_v0 = vsel %vm1013_vm2, %v1750_v10, %v1752_v57 }
 0x48a   : > { %1913 = vrot.lane.b32.xlu1 %v1817_v35, %s2648_s18  ;;  %1919 = vrot.lane.b32.xlu0 %v1823_v36, %s2648_s18 }
 0x48e   : > { %1852 = vrot.lane.b32.xlu1 %v3250_v29, %s2647_s30  ;;  %1915 = vrot.lane.b32.xlu0 %v1819_v37, %s2648_s18 }
 0x492   : > { %1921 = vrot.lane.b32.xlu1 %v1825_v8, %s2648_s18  ;;  %1834 = vrot.lane.b32.xlu0 %v3183_v41, %s2647_s30 }
 0x496   : > { %1917 = vrot.lane.b32.xlu1 %v1821_v39, %s2648_s18  ;;  %1899 = vrot.lane.b32.xlu0 %v1803_v40, %s2648_s18 }
 0x49a   : > { %1836 = vrot.lane.b32.xlu1 %v3188_v56, %s2647_s30  ;;  %1830 = vrot.lane.b32.xlu0 %v3171_v45, %s2647_s30 }
 0x49e   : > { %1901 = vrot.lane.b32.xlu1 %v1805_v61, %s2648_s18  ;;  %1895 = vrot.lane.b32.xlu0 %v1799_v34, %s2648_s18 }
 0x4a2   : > { %1832 = vrot.lane.b32.xlu1 %v3175_v6, %s2647_s30  ;;  %1826 = vrot.lane.b32.xlu0 %v3173_v4, %s2647_s30 }
 0x4a6   : > { %1897 = vrot.lane.b32.xlu1 %v1801_v47, %s2648_s18  ;;  %1891 = vrot.lane.b32.xlu0 %v1795_v51, %s2648_s18 }
 0x4aa   : > { %1828 = vrot.lane.b32.xlu1 %v3177_v46, %s2647_s30  ;;  %s2650_s30 = smov 24   ;;  %v1745_v46 = vrot.slane %v3173_v4, 7 }
 0x4ae   : > { %1893 = vrot.lane.b32.xlu1 %v1797_v52, %s2648_s18 }
 0x4d4   : > { %v1839_v26 = vpop.permute.xlu0 %1838 }
 0x4d5   : > { %v1880_v8 = vadd.f32 %v1839_v26, %v3200_v59  ;;  %v1792_v26 = vsel %vm1013_vm2, 0.0, %v1745_v46 }
 0x4d8   : > { %v1841_v56 = vpop.permute.xlu1 %1840 }
 0x4d9   : > { %v1881_v41 = vadd.f32 %v1841_v56, %v3196_v58 }
 0x4db   : > { %v1904_v53 = vpop.permute.xlu0 %1903 }
 0x4dc   : > { %v1945_v39 = vadd.f32 %v1904_v53, %v1880_v8 }
 0x4e4   : > { %v1847_v20 = vpop.permute.xlu0 %1846 }
 0x4e5   : > { %v1884_v13 = vadd.f32 %v1847_v20, %v3225_v11 }
 0x4e8   : > { %v1843_v14 = vpop.permute.xlu0 %1842  ;;  %v1849_v60 = vpop.permute.xlu1 %1848 }
 0x4e9   : > { %v1882_v35 = vadd.f32 %v1843_v14, %v3211_v3  ;;  %v1885_v38 = vadd.f32 %v1849_v60, %v3215_v55  ;;  %v1748_v55 = vrot.slane %v3171_v45, 7 }
 0x4eb   : > { %v1749_v47 = vsel %vm1013_vm2, %v1746_v42, %v1748_v55  ;;  %v1751_v60 = vsel %vm1013_vm2, %v1748_v55, %v1750_v10 }
 0x4ec   : > { %v1912_v62 = vpop.permute.xlu0 %1911  ;;  %v3301_v25 = vpop.permute.xlu1 %1905 }
 0x4ed   : > { %v1949_v30 = vadd.f32 %v1912_v62, %v1884_v13  ;;  %v1946_v52 = vadd.f32 %v3301_v25, %v1881_v41  ;;  %v3371_v13 = vld [vmem:[%s3452_s14] ss:$0 sm:$0xff] }
 0x4f0   : > { %v1855_v63 = vpop.permute.xlu0 %1854  ;;  %v1845_v23 = vpop.permute.xlu1 %1844 }
 0x4f1   : > { %v1888_v32 = vadd.f32 %v1855_v63, %v1773_v28  ;;  %v1883_v59 = vadd.f32 %v1845_v23, %v3228_v12 }
 0x4f4   : > { %v1908_v1 = vpop.permute.xlu0 %1907  ;;  %v1910_v27 = vpop.permute.xlu1 %1909 }
 0x4f5   : > { %v1948_v44 = vadd.f32 %v1910_v27, %v1883_v59 }
 0x4f8   : > { %v1851_v2 = vpop.permute.xlu0 %1850  ;;  %v1857_v21 = vpop.permute.xlu1 %1856 }
 0x4f9   : > { %v1886_v19 = vadd.f32 %v1851_v2, %v3237_v18  ;;  %v1889_v29 = vadd.f32 %v1857_v21, %v3245_v24  ;;  %v1771_v18 = vsel %vm1013_vm2, %v1768_v15, %v1770_v31  ;;  %v1947_v24 = vadd.f32 %v1908_v1, %v1882_v35  ;;  %v2633_v31 = vld [vmem:[%s3453_s15] sm:$0xff]   ;;  %v2637_v2 = vld [vmem:[%s3454_s16 + $0x8] sm:$0xff]  }
 0x4fa   : > { %2595 = vmatprep.mubr.bf16.mxu0 %v2633_v31  ;;  %v2638_v21 = vld [vmem:[%s3454_s16] sm:$0xff]   ;;  %2603 = vmatprep.subr.bf16.mxu1 %v2637_v2 }
 0x4fb   : > { %2604 = vmatpush3.bf16.msra.mxu1 %v2637_v2 }
 0x4fc   : > { %v1920_v9 = vpop.permute.xlu0 %1919  ;;  %v1914_v16 = vpop.permute.xlu1 %1913  ;;  %2605 = vmatprep.subr.bf16.mxu1 %v2638_v21 }
 0x4fd   : > { %v1953_v17 = vadd.f32 %v1920_v9, %v1888_v32  ;;  %v1950_v40 = vadd.f32 %v1914_v16, %v1885_v38 }
 0x4ff   : > { %1999 = vrot.lane.b32.xlu0 %v1953_v17, %s2650_s30  ;;  %2606 = vmatpush3.bf16.msra.mxu1 %v2638_v21 }
 0x500   : > { %v1916_v50 = vpop.permute.xlu0 %1915  ;;  %v1853_v22 = vpop.permute.xlu1 %1852 }
 0x501   : > { %v1951_v54 = vadd.f32 %v1916_v50, %v1886_v19  ;;  %v1887_v36 = vadd.f32 %v1853_v22, %v1771_v18  ;;  %v3363_v19 = vld [vmem:[%s3451_s13] ss:$0 sm:$0xff] }
 0x503   : > { %1995 = vrot.lane.b32.xlu0 %v1951_v54, %s2650_s30 }
 0x504   : > { %v1835_v5 = vpop.permute.xlu0 %1834  ;;  %v1922_v48 = vpop.permute.xlu1 %1921 }
 0x505   : > { %v1954_v33 = vadd.f32 %v1922_v48, %v1889_v29  ;;  %v1878_v61 = vadd.f32 %v1835_v5, %v1753_v0 }
 0x507   : > { %1991 = vrot.lane.b32.xlu0 %v1949_v30, %s2650_s30  ;;  %2001 = vrot.lane.b32.xlu1 %v1954_v33, %s2650_s30 }
 0x508   : > { %v1900_v11 = vpop.permute.xlu0 %1899  ;;  %v1918_v37 = vpop.permute.xlu1 %1917 }
 0x509   : > { %v1952_v7 = vadd.f32 %v1918_v37, %v1887_v36  ;;  %v1943_v49 = vadd.f32 %v1900_v11, %v1878_v61 }
 0x50b   : > { %1987 = vrot.lane.b32.xlu0 %v1947_v24, %s2650_s30  ;;  %1997 = vrot.lane.b32.xlu1 %v1952_v7, %s2650_s30 }
 0x50c   : > { %v1831_v3 = vpop.permute.xlu0 %1830  ;;  %v1837_v15 = vpop.permute.xlu1 %1836 }
 0x50d   : > { %v1876_v57 = vadd.f32 %v1831_v3, %v1749_v47  ;;  %v1879_v53 = vadd.f32 %v1837_v15, %v3205_v43  ;;  %v1747_v43 = vsel %vm1013_vm2, %v1745_v46, %v1746_v42 }
 0x50f   : > { %1983 = vrot.lane.b32.xlu0 %v1945_v39, %s2650_s30  ;;  %1993 = vrot.lane.b32.xlu1 %v1950_v40, %s2650_s30 }
 0x510   : > { %v1896_v6 = vpop.permute.xlu0 %1895  ;;  %v1902_v34 = vpop.permute.xlu1 %1901 }
 0x511   : > { %v1941_v45 = vadd.f32 %v1896_v6, %v1876_v57  ;;  %v1944_v56 = vadd.f32 %v1902_v34, %v1879_v53 }
 0x513   : > { %1979 = vrot.lane.b32.xlu0 %v1943_v49, %s2650_s30  ;;  %1989 = vrot.lane.b32.xlu1 %v1948_v44, %s2650_s30 }
 0x514   : > { %v1827_v12 = vpop.permute.xlu0 %1826  ;;  %v1833_v51 = vpop.permute.xlu1 %1832 }
 0x515   : > { %v1874_v20 = vadd.f32 %v1827_v12, %v1792_v26  ;;  %v1877_v62 = vadd.f32 %v1833_v51, %v1751_v60 }
 0x517   : > { %1975 = vrot.lane.b32.xlu0 %v1941_v45, %s2650_s30  ;;  %1985 = vrot.lane.b32.xlu1 %v1946_v52, %s2650_s30 }
 0x518   : > { %v1892_v4 = vpop.permute.xlu0 %1891  ;;  %v1898_v58 = vpop.permute.xlu1 %1897 }
 0x519   : > { %v1939_v14 = vadd.f32 %v1892_v4, %v1874_v20  ;;  %v1942_v63 = vadd.f32 %v1898_v58, %v1877_v62 }
 0x51b   : > { %1971 = vrot.lane.b32.xlu0 %v1939_v14, %s2650_s30  ;;  %1981 = vrot.lane.b32.xlu1 %v1944_v56, %s2650_s30 }
 0x51c   : > { %v1829_v25 = vpop.permute.xlu1 %1828 }
 0x51d   : > { %v1875_v23 = vadd.f32 %v1829_v25, %v1747_v43 }
 0x51f   : > { %1977 = vrot.lane.b32.xlu1 %v1942_v63, %s2650_s30 }
 0x520   : > { %v1894_v1 = vpop.permute.xlu1 %1893 }
 0x521   : > { %v1940_v27 = vadd.f32 %v1894_v1, %v1875_v23 }
 0x523   : > { %1973 = vrot.lane.b32.xlu1 %v1940_v27, %s2650_s30 }
 0x571   : > { %v2000_v28 = vpop.permute.xlu0 %1999 }
 0x572   : > { %2034 = vst.msk [vmem:[#allocation2 + $0x70] sm:$0xff] %vm2019_vm6, %v2000_v28 }
 0x575   : > { %v1996_v32 = vpop.permute.xlu0 %1995 }
 0x576   : > { %2032 = vst.msk [vmem:[#allocation2 + $0x60] sm:$0xff] %vm2019_vm6, %v1996_v32 }
 0x579   : > { %v1992_v9 = vpop.permute.xlu0 %1991  ;;  %v2002_v16 = vpop.permute.xlu1 %2001  ;;  %v2050_v17 = vld [vmem:[#allocation2 + $0x70] sm:$0xff] }
 0x57a   : > { %2030 = vst.msk [vmem:[#allocation2 + $0x50] sm:$0xff] %vm2019_vm6, %v1992_v9  ;;  %2035 = vst.msk [vmem:[#allocation2 + $0x78] sm:$0xff] %vm2019_vm6, %v2002_v16  ;;  %v2073_v54 = vmul.f32 %v3363_v19, %v2050_v17 }
 0x57c   : > { %v2096_v18 = vadd.f32 %v3371_v13, %v2073_v54 }
 0x57d   : > { %v1988_v50 = vpop.permute.xlu0 %1987  ;;  %v1998_v22 = vpop.permute.xlu1 %1997  ;;  %v2048_v29 = vld [vmem:[#allocation2 + $0x60] sm:$0xff] }
 0x57e   : > { %2028 = vst.msk [vmem:[#allocation2 + $0x40] sm:$0xff] %vm2019_vm6, %v1988_v50  ;;  %2033 = vst.msk [vmem:[#allocation2 + $0x68] sm:$0xff] %vm2019_vm6, %v1998_v22  ;;  %v2071_v35 = vmul.f32 %v3363_v19, %v2048_v29  ;;  %v2112_v38 = vmax.f32 %v2096_v18, 0.0 }
 0x580   : > { %v2094_v15 = vadd.f32 %v3371_v13, %v2071_v35 }
 0x581   : > { %v1984_v5 = vpop.permute.xlu0 %1983  ;;  %v1994_v48 = vpop.permute.xlu1 %1993  ;;  %v2051_v30 = vld [vmem:[#allocation2 + $0x78] sm:$0xff]  ;;  %v2046_v36 = vld [vmem:[#allocation2 + $0x50] sm:$0xff] }
 0x582   : > { %2026 = vst.msk [vmem:[#allocation2 + $0x30] sm:$0xff] %vm2019_vm6, %v1984_v5  ;;  %2031 = vst.msk [vmem:[#allocation2 + $0x58] sm:$0xff] %vm2019_vm6, %v1994_v48  ;;  %v2074_v33 = vmul.f32 %v3363_v19, %v2051_v30  ;;  %v2069_v8 = vmul.f32 %v3363_v19, %v2046_v36  ;;  %v2110_v6 = vmax.f32 %v2094_v15, 0.0 }
 0x584   : > { %v2097_v11 = vadd.f32 %v3371_v13, %v2074_v33  ;;  %v2092_v55 = vadd.f32 %v3371_v13, %v2069_v8 }
 0x585   : > { %v1980_v37 = vpop.permute.xlu0 %1979  ;;  %v1990_v24 = vpop.permute.xlu1 %1989  ;;  %v2049_v7 = vld [vmem:[#allocation2 + $0x68] sm:$0xff]  ;;  %v2044_v39 = vld [vmem:[#allocation2 + $0x40] sm:$0xff] }
 0x586   : > { %2024 = vst.msk [vmem:[#allocation2 + $0x20] sm:$0xff] %vm2019_vm6, %v1980_v37  ;;  %2029 = vst.msk [vmem:[#allocation2 + $0x48] sm:$0xff] %vm2019_vm6, %v1990_v24  ;;  %v2113_v10 = vmax.f32 %v2097_v11, 0.0  ;;  %v2072_v3 = vmul.f32 %v3363_v19, %v2049_v7  ;;  %v2067_v49 = vmul.f32 %v3363_v19, %v2044_v39  ;;  %v2108_v51 = vmax.f32 %v2092_v55, 0.0 }
 0x588   : > { %v2129_v40 = vpack.c.bf16 %v2113_v10, %v2112_v38  ;;  %v2095_v42 = vadd.f32 %v3371_v13, %v2072_v3  ;;  %v2090_v53 = vadd.f32 %v3371_v13, %v2067_v49 }
 0x589   : > { %v1976_v0 = vpop.permute.xlu0 %1975  ;;  %v1986_v59 = vpop.permute.xlu1 %1985  ;;  %v2047_v61 = vld [vmem:[#allocation2 + $0x58] sm:$0xff]  ;;  %v2042_v47 = vld [vmem:[#allocation2 + $0x30] sm:$0xff] }
 0x58a   : > { %2022 = vst.msk [vmem:[#allocation2 + $0x10] sm:$0xff] %vm2019_vm6, %v1976_v0  ;;  %2027 = vst.msk [vmem:[#allocation2 + $0x38] sm:$0xff] %vm2019_vm6, %v1986_v59  ;;  %2579 = vmatprep.subr.bf16.mxu0 %v2129_v40  ;;  %v2111_v34 = vmax.f32 %v2095_v42, 0.0  ;;  %v2070_v44 = vmul.f32 %v3363_v19, %v2047_v61  ;;  %v2065_v20 = vmul.f32 %v3363_v19, %v2042_v47  ;;  %v2106_v25 = vmax.f32 %v2090_v53, 0.0 }
 0x58b   : > { %2580 = vmatpush3.bf16.msra.mxu0 %v2129_v40  ;;  %v2634_v40 = vld [vmem:[%s3453_s15 + $0x8] sm:$0xff]  }
 0x58c   : > { %v2128_v46 = vpack.c.bf16 %v2111_v34, %v2110_v6  ;;  %v2093_v41 = vadd.f32 %v3371_v13, %v2070_v44  ;;  %v2088_v23 = vadd.f32 %v3371_v13, %v2065_v20 }
 0x58d   : > { %v1972_v57 = vpop.permute.xlu0 %1971  ;;  %v1982_v12 = vpop.permute.xlu1 %1981  ;;  %v2045_v52 = vld [vmem:[#allocation2 + $0x48] sm:$0xff]  ;;  %v2040_v4 = vld [vmem:[#allocation2 + $0x20] sm:$0xff] }
 0x58e   : > { %2020 = vst.msk [vmem:[#allocation2] sm:$0xff] %vm2019_vm6, %v1972_v57  ;;  %2025 = vst.msk [vmem:[#allocation2 + $0x28] sm:$0xff] %vm2019_vm6, %v1982_v12  ;;  %2581 = vmatprep.subr.bf16.mxu0 %v2128_v46  ;;  %v2109_v45 = vmax.f32 %v2093_v41, 0.0  ;;  %v2068_v26 = vmul.f32 %v3363_v19, %v2045_v52  ;;  %v2063_v62 = vmul.f32 %v3363_v19, %v2040_v4  ;;  %v2104_v32 = vmax.f32 %v2088_v23, 0.0 }
 0x58f   : > { %2582 = vmatpush3.bf16.msra.mxu0 %v2128_v46 }
 0x590   : > { %v2127_v58 = vpack.c.bf16 %v2109_v45, %v2108_v51  ;;  %v2091_v56 = vadd.f32 %v3371_v13, %v2068_v26  ;;  %v2086_v28 = vadd.f32 %v3371_v13, %v2063_v62 }
 0x591   : > { %v1978_v14 = vpop.permute.xlu1 %1977  ;;  %v2043_v60 = vld [vmem:[#allocation2 + $0x38] sm:$0xff]  ;;  %v2038_v1 = vld [vmem:[#allocation2 + $0x10] sm:$0xff] }
 0x592   : > { %2023 = vst.msk [vmem:[#allocation2 + $0x18] sm:$0xff] %vm2019_vm6, %v1978_v14  ;;  %2583 = vmatprep.subr.bf16.mxu0 %v2127_v58  ;;  %v2107_v63 = vmax.f32 %v2091_v56, 0.0  ;;  %v2066_v43 = vmul.f32 %v3363_v19, %v2043_v60  ;;  %v2061_v17 = vmul.f32 %v3363_v19, %v2038_v1  ;;  %v2102_v29 = vmax.f32 %v2086_v28, 0.0 }
 0x593   : > { %2584 = vmatpush3.bf16.msra.mxu0 %v2127_v58 }
 0x594   : > { %v2126_v27 = vpack.c.bf16 %v2107_v63, %v2106_v25  ;;  %v2089_v31 = vadd.f32 %v3371_v13, %v2066_v43  ;;  %v2084_v33 = vadd.f32 %v3371_v13, %v2061_v17 }
 0x595   : > { %v1974_v2 = vpop.permute.xlu1 %1973  ;;  %v2041_v21 = vld [vmem:[#allocation2 + $0x28] sm:$0xff]  ;;  %v2036_v50 = vld [vmem:[#allocation2] sm:$0xff] }
 0x596   : > { %2021 = vst.msk [vmem:[#allocation2 + $0x8] sm:$0xff] %vm2019_vm6, %v1974_v2  ;;  %2585 = vmatprep.subr.bf16.mxu0 %v2126_v27  ;;  %v2105_v9 = vmax.f32 %v2089_v31, 0.0  ;;  %v2064_v16 = vmul.f32 %v3363_v19, %v2041_v21  ;;  %v2059_v18 = vmul.f32 %v3363_v19, %v2036_v50  ;;  %v2100_v37 = vmax.f32 %v2084_v33, 0.0 }
 0x597   : > { %2586 = vmatpush3.bf16.msra.mxu0 %v2126_v27 }
 0x598   : > { %v2125_v22 = vpack.c.bf16 %v2105_v9, %v2104_v32  ;;  %v2087_v54 = vadd.f32 %v3371_v13, %v2064_v16  ;;  %v2082_v8 = vadd.f32 %v3371_v13, %v2059_v18 }
 0x599   : > { %v2039_v5 = vld [vmem:[#allocation2 + $0x18] sm:$0xff] }
 0x59a   : > { %2587 = vmatprep.subr.bf16.mxu0 %v2125_v22  ;;  %v2103_v48 = vmax.f32 %v2087_v54, 0.0  ;;  %v2062_v30 = vmul.f32 %v3363_v19, %v2039_v5  ;;  %v2098_v3 = vmax.f32 %v2082_v8, 0.0 }
 0x59b   : > { %2588 = vmatpush3.bf16.msra.mxu0 %v2125_v22 }
 0x59c   : > { %v2124_v35 = vpack.c.bf16 %v2103_v48, %v2102_v29  ;;  %v2085_v36 = vadd.f32 %v3371_v13, %v2062_v30 }
 0x59d   : > { %v2037_v11 = vld [vmem:[#allocation2 + $0x8] sm:$0xff] }
 0x59e   : > { %2589 = vmatprep.subr.bf16.mxu0 %v2124_v35  ;;  %v2101_v24 = vmax.f32 %v2085_v36, 0.0  ;;  %v2060_v7 = vmul.f32 %v3363_v19, %v2037_v11  ;;  %v2635_v19 = vld [vmem:[%s3453_s15 + $0x10] sm:$0xff]  }
 0x59f   : > { %2590 = vmatpush3.bf16.msra.mxu0 %v2124_v35 }
 0x5a0   : > { %v2123_v38 = vpack.c.bf16 %v2101_v24, %v2100_v37  ;;  %v2083_v10 = vadd.f32 %v3371_v13, %v2060_v7  ;;  %v2636_v13 = vld [vmem:[%s3453_s15 + $0x18] sm:$0xff]  }
 0x5a2   : > { %2591 = vmatprep.subr.bf16.mxu0 %v2123_v38  ;;  %v2099_v15 = vmax.f32 %v2083_v10, 0.0 }
 0x5a3   : > { %2592 = vmatpush3.bf16.msra.mxu0 %v2123_v38 }
 0x5a4   : > { %v2122_v39 = vpack.c.bf16 %v2099_v15, %v2098_v3 }
 0x5a6   : > { %2593 = vmatprep.subr.bf16.mxu0 %v2122_v39 }
 0x5a7   : > { %2594 = vmatpush3.bf16.msra.mxu0 %v2122_v39 }
 0x5aa   : > { %2596 = vmatmul.mubr.bf16.vlgmr.msra.gmra.mxu0 %v2634_v40 }
 0x5ab   : > { %2599 = vmatprep.mubr.bf16.mxu0 %v2635_v19 }
 0x5b2   : > { %2600 = vmatmul.mubr.bf16.gmra.mxu0 %v2636_v13 }
 0x66a   : > { %v2597_v42 = vpop.f32.mrf.mxu0 }
 0x66c   : > { %v2188_v0 = vpop.f32.mrf.mxu0 }
 0x66e   : > { %v2598_v59 = vpop.f32.mrf.mxu0 }
 0x66f   : > { %v2220_v6 = vpack.c.bf16 %v2598_v59, %v2597_v42 }
 0x670   : > { %v2191_v61 = vpop.f32.mrf.mxu0 }
 0x671   : > { %v2219_v55 = vpack.c.bf16 %v2191_v61, %v2188_v0 }
 0x672   : > { %v2601_v34 = vpop.f32.mrf.mxu0 }
 0x673   : > { %2607 = vmatprep.mubr.msk.bf16.mxu1 %vm2239_vm7, %v2219_v55 }
 0x674   : > { %v2204_v44 = vpop.f32.mrf.mxu0  ;;  %2608 = vmatmul.mubr.msk.bf16.vlgmr.msra.gmra.mxu1 %vm2239_vm7, %v2220_v6 }
 0x676   : > { %v2602_v49 = vpop.f32.mrf.mxu0 }
 0x677   : > { %v2222_v41 = vpack.c.bf16 %v2602_v49, %v2601_v34 }
 0x678   : > { %v2207_v47 = vpop.f32.mrf.mxu0 }
 0x679   : > { %v2221_v46 = vpack.c.bf16 %v2207_v47, %v2204_v44 }
 0x67b   : > { %2611 = vmatprep.mubr.msk.bf16.mxu1 %vm2239_vm7, %v2221_v46 }
 0x67c   : > { %2612 = vmatmul.mubr.msk.bf16.gmra.mxu1 %vm2239_vm7, %v2222_v41 }
 0x734   : > { %v2609_v57 = vpop.f32.mrf.mxu1 }
 0x735   : > { %2319 = vst.msk [vmem:[%s548_s29 + $0x10] sm:$0xff] %vm566_vm0, %v2609_v57 }
 0x736   : > { %v2286_v12 = vpop.f32.mrf.mxu1 }
 0x737   : > { %2317 = vst.msk [vmem:[%s548_s29] sm:$0xff] %vm566_vm0, %v2286_v12 }
 0x738   : > { %v2610_v51 = vpop.f32.mrf.mxu1 }
 0x739   : > { %2320 = vst.msk [vmem:[%s548_s29 + $0x18] sm:$0xff] %vm566_vm0, %v2610_v51 }
 0x73a   : > { %v2289_v52 = vpop.f32.mrf.mxu1 }
 0x73b   : > { %2318 = vst.msk [vmem:[%s548_s29 + $0x8] sm:$0xff] %vm566_vm0, %v2289_v52 }
 0x73c   : > { %v2613_v45 = vpop.f32.mrf.mxu1 }
 0x73d   : > { %2323 = vst.msk [vmem:[%s548_s29 + $0x30] sm:$0xff] %vm566_vm0, %v2613_v45 }
 0x73e   : > { %v2302_v26 = vpop.f32.mrf.mxu1 }
 0x73f   : > { %2321 = vst.msk [vmem:[%s548_s29 + $0x20] sm:$0xff] %vm566_vm0, %v2302_v26 }
 0x740   : > { %v2614_v53 = vpop.f32.mrf.mxu1 }
 0x741   : > { %2324 = vst.msk [vmem:[%s548_s29 + $0x38] sm:$0xff] %vm566_vm0, %v2614_v53 }
 0x742   : > { %v2305_v20 = vpop.f32.mrf.mxu1 }
 0x743   : > { %2322 = vst.msk [vmem:[%s548_s29 + $0x28] sm:$0xff] %vm566_vm0, %v2305_v20 }
 0x744 PF: > { %s27_s24 = sadd.s32 1, %s2645_s24  }
 0x745   : > { %p24_p4 = scmp.ge.s32.totalorder %s27_s24, 4  }
 0x747   :  { %26 = sbr.rel (!%p24_p4) target bundleno = 3 (0x3), region = 118 }

// kernel: densenet_forward.10
= control target key start
LH: loop header
LB: loop body
LE: loop exit
PB: predicated region body
PF: predicated region fallthrough
CT: control target
= control target key end

     0   :  { %s1934_s24 = smov 0   ;;  %s2168_s0 = inlined_call_operand.vmem [shape: f32[2,64,16], index: 0, kind: input, shape index: {}]   ;;  %s2169_s1 = inlined_call_operand.vmem [shape: f32[1,16], index: 1, kind: input, shape index: {}]   ;;  %s2170_s2 = inlined_call_operand.vmem [shape: f32[1,16], index: 2, kind: input, shape index: {}]   ;;  %s2171_s3 = inlined_call_operand.vmem [shape: bf16[16,16], index: 3, kind: input, shape index: {}]   ;;  %s2172_s4 = inlined_call_operand.vmem [shape: f32[1,16], index: 4, kind: input, shape index: {}]   ;;  %s2173_s5 = inlined_call_operand.vmem [shape: f32[1,16], index: 5, kind: input, shape index: {}]   ;;  %s2174_s6 = inlined_call_operand.vmem [shape: bf16[16,24], index: 6, kind: input, shape index: {}]   ;;  %s2175_s7 = inlined_call_operand.vmem [shape: f32[1,24], index: 7, kind: input, shape index: {}]   ;;  %s2176_s8 = inlined_call_operand.vmem [shape: f32[1,24], index: 8, kind: input, shape index: {}]   ;;  %s2177_s9 = inlined_call_operand.vmem [shape: bf16[24,16], index: 9, kind: input, shape index: {}]   ;;  %s2178_s10 = inlined_call_operand.vmem [shape: f32[1,16], index: 10, kind: input, shape index: {}]   ;;  %s2179_s11 = inlined_call_operand.vmem [shape: f32[1,16], index: 11, kind: input, shape index: {}]   ;;  %s2180_s12 = inlined_call_operand.vmem [shape: bf16[16,24], index: 12, kind: input, shape index: {}]   ;;  %s2181_s13 = inlined_call_operand.vmem [shape: f32[1,32], index: 13, kind: input, shape index: {}]   ;;  %s2182_s14 = inlined_call_operand.vmem [shape: f32[1,32], index: 14, kind: input, shape index: {}]   ;;  %s2183_s15 = inlined_call_operand.vmem [shape: bf16[32,64], index: 15, kind: input, shape index: {}]   ;;  %s2184_s16 = inlined_call_operand.vmem [shape: bf16[32,16], index: 16, kind: input, shape index: {}]   ;;  %s2185_s17 = inlined_call_operand.vmem [shape: f32[2,32,16], index: 17, kind: output, shape index: {}]  }
   0x1   :  { %2186 = sst [smem:[#allocation3_spill]] %s2168_s0 }
   0x2   :  { %2187 = sst [smem:[#allocation4_spill]] %s2169_s1 }
   0x3 LB: > { %s1665_s25 = sadd.s32 4294967295, %s1838_s24   ;;  %p1669_p0 = scmp.ge.s32.totalorder %s1838_s24, 1  ;;  %s1838_s24 = sphi %s1934_s24, %s27_s24  }
   0x4   : > { %p487_p1 = scmp.lt.s32.totalorder %s1838_s24, 3 }
   0x6   : > { %p488_p2 = pnand %p1669_p0, %p487_p1 }
   0x7   : > { %p539_p3 = scmp.lt.s32.totalorder (!%p488_p2), %s1665_s25, 1  ;;  %s2188_s30 = sld [smem:[#allocation3_spill]] (!%p488_p2) }
   0x8   : > { %491 = sbr.rel (%p488_p2) target bundleno = 1796 (0x704), region = 88  ;;  %s2189_s20 = sld [smem:[#allocation4_spill]] (!%p488_p2) }
   0x9   : > { %s1842_s19 = smov (!%p488_p2), 16  }
   0xd   : > { %v1823_v0 = vld [vmem:[%s2171_s3] sm:$0xff]   ;;  %s2191_s25 = smov (!%p539_p3, %s1665_s25), 1  ;;  %vm558_vm0 = vcmask 130048   ;;  %vm862_vm1 = vcmask 1046528   ;;  %vm837_vm2 = vcmask 1040384   ;;  %vm1061_vm3 = vcmask 1043456  }
   0xe   : > { %1748 = vmatprep.subr.bf16.mxu0 %v1823_v0  ;;  %s1715_s28 = sshll.u32 %s2191_s25, 6  ;;  %v1674_v9 = vld [vmem:[%s2189_s20] ss:$0 sm:$0xff]  ;;  %vm977_vm4 = vcmask 195712   ;;  %vm1048_vm5 = vcmask 195584   ;;  %vm1476_vm6 = vcmask 523264  }
   0xf   : > { %1749 = vmatpush3.bf16.msra.mxu0 %v1823_v0  ;;  %s543_s18 = scalar_lea.vmem %s2188_s30, %s1715_s28  ;;  %v1675_v10 = vld [vmem:[%s2170_s2] ss:$0 sm:$0xff]  ;;  %s1840_s30 = smov 120   ;;  %vm1403_vm7 = vcmask 261312   ;;  %vm1550_vm8 = vcmask 261120  }
  0x10   : > { %v550_v1 = vld [vmem:[%s543_s18] sm:$0xff]  ;;  %v551_v2 = vld [vmem:[%s543_s18 + $0x8] sm:$0xff]  ;;  %v552_v3 = vld [vmem:[%s543_s18 + $0x10] sm:$0xff] }
  0x11   : > { %559 = vst.msk [vmem:[#allocation2] sm:$0xff] %vm558_vm0, %v550_v1  ;;  %560 = vst.msk [vmem:[#allocation2 + $0x8] sm:$0xff] %vm558_vm0, %v551_v2  ;;  %v553_v4 = vld [vmem:[%s543_s18 + $0x18] sm:$0xff]  ;;  %v554_v5 = vld [vmem:[%s543_s18 + $0x20] sm:$0xff] }
  0x12   : > { %561 = vst.msk [vmem:[#allocation2 + $0x10] sm:$0xff] %vm558_vm0, %v552_v3  ;;  %v555_v6 = vld [vmem:[%s543_s18 + $0x28] sm:$0xff]  ;;  %562 = vst.msk [vmem:[#allocation2 + $0x18] sm:$0xff] %vm558_vm0, %v553_v4  ;;  %v556_v7 = vld [vmem:[%s543_s18 + $0x30] sm:$0xff] }
  0x13   : > { %563 = vst.msk [vmem:[#allocation2 + $0x20] sm:$0xff] %vm558_vm0, %v554_v5  ;;  %564 = vst.msk [vmem:[#allocation2 + $0x28] sm:$0xff] %vm558_vm0, %v555_v6  ;;  %v557_v8 = vld [vmem:[%s543_s18 + $0x38] sm:$0xff]  ;;  %v1824_v47 = vld [vmem:[%s2174_s6] sm:$0xff]   ;;  %s1841_s18 = smov 112  }
  0x14   : > { %565 = vst.msk [vmem:[#allocation2 + $0x30] sm:$0xff] %vm558_vm0, %v556_v7  ;;  %566 = vst.msk [vmem:[#allocation2 + $0x38] sm:$0xff] %vm558_vm0, %v557_v8  ;;  %1758 = vmatprep.subr.bf16.mxu1 %v1824_v47  ;;  %v1681_v49 = vld [vmem:[%s2172_s4] ss:$0 sm:$0xff] }
  0x15   : > { %1759 = vmatpush3.bf16.msra.mxu1 %v1824_v47  ;;  %v1682_v54 = vld [vmem:[%s2173_s5] ss:$0 sm:$0xff] }
  0x18   : > { %v567_v11 = vld [vmem:[#allocation2] sm:$0xff]  ;;  %v568_v12 = vld [vmem:[#allocation2 + $0x8] sm:$0xff] }
  0x19   : > { %v569_v13 = vld [vmem:[#allocation2 + $0x10] sm:$0xff]  ;;  %v582_v14 = vmul.f32 %v1674_v9, %v567_v11  ;;  %v583_v15 = vmul.f32 %v1674_v9, %v568_v12  ;;  %v570_v16 = vld [vmem:[#allocation2 + $0x18] sm:$0xff] }
  0x1a   : > { %v584_v17 = vmul.f32 %v1674_v9, %v569_v13  ;;  %v571_v18 = vld [vmem:[#allocation2 + $0x20] sm:$0xff]  ;;  %v572_v19 = vld [vmem:[#allocation2 + $0x28] sm:$0xff]  ;;  %v585_v20 = vmul.f32 %v1674_v9, %v570_v16 }
  0x1b   : > { %v586_v21 = vmul.f32 %v1674_v9, %v571_v18  ;;  %v587_v22 = vmul.f32 %v1674_v9, %v572_v19  ;;  %v573_v23 = vld [vmem:[#allocation2 + $0x30] sm:$0xff]  ;;  %v574_v24 = vld [vmem:[#allocation2 + $0x38] sm:$0xff]  ;;  %v597_v25 = vadd.f32 %v1675_v10, %v582_v14  ;;  %v598_v26 = vadd.f32 %v1675_v10, %v583_v15 }
  0x1c   : > { %v599_v27 = vadd.f32 %v1675_v10, %v584_v17  ;;  %v588_v28 = vmul.f32 %v1674_v9, %v573_v23  ;;  %v600_v29 = vadd.f32 %v1675_v10, %v585_v20  ;;  %v589_v32 = vmul.f32 %v1674_v9, %v574_v24 }
  0x1d   : > { %v601_v30 = vadd.f32 %v1675_v10, %v586_v21  ;;  %v602_v31 = vadd.f32 %v1675_v10, %v587_v22  ;;  %v605_v33 = vmax.f32 %v597_v25, 0.0  ;;  %v606_v34 = vmax.f32 %v598_v26, 0.0 }
  0x1e   : > { %v607_v35 = vmax.f32 %v599_v27, 0.0  ;;  %v603_v36 = vadd.f32 %v1675_v10, %v588_v28  ;;  %v608_v37 = vmax.f32 %v600_v29, 0.0  ;;  %v604_v40 = vadd.f32 %v1675_v10, %v589_v32 }
  0x1f   : > { %v609_v38 = vmax.f32 %v601_v30, 0.0  ;;  %v610_v39 = vmax.f32 %v602_v31, 0.0  ;;  %v613_v41 = vpack.c.bf16 %v606_v34, %v605_v33 }
  0x20   : > { %v614_v42 = vpack.c.bf16 %v608_v37, %v607_v35  ;;  %v611_v44 = vmax.f32 %v603_v36, 0.0  ;;  %v612_v45 = vmax.f32 %v604_v40, 0.0 }
  0x21   : > { %v615_v43 = vpack.c.bf16 %v610_v39, %v609_v38  ;;  %1750 = vmatprep.mubr.msk.bf16.mxu0 %vm558_vm0, %v613_v41 }
  0x22   : > { %1751 = vmatmul.mubr.msk.bf16.vlgmr.msra.gmra.mxu0 %vm558_vm0, %v614_v42  ;;  %v616_v46 = vpack.c.bf16 %v612_v45, %v611_v44 }
  0x23   : > { %1754 = vmatprep.mubr.msk.bf16.mxu0 %vm558_vm0, %v615_v43 }
  0x2a   : > { %1755 = vmatmul.mubr.msk.bf16.gmra.mxu0 %vm558_vm0, %v616_v46 }
  0xe2   : > { %v1752_v48 = vpop.f32.mrf.mxu0 }
  0xe3   : > { %v711_v52 = vmul.f32 %v1752_v48, %v1681_v49 }
  0xe4   : > { %v671_v50 = vpop.f32.mrf.mxu0 }
  0xe5   : > { %v709_v51 = vmul.f32 %v1681_v49, %v671_v50  ;;  %v726_v60 = vadd.f32 %v1682_v54, %v711_v52 }
  0xe6   : > { %v1753_v53 = vpop.f32.mrf.mxu0 }
  0xe7   : > { %v712_v55 = vmul.f32 %v1753_v53, %v1681_v49  ;;  %v724_v57 = vadd.f32 %v1682_v54, %v709_v51  ;;  %v734_v4 = vmax.f32 %v726_v60, 0.0 }
  0xe8   : > { %v674_v56 = vpop.f32.mrf.mxu0 }
  0xe9   : > { %v727_v58 = vadd.f32 %v1682_v54, %v712_v55  ;;  %v710_v59 = vmul.f32 %v1681_v49, %v674_v56  ;;  %v732_v1 = vmax.f32 %v724_v57, 0.0 }
  0xea   : > { %v1756_v61 = vpop.f32.mrf.mxu0 }
  0xeb   : > { %v725_v62 = vadd.f32 %v1682_v54, %v710_v59  ;;  %v735_v63 = vmax.f32 %v727_v58, 0.0  ;;  %v715_v5 = vmul.f32 %v1756_v61, %v1681_v49 }
  0xec   : > { %v687_v0 = vpop.f32.mrf.mxu0 }
  0xed   : > { %v733_v2 = vmax.f32 %v725_v62, 0.0  ;;  %v713_v3 = vmul.f32 %v1681_v49, %v687_v0  ;;  %v741_v9 = vpack.c.bf16 %v735_v63, %v734_v4  ;;  %v730_v14 = vadd.f32 %v1682_v54, %v715_v5 }
  0xee   : > { %v1757_v6 = vpop.f32.mrf.mxu0 }
  0xef   : > { %v716_v7 = vmul.f32 %v1757_v6, %v1681_v49  ;;  %v740_v8 = vpack.c.bf16 %v733_v2, %v732_v1  ;;  %v728_v11 = vadd.f32 %v1682_v54, %v713_v3  ;;  %v738_v19 = vmax.f32 %v730_v14, 0.0  ;;  %v1825_v2 = vld [vmem:[%s2177_s9 + $0x8] ss:$0 sps:$4 sm:$0xff]   ;;  %v1826_v14 = vld [vmem:[%s2177_s9] sm:$0xff]  }
  0xf0   : > { %v690_v10 = vpop.f32.mrf.mxu0  ;;  %1810 = vmatprep.subr.msk.bf16.mxu0 %vm1061_vm3, %v1825_v2  ;;  %v1063_v5 = vsel %vm1061_vm3, %v1825_v2, 0 }
  0xf1   : > { %v731_v12 = vadd.f32 %v1682_v54, %v716_v7  ;;  %v714_v13 = vmul.f32 %v1681_v49, %v690_v10  ;;  %1760 = vmatprep.mubr.msk.bf16.mxu1 %vm558_vm0, %v740_v8  ;;  %v736_v17 = vmax.f32 %v728_v11, 0.0  ;;  %1769 = vmatpush3.bf16.msra.mxu0 %v1063_v5 }
  0xf2   : > { %1761 = vmatmul.mubr.msk.bf16.vlgmr.msra.gmra.mxu1 %vm558_vm0, %v741_v9  ;;  %1770 = vmatprep.subr.bf16.mxu0 %v1826_v14 }
  0xf3   : > { %v729_v15 = vadd.f32 %v1682_v54, %v714_v13  ;;  %v739_v16 = vmax.f32 %v731_v12, 0.0 }
  0xf5   : > { %v737_v18 = vmax.f32 %v729_v15, 0.0  ;;  %v743_v21 = vpack.c.bf16 %v739_v16, %v738_v19  ;;  %1771 = vmatpush3.bf16.msra.mxu0 %v1826_v14 }
  0xf7   : > { %v742_v20 = vpack.c.bf16 %v737_v18, %v736_v17 }
  0xf9   : > { %1764 = vmatprep.mubr.msk.bf16.mxu1 %vm558_vm0, %v742_v20 }
  0xfa   : > { %1765 = vmatmul.mubr.msk.bf16.gmra.mxu1 %vm558_vm0, %v743_v21 }
 0x1b2   : > { %v1762_v22 = vpop.f32.mrf.mxu1 }
 0x1b3   : > { %884 = vrot.lane.b32.xlu1 %v1762_v22, %s1840_s30  ;;  %v841_v25 = vrot.slane %v1762_v22, 7  ;;  %v866_v29 = vrot.slane %v1762_v22, 1 }
 0x1b4   : > { %v1983_v23 = vpop.f32.mrf.mxu1 }
 0x1b5   : > { %880 = vrot.lane.b32.xlu0 %v1983_v23, %s1840_s30  ;;  %v838_v34 = vrot.slane %v1983_v23, 7  ;;  %v863_v46 = vrot.slane %v1983_v23, 1 }
 0x1b6   : > { %v1763_v24 = vpop.f32.mrf.mxu1 }
 0x1b7   : > { %v843_v26 = vrot.slane %v1763_v24, 7  ;;  %886 = vrot.lane.b32.xlu1 %v1763_v24, %s1840_s30  ;;  %v868_v27 = vrot.slane %v1763_v24, 1  ;;  %v861_v6 = vsel %vm837_vm2, 0.0, %v838_v34 }
 0x1b8   : > { %v801_v28 = vpop.f32.mrf.mxu1 }
 0x1b9   : > { %v839_v30 = vrot.slane %v801_v28, 7  ;;  %v864_v31 = vrot.slane %v801_v28, 1  ;;  %882 = vrot.lane.b32.xlu0 %v801_v28, %s1840_s30  ;;  %v844_v32 = vsel %vm837_vm2, %v841_v25, %v843_v26  ;;  %v869_v37 = vsel %vm862_vm1, %v866_v29, %v868_v27 }
 0x1ba   : > { %v1990_v33 = vpop.f32.mrf.mxu1 }
 0x1bb   : > { %v867_v35 = vsel %vm862_vm1, %v864_v31, %v866_v29  ;;  %v842_v38 = vsel %vm837_vm2, %v839_v30, %v841_v25  ;;  %v840_v39 = vsel %vm837_vm2, %v838_v34, %v839_v30  ;;  %v849_v45 = vrot.slane %v1990_v33, 7 }
 0x1bc   : > { %915 = vrot.lane.b32.xlu1 %v867_v35, %s1841_s18  ;;  %v1995_v36 = vpop.f32.mrf.mxu1  ;;  %v865_v50 = vsel %vm862_vm1, %v863_v46, %v864_v31  ;;  %v874_v52 = vrot.slane %v1990_v33, 1 }
 0x1bd   : > { %v845_v40 = vrot.slane %v1995_v36, 7  ;;  %917 = vrot.lane.b32.xlu0 %v869_v37, %s1841_s18  ;;  %v870_v42 = vrot.slane %v1995_v36, 1  ;;  %v1688_v37 = vld [vmem:[%s2175_s7] ss:$0 sm:$0xff] }
 0x1be   : > { %v1767_v41 = vpop.f32.mrf.mxu1 }
 0x1bf   : > { %v851_v43 = vrot.slane %v1767_v41, 7  ;;  %v846_v44 = vsel %vm837_vm2, %v843_v26, %v845_v40  ;;  %v871_v48 = vsel %vm862_vm1, %v868_v27, %v870_v42  ;;  %v876_v53 = vrot.slane %v1767_v41, 1 }
 0x1c0   : > { %894 = vrot.lane.b32.xlu1 %v1767_v41, %s1840_s30  ;;  %v817_v49 = vpop.f32.mrf.mxu1 }
 0x1c1   : > { %892 = vrot.lane.b32.xlu0 %v1990_v33, %s1840_s30  ;;  %v852_v47 = vsel %vm837_vm2, %v849_v45, %v851_v43  ;;  %v872_v51 = vrot.slane %v817_v49, 1  ;;  %v879_v56 = vsel %vm862_vm1, %v876_v53, 0.0  ;;  %v877_v57 = vsel %vm862_vm1, %v874_v52, %v876_v53 }
 0x1c2   : > { %v847_v12 = vrot.slane %v817_v49, 7 }
 0x1c3   : > { %v875_v54 = vsel %vm862_vm1, %v872_v51, %v874_v52  ;;  %v873_v55 = vsel %vm862_vm1, %v870_v42, %v872_v51 }
 0x1c4   : > { %919 = vrot.lane.b32.xlu1 %v871_v48, %s1841_s18  ;;  %v848_v19 = vsel %vm837_vm2, %v845_v40, %v847_v12  ;;  %v850_v27 = vsel %vm837_vm2, %v847_v12, %v849_v45  ;;  %v1689_v40 = vld [vmem:[%s2176_s8] ss:$0 sm:$0xff] }
 0x1c5   : > { %913 = vrot.lane.b32.xlu0 %v865_v50, %s1841_s18 }
 0x1c8   : > { %890 = vrot.lane.b32.xlu1 %v817_v49, %s1840_s30 }
 0x1c9   : > { %888 = vrot.lane.b32.xlu0 %v1995_v36, %s1840_s30 }
 0x1cc   : > { %923 = vrot.lane.b32.xlu1 %v875_v54, %s1841_s18 }
 0x1cd   : > { %921 = vrot.lane.b32.xlu0 %v873_v55, %s1841_s18 }
 0x1d0   : > { %927 = vrot.lane.b32.xlu1 %v879_v56, %s1841_s18 }
 0x1d1   : > { %925 = vrot.lane.b32.xlu0 %v877_v57, %s1841_s18 }
 0x225   : > { %v885_v58 = vpop.permute.xlu1 %884 }
 0x226   : > { %v906_v15 = vadd.f32 %v885_v58, %v842_v38 }
 0x227   : > { %v881_v59 = vpop.permute.xlu0 %880 }
 0x228   : > { %v904_v8 = vadd.f32 %v881_v59, %v861_v6 }
 0x229   : > { %v887_v60 = vpop.permute.xlu1 %886 }
 0x22a   : > { %v907_v7 = vadd.f32 %v887_v60, %v844_v32 }
 0x22b   : > { %v883_v61 = vpop.permute.xlu0 %882 }
 0x22c   : > { %v905_v62 = vadd.f32 %v883_v61, %v840_v39 }
 0x22e   : > { %v916_v63 = vpop.permute.xlu1 %915 }
 0x22f   : > { %v938_v0 = vadd.f32 %v916_v63, %v905_v62  ;;  %v918_v1 = vpop.permute.xlu0 %917 }
 0x230   : > { %v939_v18 = vadd.f32 %v918_v1, %v906_v15  ;;  %v1827_v15 = vld [vmem:[%s2180_s12] sm:$0xff]  }
 0x231   : > { %955 = vrot.lane.b32.xlu1 %v938_v0, %s1842_s19  ;;  %1780 = vmatprep.subr.bf16.mxu1 %v1827_v15 }
 0x232   : > { %v895_v3 = vpop.permute.xlu1 %894  ;;  %1781 = vmatpush3.bf16.msra.mxu1 %v1827_v15 }
 0x233   : > { %v893_v4 = vpop.permute.xlu0 %892  ;;  %v911_v26 = vadd.f32 %v895_v3, %v852_v47 }
 0x234   : > { %v910_v28 = vadd.f32 %v893_v4, %v850_v27 }
 0x236   : > { %v920_v9 = vpop.permute.xlu1 %919 }
 0x237   : > { %v940_v10 = vadd.f32 %v920_v9, %v907_v7  ;;  %v914_v11 = vpop.permute.xlu0 %913 }
 0x238   : > { %v937_v13 = vadd.f32 %v914_v11, %v904_v8 }
 0x239   : > { %959 = vrot.lane.b32.xlu1 %v940_v10, %s1842_s19 }
 0x23a   : > { %v891_v16 = vpop.permute.xlu1 %890  ;;  %953 = vrot.lane.b32.xlu0 %v937_v13, %s1842_s19 }
 0x23b   : > { %v889_v17 = vpop.permute.xlu0 %888  ;;  %v909_v20 = vadd.f32 %v891_v16, %v848_v19 }
 0x23c   : > { %v908_v21 = vadd.f32 %v889_v17, %v846_v44  ;;  %v1696_v17 = vld [vmem:[%s2178_s10] ss:$0 sm:$0xff] }
 0x23e   : > { %v924_v22 = vpop.permute.xlu1 %923  ;;  %957 = vrot.lane.b32.xlu0 %v939_v18, %s1842_s19 }
 0x23f   : > { %v942_v23 = vadd.f32 %v924_v22, %v909_v20  ;;  %v922_v24 = vpop.permute.xlu0 %921  ;;  %v1697_v22 = vld [vmem:[%s2179_s11] ss:$0 sm:$0xff] }
 0x240   : > { %v941_v25 = vadd.f32 %v922_v24, %v908_v21 }
 0x241   : > { %963 = vrot.lane.b32.xlu1 %v942_v23, %s1842_s19 }
 0x242   : > { %v928_v29 = vpop.permute.xlu1 %927  ;;  %961 = vrot.lane.b32.xlu0 %v941_v25, %s1842_s19 }
 0x243   : > { %v944_v30 = vadd.f32 %v928_v29, %v911_v26  ;;  %v926_v31 = vpop.permute.xlu0 %925 }
 0x244   : > { %v943_v32 = vadd.f32 %v926_v31, %v910_v28 }
 0x245   : > { %967 = vrot.lane.b32.xlu1 %v944_v30, %s1842_s19 }
 0x246   : > { %965 = vrot.lane.b32.xlu0 %v943_v32, %s1842_s19 }
 0x2a3   : > { %v956_v34 = vpop.permute.xlu1 %955 }
 0x2a4   : > { %979 = vst.msk [vmem:[#allocation2 + $0x8] sm:$0xff] %vm977_vm4, %v956_v34 }
 0x2ab   : > { %v960_v33 = vpop.permute.xlu1 %959  ;;  %v987_v36 = vld [vmem:[#allocation2 + $0x8] sm:$0xff] }
 0x2ac   : > { %981 = vst.msk [vmem:[#allocation2 + $0x18] sm:$0xff] %vm977_vm4, %v960_v33  ;;  %v954_v35 = vpop.permute.xlu0 %953  ;;  %v1002_v39 = vmul.f32 %v1688_v37, %v987_v36 }
 0x2ad   : > { %978 = vst.msk [vmem:[#allocation2] sm:$0xff] %vm977_vm4, %v954_v35 }
 0x2ae   : > { %v1017_v46 = vadd.f32 %v1689_v40, %v1002_v39 }
 0x2b0   : > { %v958_v38 = vpop.permute.xlu0 %957  ;;  %v1025_v53 = vmax.f32 %v1017_v46, 0.0 }
 0x2b1   : > { %980 = vst.msk [vmem:[#allocation2 + $0x10] sm:$0xff] %vm977_vm4, %v958_v38 }
 0x2b3   : > { %v964_v41 = vpop.permute.xlu1 %963  ;;  %v989_v42 = vld [vmem:[#allocation2 + $0x18] sm:$0xff] }
 0x2b4   : > { %983 = vst.msk [vmem:[#allocation2 + $0x28] sm:$0xff] %vm977_vm4, %v964_v41  ;;  %v962_v43 = vpop.permute.xlu0 %961  ;;  %v986_v44 = vld [vmem:[#allocation2] sm:$0xff]  ;;  %v1004_v47 = vmul.f32 %v1688_v37, %v989_v42 }
 0x2b5   : > { %982 = vst.msk [vmem:[#allocation2 + $0x20] sm:$0xff] %vm977_vm4, %v962_v43  ;;  %v1001_v45 = vmul.f32 %v1688_v37, %v986_v44 }
 0x2b6   : > { %v1019_v55 = vadd.f32 %v1689_v40, %v1004_v47 }
 0x2b7   : > { %v968_v48 = vpop.permute.xlu1 %967  ;;  %v1016_v49 = vadd.f32 %v1689_v40, %v1001_v45 }
 0x2b8   : > { %985 = vst.msk [vmem:[#allocation2 + $0x38] sm:$0xff] %vm977_vm4, %v968_v48  ;;  %v966_v50 = vpop.permute.xlu0 %965  ;;  %v988_v51 = vld [vmem:[#allocation2 + $0x10] sm:$0xff]  ;;  %v1027_v62 = vmax.f32 %v1019_v55, 0.0 }
 0x2b9   : > { %984 = vst.msk [vmem:[#allocation2 + $0x30] sm:$0xff] %vm977_vm4, %v966_v50  ;;  %v1024_v52 = vmax.f32 %v1016_v49, 0.0  ;;  %v1003_v54 = vmul.f32 %v1688_v37, %v988_v51 }
 0x2bb   : > { %v1032_v56 = vpack.c.bf16 %v1025_v53, %v1024_v52  ;;  %v1018_v57 = vadd.f32 %v1689_v40, %v1003_v54  ;;  %v991_v58 = vld [vmem:[#allocation2 + $0x28] sm:$0xff] }
 0x2bc   : > { %v990_v59 = vld [vmem:[#allocation2 + $0x20] sm:$0xff]  ;;  %v1006_v60 = vmul.f32 %v1688_v37, %v991_v58 }
 0x2bd   : > { %1772 = vmatprep.mubr.msk.bf16.mxu0 %vm1048_vm5, %v1032_v56  ;;  %v1026_v61 = vmax.f32 %v1018_v57, 0.0  ;;  %v1005_v63 = vmul.f32 %v1688_v37, %v990_v59 }
 0x2be   : > { %v1021_v0 = vadd.f32 %v1689_v40, %v1006_v60 }
 0x2bf   : > { %v1033_v1 = vpack.c.bf16 %v1027_v62, %v1026_v61  ;;  %v1020_v2 = vadd.f32 %v1689_v40, %v1005_v63  ;;  %v993_v3 = vld [vmem:[#allocation2 + $0x38] sm:$0xff] }
 0x2c0   : > { %v1029_v4 = vmax.f32 %v1021_v0, 0.0  ;;  %v992_v5 = vld [vmem:[#allocation2 + $0x30] sm:$0xff]  ;;  %v1008_v6 = vmul.f32 %v1688_v37, %v993_v3 }
 0x2c1   : > { %1773 = vmatmul.mubr.msk.bf16.vlgmr.msra.gmra.mxu0 %vm1048_vm5, %v1033_v1  ;;  %v1028_v7 = vmax.f32 %v1020_v2, 0.0  ;;  %v1007_v8 = vmul.f32 %v1688_v37, %v992_v5 }
 0x2c2   : > { %v1023_v9 = vadd.f32 %v1689_v40, %v1008_v6 }
 0x2c3   : > { %v1034_v10 = vpack.c.bf16 %v1029_v4, %v1028_v7  ;;  %v1022_v11 = vadd.f32 %v1689_v40, %v1007_v8 }
 0x2c4   : > { %v1031_v12 = vmax.f32 %v1023_v9, 0.0 }
 0x2c5   : > { %1776 = vmatprep.mubr.msk.bf16.mxu0 %vm1048_vm5, %v1034_v10  ;;  %v1030_v13 = vmax.f32 %v1022_v11, 0.0 }
 0x2c7   : > { %v1035_v14 = vpack.c.bf16 %v1031_v12, %v1030_v13 }
 0x2c9   : > { %1777 = vmatmul.mubr.msk.bf16.gmra.mxu0 %vm1048_vm5, %v1035_v14 }
 0x381   : > { %v1774_v16 = vpop.f32.mrf.mxu0 }
 0x382   : > { %v1139_v20 = vmul.f32 %v1774_v16, %v1696_v17 }
 0x383   : > { %v1099_v18 = vpop.f32.mrf.mxu0 }
 0x384   : > { %v1137_v19 = vmul.f32 %v1696_v17, %v1099_v18  ;;  %v1154_v28 = vadd.f32 %v1697_v22, %v1139_v20 }
 0x385   : > { %v1775_v21 = vpop.f32.mrf.mxu0 }
 0x386   : > { %v1140_v23 = vmul.f32 %v1775_v21, %v1696_v17  ;;  %v1152_v25 = vadd.f32 %v1697_v22, %v1137_v19  ;;  %v1162_v36 = vmax.f32 %v1154_v28, 0.0 }
 0x387   : > { %v1102_v24 = vpop.f32.mrf.mxu0 }
 0x388   : > { %v1155_v26 = vadd.f32 %v1697_v22, %v1140_v23  ;;  %v1138_v27 = vmul.f32 %v1696_v17, %v1102_v24  ;;  %v1160_v34 = vmax.f32 %v1152_v25, 0.0 }
 0x389   : > { %v1778_v29 = vpop.f32.mrf.mxu0 }
 0x38a   : > { %v1153_v30 = vadd.f32 %v1697_v22, %v1138_v27  ;;  %v1163_v31 = vmax.f32 %v1155_v26, 0.0  ;;  %v1143_v37 = vmul.f32 %v1778_v29, %v1696_v17 }
 0x38b   : > { %v1115_v32 = vpop.f32.mrf.mxu0 }
 0x38c   : > { %v1161_v33 = vmax.f32 %v1153_v30, 0.0  ;;  %v1141_v35 = vmul.f32 %v1696_v17, %v1115_v32  ;;  %v1169_v41 = vpack.c.bf16 %v1163_v31, %v1162_v36  ;;  %v1158_v46 = vadd.f32 %v1697_v22, %v1143_v37 }
 0x38d   : > { %v1779_v38 = vpop.f32.mrf.mxu0 }
 0x38e   : > { %v1168_v39 = vpack.c.bf16 %v1161_v33, %v1160_v34  ;;  %v1144_v40 = vmul.f32 %v1779_v38, %v1696_v17  ;;  %v1156_v43 = vadd.f32 %v1697_v22, %v1141_v35  ;;  %v1166_v51 = vmax.f32 %v1158_v46, 0.0 }
 0x38f   : > { %v1118_v42 = vpop.f32.mrf.mxu0 }
 0x390   : > { %v1159_v44 = vadd.f32 %v1697_v22, %v1144_v40  ;;  %v1142_v45 = vmul.f32 %v1696_v17, %v1118_v42  ;;  %1782 = vmatprep.mubr.msk.bf16.mxu1 %vm558_vm0, %v1168_v39  ;;  %v1164_v49 = vmax.f32 %v1156_v43, 0.0 }
 0x391   : > { %1783 = vmatmul.mubr.msk.bf16.vlgmr.msra.gmra.mxu1 %vm558_vm0, %v1169_v41 }
 0x392   : > { %v1157_v47 = vadd.f32 %v1697_v22, %v1142_v45  ;;  %v1167_v48 = vmax.f32 %v1159_v44, 0.0 }
 0x394   : > { %v1165_v50 = vmax.f32 %v1157_v47, 0.0  ;;  %v1171_v53 = vpack.c.bf16 %v1167_v48, %v1166_v51 }
 0x396   : > { %v1170_v52 = vpack.c.bf16 %v1165_v50, %v1164_v49 }
 0x398   : > { %1786 = vmatprep.mubr.msk.bf16.mxu1 %vm558_vm0, %v1170_v52 }
 0x399   : > { %1787 = vmatmul.mubr.msk.bf16.gmra.mxu1 %vm558_vm0, %v1171_v53 }
 0x451   : > { %v1784_v54 = vpop.f32.mrf.mxu1 }
 0x452   : > { %1310 = vrot.lane.b32.xlu0 %v1784_v54, %s1840_s30  ;;  %v1268_v57 = vrot.slane %v1784_v54, 7  ;;  %v1292_v58 = vrot.slane %v1784_v54, 1 }
 0x453   : > { %v2083_v55 = vpop.f32.mrf.mxu1 }
 0x454   : > { %v1265_v2 = vrot.slane %v2083_v55, 7  ;;  %v1289_v23 = vrot.slane %v2083_v55, 1 }
 0x455   : > { %v1785_v56 = vpop.f32.mrf.mxu1 }
 0x456   : > { %v1270_v59 = vrot.slane %v1785_v56, 7  ;;  %v1294_v60 = vrot.slane %v1785_v56, 1  ;;  %1312 = vrot.lane.b32.xlu1 %v1785_v56, %s1840_s30  ;;  %v1288_v51 = vsel %vm837_vm2, 0.0, %v1265_v2 }
 0x457   : > { %v1229_v61 = vpop.f32.mrf.mxu1 }
 0x458   : > { %v1266_v62 = vrot.slane %v1229_v61, 7  ;;  %v1295_v63 = vsel %vm862_vm1, %v1292_v58, %v1294_v60  ;;  %v2088_v0 = vsel %vm837_vm2, %v1268_v57, %v1270_v59  ;;  %v1290_v21 = vrot.slane %v1229_v61, 1 }
 0x459   : > { %1343 = vrot.lane.b32.xlu0 %v1295_v63, %s1841_s18  ;;  %v1788_v1 = vpop.f32.mrf.mxu1  ;;  %v1830_v63 = vld [vmem:[%s2184_s16 + $0x8] sm:$0xff]  }
 0x45a   : > { %v1269_v4 = vsel %vm837_vm2, %v1266_v62, %v1268_v57  ;;  %v2096_v5 = vsel %vm837_vm2, %v1265_v2, %v1266_v62  ;;  %v1276_v11 = vrot.slane %v1788_v1, 7  ;;  %v1300_v16 = vrot.slane %v1788_v1, 1  ;;  %1802 = vmatprep.subr.bf16.mxu1 %v1830_v63 }
 0x45b   : > { %v1242_v3 = vpop.f32.mrf.mxu1  ;;  %v1291_v24 = vsel %vm862_vm1, %v1289_v23, %v1290_v21  ;;  %v1293_v25 = vsel %vm862_vm1, %v1290_v21, %v1292_v58  ;;  %1803 = vmatpush3.bf16.msra.mxu1 %v1830_v63 }
 0x45c   : > { %v1272_v6 = vrot.slane %v1242_v3, 7  ;;  %v1296_v7 = vrot.slane %v1242_v3, 1 }
 0x45d   : > { %1318 = vrot.lane.b32.xlu0 %v1788_v1, %s1840_s30  ;;  %v1789_v8 = vpop.f32.mrf.mxu1 }
 0x45e   : > { %v1278_v9 = vrot.slane %v1789_v8, 7  ;;  %1320 = vrot.lane.b32.xlu1 %v1789_v8, %s1840_s30  ;;  %v1273_v10 = vsel %vm837_vm2, %v1270_v59, %v1272_v6  ;;  %v1302_v12 = vrot.slane %v1789_v8, 1  ;;  %v1297_v14 = vsel %vm862_vm1, %v1294_v60, %v1296_v7  ;;  %v1704_v8 = vld [vmem:[%s2182_s14] ss:$0 sm:$0xff] }
 0x45f   : > { %v1245_v13 = vpop.f32.mrf.mxu1 }
 0x460   : > { %v1279_v15 = vsel %vm837_vm2, %v1276_v11, %v1278_v9  ;;  %v1298_v17 = vrot.slane %v1245_v13, 1  ;;  %v1303_v18 = vsel %vm862_vm1, %v1300_v16, %v1302_v12  ;;  %v1305_v20 = vsel %vm862_vm1, %v1302_v12, 0.0 }
 0x461   : > { %1314 = vrot.lane.b32.xlu0 %v1242_v3, %s1840_s30  ;;  %v1274_v31 = vrot.slane %v1245_v13, 7  ;;  %v1703_v3 = vld [vmem:[%s2181_s13] ss:$0 sm:$0xff] }
 0x462   : > { %1345 = vrot.lane.b32.xlu1 %v1297_v14, %s1841_s18  ;;  %v1299_v19 = vsel %vm862_vm1, %v1296_v7, %v1298_v17  ;;  %v1301_v22 = vsel %vm862_vm1, %v1298_v17, %v1300_v16 }
 0x463   : > { %v1277_v33 = vsel %vm837_vm2, %v1274_v31, %v1276_v11  ;;  %v1275_v46 = vsel %vm837_vm2, %v1272_v6, %v1274_v31 }
 0x465   : > { %1351 = vrot.lane.b32.xlu0 %v1303_v18, %s1841_s18 }
 0x466   : > { %1316 = vrot.lane.b32.xlu1 %v1245_v13, %s1840_s30 }
 0x469   : > { %1347 = vrot.lane.b32.xlu0 %v1299_v19, %s1841_s18 }
 0x46a   : > { %1353 = vrot.lane.b32.xlu1 %v1305_v20, %s1841_s18 }
 0x46d   : > { %1306 = vrot.lane.b32.xlu0 %v2083_v55, %s1840_s30  ;;  %v1828_v55 = vld [vmem:[%s2183_s15] sm:$0xff]  }
 0x46e   : > { %1349 = vrot.lane.b32.xlu1 %v1301_v22, %s1841_s18  ;;  %1798 = vmatprep.mubr.msk.bf16.mxu0 %vm1476_vm6, %v1828_v55 }
 0x471   : > { %1339 = vrot.lane.b32.xlu0 %v1291_v24, %s1841_s18 }
 0x472   : > { %1308 = vrot.lane.b32.xlu1 %v1229_v61, %s1840_s30  ;;  %s1843_s30 = smov 24  }
 0x476   : > { %1341 = vrot.lane.b32.xlu1 %v1293_v25, %s1841_s18 }
 0x4c4   : > { %v1311_v26 = vpop.permute.xlu0 %1310 }
 0x4c5   : > { %v1332_v45 = vadd.f32 %v1311_v26, %v1269_v4 }
 0x4c8   : > { %v1313_v28 = vpop.permute.xlu1 %1312 }
 0x4c9   : > { %v1333_v54 = vadd.f32 %v1313_v28, %v2088_v0 }
 0x4cb   : > { %v1344_v27 = vpop.permute.xlu0 %1343 }
 0x4cc   : > { %v1365_v49 = vadd.f32 %v1344_v27, %v1332_v45 }
 0x4cf   : > { %v1319_v29 = vpop.permute.xlu0 %1318 }
 0x4d0   : > { %v1321_v30 = vpop.permute.xlu1 %1320  ;;  %v1336_v35 = vadd.f32 %v1319_v29, %v1277_v33 }
 0x4d1   : > { %v1337_v40 = vadd.f32 %v1321_v30, %v1279_v15 }
 0x4d3   : > { %v1315_v32 = vpop.permute.xlu0 %1314 }
 0x4d4   : > { %v1346_v34 = vpop.permute.xlu1 %1345  ;;  %v1334_v39 = vadd.f32 %v1315_v32, %v1273_v10 }
 0x4d5   : > { %v1366_v59 = vadd.f32 %v1346_v34, %v1333_v54 }
 0x4d7   : > { %v1352_v36 = vpop.permute.xlu0 %1351 }
 0x4d8   : > { %v1369_v37 = vadd.f32 %v1352_v36, %v1336_v35  ;;  %v1317_v38 = vpop.permute.xlu1 %1316 }
 0x4d9   : > { %v1335_v47 = vadd.f32 %v1317_v38, %v1275_v46  ;;  %v1829_v46 = vld [vmem:[%s2183_s15 + $0x8] sm:$0xff]  }
 0x4da   : > { %1391 = vrot.lane.b32.xlu0 %v1369_v37, %s1843_s30 }
 0x4db   : > { %v1348_v41 = vpop.permute.xlu0 %1347 }
 0x4dc   : > { %v1367_v42 = vadd.f32 %v1348_v41, %v1334_v39  ;;  %v1354_v43 = vpop.permute.xlu1 %1353 }
 0x4dd   : > { %v1370_v44 = vadd.f32 %v1354_v43, %v1337_v40 }
 0x4de   : > { %1387 = vrot.lane.b32.xlu0 %v1367_v42, %s1843_s30 }
 0x4df   : > { %v1307_v48 = vpop.permute.xlu0 %1306  ;;  %1393 = vrot.lane.b32.xlu1 %v1370_v44, %s1843_s30 }
 0x4e0   : > { %v1350_v50 = vpop.permute.xlu1 %1349  ;;  %v1330_v53 = vadd.f32 %v1307_v48, %v1288_v51 }
 0x4e1   : > { %v1368_v52 = vadd.f32 %v1350_v50, %v1335_v47  ;;  %v1831_v47 = vld [vmem:[%s2184_s16] sm:$0xff]  }
 0x4e2   : > { %1383 = vrot.lane.b32.xlu0 %v1365_v49, %s1843_s30  ;;  %1804 = vmatprep.subr.bf16.mxu1 %v1831_v47 }
 0x4e3   : > { %v1340_v56 = vpop.permute.xlu0 %1339  ;;  %1389 = vrot.lane.b32.xlu1 %v1368_v52, %s1843_s30  ;;  %1805 = vmatpush3.bf16.msra.mxu1 %v1831_v47 }
 0x4e4   : > { %v1363_v57 = vadd.f32 %v1340_v56, %v1330_v53  ;;  %v1309_v58 = vpop.permute.xlu1 %1308 }
 0x4e5   : > { %v1331_v60 = vadd.f32 %v1309_v58, %v2096_v5 }
 0x4e6   : > { %1379 = vrot.lane.b32.xlu0 %v1363_v57, %s1843_s30 }
 0x4e7   : > { %1385 = vrot.lane.b32.xlu1 %v1366_v59, %s1843_s30 }
 0x4e8   : > { %v1342_v61 = vpop.permute.xlu1 %1341 }
 0x4e9   : > { %v1364_v62 = vadd.f32 %v1342_v61, %v1331_v60 }
 0x4eb   : > { %1381 = vrot.lane.b32.xlu1 %v1364_v62, %s1843_s30  ;;  %s1716_s30 = sshll.u32 %s2191_s25, 5 }
 0x4ec   : > { %s548_s23 = scalar_lea.vmem %s2185_s17, %s1716_s30 }
 0x54c   : > { %v1392_v0 = vpop.permute.xlu0 %1391 }
 0x54d   : > { %1410 = vst.msk [vmem:[#allocation2 + $0x30] sm:$0xff] %vm1403_vm7, %v1392_v0 }
 0x550   : > { %v1388_v1 = vpop.permute.xlu0 %1387 }
 0x551   : > { %1408 = vst.msk [vmem:[#allocation2 + $0x20] sm:$0xff] %vm1403_vm7, %v1388_v1  ;;  %v1394_v2 = vpop.permute.xlu1 %1393 }
 0x552   : > { %1411 = vst.msk [vmem:[#allocation2 + $0x38] sm:$0xff] %vm1403_vm7, %v1394_v2 }
 0x554   : > { %v1384_v4 = vpop.permute.xlu0 %1383  ;;  %v1418_v5 = vld [vmem:[#allocation2 + $0x30] sm:$0xff] }
 0x555   : > { %1406 = vst.msk [vmem:[#allocation2 + $0x10] sm:$0xff] %vm1403_vm7, %v1384_v4  ;;  %v1390_v6 = vpop.permute.xlu1 %1389  ;;  %v1433_v7 = vmul.f32 %v1703_v3, %v1418_v5 }
 0x556   : > { %1409 = vst.msk [vmem:[#allocation2 + $0x28] sm:$0xff] %vm1403_vm7, %v1390_v6 }
 0x557   : > { %v1448_v15 = vadd.f32 %v1704_v8, %v1433_v7 }
 0x558   : > { %v1380_v9 = vpop.permute.xlu0 %1379  ;;  %v1416_v10 = vld [vmem:[#allocation2 + $0x20] sm:$0xff] }
 0x559   : > { %1404 = vst.msk [vmem:[#allocation2] sm:$0xff] %vm1403_vm7, %v1380_v9  ;;  %v1386_v11 = vpop.permute.xlu1 %1385  ;;  %v1419_v12 = vld [vmem:[#allocation2 + $0x38] sm:$0xff]  ;;  %v1431_v13 = vmul.f32 %v1703_v3, %v1416_v10  ;;  %v1456_v21 = vmax.f32 %v1448_v15, 0.0 }
 0x55a   : > { %1407 = vst.msk [vmem:[#allocation2 + $0x18] sm:$0xff] %vm1403_vm7, %v1386_v11  ;;  %v1434_v14 = vmul.f32 %v1703_v3, %v1419_v12 }
 0x55b   : > { %v1446_v20 = vadd.f32 %v1704_v8, %v1431_v13 }
 0x55c   : > { %v1449_v16 = vadd.f32 %v1704_v8, %v1434_v14  ;;  %v1414_v17 = vld [vmem:[#allocation2 + $0x10] sm:$0xff] }
 0x55d   : > { %v1382_v18 = vpop.permute.xlu1 %1381  ;;  %v1417_v19 = vld [vmem:[#allocation2 + $0x28] sm:$0xff]  ;;  %v1429_v24 = vmul.f32 %v1703_v3, %v1414_v17  ;;  %v1454_v28 = vmax.f32 %v1446_v20, 0.0 }
 0x55e   : > { %1405 = vst.msk [vmem:[#allocation2 + $0x8] sm:$0xff] %vm1403_vm7, %v1382_v18  ;;  %v1457_v22 = vmax.f32 %v1449_v16, 0.0  ;;  %v1432_v23 = vmul.f32 %v1703_v3, %v1417_v19 }
 0x55f   : > { %v1444_v32 = vadd.f32 %v1704_v8, %v1429_v24 }
 0x560   : > { %v1465_v25 = vpack.c.bf16 %v1457_v22, %v1456_v21  ;;  %v1447_v26 = vadd.f32 %v1704_v8, %v1432_v23  ;;  %v1412_v27 = vld [vmem:[#allocation2] sm:$0xff] }
 0x561   : > { %v1415_v29 = vld [vmem:[#allocation2 + $0x18] sm:$0xff]  ;;  %v1427_v34 = vmul.f32 %v1703_v3, %v1412_v27  ;;  %v1452_v37 = vmax.f32 %v1444_v32, 0.0 }
 0x562   : > { %1790 = vmatprep.subr.bf16.mxu0 %v1465_v25  ;;  %v1455_v30 = vmax.f32 %v1447_v26, 0.0  ;;  %v1430_v31 = vmul.f32 %v1703_v3, %v1415_v29 }
 0x563   : > { %1791 = vmatpush3.bf16.msra.mxu0 %v1465_v25  ;;  %v1442_v40 = vadd.f32 %v1704_v8, %v1427_v34 }
 0x564   : > { %v1464_v33 = vpack.c.bf16 %v1455_v30, %v1454_v28  ;;  %v1445_v35 = vadd.f32 %v1704_v8, %v1430_v31 }
 0x565   : > { %v1413_v36 = vld [vmem:[#allocation2 + $0x8] sm:$0xff]  ;;  %v1450_v43 = vmax.f32 %v1442_v40, 0.0 }
 0x566   : > { %1792 = vmatprep.subr.bf16.mxu0 %v1464_v33  ;;  %v1453_v38 = vmax.f32 %v1445_v35, 0.0  ;;  %v1428_v39 = vmul.f32 %v1703_v3, %v1413_v36 }
 0x567   : > { %1793 = vmatpush3.bf16.msra.mxu0 %v1464_v33 }
 0x568   : > { %v1463_v41 = vpack.c.bf16 %v1453_v38, %v1452_v37  ;;  %v1443_v42 = vadd.f32 %v1704_v8, %v1428_v39 }
 0x56a   : > { %1794 = vmatprep.subr.bf16.mxu0 %v1463_v41  ;;  %v1451_v44 = vmax.f32 %v1443_v42, 0.0 }
 0x56b   : > { %1795 = vmatpush3.bf16.msra.mxu0 %v1463_v41 }
 0x56c   : > { %v1462_v45 = vpack.c.bf16 %v1451_v44, %v1450_v43 }
 0x56e   : > { %1796 = vmatprep.subr.bf16.mxu0 %v1462_v45 }
 0x56f   : > { %1797 = vmatpush3.bf16.msra.mxu0 %v1462_v45 }
 0x572   : > { %1799 = vmatmul.mubr.msk.bf16.vlgmr.msra.gmra.mxu0 %vm1476_vm6, %v1829_v46 }
 0x632   : > { %v1800_v48 = vpop.f32.mrf.mxu0 }
 0x634   : > { %v1517_v49 = vpop.f32.mrf.mxu0 }
 0x636   : > { %v1801_v50 = vpop.f32.mrf.mxu0 }
 0x637   : > { %v1533_v53 = vpack.c.bf16 %v1801_v50, %v1800_v48 }
 0x638   : > { %v1520_v51 = vpop.f32.mrf.mxu0 }
 0x639   : > { %v1532_v52 = vpack.c.bf16 %v1520_v51, %v1517_v49 }
 0x63b   : > { %1806 = vmatprep.mubr.msk.bf16.mxu1 %vm1550_vm8, %v1532_v52 }
 0x63c   : > { %1807 = vmatmul.mubr.msk.bf16.vlgmr.msra.gmra.mxu1 %vm1550_vm8, %v1533_v53 }
 0x6fc   : > { %v1808_v54 = vpop.f32.mrf.mxu1 }
 0x6fd   : > { %1608 = vst.msk [vmem:[%s548_s23 + $0x10] sm:$0xff] %vm558_vm0, %v1808_v54 }
 0x6fe   : > { %v1591_v56 = vpop.f32.mrf.mxu1 }
 0x6ff   : > { %1606 = vst.msk [vmem:[%s548_s23] sm:$0xff] %vm558_vm0, %v1591_v56 }
 0x700   : > { %v1809_v57 = vpop.f32.mrf.mxu1 }
 0x701   : > { %1609 = vst.msk [vmem:[%s548_s23 + $0x18] sm:$0xff] %vm558_vm0, %v1809_v57 }
 0x702   : > { %v1594_v58 = vpop.f32.mrf.mxu1 }
 0x703   : > { %1607 = vst.msk [vmem:[%s548_s23 + $0x8] sm:$0xff] %vm558_vm0, %v1594_v58 }
 0x704 PF: > { %s27_s24 = sadd.s32 1, %s1838_s24  }
 0x705   : > { %p24_p4 = scmp.ge.s32.totalorder %s27_s24, 4  }
 0x707   :  { %26 = sbr.rel (!%p24_p4) target bundleno = 3 (0x3), region = 118 }

// kernel: densenet_forward.11
= control target key start
LH: loop header
LB: loop body
LE: loop exit
PB: predicated region body
PF: predicated region fallthrough
CT: control target
= control target key end

     0   :  { %s1531_s24 = smov 0   ;;  %s1650_s0 = inlined_call_operand.vmem [shape: f32[2,32,16], index: 0, kind: input, shape index: {}]   ;;  %s1651_s1 = inlined_call_operand.vmem [shape: f32[1,16], index: 1, kind: input, shape index: {}]   ;;  %s1652_s2 = inlined_call_operand.vmem [shape: f32[1,16], index: 2, kind: input, shape index: {}]   ;;  %s1653_s3 = inlined_call_operand.vmem [shape: bf16[16,16], index: 3, kind: input, shape index: {}]   ;;  %s1654_s4 = inlined_call_operand.vmem [shape: f32[1,16], index: 4, kind: input, shape index: {}]   ;;  %s1655_s5 = inlined_call_operand.vmem [shape: f32[1,16], index: 5, kind: input, shape index: {}]   ;;  %s1656_s6 = inlined_call_operand.vmem [shape: bf16[16,24], index: 6, kind: input, shape index: {}]   ;;  %s1657_s7 = inlined_call_operand.vmem [shape: f32[1,24], index: 7, kind: input, shape index: {}]   ;;  %s1658_s8 = inlined_call_operand.vmem [shape: f32[1,24], index: 8, kind: input, shape index: {}]   ;;  %s1659_s9 = inlined_call_operand.vmem [shape: bf16[24,16], index: 9, kind: input, shape index: {}]   ;;  %s1660_s10 = inlined_call_operand.vmem [shape: f32[1,16], index: 10, kind: input, shape index: {}]   ;;  %s1661_s11 = inlined_call_operand.vmem [shape: f32[1,16], index: 11, kind: input, shape index: {}]   ;;  %s1662_s12 = inlined_call_operand.vmem [shape: bf16[16,24], index: 12, kind: input, shape index: {}]   ;;  %s1663_s13 = inlined_call_operand.vmem [shape: f32[1,32], index: 13, kind: input, shape index: {}]   ;;  %s1664_s14 = inlined_call_operand.vmem [shape: f32[1,32], index: 14, kind: input, shape index: {}]   ;;  %s1665_s15 = inlined_call_operand.vmem [shape: bf16[16,32], index: 15, kind: input, shape index: {}]   ;;  %s1666_s16 = inlined_call_operand.vmem [shape: bf16[32,16], index: 16, kind: input, shape index: {}]   ;;  %s1667_s17 = inlined_call_operand.vmem [shape: f32[2,16,16], index: 17, kind: output, shape index: {}]  }
   0x1   :  { %1668 = sst [smem:[#allocation3_spill]] %s1650_s0 }
   0x2   :  { %1669 = sst [smem:[#allocation4_spill]] %s1651_s1 }
   0x3 LB: > { %s1302_s25 = sadd.s32 4294967295, %s1433_s24   ;;  %p1306_p0 = scmp.ge.s32.totalorder %s1433_s24, 1  ;;  %s1433_s24 = sphi %s1531_s24, %s27_s24  }
   0x4   : > { %p487_p1 = scmp.lt.s32.totalorder %s1433_s24, 3 }
   0x6   : > { %p488_p2 = pnand %p1306_p0, %p487_p1 }
   0x7   : > { %p539_p3 = scmp.lt.s32.totalorder (!%p488_p2), %s1302_s25, 1  ;;  %s1670_s30 = sld [smem:[#allocation3_spill]] (!%p488_p2) }
   0x8   : > { %491 = sbr.rel (%p488_p2) target bundleno = 1763 (0x6e3), region = 88  ;;  %s1671_s20 = sld [smem:[#allocation4_spill]] (!%p488_p2) }
   0x9   : > { %s1437_s22 = smov (!%p488_p2), 16  }
   0xd   : > { %v1419_v0 = vld [vmem:[%s1653_s3] sm:$0xff]   ;;  %s1673_s25 = smov (!%p539_p3, %s1302_s25), 1  ;;  %vm554_vm0 = vcmask 130048   ;;  %vm749_vm1 = vcmask 1040384   ;;  %vm762_vm2 = vcmask 1046528   ;;  %vm877_vm3 = vcmask 1043456  }
   0xe   : > { %1362 = vmatprep.subr.bf16.mxu0 %v1419_v0  ;;  %s1341_s28 = sshll.u32 %s1673_s25, 5  ;;  %v1311_v5 = vld [vmem:[%s1671_s20] ss:$0 sm:$0xff]  ;;  %vm821_vm4 = vcmask 195712   ;;  %vm870_vm5 = vcmask 195584   ;;  %vm1440_vm6 = vmmov 0  }
   0xf   : > { %1363 = vmatpush3.bf16.msra.mxu0 %v1419_v0  ;;  %s543_s18 = scalar_lea.vmem %s1670_s30, %s1341_s28  ;;  %v1312_v6 = vld [vmem:[%s1652_s2] ss:$0 sm:$0xff]  ;;  %s1435_s30 = smov 120   ;;  %vm1095_vm7 = vcmask 261312   ;;  %vm1139_vm8 = vcmask 261120  }
  0x10   : > { %v550_v1 = vld [vmem:[%s543_s18] sm:$0xff]  ;;  %v551_v2 = vld [vmem:[%s543_s18 + $0x8] sm:$0xff]  ;;  %v552_v3 = vld [vmem:[%s543_s18 + $0x10] sm:$0xff]  ;;  %s1342_s20 = sshll.u32 %s1673_s25, 4 }
  0x11   : > { %555 = vst.msk [vmem:[#allocation2] sm:$0xff] %vm554_vm0, %v550_v1  ;;  %556 = vst.msk [vmem:[#allocation2 + $0x8] sm:$0xff] %vm554_vm0, %v551_v2  ;;  %v553_v4 = vld [vmem:[%s543_s18 + $0x18] sm:$0xff]  ;;  %v1420_v25 = vld [vmem:[%s1656_s6] sm:$0xff]   ;;  %s1436_s18 = smov 112  }
  0x12   : > { %557 = vst.msk [vmem:[#allocation2 + $0x10] sm:$0xff] %vm554_vm0, %v552_v3  ;;  %558 = vst.msk [vmem:[#allocation2 + $0x18] sm:$0xff] %vm554_vm0, %v553_v4  ;;  %1368 = vmatprep.subr.bf16.mxu1 %v1420_v25  ;;  %v1316_v27 = vld [vmem:[%s1654_s4] ss:$0 sm:$0xff]  ;;  %v1421_v2 = vld [vmem:[%s1659_s9 + $0x8] ss:$0 sps:$4 sm:$0xff]  }
  0x13   : > { %1369 = vmatpush3.bf16.msra.mxu1 %v1420_v25  ;;  %v1317_v32 = vld [vmem:[%s1655_s5] ss:$0 sm:$0xff]  ;;  %1404 = vmatprep.subr.msk.bf16.mxu0 %vm877_vm3, %v1421_v2 }
  0x14   : > { %v1422_v3 = vld [vmem:[%s1659_s9] sm:$0xff]  }
  0x15   : > { %v1321_v25 = vld [vmem:[%s1657_s7] ss:$0 sm:$0xff] }
  0x18   : > { %v559_v7 = vld [vmem:[#allocation2] sm:$0xff]  ;;  %v560_v8 = vld [vmem:[#allocation2 + $0x8] sm:$0xff] }
  0x19   : > { %v561_v9 = vld [vmem:[#allocation2 + $0x10] sm:$0xff]  ;;  %v570_v10 = vmul.f32 %v1311_v5, %v559_v7  ;;  %v571_v11 = vmul.f32 %v1311_v5, %v560_v8  ;;  %v562_v12 = vld [vmem:[#allocation2 + $0x18] sm:$0xff] }
  0x1a   : > { %v572_v13 = vmul.f32 %v1311_v5, %v561_v9  ;;  %v573_v14 = vmul.f32 %v1311_v5, %v562_v12 }
  0x1b   : > { %v581_v15 = vadd.f32 %v1312_v6, %v570_v10  ;;  %v582_v16 = vadd.f32 %v1312_v6, %v571_v11 }
  0x1c   : > { %v583_v17 = vadd.f32 %v1312_v6, %v572_v13  ;;  %v584_v18 = vadd.f32 %v1312_v6, %v573_v14  ;;  %v879_v6 = vsel %vm877_vm3, %v1421_v2, 0 }
  0x1d   : > { %v585_v19 = vmax.f32 %v581_v15, 0.0  ;;  %v586_v20 = vmax.f32 %v582_v16, 0.0 }
  0x1e   : > { %v587_v21 = vmax.f32 %v583_v17, 0.0  ;;  %v588_v22 = vmax.f32 %v584_v18, 0.0 }
  0x1f   : > { %v589_v23 = vpack.c.bf16 %v586_v20, %v585_v19 }
  0x20   : > { %v590_v24 = vpack.c.bf16 %v588_v22, %v587_v21 }
  0x21   : > { %1364 = vmatprep.mubr.msk.bf16.mxu0 %vm554_vm0, %v589_v23 }
  0x22   : > { %1365 = vmatmul.mubr.msk.bf16.vlgmr.msra.gmra.mxu0 %vm554_vm0, %v590_v24 }
  0x23   : > { %1375 = vmatpush3.bf16.msra.mxu0 %v879_v6 }
  0x24   : > { %1376 = vmatprep.subr.bf16.mxu0 %v1422_v3 }
  0x27   : > { %1377 = vmatpush3.bf16.msra.mxu0 %v1422_v3 }
  0xe2   : > { %v1366_v26 = vpop.f32.mrf.mxu0 }
  0xe3   : > { %v663_v30 = vmul.f32 %v1366_v26, %v1316_v27 }
  0xe4   : > { %v639_v28 = vpop.f32.mrf.mxu0 }
  0xe5   : > { %v661_v29 = vmul.f32 %v1316_v27, %v639_v28  ;;  %v674_v38 = vadd.f32 %v1317_v32, %v663_v30 }
  0xe6   : > { %v1367_v31 = vpop.f32.mrf.mxu0 }
  0xe7   : > { %v664_v33 = vmul.f32 %v1367_v31, %v1316_v27  ;;  %v672_v35 = vadd.f32 %v1317_v32, %v661_v29  ;;  %v678_v43 = vmax.f32 %v674_v38, 0.0 }
  0xe8   : > { %v642_v34 = vpop.f32.mrf.mxu0 }
  0xe9   : > { %v675_v36 = vadd.f32 %v1317_v32, %v664_v33  ;;  %v662_v37 = vmul.f32 %v1316_v27, %v642_v34  ;;  %v676_v41 = vmax.f32 %v672_v35, 0.0  ;;  %v1322_v27 = vld [vmem:[%s1658_s8] ss:$0 sm:$0xff] }
  0xeb   : > { %v673_v39 = vadd.f32 %v1317_v32, %v662_v37  ;;  %v679_v40 = vmax.f32 %v675_v36, 0.0 }
  0xed   : > { %v677_v42 = vmax.f32 %v673_v39, 0.0  ;;  %v681_v45 = vpack.c.bf16 %v679_v40, %v678_v43 }
  0xef   : > { %v680_v44 = vpack.c.bf16 %v677_v42, %v676_v41 }
  0xf1   : > { %1370 = vmatprep.mubr.msk.bf16.mxu1 %vm554_vm0, %v680_v44 }
  0xf2   : > { %1371 = vmatmul.mubr.msk.bf16.vlgmr.msra.gmra.mxu1 %vm554_vm0, %v681_v45  ;;  %v1423_v45 = vld [vmem:[%s1662_s12] sm:$0xff]  }
  0xf3   : > { %1382 = vmatprep.subr.bf16.mxu1 %v1423_v45 }
  0xf4   : > { %1383 = vmatpush3.bf16.msra.mxu1 %v1423_v45 }
 0x1b2   : > { %v1372_v46 = vpop.f32.mrf.mxu1 }
 0x1b3   : > { %776 = vrot.lane.b32.xlu1 %v1372_v46, %s1435_s30  ;;  %v753_v50 = vrot.slane %v1372_v46, 7  ;;  %v766_v52 = vrot.slane %v1372_v46, 1 }
 0x1b4   : > { %v730_v47 = vpop.f32.mrf.mxu1 }
 0x1b5   : > { %772 = vrot.lane.b32.xlu0 %v730_v47, %s1435_s30  ;;  %v763_v53 = vrot.slane %v730_v47, 1  ;;  %v750_v0 = vrot.slane %v730_v47, 7  ;;  %v1327_v47 = vld [vmem:[%s1660_s10] ss:$0 sm:$0xff] }
 0x1b6   : > { %v1373_v48 = vpop.f32.mrf.mxu1 }
 0x1b7   : > { %v755_v49 = vrot.slane %v1373_v48, 7  ;;  %778 = vrot.lane.b32.xlu1 %v1373_v48, %s1435_s30  ;;  %v768_v56 = vrot.slane %v1373_v48, 1  ;;  %v761_v8 = vsel %vm749_vm1, 0.0, %v750_v0 }
 0x1b8   : > { %v733_v51 = vpop.f32.mrf.mxu1 }
 0x1b9   : > { %v764_v54 = vrot.slane %v733_v51, 1  ;;  %774 = vrot.lane.b32.xlu0 %v733_v51, %s1435_s30  ;;  %v756_v55 = vsel %vm749_vm1, %v753_v50, %v755_v49  ;;  %v771_v59 = vsel %vm762_vm2, %v768_v56, 0.0  ;;  %v769_v60 = vsel %vm762_vm2, %v766_v52, %v768_v56 }
 0x1ba   : > { %v751_v62 = vrot.slane %v733_v51, 7 }
 0x1bb   : > { %v767_v57 = vsel %vm762_vm2, %v764_v54, %v766_v52  ;;  %v765_v58 = vsel %vm762_vm2, %v763_v53, %v764_v54  ;;  %v1328_v52 = vld [vmem:[%s1661_s11] ss:$0 sm:$0xff] }
 0x1bc   : > { %791 = vrot.lane.b32.xlu1 %v767_v57, %s1436_s18  ;;  %v752_v5 = vsel %vm749_vm1, %v750_v0, %v751_v62  ;;  %v754_v14 = vsel %vm749_vm1, %v751_v62, %v753_v50 }
 0x1bd   : > { %789 = vrot.lane.b32.xlu0 %v765_v58, %s1436_s18 }
 0x1c0   : > { %795 = vrot.lane.b32.xlu1 %v771_v59, %s1436_s18 }
 0x1c1   : > { %793 = vrot.lane.b32.xlu0 %v769_v60, %s1436_s18 }
 0x225   : > { %v777_v61 = vpop.permute.xlu1 %776 }
 0x226   : > { %v786_v16 = vadd.f32 %v777_v61, %v754_v14 }
 0x227   : > { %v773_v63 = vpop.permute.xlu0 %772 }
 0x228   : > { %v784_v9 = vadd.f32 %v773_v63, %v761_v8 }
 0x229   : > { %v779_v1 = vpop.permute.xlu1 %778 }
 0x22a   : > { %v787_v15 = vadd.f32 %v779_v1, %v756_v55 }
 0x22b   : > { %v775_v4 = vpop.permute.xlu0 %774 }
 0x22c   : > { %v785_v7 = vadd.f32 %v775_v4, %v752_v5 }
 0x22e   : > { %v792_v10 = vpop.permute.xlu1 %791 }
 0x22f   : > { %v802_v11 = vadd.f32 %v792_v10, %v785_v7  ;;  %v790_v12 = vpop.permute.xlu0 %789 }
 0x230   : > { %v801_v13 = vadd.f32 %v790_v12, %v784_v9 }
 0x231   : > { %811 = vrot.lane.b32.xlu1 %v802_v11, %s1437_s22 }
 0x232   : > { %v796_v17 = vpop.permute.xlu1 %795  ;;  %809 = vrot.lane.b32.xlu0 %v801_v13, %s1437_s22 }
 0x233   : > { %v804_v18 = vadd.f32 %v796_v17, %v787_v15  ;;  %v794_v19 = vpop.permute.xlu0 %793 }
 0x234   : > { %v803_v20 = vadd.f32 %v794_v19, %v786_v16 }
 0x235   : > { %815 = vrot.lane.b32.xlu1 %v804_v18, %s1437_s22 }
 0x236   : > { %813 = vrot.lane.b32.xlu0 %v803_v20, %s1437_s22 }
 0x2a3   : > { %v812_v21 = vpop.permute.xlu1 %811 }
 0x2a4   : > { %823 = vst.msk [vmem:[#allocation2 + $0x8] sm:$0xff] %vm821_vm4, %v812_v21  ;;  %v810_v22 = vpop.permute.xlu0 %809 }
 0x2a5   : > { %822 = vst.msk [vmem:[#allocation2] sm:$0xff] %vm821_vm4, %v810_v22 }
 0x2a7   : > { %v816_v23 = vpop.permute.xlu1 %815 }
 0x2a8   : > { %825 = vst.msk [vmem:[#allocation2 + $0x18] sm:$0xff] %vm821_vm4, %v816_v23  ;;  %v814_v24 = vpop.permute.xlu0 %813 }
 0x2a9   : > { %824 = vst.msk [vmem:[#allocation2 + $0x10] sm:$0xff] %vm821_vm4, %v814_v24  ;;  %v1438_v24 = vmov 0.0  }
 0x2aa   : > { %1388 = vmatprep.subr.bf16.mxu0 %v1438_v24  ;;  %1396 = vmatprep.subr.bf16.mxu1 %v1438_v24 }
 0x2ab   : > { %v827_v26 = vld [vmem:[#allocation2 + $0x8] sm:$0xff] }
 0x2ac   : > { %v826_v28 = vld [vmem:[#allocation2] sm:$0xff]  ;;  %v838_v29 = vmul.f32 %v1321_v25, %v827_v26 }
 0x2ad   : > { %v837_v30 = vmul.f32 %v1321_v25, %v826_v28 }
 0x2ae   : > { %v849_v31 = vadd.f32 %v1322_v27, %v838_v29 }
 0x2af   : > { %v848_v32 = vadd.f32 %v1322_v27, %v837_v30  ;;  %v829_v33 = vld [vmem:[#allocation2 + $0x18] sm:$0xff] }
 0x2b0   : > { %v853_v34 = vmax.f32 %v849_v31, 0.0  ;;  %v828_v35 = vld [vmem:[#allocation2 + $0x10] sm:$0xff]  ;;  %v840_v36 = vmul.f32 %v1321_v25, %v829_v33 }
 0x2b1   : > { %v852_v37 = vmax.f32 %v848_v32, 0.0  ;;  %v839_v38 = vmul.f32 %v1321_v25, %v828_v35 }
 0x2b2   : > { %v851_v39 = vadd.f32 %v1322_v27, %v840_v36 }
 0x2b3   : > { %v856_v40 = vpack.c.bf16 %v853_v34, %v852_v37  ;;  %v850_v41 = vadd.f32 %v1322_v27, %v839_v38 }
 0x2b4   : > { %v855_v42 = vmax.f32 %v851_v39, 0.0 }
 0x2b5   : > { %1378 = vmatprep.mubr.msk.bf16.mxu0 %vm870_vm5, %v856_v40  ;;  %v854_v43 = vmax.f32 %v850_v41, 0.0 }
 0x2b7   : > { %v857_v44 = vpack.c.bf16 %v855_v42, %v854_v43  ;;  %v1332_v42 = vld [vmem:[%s1663_s13] ss:$0 sm:$0xff] }
 0x2b9   : > { %1379 = vmatmul.mubr.msk.bf16.vlgmr.msra.gmra.mxu0 %vm870_vm5, %v857_v44 }
 0x2ba   : > { %1392 = vmatprep.mubr.msk.bf16.mxu0 %vm1440_vm6, %v1438_v24 }
 0x379   : > { %v1380_v46 = vpop.f32.mrf.mxu0 }
 0x37a   : > { %v939_v50 = vmul.f32 %v1380_v46, %v1327_v47  ;;  %v1333_v46 = vld [vmem:[%s1664_s14] ss:$0 sm:$0xff] }
 0x37b   : > { %v915_v48 = vpop.f32.mrf.mxu0 }
 0x37c   : > { %v937_v49 = vmul.f32 %v1327_v47, %v915_v48  ;;  %v950_v58 = vadd.f32 %v1328_v52, %v939_v50 }
 0x37d   : > { %v1381_v51 = vpop.f32.mrf.mxu0 }
 0x37e   : > { %v940_v53 = vmul.f32 %v1381_v51, %v1327_v47  ;;  %v948_v55 = vadd.f32 %v1328_v52, %v937_v49  ;;  %v954_v63 = vmax.f32 %v950_v58, 0.0 }
 0x37f   : > { %v918_v54 = vpop.f32.mrf.mxu0 }
 0x380   : > { %v951_v56 = vadd.f32 %v1328_v52, %v940_v53  ;;  %v938_v57 = vmul.f32 %v1327_v47, %v918_v54  ;;  %v952_v61 = vmax.f32 %v948_v55, 0.0 }
 0x382   : > { %v949_v59 = vadd.f32 %v1328_v52, %v938_v57  ;;  %v955_v60 = vmax.f32 %v951_v56, 0.0 }
 0x384   : > { %v953_v62 = vmax.f32 %v949_v59, 0.0  ;;  %v957_v1 = vpack.c.bf16 %v955_v60, %v954_v63  ;;  %v1424_v63 = vld [vmem:[%s1665_s15] sm:$0xff]  }
 0x386   : > { %v956_v0 = vpack.c.bf16 %v953_v62, %v952_v61 }
 0x388   : > { %1384 = vmatprep.mubr.msk.bf16.mxu1 %vm554_vm0, %v956_v0  ;;  %v1425_v0 = vld [vmem:[%s1666_s16 + $0x8] sm:$0xff]  }
 0x389   : > { %1385 = vmatmul.mubr.msk.bf16.vlgmr.msra.gmra.mxu1 %vm554_vm0, %v957_v1  ;;  %v1426_v1 = vld [vmem:[%s1666_s16] sm:$0xff]  }
 0x38a   : > { %1400 = vmatprep.mubr.msk.bf16.mxu1 %vm1440_vm6, %v1438_v24  ;;  %1397 = vmatpush3.bf16.msra.mxu1 %v1425_v0 }
 0x38b   : > { %1398 = vmatprep.subr.bf16.mxu1 %v1438_v24 }
 0x38e   : > { %1399 = vmatpush3.bf16.msra.mxu1 %v1426_v1 }
 0x449   : > { %v1386_v2 = vpop.f32.mrf.mxu1 }
 0x44a   : > { %1050 = vrot.lane.b32.xlu0 %v1386_v2, %s1435_s30  ;;  %v1040_v5 = vrot.slane %v1386_v2, 1  ;;  %v1028_v8 = vrot.slane %v1386_v2, 7 }
 0x44b   : > { %v1006_v3 = vpop.f32.mrf.mxu1 }
 0x44c   : > { %v1037_v13 = vrot.slane %v1006_v3, 1  ;;  %v1025_v22 = vrot.slane %v1006_v3, 7 }
 0x44d   : > { %v1387_v4 = vpop.f32.mrf.mxu1 }
 0x44e   : > { %v1030_v6 = vrot.slane %v1387_v4, 7  ;;  %v1042_v7 = vrot.slane %v1387_v4, 1  ;;  %1046 = vrot.lane.b32.xlu0 %v1006_v3, %s1435_s30  ;;  %1052 = vrot.lane.b32.xlu1 %v1387_v4, %s1435_s30  ;;  %v1036_v28 = vsel %vm749_vm1, 0.0, %v1025_v22 }
 0x44f   : > { %v1009_v9 = vpop.f32.mrf.mxu1 }
 0x450   : > { %v1043_v10 = vsel %vm762_vm2, %v1040_v5, %v1042_v7  ;;  %v1038_v11 = vrot.slane %v1009_v9, 1  ;;  %v1031_v12 = vsel %vm749_vm1, %v1028_v8, %v1030_v6  ;;  %v1045_v14 = vsel %vm762_vm2, %v1042_v7, 0.0 }
 0x451   : > { %v1026_v18 = vrot.slane %v1009_v9, 7 }
 0x452   : > { %1067 = vrot.lane.b32.xlu0 %v1043_v10, %s1436_s18  ;;  %1048 = vrot.lane.b32.xlu1 %v1009_v9, %s1435_s30  ;;  %v1039_v15 = vsel %vm762_vm2, %v1037_v13, %v1038_v11  ;;  %v1041_v16 = vsel %vm762_vm2, %v1038_v11, %v1040_v5  ;;  %s1439_s30 = smov 24  }
 0x453   : > { %v1029_v21 = vsel %vm749_vm1, %v1026_v18, %v1028_v8  ;;  %v1027_v35 = vsel %vm749_vm1, %v1025_v22, %v1026_v18 }
 0x456   : > { %1069 = vrot.lane.b32.xlu1 %v1045_v14, %s1436_s18  ;;  %1063 = vrot.lane.b32.xlu0 %v1039_v15, %s1436_s18 }
 0x45a   : > { %1065 = vrot.lane.b32.xlu1 %v1041_v16, %s1436_s18  ;;  %s548_s18 = scalar_lea.vmem %s1667_s17, %s1342_s20 }
 0x4bc   : > { %v1051_v17 = vpop.permute.xlu0 %1050 }
 0x4bd   : > { %v1060_v23 = vadd.f32 %v1051_v17, %v1029_v21 }
 0x4c0   : > { %v1047_v19 = vpop.permute.xlu0 %1046  ;;  %v1053_v20 = vpop.permute.xlu1 %1052 }
 0x4c1   : > { %v1058_v29 = vadd.f32 %v1047_v19, %v1036_v28  ;;  %v1061_v30 = vadd.f32 %v1053_v20, %v1031_v12 }
 0x4c4   : > { %v1068_v25 = vpop.permute.xlu0 %1067  ;;  %v1049_v26 = vpop.permute.xlu1 %1048 }
 0x4c5   : > { %v1077_v27 = vadd.f32 %v1068_v25, %v1060_v23  ;;  %v1059_v36 = vadd.f32 %v1049_v26, %v1027_v35 }
 0x4c7   : > { %1087 = vrot.lane.b32.xlu0 %v1077_v27, %s1439_s30 }
 0x4c8   : > { %v1070_v31 = vpop.permute.xlu1 %1069  ;;  %v1064_v32 = vpop.permute.xlu0 %1063 }
 0x4c9   : > { %v1078_v33 = vadd.f32 %v1070_v31, %v1061_v30  ;;  %v1075_v34 = vadd.f32 %v1064_v32, %v1058_v29 }
 0x4cb   : > { %1089 = vrot.lane.b32.xlu1 %v1078_v33, %s1439_s30  ;;  %1083 = vrot.lane.b32.xlu0 %v1075_v34, %s1439_s30 }
 0x4cc   : > { %v1066_v37 = vpop.permute.xlu1 %1065 }
 0x4cd   : > { %v1076_v38 = vadd.f32 %v1066_v37, %v1059_v36 }
 0x4cf   : > { %1085 = vrot.lane.b32.xlu1 %v1076_v38, %s1439_s30 }
 0x539   : > { %v1088_v39 = vpop.permute.xlu0 %1087 }
 0x53a   : > { %1098 = vst.msk [vmem:[#allocation2 + $0x10] sm:$0xff] %vm1095_vm7, %v1088_v39 }
 0x53d   : > { %v1090_v40 = vpop.permute.xlu1 %1089  ;;  %v1084_v41 = vpop.permute.xlu0 %1083 }
 0x53e   : > { %1099 = vst.msk [vmem:[#allocation2 + $0x18] sm:$0xff] %vm1095_vm7, %v1090_v40  ;;  %1096 = vst.msk [vmem:[#allocation2] sm:$0xff] %vm1095_vm7, %v1084_v41 }
 0x541   : > { %v1086_v43 = vpop.permute.xlu1 %1085  ;;  %v1102_v44 = vld [vmem:[#allocation2 + $0x10] sm:$0xff] }
 0x542   : > { %1097 = vst.msk [vmem:[#allocation2 + $0x8] sm:$0xff] %vm1095_vm7, %v1086_v43  ;;  %v1113_v45 = vmul.f32 %v1332_v42, %v1102_v44 }
 0x544   : > { %v1124_v50 = vadd.f32 %v1333_v46, %v1113_v45 }
 0x545   : > { %v1103_v47 = vld [vmem:[#allocation2 + $0x18] sm:$0xff]  ;;  %v1100_v48 = vld [vmem:[#allocation2] sm:$0xff] }
 0x546   : > { %v1114_v49 = vmul.f32 %v1332_v42, %v1103_v47  ;;  %v1111_v51 = vmul.f32 %v1332_v42, %v1100_v48  ;;  %v1128_v54 = vmax.f32 %v1124_v50, 0.0 }
 0x548   : > { %v1125_v52 = vadd.f32 %v1333_v46, %v1114_v49  ;;  %v1122_v57 = vadd.f32 %v1333_v46, %v1111_v51 }
 0x549   : > { %v1101_v53 = vld [vmem:[#allocation2 + $0x8] sm:$0xff] }
 0x54a   : > { %v1129_v55 = vmax.f32 %v1125_v52, 0.0  ;;  %v1112_v56 = vmul.f32 %v1332_v42, %v1101_v53  ;;  %v1126_v60 = vmax.f32 %v1122_v57, 0.0 }
 0x54c   : > { %v1133_v58 = vpack.c.bf16 %v1129_v55, %v1128_v54  ;;  %v1123_v59 = vadd.f32 %v1333_v46, %v1112_v56 }
 0x54e   : > { %1389 = vmatpush3.bf16.msra.mxu0 %v1133_v58  ;;  %v1127_v61 = vmax.f32 %v1123_v59, 0.0 }
 0x54f   : > { %1390 = vmatprep.subr.bf16.mxu0 %v1438_v24 }
 0x550   : > { %v1132_v62 = vpack.c.bf16 %v1127_v61, %v1126_v60 }
 0x552   : > { %1391 = vmatpush3.bf16.msra.mxu0 %v1132_v62 }
 0x555   : > { %1393 = vmatmul.mubr.msk.bf16.vlgmr.msra.gmra.mxu0 %vm1139_vm8, %v1424_v63 }
 0x615   : > { %v1177_v2 = vpop.f32.mrf.mxu0 }
 0x617   : > { %v1394_v3 = vpop.f32.mrf.mxu0 }
 0x619   : > { %v1180_v4 = vpop.f32.mrf.mxu0 }
 0x61a   : > { %v1184_v5 = vpack.c.bf16 %v1180_v4, %v1177_v2 }
 0x61b   : > { %v1395_v6 = vpop.f32.mrf.mxu0 }
 0x61c   : > { %1401 = vmatmul.mubr.msk.bf16.vlgmr.msra.gmra.mxu1 %vm1139_vm8, %v1184_v5 }
 0x6dc   : > { %v1238_v7 = vpop.f32.mrf.mxu1 }
 0x6dd   : > { %1245 = vst.msk [vmem:[%s548_s18] sm:$0xff] %vm554_vm0, %v1238_v7 }
 0x6de   : > { %v1402_v8 = vpop.f32.mrf.mxu1 }
 0x6e0   : > { %v1241_v9 = vpop.f32.mrf.mxu1 }
 0x6e1   : > { %1246 = vst.msk [vmem:[%s548_s18 + $0x8] sm:$0xff] %vm554_vm0, %v1241_v9 }
 0x6e2   : > { %v1403_v10 = vpop.f32.mrf.mxu1 }
 0x6e3 PF: > { %s27_s24 = sadd.s32 1, %s1433_s24  }
 0x6e4   : > { %p24_p4 = scmp.ge.s32.totalorder %s27_s24, 4  }
 0x6e6   :  { %26 = sbr.rel (!%p24_p4) target bundleno = 3 (0x3), region = 118 }

// kernel: densenet_forward.12
= control target key start
LH: loop header
LB: loop body
LE: loop exit
PB: predicated region body
PF: predicated region fallthrough
CT: control target
= control target key end

     0   :  { %s1193_s29 = smov 0   ;;  %s1298_s0 = inlined_call_operand.vmem [shape: f32[2,16,16], index: 0, kind: input, shape index: {}]   ;;  %s1299_s1 = inlined_call_operand.vmem [shape: f32[1,16], index: 1, kind: input, shape index: {}]   ;;  %s1300_s2 = inlined_call_operand.vmem [shape: f32[1,16], index: 2, kind: input, shape index: {}]   ;;  %s1301_s3 = inlined_call_operand.vmem [shape: bf16[16,16], index: 3, kind: input, shape index: {}]   ;;  %s1302_s4 = inlined_call_operand.vmem [shape: f32[1,16], index: 4, kind: input, shape index: {}]   ;;  %s1303_s5 = inlined_call_operand.vmem [shape: f32[1,16], index: 5, kind: input, shape index: {}]   ;;  %s1304_s6 = inlined_call_operand.vmem [shape: bf16[16,24], index: 6, kind: input, shape index: {}]   ;;  %s1305_s7 = inlined_call_operand.vmem [shape: f32[1,24], index: 7, kind: input, shape index: {}]   ;;  %s1306_s8 = inlined_call_operand.vmem [shape: f32[1,24], index: 8, kind: input, shape index: {}]   ;;  %s1307_s9 = inlined_call_operand.vmem [shape: bf16[24,16], index: 9, kind: input, shape index: {}]   ;;  %s1308_s10 = inlined_call_operand.vmem [shape: f32[1,16], index: 10, kind: input, shape index: {}]   ;;  %s1309_s11 = inlined_call_operand.vmem [shape: f32[1,16], index: 11, kind: input, shape index: {}]   ;;  %s1310_s12 = inlined_call_operand.vmem [shape: bf16[16,24], index: 12, kind: input, shape index: {}]   ;;  %s1311_s13 = inlined_call_operand.vmem [shape: f32[9,16], index: 13, kind: input, shape index: {}]   ;;  %s1312_s14 = inlined_call_operand.vmem [shape: f32[2,9,32], index: 14, kind: output, shape index: {}]  }
   0x1 LB: > { %s1007_s30 = sadd.s32 4294967295, %s1110_s29   ;;  %p1011_p0 = scmp.ge.s32.totalorder %s1110_s29, 1  ;;  %s1110_s29 = sphi %s1193_s29, %s24_s29  }
   0x2   : > { %p412_p1 = scmp.lt.s32.totalorder %s1110_s29, 3 }
   0x4   : > { %p413_p2 = pnand %p1011_p0, %p412_p1 }
   0x5   : > { %p458_p3 = scmp.lt.s32.totalorder (!%p413_p2), %s1007_s30, 1  ;;  %s1114_s18 = smov (!%p413_p2), 120  }
   0x6   : > { %416 = sbr.rel (%p413_p2) target bundleno = 1534 (0x5fe), region = 76  ;;  %s1115_s19 = smov (!%p413_p2), 112  }
   0x7   : > { %s1116_s24 = smov (!%p413_p2), 16   ;;  %s1117_s25 = smov (!%p413_p2), 24  }
   0xb   : > { %v1099_v0 = vld [vmem:[%s1301_s3] sm:$0xff]   ;;  %v1112_v1 = vmov 0.0   ;;  %vm1113_vm0 = vmmov 0   ;;  %s1314_s30 = smov (!%p458_p3, %s1007_s30), 1  ;;  %vm471_vm1 = vcmask 130048   ;;  %vm631_vm2 = vcmask 1046528  }
   0xc   : > { %1052 = vmatprep.subr.bf16.mxu0 %v1112_v1  ;;  %1058 = vmatprep.subr.bf16.mxu1 %v1112_v1  ;;  %s1037_s17 = sshll.u32 %s1314_s30, 4  ;;  %v1016_v4 = vld [vmem:[%s1299_s1] ss:$0 sm:$0xff]  ;;  %vm624_vm3 = vcmask 1040384   ;;  %v1101_v41 = vld [vmem:[%s1307_s9 + $0x8] ss:$0 sps:$4 sm:$0xff]  }
   0xd   : > { %1053 = vmatpush3.bf16.msra.mxu0 %v1099_v0  ;;  %1054 = vmatprep.mubr.msk.bf16.mxu0 %vm1113_vm0, %v1112_v1  ;;  %s462_s20 = scalar_lea.vmem %s1298_s0, %s1037_s17  ;;  %v1017_v7 = vld [vmem:[%s1300_s2] ss:$0 sm:$0xff]  ;;  %vm704_vm4 = vcmask 1043456   ;;  %vm662_vm5 = vcmask 195712   ;;  %vm700_vm6 = vcmask 195584   ;;  %vm860_vm7 = vcmask 261312   ;;  %s467_s15 = scalar_lea.vmem %s1312_s14, %s1037_s17 }
   0xe   : > { %1060 = vmatprep.mubr.msk.bf16.mxu1 %vm1113_vm0, %v1112_v1  ;;  %1064 = vmatprep.subr.bf16.mxu0 %v1112_v1  ;;  %v469_v2 = vld [vmem:[%s462_s20] sm:$0xff]  ;;  %v470_v3 = vld [vmem:[%s462_s20 + $0x8] sm:$0xff]  ;;  %v706_v42 = vsel %vm704_vm4, %v1101_v41, 0  ;;  %vm950_vm8 = vcmask 253952   ;;  %vm948_vm9 = vcmask 261120  }
   0xf   : > { %472 = vst.msk [vmem:[#allocation2] sm:$0xff] %vm471_vm1, %v469_v2  ;;  %473 = vst.msk [vmem:[#allocation2 + $0x8] sm:$0xff] %vm471_vm1, %v470_v3  ;;  %v1100_v15 = vld [vmem:[%s1304_s6] sm:$0xff]  }
  0x10   : > { %1059 = vmatpush3.bf16.msra.mxu1 %v1100_v15  ;;  %v1020_v16 = vld [vmem:[%s1302_s4] ss:$0 sm:$0xff] }
  0x11   : > { %1072 = vmatprep.subr.bf16.mxu1 %v1112_v1  ;;  %v1021_v19 = vld [vmem:[%s1303_s5] ss:$0 sm:$0xff] }
  0x12   : > { %v1102_v43 = vld [vmem:[%s1307_s9] sm:$0xff]  }
  0x13   : > { %v1024_v54 = vld [vmem:[%s1305_s7] ss:$0 sm:$0xff] }
  0x14   : > { %v1025_v57 = vld [vmem:[%s1306_s8] ss:$0 sm:$0xff] }
  0x15   : > { %v1029_v2 = vld [vmem:[%s1308_s10] ss:$0 sm:$0xff] }
  0x16   : > { %v474_v5 = vld [vmem:[#allocation2] sm:$0xff]  ;;  %v475_v6 = vld [vmem:[#allocation2 + $0x8] sm:$0xff] }
  0x17   : > { %v483_v8 = vmul.f32 %v1016_v4, %v474_v5  ;;  %v484_v9 = vmul.f32 %v1016_v4, %v475_v6  ;;  %v1030_v5 = vld [vmem:[%s1309_s11] ss:$0 sm:$0xff] }
  0x19   : > { %v492_v10 = vadd.f32 %v1017_v7, %v483_v8  ;;  %v493_v11 = vadd.f32 %v1017_v7, %v484_v9 }
  0x1b   : > { %v494_v12 = vmax.f32 %v492_v10, 0.0  ;;  %v495_v13 = vmax.f32 %v493_v11, 0.0 }
  0x1d   : > { %v496_v14 = vpack.c.bf16 %v495_v13, %v494_v12 }
  0x1f   : > { %1055 = vmatmul.mubr.msk.bf16.vlgmr.msra.gmra.mxu0 %vm471_vm1, %v496_v14 }
  0x20   : > { %1068 = vmatprep.mubr.msk.bf16.mxu0 %vm1113_vm0, %v1112_v1  ;;  %1065 = vmatpush3.bf16.msra.mxu0 %v706_v42 }
  0x21   : > { %1066 = vmatprep.subr.bf16.mxu0 %v1112_v1 }
  0x24   : > { %1067 = vmatpush3.bf16.msra.mxu0 %v1102_v43 }
  0xdf   : > { %v542_v17 = vpop.f32.mrf.mxu0 }
  0xe0   : > { %v556_v18 = vmul.f32 %v1020_v16, %v542_v17 }
  0xe1   : > { %v1056_v20 = vpop.f32.mrf.mxu0 }
  0xe2   : > { %v565_v22 = vadd.f32 %v1021_v19, %v556_v18 }
  0xe3   : > { %v545_v21 = vpop.f32.mrf.mxu0 }
  0xe4   : > { %v557_v23 = vmul.f32 %v1020_v16, %v545_v21  ;;  %v567_v26 = vmax.f32 %v565_v22, 0.0 }
  0xe5   : > { %v1057_v24 = vpop.f32.mrf.mxu0 }
  0xe6   : > { %v566_v25 = vadd.f32 %v1021_v19, %v557_v23 }
  0xe8   : > { %v568_v27 = vmax.f32 %v566_v25, 0.0 }
  0xea   : > { %v569_v28 = vpack.c.bf16 %v568_v27, %v567_v26 }
  0xec   : > { %1061 = vmatmul.mubr.msk.bf16.vlgmr.msra.gmra.mxu1 %vm471_vm1, %v569_v28 }
  0xed   : > { %1074 = vmatprep.mubr.msk.bf16.mxu1 %vm1113_vm0, %v1112_v1  ;;  %v1103_v1 = vld [vmem:[%s1310_s12] sm:$0xff]  }
  0xee   : > { %1073 = vmatpush3.bf16.msra.mxu1 %v1103_v1 }
 0x1ac   : > { %v615_v29 = vpop.f32.mrf.mxu1 }
 0x1ad   : > { %637 = vrot.lane.b32.xlu0 %v615_v29, %s1114_s18  ;;  %v632_v32 = vrot.slane %v615_v29, 1  ;;  %v625_v35 = vrot.slane %v615_v29, 7 }
 0x1ae   : > { %v1062_v30 = vpop.f32.mrf.mxu1 }
 0x1af   : > { %v630_v44 = vsel %vm624_vm3, 0.0, %v625_v35 }
 0x1b0   : > { %v618_v31 = vpop.f32.mrf.mxu1 }
 0x1b1   : > { %v626_v33 = vrot.slane %v618_v31, 7  ;;  %v633_v34 = vrot.slane %v618_v31, 1  ;;  %639 = vrot.lane.b32.xlu0 %v618_v31, %s1114_s18 }
 0x1b2   : > { %v1063_v36 = vpop.f32.mrf.mxu1 }
 0x1b3   : > { %v634_v37 = vsel %vm631_vm2, %v632_v32, %v633_v34  ;;  %v627_v38 = vsel %vm624_vm3, %v625_v35, %v626_v33  ;;  %v636_v39 = vsel %vm631_vm2, %v633_v34, 0.0  ;;  %v865_v34 = vld [vmem:[%s1311_s13] sm:$0xff] }
 0x1b4   : > { %646 = vrot.lane.b32.xlu1 %v634_v37, %s1115_s19 }
 0x1b8   : > { %648 = vrot.lane.b32.xlu1 %v636_v39, %s1115_s19 }
 0x21f   : > { %v638_v40 = vpop.permute.xlu0 %637 }
 0x220   : > { %v643_v45 = vadd.f32 %v638_v40, %v630_v44  ;;  %v866_v40 = vld [vmem:[%s1311_s13 + $0x8] sm:$0x1] }
 0x223   : > { %v640_v46 = vpop.permute.xlu0 %639 }
 0x224   : > { %v644_v49 = vadd.f32 %v640_v46, %v627_v38 }
 0x226   : > { %v647_v47 = vpop.permute.xlu1 %646 }
 0x227   : > { %v652_v48 = vadd.f32 %v647_v47, %v643_v45 }
 0x229   : > { %656 = vrot.lane.b32.xlu0 %v652_v48, %s1116_s24 }
 0x22a   : > { %v649_v50 = vpop.permute.xlu1 %648 }
 0x22b   : > { %v653_v51 = vadd.f32 %v649_v50, %v644_v49 }
 0x22d   : > { %658 = vrot.lane.b32.xlu1 %v653_v51, %s1116_s24 }
 0x29b   : > { %v657_v52 = vpop.permute.xlu0 %656 }
 0x29c   : > { %663 = vst.msk [vmem:[#allocation2] sm:$0xff] %vm662_vm5, %v657_v52 }
 0x29f   : > { %v659_v53 = vpop.permute.xlu1 %658 }
 0x2a0   : > { %664 = vst.msk [vmem:[#allocation2 + $0x8] sm:$0xff] %vm662_vm5, %v659_v53 }
 0x2a3   : > { %v665_v55 = vld [vmem:[#allocation2] sm:$0xff] }
 0x2a4   : > { %v674_v56 = vmul.f32 %v1024_v54, %v665_v55 }
 0x2a6   : > { %v683_v60 = vadd.f32 %v1025_v57, %v674_v56 }
 0x2a7   : > { %v666_v58 = vld [vmem:[#allocation2 + $0x8] sm:$0xff] }
 0x2a8   : > { %v675_v59 = vmul.f32 %v1024_v54, %v666_v58  ;;  %v685_v62 = vmax.f32 %v683_v60, 0.0 }
 0x2aa   : > { %v684_v61 = vadd.f32 %v1025_v57, %v675_v59 }
 0x2ac   : > { %v686_v63 = vmax.f32 %v684_v61, 0.0 }
 0x2ae   : > { %v687_v0 = vpack.c.bf16 %v686_v63, %v685_v62 }
 0x2b0   : > { %1069 = vmatmul.mubr.msk.bf16.vlgmr.msra.gmra.mxu0 %vm700_vm6, %v687_v0 }
 0x2b1   : > { %1082 = vmatprep.mubr.msk.f32.mxu0 %vm471_vm1, %v865_v34 }
 0x370   : > { %v742_v3 = vpop.f32.mrf.mxu0 }
 0x371   : > { %v756_v4 = vmul.f32 %v1029_v2, %v742_v3 }
 0x372   : > { %v1070_v6 = vpop.f32.mrf.mxu0 }
 0x373   : > { %v765_v8 = vadd.f32 %v1030_v5, %v756_v4 }
 0x374   : > { %v745_v7 = vpop.f32.mrf.mxu0 }
 0x375   : > { %v757_v9 = vmul.f32 %v1029_v2, %v745_v7  ;;  %v767_v12 = vmax.f32 %v765_v8, 0.0 }
 0x376   : > { %v1071_v10 = vpop.f32.mrf.mxu0 }
 0x377   : > { %v766_v11 = vadd.f32 %v1030_v5, %v757_v9 }
 0x379   : > { %v768_v13 = vmax.f32 %v766_v11, 0.0 }
 0x37b   : > { %v769_v14 = vpack.c.bf16 %v768_v13, %v767_v12 }
 0x37d   : > { %1075 = vmatmul.mubr.msk.bf16.vlgmr.msra.gmra.mxu1 %vm471_vm1, %v769_v14 }
 0x43d   : > { %v815_v15 = vpop.f32.mrf.mxu1 }
 0x43e   : > { %835 = vrot.lane.b32.xlu1 %v815_v15, %s1114_s18  ;;  %v830_v18 = vrot.slane %v815_v15, 1  ;;  %v824_v21 = vrot.slane %v815_v15, 7 }
 0x43f   : > { %v1076_v16 = vpop.f32.mrf.mxu1 }
 0x440   : > { %v829_v28 = vsel %vm624_vm3, 0.0, %v824_v21 }
 0x441   : > { %v818_v17 = vpop.f32.mrf.mxu1 }
 0x442   : > { %v825_v19 = vrot.slane %v818_v17, 7  ;;  %v831_v20 = vrot.slane %v818_v17, 1  ;;  %837 = vrot.lane.b32.xlu0 %v818_v17, %s1114_s18 }
 0x443   : > { %v1077_v22 = vpop.f32.mrf.mxu1 }
 0x444   : > { %v832_v23 = vsel %vm631_vm2, %v830_v18, %v831_v20  ;;  %v834_v24 = vsel %vm631_vm2, %v831_v20, 0.0  ;;  %v826_v25 = vsel %vm624_vm3, %v824_v21, %v825_v19 }
 0x445   : > { %844 = vrot.lane.b32.xlu1 %v832_v23, %s1115_s19 }
 0x446   : > { %846 = vrot.lane.b32.xlu0 %v834_v24, %s1115_s19 }
 0x4b0   : > { %v836_v26 = vpop.permute.xlu1 %835 }
 0x4b1   : > { %v841_v29 = vadd.f32 %v836_v26, %v829_v28 }
 0x4b4   : > { %v838_v27 = vpop.permute.xlu0 %837 }
 0x4b5   : > { %v842_v30 = vadd.f32 %v838_v27, %v826_v25 }
 0x4b7   : > { %v845_v31 = vpop.permute.xlu1 %844 }
 0x4b8   : > { %v850_v32 = vadd.f32 %v845_v31, %v841_v29  ;;  %v847_v33 = vpop.permute.xlu0 %846 }
 0x4b9   : > { %v851_v35 = vadd.f32 %v847_v33, %v842_v30 }
 0x4ba   : > { %854 = vrot.lane.b32.xlu1 %v850_v32, %s1117_s25 }
 0x4bb   : > { %856 = vrot.lane.b32.xlu0 %v851_v35, %s1117_s25 }
 0x52c   : > { %v855_v36 = vpop.permute.xlu1 %854 }
 0x52d   : > { %861 = vst.msk [vmem:[#allocation2] sm:$0xff] %vm860_vm7, %v855_v36  ;;  %v857_v37 = vpop.permute.xlu0 %856 }
 0x52e   : > { %862 = vst.msk [vmem:[#allocation2 + $0x8] sm:$0xff] %vm860_vm7, %v857_v37 }
 0x534   : > { %v863_v39 = vld [vmem:[#allocation2] sm:$0xff] }
 0x535   : > { %v864_v38 = vld [vmem:[#allocation2 + $0x8] sm:$0xff] }
 0x536   : > { %1078 = vmatprep.subr.mxu0 %v864_v38 }
 0x537   : > { %1079 = vmatpush3.msra.mxu0 %v864_v38 }
 0x538   : > { %1080 = vmatprep.subr.mxu0 %v863_v39 }
 0x539   : > { %1081 = vmatpush3.msra.mxu0 %v863_v39 }
 0x53a   : > { %1083 = vmatmul.mubr.msk.f32.vlgmr.msra.gmra.mxu0 %vm471_vm1, %v866_v40 }
 0x5fa   : > { %v1084_v41 = vpop.f32.mrf.mxu0 }
 0x5fb   : > { %951 = vst.msk [vmem:[%s467_s15 + $0x8] sm:$0x1] %vm950_vm8, %v1084_v41 }
 0x5fc   : > { %v939_v42 = vpop.f32.mrf.mxu0 }
 0x5fd   : > { %949 = vst.msk [vmem:[%s467_s15] sm:$0xff] %vm948_vm9, %v939_v42 }
 0x5fe PF: > { %s24_s29 = sadd.s32 1, %s1110_s29  }
 0x5ff   : > { %p21_p4 = scmp.ge.s32.totalorder %s24_s29, 4  }
 0x601   :  { %23 = sbr.rel (!%p21_p4) target bundleno = 1 (0x1), region = 106 }

// kernel: densenet_forward.14
= control target key start
LH: loop header
LB: loop body
LE: loop exit
PB: predicated region body
PF: predicated region fallthrough
CT: control target
= control target key end

     0   :  { %s1631_s12 = smov 0   ;;  %s1816_s0 = inlined_call_operand.vmem [shape: f32[2,1024], index: 0, kind: input, shape index: {}]   ;;  %s1817_s1 = inlined_call_operand.vmem [shape: bf16[1024,512], index: 1, kind: input, shape index: {}]   ;;  %s1818_s2 = inlined_call_operand.vmem [shape: f32[1,512], index: 2, kind: input, shape index: {}]   ;;  %s1819_s3 = inlined_call_operand.vmem [shape: f32[2,512], index: 3, kind: output, shape index: {}]  }
   0x1 LB: > { %s1637_s13 = sadd.s32 4294967295, %s1607_s12   ;;  %p1259_p0 = scmp.ge.s32.totalorder %s1607_s12, 1  ;;  %s1607_s12 = sphi %s1631_s12, %s13_s12  }
   0x2   : > { %p145_p1 = scmp.lt.s32.totalorder %s1607_s12, 3 }
   0x4   : > { %p146_p2 = pnand %p1259_p0, %p145_p1 }
   0x5   : > { %s1260_s14 = sshll.u32 (!%p146_p2), %s1637_s13, 2  ;;  %s1262_s15 = sshll.u32 (!%p146_p2), %s1637_s13, 6 }
   0x6   : > { %149 = sbr.rel (%p146_p2) target bundleno = 372 (0x174), region = 32  ;;  %p171_p3 = scmp.lt.s32.totalorder (!%p146_p2), %s1260_s14, 7 }
   0x7   : > { %p177_p4 = scmp.lt.s32.totalorder (!%p146_p2), %s1262_s15, 127  ;;  %p1265_p5 = scmp.ne.s32.totalorder (!%p146_p2), %s1637_s13, 0 }
   0xb   : > { %s1821_s14 = smov (!%p171_p3, %s1260_s14), 7  ;;  %s1823_s15 = smov (!%p177_p4, %s1262_s15), 127 }
   0xc   : > { %s1261_s16 = sshll.u32 %s1821_s14, 1  ;;  %s1397_s20 = sshll.u32 %s1823_s15, 4 }
   0xd   : > { %s1646_s19 = scalar_lea.vmem %s1816_s0, %s1261_s16  ;;  %s1651_s23 = scalar_lea.vmem %s1817_s1, %s1397_s20 }
   0xe   : > { %186 = sbr.rel (%p1265_p5) target bundleno = 21 (0x15), region = 36 }
  0x13   : > { %v1609_v0 = vmov 0.0  }
  0x14   : > { %187 = vst [vmem:[#allocation2] sm:$0xff] %v1609_v0 }
  0x15 PF: > { %v1408_v1 = vld [vmem:[%s1651_s23 + $0xe4] ss:$16 sps:$4 sm:$0xff]   ;;  %v1412_v3 = vld [vmem:[%s1651_s23 + $0xe0] ss:$16 sps:$4 sm:$0xff]   ;;  %v1610_v37 = vmov 1983009808   ;;  %v195_v39 = vlaneseq }
  0x16   : > { %v1410_v2 = vld [vmem:[%s1651_s23 + $0x2e4] ss:$16 sps:$4 sm:$0xff]   ;;  %984 = vmatprep.subr.bf16.mxu0 %v1408_v1  ;;  %v1413_v4 = vld [vmem:[%s1651_s23 + $0x2e0] ss:$16 sps:$4 sm:$0xff]   ;;  %v193_v38 = vunpack.c.l.s4 %v1610_v37  ;;  %v1537_v37 = vld [vmem:[%s1651_s23 + $0x4c] ss:$16 sps:$4 sm:$0xff]  }
  0x17   : > { %1025 = vmatprep.subr.bf16.mxu1 %v1410_v2  ;;  %v1414_v5 = vld [vmem:[%s1651_s23 + $0xc4] ss:$16 sps:$4 sm:$0xff]   ;;  %985 = vmatpush1.bf16.msra.mxu0 %v1412_v3  ;;  %v1418_v7 = vld [vmem:[%s1651_s23 + $0xc0] ss:$16 sps:$4 sm:$0xff]   ;;  %v1693_v44 = vshrl.u32 %v195_v39, 7  ;;  %p1394_p6 = scmp.ne.s32.totalorder %s1637_s13, 1 }
  0x18   : > { %1026 = vmatpush1.bf16.msra.mxu1 %v1413_v4  ;;  %v1416_v6 = vld [vmem:[%s1651_s23 + $0x2c4] ss:$16 sps:$4 sm:$0xff]   ;;  %986 = vmatprep.subr.bf16.mxu0 %v1414_v5  ;;  %v1419_v8 = vld [vmem:[%s1651_s23 + $0x2c0] ss:$16 sps:$4 sm:$0xff]   ;;  %v194_v43 = vunpack.c.0.s8 %v193_v38  ;;  %v1540_v38 = vld [vmem:[%s1651_s23 + $0x24c] ss:$16 sps:$4 sm:$0xff]  }
  0x19   : > { %1027 = vmatprep.subr.bf16.mxu1 %v1416_v6  ;;  %v1420_v9 = vld [vmem:[%s1651_s23 + $0xa4] ss:$16 sps:$4 sm:$0xff]   ;;  %v1424_v11 = vld [vmem:[%s1651_s23 + $0xa0] ss:$16 sps:$4 sm:$0xff]   ;;  %v1535_v39 = vld [vmem:[%s1651_s23 + $0x48] ss:$16 sps:$4 sm:$0xff]  }
  0x1a   : > { %v1422_v10 = vld [vmem:[%s1651_s23 + $0x2a4] ss:$16 sps:$4 sm:$0xff]   ;;  %v1425_v12 = vld [vmem:[%s1651_s23 + $0x2a0] ss:$16 sps:$4 sm:$0xff]   ;;  %v1701_v50 = vsub.s32 %v194_v43, %v1693_v44  ;;  %v1541_v43 = vld [vmem:[%s1651_s23 + $0x28] ss:$16 sps:$4 sm:$0xff]  }
  0x1b   : > { %987 = vmatpush1.bf16.msra.mxu0 %v1418_v7  ;;  %v1426_v13 = vld [vmem:[%s1651_s23 + $0x84] ss:$16 sps:$4 sm:$0xff]   ;;  %v1430_v15 = vld [vmem:[%s1651_s23 + $0x80] ss:$16 sps:$4 sm:$0xff]  }
  0x1c   : > { %1028 = vmatpush1.bf16.msra.mxu1 %v1419_v8  ;;  %988 = vmatprep.subr.bf16.mxu0 %v1420_v9  ;;  %v1428_v14 = vld [vmem:[%s1651_s23 + $0x284] ss:$16 sps:$4 sm:$0xff]   ;;  %v1431_v16 = vld [vmem:[%s1651_s23 + $0x280] ss:$16 sps:$4 sm:$0xff]  }
  0x1d   : > { %1029 = vmatprep.subr.bf16.mxu1 %v1422_v10  ;;  %v1432_v17 = vld [vmem:[%s1651_s23 + $0x64] ss:$16 sps:$4 sm:$0xff]   ;;  %v1436_v19 = vld [vmem:[%s1651_s23 + $0x60] ss:$16 sps:$4 sm:$0xff]  }
  0x1e   : > { %v1434_v18 = vld [vmem:[%s1651_s23 + $0x264] ss:$16 sps:$4 sm:$0xff]   ;;  %v1437_v20 = vld [vmem:[%s1651_s23 + $0x260] ss:$16 sps:$4 sm:$0xff]  }
  0x1f   : > { %989 = vmatpush1.bf16.msra.mxu0 %v1424_v11  ;;  %v1438_v21 = vld [vmem:[%s1651_s23 + $0x44] ss:$16 sps:$4 sm:$0xff]   ;;  %v1442_v23 = vld [vmem:[%s1651_s23 + $0x40] ss:$16 sps:$4 sm:$0xff]  }
  0x20   : > { %1030 = vmatpush1.bf16.msra.mxu1 %v1425_v12  ;;  %990 = vmatprep.subr.bf16.mxu0 %v1426_v13  ;;  %v1440_v22 = vld [vmem:[%s1651_s23 + $0x244] ss:$16 sps:$4 sm:$0xff]   ;;  %v1443_v24 = vld [vmem:[%s1651_s23 + $0x240] ss:$16 sps:$4 sm:$0xff]  }
  0x21   : > { %1031 = vmatprep.subr.bf16.mxu1 %v1428_v14  ;;  %v1444_v25 = vld [vmem:[%s1651_s23 + $0x24] ss:$16 sps:$4 sm:$0xff]   ;;  %v1448_v27 = vld [vmem:[%s1651_s23 + $0x20] ss:$16 sps:$4 sm:$0xff]  }
  0x22   : > { %v1446_v26 = vld [vmem:[%s1651_s23 + $0x224] ss:$16 sps:$4 sm:$0xff]   ;;  %v1449_v28 = vld [vmem:[%s1651_s23 + $0x220] ss:$16 sps:$4 sm:$0xff]  }
  0x23   : > { %991 = vmatpush1.bf16.msra.mxu0 %v1430_v15  ;;  %v1450_v29 = vld [vmem:[%s1651_s23 + $0x4] ss:$16 sps:$4 sm:$0xff]   ;;  %v1454_v31 = vld [vmem:[%s1651_s23] ss:$16 sps:$4 sm:$0xff]   ;;  %v1507_v15 = vld [vmem:[%s1651_s23 + $0xec] ss:$16 sps:$4 sm:$0xff]  }
  0x24   : > { %1032 = vmatpush1.bf16.msra.mxu1 %v1431_v16  ;;  %992 = vmatprep.subr.bf16.mxu0 %v1432_v17  ;;  %v1452_v30 = vld [vmem:[%s1651_s23 + $0x204] ss:$16 sps:$4 sm:$0xff]   ;;  %v1455_v32 = vld [vmem:[%s1651_s23 + $0x200] ss:$16 sps:$4 sm:$0xff]   ;;  %v1510_v16 = vld [vmem:[%s1651_s23 + $0x2ec] ss:$16 sps:$4 sm:$0xff]  }
  0x25   : > { %1033 = vmatprep.subr.bf16.mxu1 %v1434_v18  ;;  %v1456_v33 = vld [vmem:[%s1651_s23 + $0x1e4] ss:$16 sps:$4 sm:$0xff]   ;;  %v1460_v35 = vld [vmem:[%s1651_s23 + $0x1e0] ss:$16 sps:$4 sm:$0xff]  }
  0x26   : > { %v1458_v34 = vld [vmem:[%s1651_s23 + $0x3e4] ss:$16 sps:$4 sm:$0xff]   ;;  %v1461_v36 = vld [vmem:[%s1651_s23 + $0x3e0] ss:$16 sps:$4 sm:$0xff]  }
  0x27   : > { %993 = vmatpush1.bf16.msra.mxu0 %v1436_v19  ;;  %v1462_v40 = vld [vmem:[%s1651_s23 + $0x1c4] ss:$16 sps:$4 sm:$0xff]   ;;  %v1466_v42 = vld [vmem:[%s1651_s23 + $0x1c0] ss:$16 sps:$4 sm:$0xff]   ;;  %v1505_v19 = vld [vmem:[%s1651_s23 + $0xe8] ss:$16 sps:$4 sm:$0xff]  }
  0x28   : > { %1034 = vmatpush1.bf16.msra.mxu1 %v1437_v20  ;;  %994 = vmatprep.subr.bf16.mxu0 %v1438_v21  ;;  %v1464_v41 = vld [vmem:[%s1651_s23 + $0x3c4] ss:$16 sps:$4 sm:$0xff]   ;;  %v1467_v45 = vld [vmem:[%s1651_s23 + $0x3c0] ss:$16 sps:$4 sm:$0xff]   ;;  %v1508_v20 = vld [vmem:[%s1651_s23 + $0x2e8] ss:$16 sps:$4 sm:$0xff]  }
  0x29   : > { %1035 = vmatprep.subr.bf16.mxu1 %v1440_v22  ;;  %v1468_v46 = vld [vmem:[%s1651_s23 + $0x1a4] ss:$16 sps:$4 sm:$0xff]   ;;  %v1472_v48 = vld [vmem:[%s1651_s23 + $0x1a0] ss:$16 sps:$4 sm:$0xff]   ;;  %v1513_v21 = vld [vmem:[%s1651_s23 + $0xcc] ss:$16 sps:$4 sm:$0xff]  }
  0x2a   : > { %v1470_v47 = vld [vmem:[%s1651_s23 + $0x3a4] ss:$16 sps:$4 sm:$0xff]   ;;  %v1473_v49 = vld [vmem:[%s1651_s23 + $0x3a0] ss:$16 sps:$4 sm:$0xff]   ;;  %v1516_v22 = vld [vmem:[%s1651_s23 + $0x2cc] ss:$16 sps:$4 sm:$0xff]  }
  0x2b   : > { %995 = vmatpush1.bf16.msra.mxu0 %v1442_v23  ;;  %v1474_v51 = vld [vmem:[%s1651_s23 + $0x184] ss:$16 sps:$4 sm:$0xff]   ;;  %v1478_v54 = vld [vmem:[%s1651_s23 + $0x180] ss:$16 sps:$4 sm:$0xff]   ;;  %v1511_v23 = vld [vmem:[%s1651_s23 + $0xc8] ss:$16 sps:$4 sm:$0xff]  }
  0x2c   : > { %1036 = vmatpush1.bf16.msra.mxu1 %v1443_v24  ;;  %996 = vmatprep.subr.bf16.mxu0 %v1444_v25  ;;  %v1476_v52 = vld [vmem:[%s1651_s23 + $0x384] ss:$16 sps:$4 sm:$0xff]   ;;  %v1479_v57 = vld [vmem:[%s1651_s23 + $0x380] ss:$16 sps:$4 sm:$0xff]   ;;  %v1514_v24 = vld [vmem:[%s1651_s23 + $0x2c8] ss:$16 sps:$4 sm:$0xff]  }
  0x2d   : > { %1037 = vmatprep.subr.bf16.mxu1 %v1446_v26  ;;  %v189_v53 = vld [vmem:[%s1646_s19] sm:$0xff]  ;;  %v1519_v25 = vld [vmem:[%s1651_s23 + $0xac] ss:$16 sps:$4 sm:$0xff]  }
  0x2e   : > { %v198_v55 = vrot.slane %v189_v53, %v1701_v50  ;;  %v191_v56 = vcombine.high %v189_v53, %v189_v53  ;;  %v1480_v58 = vld [vmem:[%s1651_s23 + $0x164] ss:$16 sps:$4 sm:$0xff]   ;;  %v1484_v62 = vld [vmem:[%s1651_s23 + $0x160] ss:$16 sps:$4 sm:$0xff]   ;;  %v1522_v26 = vld [vmem:[%s1651_s23 + $0x2ac] ss:$16 sps:$4 sm:$0xff]  }
  0x2f   : > { %997 = vmatpush1.bf16.msra.mxu0 %v1448_v27  ;;  %v1482_v59 = vld [vmem:[%s1651_s23 + $0x364] ss:$16 sps:$4 sm:$0xff]   ;;  %v1485_v1 = vld [vmem:[%s1651_s23 + $0x360] ss:$16 sps:$4 sm:$0xff]   ;;  %v1517_v27 = vld [vmem:[%s1651_s23 + $0xa8] ss:$16 sps:$4 sm:$0xff]  }
  0x30   : > { %1038 = vmatpush1.bf16.msra.mxu1 %v1449_v28  ;;  %998 = vmatprep.subr.bf16.mxu0 %v1450_v29  ;;  %v206_v60 = vcombine.high %v198_v55, %v198_v55  ;;  %v205_v61 = vrot.slane %v191_v56, %v1701_v50  ;;  %v1486_v2 = vld [vmem:[%s1651_s23 + $0x144] ss:$16 sps:$4 sm:$0xff]   ;;  %v1490_v5 = vld [vmem:[%s1651_s23 + $0x140] ss:$16 sps:$4 sm:$0xff]   ;;  %v1728_v17 = vpack.c.bf16 %v198_v55, %v198_v55  ;;  %v1520_v28 = vld [vmem:[%s1651_s23 + $0x2a8] ss:$16 sps:$4 sm:$0xff]  }
  0x31   : > { %1039 = vmatprep.subr.bf16.mxu1 %v1452_v30  ;;  %v1488_v3 = vld [vmem:[%s1651_s23 + $0x344] ss:$16 sps:$4 sm:$0xff]   ;;  %v1491_v6 = vld [vmem:[%s1651_s23 + $0x340] ss:$16 sps:$4 sm:$0xff]   ;;  %v1525_v29 = vld [vmem:[%s1651_s23 + $0x8c] ss:$16 sps:$4 sm:$0xff]  }
  0x32   : > { %v213_v63 = vpack.c.bf16 %v206_v60, %v206_v60  ;;  %v207_v0 = vcombine.high %v205_v61, %v205_v61  ;;  %v1492_v7 = vld [vmem:[%s1651_s23 + $0x124] ss:$16 sps:$4 sm:$0xff]   ;;  %v1496_v9 = vld [vmem:[%s1651_s23 + $0x120] ss:$16 sps:$4 sm:$0xff]   ;;  %v1730_v18 = vpack.c.bf16 %v205_v61, %v205_v61  ;;  %v1528_v30 = vld [vmem:[%s1651_s23 + $0x28c] ss:$16 sps:$4 sm:$0xff]  }
  0x33   : > { %999 = vmatpush1.bf16.msra.mxu0 %v1454_v31  ;;  %v1494_v8 = vld [vmem:[%s1651_s23 + $0x324] ss:$16 sps:$4 sm:$0xff]   ;;  %v1497_v10 = vld [vmem:[%s1651_s23 + $0x320] ss:$16 sps:$4 sm:$0xff]   ;;  %v1523_v31 = vld [vmem:[%s1651_s23 + $0x88] ss:$16 sps:$4 sm:$0xff]  }
  0x34   : > { %1040 = vmatpush1.bf16.msra.mxu1 %v1455_v32  ;;  %1000 = vmatprep.subr.bf16.mxu0 %v1456_v33  ;;  %v215_v4 = vpack.c.bf16 %v207_v0, %v207_v0  ;;  %v1498_v11 = vld [vmem:[%s1651_s23 + $0x104] ss:$16 sps:$4 sm:$0xff]   ;;  %v1502_v13 = vld [vmem:[%s1651_s23 + $0x100] ss:$16 sps:$4 sm:$0xff]   ;;  %v1526_v32 = vld [vmem:[%s1651_s23 + $0x288] ss:$16 sps:$4 sm:$0xff]  }
  0x35   : > { %1041 = vmatprep.subr.bf16.mxu1 %v1458_v34  ;;  %1016 = vmatprep.mubr.bf16.mxu0 %v213_v63  ;;  %v1500_v12 = vld [vmem:[%s1651_s23 + $0x304] ss:$16 sps:$4 sm:$0xff]   ;;  %v1503_v14 = vld [vmem:[%s1651_s23 + $0x300] ss:$16 sps:$4 sm:$0xff]   ;;  %v1531_v33 = vld [vmem:[%s1651_s23 + $0x6c] ss:$16 sps:$4 sm:$0xff]  }
  0x36   : > { %1057 = vmatprep.mubr.bf16.mxu1 %v215_v4  ;;  %v1534_v34 = vld [vmem:[%s1651_s23 + $0x26c] ss:$16 sps:$4 sm:$0xff]   ;;  %v1553_v53 = vld [vmem:[%s1651_s23 + $0x1e8] ss:$16 sps:$4 sm:$0xff]  }
  0x37   : > { %1001 = vmatpush2.bf16.msra.mxu0 %v1460_v35  ;;  %v1529_v35 = vld [vmem:[%s1651_s23 + $0x68] ss:$16 sps:$4 sm:$0xff]   ;;  %v1561_v55 = vld [vmem:[%s1651_s23 + $0x1cc] ss:$16 sps:$4 sm:$0xff]  }
  0x38   : > { %1042 = vmatpush2.bf16.msra.mxu1 %v1461_v36  ;;  %1002 = vmatprep.subr.bf16.mxu0 %v1462_v40  ;;  %v1532_v36 = vld [vmem:[%s1651_s23 + $0x268] ss:$16 sps:$4 sm:$0xff]   ;;  %v1564_v56 = vld [vmem:[%s1651_s23 + $0x3cc] ss:$16 sps:$4 sm:$0xff]  }
  0x39   : > { %1043 = vmatprep.subr.bf16.mxu1 %v1464_v41  ;;  %v1538_v40 = vld [vmem:[%s1651_s23 + $0x248] ss:$16 sps:$4 sm:$0xff]   ;;  %v1543_v41 = vld [vmem:[%s1651_s23 + $0x2c] ss:$16 sps:$4 sm:$0xff]  }
  0x3a   : > { %v1570_v60 = vld [vmem:[%s1651_s23 + $0x3ac] ss:$16 sps:$4 sm:$0xff]   ;;  %v1565_v61 = vld [vmem:[%s1651_s23 + $0x1a8] ss:$16 sps:$4 sm:$0xff]  }
  0x3b   : > { %1003 = vmatpush2.bf16.msra.mxu0 %v1466_v42  ;;  %v1546_v42 = vld [vmem:[%s1651_s23 + $0x22c] ss:$16 sps:$4 sm:$0xff]  }
  0x3c   : > { %1044 = vmatpush2.bf16.msra.mxu1 %v1467_v45  ;;  %1004 = vmatprep.subr.bf16.mxu0 %v1468_v46  ;;  %v1544_v45 = vld [vmem:[%s1651_s23 + $0x228] ss:$16 sps:$4 sm:$0xff]   ;;  %v1549_v46 = vld [vmem:[%s1651_s23 + $0xc] ss:$16 sps:$4 sm:$0xff]  }
  0x3d   : > { %1045 = vmatprep.subr.bf16.mxu1 %v1470_v47  ;;  %v1552_v47 = vld [vmem:[%s1651_s23 + $0x20c] ss:$16 sps:$4 sm:$0xff]  }
  0x3e   : > { %v1576_v0 = vld [vmem:[%s1651_s23 + $0x38c] ss:$16 sps:$4 sm:$0xff]  }
  0x3f   : > { %1005 = vmatpush2.bf16.msra.mxu0 %v1472_v48  ;;  %v1547_v48 = vld [vmem:[%s1651_s23 + $0x8] ss:$16 sps:$4 sm:$0xff]  }
  0x40   : > { %1046 = vmatpush2.bf16.msra.mxu1 %v1473_v49  ;;  %1006 = vmatprep.subr.bf16.mxu0 %v1474_v51  ;;  %v1550_v49 = vld [vmem:[%s1651_s23 + $0x208] ss:$16 sps:$4 sm:$0xff]   ;;  %v1555_v51 = vld [vmem:[%s1651_s23 + $0x1ec] ss:$16 sps:$4 sm:$0xff]  }
  0x41   : > { %1047 = vmatprep.subr.bf16.mxu1 %v1476_v52  ;;  %v1558_v52 = vld [vmem:[%s1651_s23 + $0x3ec] ss:$16 sps:$4 sm:$0xff]  }
  0x43   : > { %1007 = vmatpush2.bf16.msra.mxu0 %v1478_v54  ;;  %v1556_v54 = vld [vmem:[%s1651_s23 + $0x3e8] ss:$16 sps:$4 sm:$0xff]  }
  0x44   : > { %1048 = vmatpush2.bf16.msra.mxu1 %v1479_v57  ;;  %1008 = vmatprep.subr.bf16.mxu0 %v1480_v58  ;;  %v1559_v57 = vld [vmem:[%s1651_s23 + $0x1c8] ss:$16 sps:$4 sm:$0xff]  }
  0x45   : > { %1049 = vmatprep.subr.bf16.mxu1 %v1482_v59  ;;  %v1562_v58 = vld [vmem:[%s1651_s23 + $0x3c8] ss:$16 sps:$4 sm:$0xff]   ;;  %v1567_v59 = vld [vmem:[%s1651_s23 + $0x1ac] ss:$16 sps:$4 sm:$0xff]  }
  0x47   : > { %1009 = vmatpush2.bf16.msra.mxu0 %v1484_v62  ;;  %v1568_v62 = vld [vmem:[%s1651_s23 + $0x3a8] ss:$16 sps:$4 sm:$0xff]  }
  0x48   : > { %1050 = vmatpush2.bf16.msra.mxu1 %v1485_v1  ;;  %1010 = vmatprep.subr.bf16.mxu0 %v1486_v2  ;;  %v1571_v1 = vld [vmem:[%s1651_s23 + $0x188] ss:$16 sps:$4 sm:$0xff]  }
  0x49   : > { %1051 = vmatprep.subr.bf16.mxu1 %v1488_v3  ;;  %v1574_v2 = vld [vmem:[%s1651_s23 + $0x388] ss:$16 sps:$4 sm:$0xff]   ;;  %v1579_v3 = vld [vmem:[%s1651_s23 + $0x16c] ss:$16 sps:$4 sm:$0xff]  }
  0x4b   : > { %1011 = vmatpush2.bf16.msra.mxu0 %v1490_v5  ;;  %v1577_v5 = vld [vmem:[%s1651_s23 + $0x168] ss:$16 sps:$4 sm:$0xff]  }
  0x4c   : > { %1052 = vmatpush2.bf16.msra.mxu1 %v1491_v6  ;;  %1012 = vmatprep.subr.bf16.mxu0 %v1492_v7  ;;  %v1580_v6 = vld [vmem:[%s1651_s23 + $0x368] ss:$16 sps:$4 sm:$0xff]   ;;  %v1585_v7 = vld [vmem:[%s1651_s23 + $0x14c] ss:$16 sps:$4 sm:$0xff]  }
  0x4d   : > { %1053 = vmatprep.subr.bf16.mxu1 %v1494_v8  ;;  %v1588_v8 = vld [vmem:[%s1651_s23 + $0x34c] ss:$16 sps:$4 sm:$0xff]  }
  0x4f   : > { %1013 = vmatpush2.bf16.msra.mxu0 %v1496_v9  ;;  %v1583_v9 = vld [vmem:[%s1651_s23 + $0x148] ss:$16 sps:$4 sm:$0xff]  }
  0x50   : > { %1054 = vmatpush2.bf16.msra.mxu1 %v1497_v10  ;;  %1014 = vmatprep.subr.bf16.mxu0 %v1498_v11  ;;  %v1586_v10 = vld [vmem:[%s1651_s23 + $0x348] ss:$16 sps:$4 sm:$0xff]   ;;  %v1591_v11 = vld [vmem:[%s1651_s23 + $0x12c] ss:$16 sps:$4 sm:$0xff]  }
  0x51   : > { %1055 = vmatprep.subr.bf16.mxu1 %v1500_v12  ;;  %v1594_v12 = vld [vmem:[%s1651_s23 + $0x32c] ss:$16 sps:$4 sm:$0xff]  }
  0x53   : > { %1015 = vmatpush2.bf16.msra.mxu0 %v1502_v13  ;;  %v1589_v13 = vld [vmem:[%s1651_s23 + $0x128] ss:$16 sps:$4 sm:$0xff]  }
  0x54   : > { %1056 = vmatpush2.bf16.msra.mxu1 %v1503_v14  ;;  %1066 = vmatprep.subr.bf16.mxu0 %v1507_v15  ;;  %v1592_v14 = vld [vmem:[%s1651_s23 + $0x328] ss:$16 sps:$4 sm:$0xff]   ;;  %v1597_v15 = vld [vmem:[%s1651_s23 + $0x10c] ss:$16 sps:$4 sm:$0xff]  }
  0x55   : > { %1107 = vmatprep.subr.bf16.mxu1 %v1510_v16  ;;  %v1600_v16 = vld [vmem:[%s1651_s23 + $0x30c] ss:$16 sps:$4 sm:$0xff]  }
  0x56   : > { %1017 = vmatmul.mubr.bf16.vlgmr.msra.gmra.mxu0 %v1728_v17 }
  0x57   : > { %1058 = vmatmul.mubr.bf16.vlgmr.msra.gmra.mxu1 %v1730_v18  ;;  %1067 = vmatpush1.bf16.msra.mxu0 %v1505_v19  ;;  %v1595_v19 = vld [vmem:[%s1651_s23 + $0x108] ss:$16 sps:$4 sm:$0xff]  }
  0x58   : > { %1108 = vmatpush1.bf16.msra.mxu1 %v1508_v20  ;;  %1068 = vmatprep.subr.bf16.mxu0 %v1513_v21  ;;  %v1598_v20 = vld [vmem:[%s1651_s23 + $0x308] ss:$16 sps:$4 sm:$0xff]  }
  0x59   : > { %1109 = vmatprep.subr.bf16.mxu1 %v1516_v22  ;;  %1098 = vmatprep.mubr.bf16.mxu0 %v213_v63  ;;  %v1573_v63 = vld [vmem:[%s1651_s23 + $0x18c] ss:$16 sps:$4 sm:$0xff]  }
  0x5a   : > { %1139 = vmatprep.mubr.bf16.mxu1 %v215_v4  ;;  %v1582_v4 = vld [vmem:[%s1651_s23 + $0x36c] ss:$16 sps:$4 sm:$0xff]  }
  0x5b   : > { %1069 = vmatpush1.bf16.msra.mxu0 %v1511_v23 }
  0x5c   : > { %1110 = vmatpush1.bf16.msra.mxu1 %v1514_v24  ;;  %1070 = vmatprep.subr.bf16.mxu0 %v1519_v25 }
  0x5d   : > { %1111 = vmatprep.subr.bf16.mxu1 %v1522_v26 }
  0x5f   : > { %1071 = vmatpush1.bf16.msra.mxu0 %v1517_v27 }
  0x60   : > { %1112 = vmatpush1.bf16.msra.mxu1 %v1520_v28  ;;  %1072 = vmatprep.subr.bf16.mxu0 %v1525_v29 }
  0x61   : > { %1113 = vmatprep.subr.bf16.mxu1 %v1528_v30 }
  0x63   : > { %1073 = vmatpush1.bf16.msra.mxu0 %v1523_v31 }
  0x64   : > { %1114 = vmatpush1.bf16.msra.mxu1 %v1526_v32  ;;  %1074 = vmatprep.subr.bf16.mxu0 %v1531_v33 }
  0x65   : > { %1115 = vmatprep.subr.bf16.mxu1 %v1534_v34 }
  0x67   : > { %1075 = vmatpush1.bf16.msra.mxu0 %v1529_v35 }
  0x68   : > { %1116 = vmatpush1.bf16.msra.mxu1 %v1532_v36  ;;  %1076 = vmatprep.subr.bf16.mxu0 %v1537_v37 }
  0x69   : > { %1117 = vmatprep.subr.bf16.mxu1 %v1540_v38 }
  0x6b   : > { %1077 = vmatpush1.bf16.msra.mxu0 %v1535_v39 }
  0x6c   : > { %1118 = vmatpush1.bf16.msra.mxu1 %v1538_v40  ;;  %1078 = vmatprep.subr.bf16.mxu0 %v1543_v41 }
  0x6d   : > { %1119 = vmatprep.subr.bf16.mxu1 %v1546_v42 }
  0x6f   : > { %1079 = vmatpush1.bf16.msra.mxu0 %v1541_v43  ;;  %v188_v43 = vld [vmem:[#allocation2] sm:$0xff] }
  0x70   : > { %1120 = vmatpush1.bf16.msra.mxu1 %v1544_v45  ;;  %1080 = vmatprep.subr.bf16.mxu0 %v1549_v46 }
  0x71   : > { %1121 = vmatprep.subr.bf16.mxu1 %v1552_v47 }
  0x73   : > { %1081 = vmatpush1.bf16.msra.mxu0 %v1547_v48 }
  0x74   : > { %1122 = vmatpush1.bf16.msra.mxu1 %v1550_v49  ;;  %1082 = vmatprep.subr.bf16.mxu0 %v1555_v51 }
  0x75   : > { %1123 = vmatprep.subr.bf16.mxu1 %v1558_v52 }
  0x77   : > { %1083 = vmatpush2.bf16.msra.mxu0 %v1553_v53 }
  0x78   : > { %1124 = vmatpush2.bf16.msra.mxu1 %v1556_v54  ;;  %1084 = vmatprep.subr.bf16.mxu0 %v1561_v55 }
  0x79   : > { %1125 = vmatprep.subr.bf16.mxu1 %v1564_v56 }
  0x7b   : > { %1085 = vmatpush2.bf16.msra.mxu0 %v1559_v57 }
  0x7c   : > { %1126 = vmatpush2.bf16.msra.mxu1 %v1562_v58  ;;  %1086 = vmatprep.subr.bf16.mxu0 %v1567_v59 }
  0x7d   : > { %1127 = vmatprep.subr.bf16.mxu1 %v1570_v60 }
  0x7f   : > { %1087 = vmatpush2.bf16.msra.mxu0 %v1565_v61 }
  0x80   : > { %1128 = vmatpush2.bf16.msra.mxu1 %v1568_v62  ;;  %1088 = vmatprep.subr.bf16.mxu0 %v1573_v63 }
  0x81   : > { %1129 = vmatprep.subr.bf16.mxu1 %v1576_v0 }
  0x83   : > { %1089 = vmatpush2.bf16.msra.mxu0 %v1571_v1 }
  0x84   : > { %1130 = vmatpush2.bf16.msra.mxu1 %v1574_v2  ;;  %1090 = vmatprep.subr.bf16.mxu0 %v1579_v3 }
  0x85   : > { %1131 = vmatprep.subr.bf16.mxu1 %v1582_v4 }
  0x87   : > { %1091 = vmatpush2.bf16.msra.mxu0 %v1577_v5 }
  0x88   : > { %1132 = vmatpush2.bf16.msra.mxu1 %v1580_v6  ;;  %1092 = vmatprep.subr.bf16.mxu0 %v1585_v7 }
  0x89   : > { %1133 = vmatprep.subr.bf16.mxu1 %v1588_v8 }
  0x8b   : > { %1093 = vmatpush2.bf16.msra.mxu0 %v1583_v9 }
  0x8c   : > { %1134 = vmatpush2.bf16.msra.mxu1 %v1586_v10  ;;  %1094 = vmatprep.subr.bf16.mxu0 %v1591_v11 }
  0x8d   : > { %1135 = vmatprep.subr.bf16.mxu1 %v1594_v12 }
  0x8f   : > { %1095 = vmatpush2.bf16.msra.mxu0 %v1589_v13 }
  0x90   : > { %1136 = vmatpush2.bf16.msra.mxu1 %v1592_v14  ;;  %1096 = vmatprep.subr.bf16.mxu0 %v1597_v15 }
  0x91   : > { %1137 = vmatprep.subr.bf16.mxu1 %v1600_v16 }
  0x93   : > { %1097 = vmatpush2.bf16.msra.mxu0 %v1595_v19 }
  0x94   : > { %1138 = vmatpush2.bf16.msra.mxu1 %v1598_v20 }
  0x96   : > { %1099 = vmatmul.mubr.bf16.vlgmr.msra.gmra.mxu0 %v1728_v17 }
  0x97   : > { %1140 = vmatmul.mubr.bf16.vlgmr.msra.gmra.mxu1 %v1730_v18 }
 0x116   : > { %v1018_v21 = vpop.f32.mrf.mxu0 }
 0x117   : > { %v1059_v22 = vpop.f32.mrf.mxu1 }
 0x118   : > { %v1060_v23 = vadd.f32 %v1059_v22, %v1018_v21  ;;  %v1020_v24 = vpop.f32.mrf.mxu0 }
 0x119   : > { %v1061_v25 = vpop.f32.mrf.mxu1 }
 0x11a   : > { %v1062_v26 = vadd.f32 %v1061_v25, %v1020_v24  ;;  %v1022_v27 = vpop.f32.mrf.mxu0 }
 0x11b   : > { %v1063_v28 = vpop.f32.mrf.mxu1 }
 0x11c   : > { %v1152_v29 = vcombine.low %v1060_v23, %v1062_v26  ;;  %v1023_v30 = vpop.f32.mrf.mxu0 }
 0x11d   : > { %v1064_v31 = vpop.f32.mrf.mxu1 }
 0x11e   : > { %v1160_v41 = vrot.slane %v1152_v29, %v1701_v50 }
 0x156   : > { %v1100_v32 = vpop.f32.mrf.mxu0 }
 0x157   : > { %v1141_v33 = vpop.f32.mrf.mxu1 }
 0x158   : > { %v1102_v34 = vpop.f32.mrf.mxu0  ;;  %v1142_v36 = vadd.f32 %v1141_v33, %v1100_v32 }
 0x159   : > { %v1143_v35 = vpop.f32.mrf.mxu1 }
 0x15a   : > { %v1144_v37 = vadd.f32 %v1143_v35, %v1102_v34  ;;  %v1104_v17 = vpop.f32.mrf.mxu0 }
 0x15b   : > { %v1145_v38 = vpop.f32.mrf.mxu1 }
 0x15c   : > { %v1153_v18 = vcombine.low %v1142_v36, %v1144_v37  ;;  %v1105_v39 = vpop.f32.mrf.mxu0 }
 0x15d   : > { %v1146_v40 = vpop.f32.mrf.mxu1 }
 0x15e   : > { %v1167_v42 = vrot.slane %v1153_v18, %v1701_v50 }
 0x160   : > { %v1168_v45 = vcombine.low %v1160_v41, %v1167_v42  ;;  %1175 = sbr.rel (%p1394_p6) target bundleno = 372 (0x174), region = 40 }
 0x162   : > { %v1170_v46 = vadd.f32 %v1168_v45, %v188_v43 }
 0x164   : > { %1171 = vst [vmem:[#allocation2] sm:$0xff] %v1170_v46 }
 0x165   : > { %v1177_v47 = vld [vmem:[%s1818_s2] sm:$0xf]  ;;  %v1181_v48 = vsub.s32 0, %v1693_v44  ;;  %v1185_v49 = vsub.s32 1, %v1693_v44  ;;  %v1189_v51 = vsub.s32 2, %v1693_v44  ;;  %v1193_v52 = vsub.s32 3, %v1693_v44 }
 0x167   : > { %v1182_v53 = vrot.slane %v1177_v47, %v1181_v48  ;;  %v1186_v54 = vrot.slane %v1177_v47, %v1185_v49  ;;  %v1190_v55 = vrot.slane %v1177_v47, %v1189_v51  ;;  %v1194_v56 = vrot.slane %v1177_v47, %v1193_v52 }
 0x169   : > { %v1195_v57 = vcombine.low %v1182_v53, %v1186_v54  ;;  %v1196_v58 = vcombine.low %v1190_v55, %v1194_v56 }
 0x16b   : > { %v1203_v59 = vrot.slane %v1195_v57, %v1701_v50  ;;  %v1210_v60 = vrot.slane %v1196_v58, %v1701_v50  ;;  %v1176_v61 = vld [vmem:[#allocation2] sm:$0xff] }
 0x16d   : > { %v1211_v62 = vcombine.low %v1203_v59, %v1210_v60 }
 0x16f   : > { %v1213_v63 = vadd.f32 %v1211_v62, %v1176_v61 }
 0x171   : > { %v1214_v0 = vmax.f32 %v1213_v63, 0.0 }
 0x173   : > { %1215 = vst [vmem:[%s1819_s3] sm:$0xff] %v1214_v0 }
 0x174 PF: > { %s13_s12 = sadd.s32 1, %s1607_s12  }
 0x175   : > { %p10_p7 = scmp.ge.s32.totalorder %s13_s12, 4  }
 0x177   :  { %12 = sbr.rel (!%p10_p7) target bundleno = 1 (0x1), region = 69 }

// kernel: densenet_forward.15
= control target key start
LH: loop header
LB: loop body
LE: loop exit
PB: predicated region body
PF: predicated region fallthrough
CT: control target
= control target key end

     0   :  { %v29_v30 = vlaneseq  ;;  %s682_s0 = inlined_call_operand.vmem [shape: f32[2,512], index: 0, kind: input, shape index: {}]   ;;  %s683_s1 = inlined_call_operand.vmem [shape: bf16[512,2], index: 1, kind: input, shape index: {}]   ;;  %s684_s2 = inlined_call_operand.vmem [shape: f32[1,2], index: 2, kind: input, shape index: {}]   ;;  %s685_s3 = inlined_call_operand.hbm [shape: f32[2,2], index: 3, kind: output, shape index: {}]  }
   0x1   :  { %v496_v0 = vld [vmem:[%s683_s1 + $0x78] sm:$0xff]   ;;  %v500_v4 = vld [vmem:[%s683_s1 + $0x70] sm:$0xff]   ;;  %v504_v8 = vld [vmem:[%s683_s1 + $0x68] sm:$0xff]  }
   0x2   :  { %v497_v1 = vld [vmem:[%s683_s1 + $0xf8] sm:$0xff]   ;;  %449 = vmatprep.subr.bf16.mxu0 %v496_v0  ;;  %v501_v5 = vld [vmem:[%s683_s1 + $0xf0] sm:$0xff]   ;;  %v505_v9 = vld [vmem:[%s683_s1 + $0xe8] sm:$0xff]  }
   0x3   :  { %v498_v2 = vld [vmem:[%s683_s1 + $0x38] sm:$0xff]   ;;  %471 = vmatprep.subr.bf16.mxu1 %v497_v1  ;;  %v502_v6 = vld [vmem:[%s683_s1 + $0x30] sm:$0xff]   ;;  %v506_v10 = vld [vmem:[%s683_s1 + $0x28] sm:$0xff]  }
   0x4   :  { %v499_v3 = vld [vmem:[%s683_s1 + $0xb8] sm:$0xff]   ;;  %450 = vmatpush3.bf16.msra.mxu0 %v498_v2  ;;  %v503_v7 = vld [vmem:[%s683_s1 + $0xb0] sm:$0xff]   ;;  %v507_v11 = vld [vmem:[%s683_s1 + $0xa8] sm:$0xff]  }
   0x5   :  { %472 = vmatpush3.bf16.msra.mxu1 %v499_v3  ;;  %451 = vmatprep.subr.bf16.mxu0 %v500_v4  ;;  %v508_v12 = vld [vmem:[%s683_s1 + $0x60] sm:$0xff]   ;;  %v512_v16 = vld [vmem:[%s683_s1 + $0x58] sm:$0xff]   ;;  %v516_v20 = vld [vmem:[%s683_s1 + $0x50] sm:$0xff]  }
   0x6   :  { %473 = vmatprep.subr.bf16.mxu1 %v501_v5  ;;  %v509_v13 = vld [vmem:[%s683_s1 + $0xe0] sm:$0xff]   ;;  %v513_v17 = vld [vmem:[%s683_s1 + $0xd8] sm:$0xff]   ;;  %v517_v21 = vld [vmem:[%s683_s1 + $0xd0] sm:$0xff]  }
   0x7   :  { %v510_v14 = vld [vmem:[%s683_s1 + $0x20] sm:$0xff]   ;;  %v514_v18 = vld [vmem:[%s683_s1 + $0x18] sm:$0xff]   ;;  %v518_v22 = vld [vmem:[%s683_s1 + $0x10] sm:$0xff]  }
   0x8   :  { %452 = vmatpush3.bf16.msra.mxu0 %v502_v6  ;;  %v511_v15 = vld [vmem:[%s683_s1 + $0xa0] sm:$0xff]   ;;  %v515_v19 = vld [vmem:[%s683_s1 + $0x98] sm:$0xff]   ;;  %v519_v23 = vld [vmem:[%s683_s1 + $0x90] sm:$0xff]  }
   0x9   :  { %474 = vmatpush3.bf16.msra.mxu1 %v503_v7  ;;  %453 = vmatprep.subr.bf16.mxu0 %v504_v8  ;;  %v520_v24 = vld [vmem:[%s683_s1 + $0x48] sm:$0xff]   ;;  %v524_v28 = vld [vmem:[%s683_s1 + $0x40] sm:$0xff]  }
   0xa   :  { %475 = vmatprep.subr.bf16.mxu1 %v505_v9  ;;  %v521_v25 = vld [vmem:[%s683_s1 + $0xc8] sm:$0xff]   ;;  %v525_v29 = vld [vmem:[%s683_s1 + $0xc0] sm:$0xff]  }
   0xb   :  { %v522_v26 = vld [vmem:[%s683_s1 + $0x8] sm:$0xff]   ;;  %v526_v31 = vld [vmem:[%s683_s1] sm:$0xff]  }
   0xc   :  { %454 = vmatpush3.bf16.msra.mxu0 %v506_v10  ;;  %v523_v27 = vld [vmem:[%s683_s1 + $0x88] sm:$0xff]   ;;  %v527_v32 = vld [vmem:[%s683_s1 + $0x80] sm:$0xff]  }
   0xd   :  { %476 = vmatpush3.bf16.msra.mxu1 %v507_v11  ;;  %455 = vmatprep.subr.bf16.mxu0 %v508_v12  ;;  %v23_v33 = vld [vmem:[%s682_s0] sm:$0xff] }
   0xe   :  { %477 = vmatprep.subr.bf16.mxu1 %v509_v13 }
  0x10   :  { %456 = vmatpush3.bf16.msra.mxu0 %v510_v14 }
  0x11   :  { %478 = vmatpush3.bf16.msra.mxu1 %v511_v15  ;;  %457 = vmatprep.subr.bf16.mxu0 %v512_v16 }
  0x12   :  { %479 = vmatprep.subr.bf16.mxu1 %v513_v17 }
  0x14   :  { %458 = vmatpush3.bf16.msra.mxu0 %v514_v18 }
  0x15   :  { %480 = vmatpush3.bf16.msra.mxu1 %v515_v19  ;;  %459 = vmatprep.subr.bf16.mxu0 %v516_v20 }
  0x16   :  { %481 = vmatprep.subr.bf16.mxu1 %v517_v21 }
  0x18   :  { %460 = vmatpush3.bf16.msra.mxu0 %v518_v22 }
  0x19   :  { %482 = vmatpush3.bf16.msra.mxu1 %v519_v23  ;;  %461 = vmatprep.subr.bf16.mxu0 %v520_v24 }
  0x1a   :  { %483 = vmatprep.subr.bf16.mxu1 %v521_v25 }
  0x1c   :  { %462 = vmatpush3.bf16.msra.mxu0 %v522_v26 }
  0x1d   :  { %484 = vmatpush3.bf16.msra.mxu1 %v523_v27  ;;  %463 = vmatprep.subr.bf16.mxu0 %v524_v28 }
  0x1e   :  { %485 = vmatprep.subr.bf16.mxu1 %v525_v29 }
  0x20   :  { %464 = vmatpush3.bf16.msra.mxu0 %v526_v31 }
  0x21   :  { %8 = vsyncpa [#allocation4], 0  ;;  %486 = vmatpush3.bf16.msra.mxu1 %v527_v32  ;;  %v551_v34 = vmov 1983009808   ;;  %v30_v36 = vshrl.u32 %v29_v30, 7  ;;  %v25_v38 = vcombine.high %v23_v33, %v23_v33  ;;  %vm20_vm0 = vcmask 9216  }
  0x22   :  { %v27_v35 = vunpack.c.l.s4 %v551_v34  ;;  %v552_v48 = vmov 0.0   ;;  %v448_v62 = vld [vmem:[%s684_s2] ss:$0 sm:$0xff]  ;;  %s553_s24 = smov [#allocation3]  }
  0x23   :  { %21 = vst.msk [vmem:[#allocation2] sm:$0x3] %vm20_vm0, %v552_v48  ;;  %s408_s25 = sshll.u32 %s553_s24, 4  ;;  %s409_s25 = int_to_ptr.vmem [resolvable:$true] %s408_s25 }
  0x24   :  { %v28_v37 = vunpack.c.0.s8 %v27_v35  ;;  %s529_s26 = scalar_lea.vmem %s409_s25, 32  ;;  %p534_p1 = scmp.lt.s32.totalorder %s409_s25, %s409_s25 }
  0x25   :  { %p530_p0 = scmp.ne.s32.totalorder %s409_s25, %s529_s26  ;;  %p535_p2 = scmp.lt.s32.totalorder %s529_s26, %s529_s26 }
  0x26   :  { %v31_v39 = vsub.s32 %v28_v37, %v30_v36 }
  0x27   :  { %p536_p3 = por %p535_p2, %p534_p1 }
  0x28   :  { %v32_v40 = vrot.slane %v23_v33, %v31_v39  ;;  %v39_v41 = vrot.slane %v25_v38, %v31_v39 }
  0x29   :  { %p537_p4 = pnand %p536_p3, %p530_p0 }
  0x2a   :  { %v40_v42 = vcombine.high %v32_v40, %v32_v40  ;;  %v41_v43 = vcombine.high %v39_v41, %v39_v41  ;;  %v46_v44 = vpack.c.bf16 %v32_v40, %v32_v40  ;;  %v48_v45 = vpack.c.bf16 %v39_v41, %v39_v41  ;;  %v22_v57 = vld [vmem:[#allocation2] sm:$0x3] }
  0x2c   :  { %v47_v46 = vpack.c.bf16 %v40_v42, %v40_v42  ;;  %v49_v47 = vpack.c.bf16 %v41_v43, %v41_v43 }
  0x2e   :  { %338 = vmatprep.mubr.bf16.mxu0 %v47_v46  ;;  %378 = vmatprep.mubr.bf16.mxu1 %v49_v47 }
  0x2f   :  { %339 = vmatmul.mubr.bf16.vlgmr.msra.gmra.mxu0 %v46_v44  ;;  %379 = vmatmul.mubr.bf16.vlgmr.msra.gmra.mxu1 %v48_v45 }
  0xef   :  { %v465_v49 = vpop.f32.mrf.mxu0  ;;  %v487_v50 = vpop.f32.mrf.mxu1 }
  0xf1   :  { %v466_v51 = vpop.f32.mrf.mxu0  ;;  %v488_v52 = vpop.f32.mrf.mxu1 }
  0xf2   :  { %v467_v53 = vadd.f32 %v466_v51, %v465_v49  ;;  %v489_v54 = vadd.f32 %v488_v52, %v487_v50 }
  0xf3   :  { %v468_v55 = vpop.f32.mrf.mxu0  ;;  %v490_v56 = vpop.f32.mrf.mxu1 }
  0xf4   :  { %v381_v58 = vadd.f32 %v489_v54, %v467_v53 }
  0xf5   :  { %v469_v59 = vpop.f32.mrf.mxu0  ;;  %v491_v60 = vpop.f32.mrf.mxu1 }
  0xf6   :  { %v386_v61 = vadd.f32 %v381_v58, %v22_v57 }
  0xf8   :  { %388 = vst.msk [vmem:[#allocation2] sm:$0x3] %vm20_vm0, %v386_v61 }
  0xff   :  { %v392_v63 = vld [vmem:[#allocation2] sm:$0x3] }
 0x100   :  { %v400_v0 = vadd.f32 %v448_v62, %v392_v63 }
 0x102   :  { %401 = vst.msk [vmem:[#allocation3] sm:$0x3] %vm20_vm0, %v400_v0 }
 0x103   :  { %540 = shalt.err (!%p537_p4)
}
 0x104   :  { %411 = dma.vmem_to_hbm [thread:$0]  %s409_s25, 32, %s685_s3, [#allocation4]  }
 0x105   :  { %549 = dma.done.wait [#allocation4], 32  }
 0x106   :  { %550 = vsyncadd [#allocation4], 4294967264 }
 0x107   :  { %415 = vsyncpa [#allocation4], 1 }

// kernel: densenet_forward.13
= control target key start
LH: loop header
LB: loop body
LE: loop exit
PB: predicated region body
PF: predicated region fallthrough
CT: control target
= control target key end

     0   :  { %v1855_v3 = vmov 0   ;;  %v29_v9 = vlaneseq  ;;  %v1856_v16 = vmov 1983009808   ;;  %s2516_s1 = inlined_call_operand.vmem [shape: bf16[384,1024], index: 1, kind: input, shape index: {}]   ;;  %s2517_s0 = inlined_call_operand.vmem [shape: f32[2,384], index: 0, kind: input, shape index: {}]   ;;  %s2518_s2 = inlined_call_operand.vmem [shape: f32[1,1024], index: 2, kind: input, shape index: {}]   ;;  %s2519_s3 = inlined_call_operand.vmem [shape: f32[2,1024], index: 3, kind: output, shape index: {}]  }
   0x1   :  { %v103_v0 = vld [vmem:[%s2516_s1 + $0x1c0] sm:$0xff]  ;;  %1272 = vmatprep.mubr.bf16.mxu1 %v1855_v3  ;;  %v27_v17 = vunpack.c.l.s4 %v1856_v16 }
   0x2   :  { %v107_v1 = vld [vmem:[%s2516_s1 + $0x1e0] sm:$0xff]  ;;  %v1920_v29 = vshrl.u32 %v29_v9, 7 }
   0x3   :  { %v231_v2 = vld [vmem:[%s2516_s1 + $0x5c0] sm:$0xff]  ;;  %v1717_v4 = vcombine.high %v103_v0, %v107_v1  ;;  %v1716_v6 = vcombine.low %v103_v0, %v107_v1  ;;  %v28_v28 = vunpack.c.0.s8 %v27_v17 }
   0x4   :  { %v235_v5 = vld [vmem:[%s2516_s1 + $0x5e0] sm:$0xff] }
   0x5   :  { %v95_v7 = vld [vmem:[%s2516_s1 + $0x180] sm:$0xff]  ;;  %v1845_v10 = vcombine.high %v231_v2, %v235_v5  ;;  %v1844_v11 = vcombine.low %v231_v2, %v235_v5  ;;  %1199 = vmatprep.subr.bf16.mxu0 %v1717_v4  ;;  %v1935_v38 = vsub.s32 %v28_v28, %v1920_v29 }
   0x6   :  { %v99_v8 = vld [vmem:[%s2516_s1 + $0x1a0] sm:$0xff]  ;;  %1200 = vmatpush1.bf16.msra.mxu0 %v1716_v6 }
   0x7   :  { %v1709_v12 = vcombine.high %v95_v7, %v99_v8  ;;  %v223_v13 = vld [vmem:[%s2516_s1 + $0x580] sm:$0xff]  ;;  %1240 = vmatprep.subr.bf16.mxu1 %v1845_v10  ;;  %v1708_v22 = vcombine.low %v95_v7, %v99_v8 }
   0x8   :  { %v227_v14 = vld [vmem:[%s2516_s1 + $0x5a0] sm:$0xff]  ;;  %1241 = vmatpush1.bf16.msra.mxu1 %v1844_v11 }
   0x9   :  { %v87_v15 = vld [vmem:[%s2516_s1 + $0x140] sm:$0xff]  ;;  %v1837_v18 = vcombine.high %v223_v13, %v227_v14  ;;  %1201 = vmatprep.subr.bf16.mxu0 %v1709_v12  ;;  %v1836_v23 = vcombine.low %v223_v13, %v227_v14  ;;  %v104_v13 = vld [vmem:[%s2516_s1 + $0x1c8] sm:$0xff] }
   0xa   :  { %v91_v19 = vld [vmem:[%s2516_s1 + $0x160] sm:$0xff]  ;;  %1202 = vmatpush1.bf16.msra.mxu0 %v1708_v22  ;;  %v108_v14 = vld [vmem:[%s2516_s1 + $0x1e8] sm:$0xff] }
   0xb   :  { %v215_v20 = vld [vmem:[%s2516_s1 + $0x540] sm:$0xff]  ;;  %v1701_v24 = vcombine.high %v87_v15, %v91_v19  ;;  %1242 = vmatprep.subr.bf16.mxu1 %v1837_v18  ;;  %v1700_v32 = vcombine.low %v87_v15, %v91_v19  ;;  %v1719_v19 = vcombine.high %v104_v13, %v108_v14  ;;  %v96_v22 = vld [vmem:[%s2516_s1 + $0x188] sm:$0xff] }
   0xc   :  { %v219_v21 = vld [vmem:[%s2516_s1 + $0x560] sm:$0xff]  ;;  %1243 = vmatpush1.bf16.msra.mxu1 %v1836_v23  ;;  %v100_v23 = vld [vmem:[%s2516_s1 + $0x1a8] sm:$0xff] }
   0xd   :  { %v1829_v25 = vcombine.high %v215_v20, %v219_v21  ;;  %v79_v26 = vld [vmem:[%s2516_s1 + $0x100] sm:$0xff]  ;;  %1203 = vmatprep.subr.bf16.mxu0 %v1701_v24  ;;  %v1828_v33 = vcombine.low %v215_v20, %v219_v21  ;;  %v1711_v28 = vcombine.high %v96_v22, %v100_v23 }
   0xe   :  { %v83_v27 = vld [vmem:[%s2516_s1 + $0x120] sm:$0xff]  ;;  %1204 = vmatpush1.bf16.msra.mxu0 %v1700_v32  ;;  %v88_v32 = vld [vmem:[%s2516_s1 + $0x148] sm:$0xff] }
   0xf   :  { %v207_v30 = vld [vmem:[%s2516_s1 + $0x500] sm:$0xff]  ;;  %v1693_v34 = vcombine.high %v79_v26, %v83_v27  ;;  %1244 = vmatprep.subr.bf16.mxu1 %v1829_v25  ;;  %v1692_v42 = vcombine.low %v79_v26, %v83_v27  ;;  %v1718_v26 = vcombine.low %v104_v13, %v108_v14  ;;  %v52_v13 = vld [vmem:[%s2516_s1 + $0x28] sm:$0xff] }
  0x10   :  { %v211_v31 = vld [vmem:[%s2516_s1 + $0x520] sm:$0xff]  ;;  %1245 = vmatpush1.bf16.msra.mxu1 %v1828_v33  ;;  %v92_v33 = vld [vmem:[%s2516_s1 + $0x168] sm:$0xff] }
  0x11   :  { %v1821_v35 = vcombine.high %v207_v30, %v211_v31  ;;  %v71_v36 = vld [vmem:[%s2516_s1 + $0xc0] sm:$0xff]  ;;  %1205 = vmatprep.subr.bf16.mxu0 %v1693_v34  ;;  %v1820_v44 = vcombine.low %v207_v30, %v211_v31 }
  0x12   :  { %v75_v37 = vld [vmem:[%s2516_s1 + $0xe0] sm:$0xff]  ;;  %1206 = vmatpush1.bf16.msra.mxu0 %v1692_v42  ;;  %v84_v42 = vld [vmem:[%s2516_s1 + $0x128] sm:$0xff] }
  0x13   :  { %v199_v39 = vld [vmem:[%s2516_s1 + $0x4c0] sm:$0xff]  ;;  %v1685_v45 = vcombine.high %v71_v36, %v75_v37  ;;  %1246 = vmatprep.subr.bf16.mxu1 %v1821_v35  ;;  %v1684_v51 = vcombine.low %v71_v36, %v75_v37  ;;  %v1710_v35 = vcombine.low %v96_v22, %v100_v23  ;;  %v1703_v37 = vcombine.high %v88_v32, %v92_v33 }
  0x14   :  { %v203_v40 = vld [vmem:[%s2516_s1 + $0x4e0] sm:$0xff]  ;;  %1247 = vmatpush1.bf16.msra.mxu1 %v1820_v44 }
  0x15   :  { %v23_v41 = vld [vmem:[%s2517_s0] sm:$0x3f]  ;;  %v1813_v46 = vcombine.high %v199_v39, %v203_v40  ;;  %1207 = vmatprep.subr.bf16.mxu0 %v1685_v45  ;;  %v1812_v53 = vcombine.low %v199_v39, %v203_v40  ;;  %v1702_v45 = vcombine.low %v88_v32, %v92_v33  ;;  %v164_v32 = vld [vmem:[%s2516_s1 + $0x3a8] sm:$0xff] }
  0x16   :  { %v1947_v43 = vrot.slane %v23_v41, %v1935_v38  ;;  %v63_v47 = vld [vmem:[%s2516_s1 + $0x80] sm:$0xff]  ;;  %1208 = vmatpush1.bf16.msra.mxu0 %v1684_v51  ;;  %v25_v7 = vcombine.high %v23_v41, %v23_v41  ;;  %v80_v41 = vld [vmem:[%s2516_s1 + $0x108] sm:$0xff] }
  0x17   :  { %v67_v48 = vld [vmem:[%s2516_s1 + $0xa0] sm:$0xff]  ;;  %1248 = vmatprep.subr.bf16.mxu1 %v1813_v46  ;;  %v76_v51 = vld [vmem:[%s2516_s1 + $0xe8] sm:$0xff] }
  0x18   :  { %v191_v49 = vld [vmem:[%s2516_s1 + $0x480] sm:$0xff]  ;;  %v40_v52 = vcombine.high %v1947_v43, %v1947_v43  ;;  %v1677_v54 = vcombine.high %v63_v47, %v67_v48  ;;  %v1676_v61 = vcombine.low %v63_v47, %v67_v48  ;;  %1249 = vmatpush1.bf16.msra.mxu1 %v1812_v53  ;;  %v39_v16 = vrot.slane %v25_v7, %v1935_v38 }
  0x19   :  { %v195_v50 = vld [vmem:[%s2516_s1 + $0x4a0] sm:$0xff]  ;;  %v1695_v47 = vcombine.high %v80_v41, %v84_v42  ;;  %v1694_v53 = vcombine.low %v80_v41, %v84_v42 }
  0x1a   :  { %v1805_v55 = vcombine.high %v191_v49, %v195_v50  ;;  %v55_v56 = vld [vmem:[%s2516_s1 + $0x40] sm:$0xff]  ;;  %v1969_v58 = vpack.c.bf16 %v40_v52, %v40_v52  ;;  %1209 = vmatprep.subr.bf16.mxu0 %v1677_v54  ;;  %v1804_v62 = vcombine.low %v191_v49, %v195_v50  ;;  %v2015_v24 = vpack.c.bf16 %v39_v16, %v39_v16  ;;  %v72_v50 = vld [vmem:[%s2516_s1 + $0xc8] sm:$0xff] }
  0x1b   :  { %v59_v57 = vld [vmem:[%s2516_s1 + $0x60] sm:$0xff]  ;;  %1210 = vmatpush1.bf16.msra.mxu0 %v1676_v61 }
  0x1c   :  { %v183_v59 = vld [vmem:[%s2516_s1 + $0x440] sm:$0xff]  ;;  %1231 = vmatprep.mubr.bf16.mxu0 %v1969_v58  ;;  %v1669_v63 = vcombine.high %v55_v56, %v59_v57  ;;  %1250 = vmatprep.subr.bf16.mxu1 %v1805_v55  ;;  %v1668_v6 = vcombine.low %v55_v56, %v59_v57  ;;  %v1687_v55 = vcombine.high %v72_v50, %v76_v51 }
  0x1d   :  { %v187_v60 = vld [vmem:[%s2516_s1 + $0x460] sm:$0xff]  ;;  %1251 = vmatpush1.bf16.msra.mxu1 %v1804_v62  ;;  %v1686_v62 = vcombine.low %v72_v50, %v76_v51 }
  0x1e   :  { %v1797_v0 = vcombine.high %v183_v59, %v187_v60  ;;  %v47_v1 = vld [vmem:[%s2516_s1] sm:$0xff]  ;;  %1211 = vmatprep.subr.bf16.mxu0 %v1669_v63  ;;  %v1796_v8 = vcombine.low %v183_v59, %v187_v60  ;;  %v64_v59 = vld [vmem:[%s2516_s1 + $0x88] sm:$0xff] }
  0x1f   :  { %v51_v2 = vld [vmem:[%s2516_s1 + $0x20] sm:$0xff]  ;;  %1212 = vmatpush1.bf16.msra.mxu0 %v1668_v6  ;;  %v68_v60 = vld [vmem:[%s2516_s1 + $0xa8] sm:$0xff] }
  0x20   :  { %v175_v4 = vld [vmem:[%s2516_s1 + $0x400] sm:$0xff]  ;;  %v1661_v9 = vcombine.high %v47_v1, %v51_v2  ;;  %1252 = vmatprep.subr.bf16.mxu1 %v1797_v0  ;;  %v1660_v15 = vcombine.low %v47_v1, %v51_v2  ;;  %v1679_v0 = vcombine.high %v64_v59, %v68_v60  ;;  %v1678_v7 = vcombine.low %v64_v59, %v68_v60 }
  0x21   :  { %v179_v5 = vld [vmem:[%s2516_s1 + $0x420] sm:$0xff]  ;;  %1253 = vmatpush1.bf16.msra.mxu1 %v1796_v8 }
  0x22   :  { %v1789_v10 = vcombine.high %v175_v4, %v179_v5  ;;  %v167_v11 = vld [vmem:[%s2516_s1 + $0x3c0] sm:$0xff]  ;;  %1213 = vmatprep.subr.bf16.mxu0 %v1661_v9  ;;  %v1788_v17 = vcombine.low %v175_v4, %v179_v5  ;;  %v56_v4 = vld [vmem:[%s2516_s1 + $0x48] sm:$0xff] }
  0x23   :  { %v171_v12 = vld [vmem:[%s2516_s1 + $0x3e0] sm:$0xff]  ;;  %1214 = vmatpush1.bf16.msra.mxu0 %v1660_v15  ;;  %v60_v5 = vld [vmem:[%s2516_s1 + $0x68] sm:$0xff] }
  0x24   :  { %v1781_v18 = vcombine.high %v167_v11, %v171_v12  ;;  %1254 = vmatprep.subr.bf16.mxu1 %v1789_v10  ;;  %v159_v20 = vld [vmem:[%s2516_s1 + $0x380] sm:$0xff]  ;;  %v1780_v25 = vcombine.low %v167_v11, %v171_v12  ;;  %v1671_v9 = vcombine.high %v56_v4, %v60_v5  ;;  %v48_v12 = vld [vmem:[%s2516_s1 + $0x8] sm:$0xff]  ;;  %v1670_v15 = vcombine.low %v56_v4, %v60_v5 }
  0x25   :  { %v163_v21 = vld [vmem:[%s2516_s1 + $0x3a0] sm:$0xff]  ;;  %1255 = vmatpush1.bf16.msra.mxu1 %v1788_v17  ;;  %v1663_v17 = vcombine.high %v48_v12, %v52_v13  ;;  %v1662_v23 = vcombine.low %v48_v12, %v52_v13 }
  0x26   :  { %1215 = vmatprep.subr.bf16.mxu0 %v1781_v18  ;;  %v1773_v27 = vcombine.high %v159_v20, %v163_v21  ;;  %1281 = vmatprep.subr.bf16.mxu1 %v1719_v19  ;;  %v151_v30 = vld [vmem:[%s2516_s1 + $0x340] sm:$0xff]  ;;  %v1772_v34 = vcombine.low %v159_v20, %v163_v21  ;;  %v232_v18 = vld [vmem:[%s2516_s1 + $0x5c8] sm:$0xff] }
  0x27   :  { %v155_v31 = vld [vmem:[%s2516_s1 + $0x360] sm:$0xff]  ;;  %1216 = vmatpush2.bf16.msra.mxu0 %v1780_v25  ;;  %v236_v19 = vld [vmem:[%s2516_s1 + $0x5e8] sm:$0xff] }
  0x28   :  { %1273 = vmatmul.mubr.bf16.vlgmr.msra.gmra.mxu1 %v2015_v24  ;;  %1217 = vmatprep.subr.bf16.mxu0 %v1773_v27  ;;  %v1765_v36 = vcombine.high %v151_v30, %v155_v31  ;;  %v143_v39 = vld [vmem:[%s2516_s1 + $0x300] sm:$0xff]  ;;  %v1764_v44 = vcombine.low %v151_v30, %v155_v31  ;;  %v168_v20 = vld [vmem:[%s2516_s1 + $0x3c8] sm:$0xff]  ;;  %v1847_v25 = vcombine.high %v232_v18, %v236_v19 }
  0x29   :  { %1282 = vmatpush1.bf16.msra.mxu1 %v1718_v26  ;;  %v147_v40 = vld [vmem:[%s2516_s1 + $0x320] sm:$0xff]  ;;  %1313 = vmatprep.mubr.bf16.mxu1 %v1969_v58  ;;  %v172_v21 = vld [vmem:[%s2516_s1 + $0x3e8] sm:$0xff]  ;;  %v2111_v30 = vpack.c.bf16 %v1947_v43, %v1947_v43  ;;  %v1846_v33 = vcombine.low %v232_v18, %v236_v19 }
  0x2a   :  { %1283 = vmatprep.subr.bf16.mxu1 %v1711_v28  ;;  %v1757_v46 = vcombine.high %v143_v39, %v147_v40  ;;  %v135_v48 = vld [vmem:[%s2516_s1 + $0x2c0] sm:$0xff]  ;;  %v1756_v52 = vcombine.low %v143_v39, %v147_v40  ;;  %v1783_v26 = vcombine.high %v168_v20, %v172_v21  ;;  %v224_v27 = vld [vmem:[%s2516_s1 + $0x588] sm:$0xff] }
  0x2b   :  { %1218 = vmatpush2.bf16.msra.mxu0 %v1772_v34  ;;  %v139_v49 = vld [vmem:[%s2516_s1 + $0x2e0] sm:$0xff]  ;;  %v228_v28 = vld [vmem:[%s2516_s1 + $0x5a8] sm:$0xff]  ;;  %v1782_v34 = vcombine.low %v168_v20, %v172_v21 }
  0x2c   :  { %1219 = vmatprep.subr.bf16.mxu0 %v1765_v36  ;;  %v1749_v54 = vcombine.high %v135_v48, %v139_v49  ;;  %v127_v56 = vld [vmem:[%s2516_s1 + $0x280] sm:$0xff]  ;;  %v1748_v61 = vcombine.low %v135_v48, %v139_v49  ;;  %v160_v31 = vld [vmem:[%s2516_s1 + $0x388] sm:$0xff]  ;;  %v1838_v41 = vcombine.low %v224_v27, %v228_v28 }
  0x2d   :  { %1284 = vmatpush1.bf16.msra.mxu1 %v1710_v35  ;;  %v131_v57 = vld [vmem:[%s2516_s1 + $0x2a0] sm:$0xff]  ;;  %v1839_v35 = vcombine.high %v224_v27, %v228_v28  ;;  %v1775_v36 = vcombine.high %v160_v31, %v164_v32  ;;  %v216_v43 = vld [vmem:[%s2516_s1 + $0x548] sm:$0xff]  ;;  %v1774_v42 = vcombine.low %v160_v31, %v164_v32  ;;  %v233_v27 = vld [vmem:[%s2516_s1 + $0x5d0] sm:$0xff] }
  0x2e   :  { %1285 = vmatprep.subr.bf16.mxu1 %v1703_v37  ;;  %v1741_v63 = vcombine.high %v127_v56, %v131_v57  ;;  %v119_v1 = vld [vmem:[%s2516_s1 + $0x240] sm:$0xff]  ;;  %v1740_v6 = vcombine.low %v127_v56, %v131_v57  ;;  %v220_v37 = vld [vmem:[%s2516_s1 + $0x568] sm:$0xff]  ;;  %v237_v28 = vld [vmem:[%s2516_s1 + $0x5f0] sm:$0xff] }
  0x2f   :  { %1220 = vmatpush2.bf16.msra.mxu0 %v1764_v44  ;;  %v123_v2 = vld [vmem:[%s2516_s1 + $0x260] sm:$0xff]  ;;  %v152_v39 = vld [vmem:[%s2516_s1 + $0x348] sm:$0xff]  ;;  %v1831_v44 = vcombine.high %v216_v43, %v220_v37  ;;  %v1830_v50 = vcombine.low %v216_v43, %v220_v37  ;;  %v225_v43 = vld [vmem:[%s2516_s1 + $0x590] sm:$0xff] }
  0x30   :  { %1221 = vmatprep.subr.bf16.mxu0 %v1757_v46  ;;  %v1733_v8 = vcombine.high %v119_v1, %v123_v2  ;;  %v111_v10 = vld [vmem:[%s2516_s1 + $0x200] sm:$0xff]  ;;  %v1732_v14 = vcombine.low %v119_v1, %v123_v2  ;;  %v156_v40 = vld [vmem:[%s2516_s1 + $0x368] sm:$0xff]  ;;  %v229_v37 = vld [vmem:[%s2516_s1 + $0x5b0] sm:$0xff] }
  0x31   :  { %1286 = vmatpush1.bf16.msra.mxu1 %v1702_v45  ;;  %v115_v11 = vld [vmem:[%s2516_s1 + $0x220] sm:$0xff]  ;;  %v1767_v45 = vcombine.high %v152_v39, %v156_v40  ;;  %v208_v46 = vld [vmem:[%s2516_s1 + $0x508] sm:$0xff]  ;;  %v1766_v51 = vcombine.low %v152_v39, %v156_v40  ;;  %v1848_v40 = vcombine.low %v233_v27, %v237_v28 }
  0x32   :  { %1287 = vmatprep.subr.bf16.mxu1 %v1695_v47  ;;  %v1725_v16 = vcombine.high %v111_v10, %v115_v11  ;;  %v1724_v22 = vcombine.low %v111_v10, %v115_v11  ;;  %v212_v47 = vld [vmem:[%s2516_s1 + $0x528] sm:$0xff] }
  0x33   :  { %1222 = vmatpush2.bf16.msra.mxu0 %v1756_v52  ;;  %v144_v48 = vld [vmem:[%s2516_s1 + $0x308] sm:$0xff]  ;;  %v1823_v52 = vcombine.high %v208_v46, %v212_v47  ;;  %v1822_v59 = vcombine.low %v208_v46, %v212_v47  ;;  %v217_v46 = vld [vmem:[%s2516_s1 + $0x550] sm:$0xff] }
  0x34   :  { %1223 = vmatprep.subr.bf16.mxu0 %v1749_v54  ;;  %v148_v49 = vld [vmem:[%s2516_s1 + $0x328] sm:$0xff]  ;;  %v221_v47 = vld [vmem:[%s2516_s1 + $0x570] sm:$0xff] }
  0x35   :  { %1288 = vmatpush1.bf16.msra.mxu1 %v1694_v53  ;;  %v1759_v53 = vcombine.high %v144_v48, %v148_v49  ;;  %v200_v54 = vld [vmem:[%s2516_s1 + $0x4c8] sm:$0xff]  ;;  %v1758_v60 = vcombine.low %v144_v48, %v148_v49  ;;  %v1840_v49 = vcombine.low %v225_v43, %v229_v37 }
  0x36   :  { %1289 = vmatprep.subr.bf16.mxu1 %v1687_v55  ;;  %v204_v55 = vld [vmem:[%s2516_s1 + $0x4e8] sm:$0xff] }
  0x37   :  { %1224 = vmatpush2.bf16.msra.mxu0 %v1748_v61  ;;  %v136_v56 = vld [vmem:[%s2516_s1 + $0x2c8] sm:$0xff]  ;;  %v1815_v61 = vcombine.high %v200_v54, %v204_v55  ;;  %v1814_v4 = vcombine.low %v200_v54, %v204_v55  ;;  %v209_v54 = vld [vmem:[%s2516_s1 + $0x510] sm:$0xff] }
  0x38   :  { %1225 = vmatprep.subr.bf16.mxu0 %v1741_v63  ;;  %v140_v57 = vld [vmem:[%s2516_s1 + $0x2e8] sm:$0xff]  ;;  %v213_v55 = vld [vmem:[%s2516_s1 + $0x530] sm:$0xff] }
  0x39   :  { %1290 = vmatpush1.bf16.msra.mxu1 %v1686_v62  ;;  %v1751_v62 = vcombine.high %v136_v56, %v140_v57  ;;  %v192_v63 = vld [vmem:[%s2516_s1 + $0x488] sm:$0xff]  ;;  %v1750_v5 = vcombine.low %v136_v56, %v140_v57  ;;  %v1832_v57 = vcombine.low %v217_v46, %v221_v47 }
  0x3a   :  { %1291 = vmatprep.subr.bf16.mxu1 %v1679_v0  ;;  %v196_v0 = vld [vmem:[%s2516_s1 + $0x4a8] sm:$0xff] }
  0x3b   :  { %1226 = vmatpush2.bf16.msra.mxu0 %v1740_v6  ;;  %v128_v1 = vld [vmem:[%s2516_s1 + $0x288] sm:$0xff]  ;;  %v1807_v6 = vcombine.high %v192_v63, %v196_v0  ;;  %v1806_v12 = vcombine.low %v192_v63, %v196_v0  ;;  %v201_v63 = vld [vmem:[%s2516_s1 + $0x4d0] sm:$0xff] }
  0x3c   :  { %1227 = vmatprep.subr.bf16.mxu0 %v1733_v8  ;;  %v132_v2 = vld [vmem:[%s2516_s1 + $0x2a8] sm:$0xff]  ;;  %v205_v0 = vld [vmem:[%s2516_s1 + $0x4f0] sm:$0xff] }
  0x3d   :  { %1292 = vmatpush1.bf16.msra.mxu1 %v1678_v7  ;;  %v1743_v7 = vcombine.high %v128_v1, %v132_v2  ;;  %v184_v8 = vld [vmem:[%s2516_s1 + $0x448] sm:$0xff]  ;;  %v1742_v13 = vcombine.low %v128_v1, %v132_v2  ;;  %v1824_v2 = vcombine.low %v209_v54, %v213_v55 }
  0x3e   :  { %1293 = vmatprep.subr.bf16.mxu1 %v1671_v9  ;;  %v188_v9 = vld [vmem:[%s2516_s1 + $0x468] sm:$0xff] }
  0x3f   :  { %1228 = vmatpush2.bf16.msra.mxu0 %v1732_v14  ;;  %v120_v10 = vld [vmem:[%s2516_s1 + $0x248] sm:$0xff]  ;;  %v1799_v14 = vcombine.high %v184_v8, %v188_v9  ;;  %v1798_v20 = vcombine.low %v184_v8, %v188_v9  ;;  %v193_v8 = vld [vmem:[%s2516_s1 + $0x490] sm:$0xff] }
  0x40   :  { %1229 = vmatprep.subr.bf16.mxu0 %v1725_v16  ;;  %v124_v11 = vld [vmem:[%s2516_s1 + $0x268] sm:$0xff]  ;;  %v197_v9 = vld [vmem:[%s2516_s1 + $0x4b0] sm:$0xff] }
  0x41   :  { %1294 = vmatpush1.bf16.msra.mxu1 %v1670_v15  ;;  %v1735_v15 = vcombine.high %v120_v10, %v124_v11  ;;  %v176_v16 = vld [vmem:[%s2516_s1 + $0x408] sm:$0xff]  ;;  %v1734_v21 = vcombine.low %v120_v10, %v124_v11  ;;  %v1816_v11 = vcombine.low %v201_v63, %v205_v0 }
  0x42   :  { %1295 = vmatprep.subr.bf16.mxu1 %v1663_v17  ;;  %v180_v17 = vld [vmem:[%s2516_s1 + $0x428] sm:$0xff] }
  0x43   :  { %1230 = vmatpush2.bf16.msra.mxu0 %v1724_v22  ;;  %v112_v18 = vld [vmem:[%s2516_s1 + $0x208] sm:$0xff]  ;;  %v1791_v22 = vcombine.high %v176_v16, %v180_v17  ;;  %v1790_v31 = vcombine.low %v176_v16, %v180_v17  ;;  %v185_v16 = vld [vmem:[%s2516_s1 + $0x450] sm:$0xff] }
  0x44   :  { %1322 = vmatprep.subr.bf16.mxu0 %v1847_v25  ;;  %v116_v19 = vld [vmem:[%s2516_s1 + $0x228] sm:$0xff]  ;;  %v105_v25 = vld [vmem:[%s2516_s1 + $0x1d0] sm:$0xff] }
  0x45   :  { %1296 = vmatpush1.bf16.msra.mxu1 %v1662_v23  ;;  %v1727_v23 = vcombine.high %v112_v18, %v116_v19  ;;  %v1726_v32 = vcombine.low %v112_v18, %v116_v19  ;;  %v189_v17 = vld [vmem:[%s2516_s1 + $0x470] sm:$0xff]  ;;  %v1808_v19 = vcombine.low %v193_v8, %v197_v9 }
  0x46   :  { %1297 = vmatprep.subr.bf16.mxu1 %v1783_v26  ;;  %1232 = vmatmul.mubr.bf16.vlgmr.msra.gmra.mxu0 %v2111_v30  ;;  %v109_v26 = vld [vmem:[%s2516_s1 + $0x1f0] sm:$0xff] }
  0x47   :  { %1323 = vmatpush1.bf16.msra.mxu0 %v1846_v33  ;;  %1354 = vmatprep.mubr.bf16.mxu0 %v1855_v3  ;;  %v1721_v33 = vcombine.high %v105_v25, %v109_v26  ;;  %v1720_v39 = vcombine.low %v105_v25, %v109_v26  ;;  %v177_v25 = vld [vmem:[%s2516_s1 + $0x410] sm:$0xff] }
  0x48   :  { %1324 = vmatprep.subr.bf16.mxu0 %v1839_v35  ;;  %v97_v35 = vld [vmem:[%s2516_s1 + $0x190] sm:$0xff] }
  0x49   :  { %1298 = vmatpush2.bf16.msra.mxu1 %v1782_v34  ;;  %v1849_v34 = vcombine.high %v233_v27, %v237_v28  ;;  %v181_v26 = vld [vmem:[%s2516_s1 + $0x430] sm:$0xff]  ;;  %v1800_v28 = vcombine.low %v185_v16, %v189_v17 }
  0x4a   :  { %1299 = vmatprep.subr.bf16.mxu1 %v1775_v36  ;;  %v101_v36 = vld [vmem:[%s2516_s1 + $0x1b0] sm:$0xff] }
  0x4b   :  { %1325 = vmatpush1.bf16.msra.mxu0 %v1838_v41  ;;  %v1713_v41 = vcombine.high %v97_v35, %v101_v36  ;;  %v1712_v48 = vcombine.low %v97_v35, %v101_v36  ;;  %v106_v35 = vld [vmem:[%s2516_s1 + $0x1d8] sm:$0xff] }
  0x4c   :  { %1326 = vmatprep.subr.bf16.mxu0 %v1831_v44  ;;  %v89_v44 = vld [vmem:[%s2516_s1 + $0x150] sm:$0xff]  ;;  %v110_v36 = vld [vmem:[%s2516_s1 + $0x1f8] sm:$0xff] }
  0x4d   :  { %1300 = vmatpush2.bf16.msra.mxu1 %v1774_v42  ;;  %v1841_v42 = vcombine.high %v225_v43, %v229_v37  ;;  %v1792_v37 = vcombine.low %v177_v25, %v181_v26 }
  0x4e   :  { %1301 = vmatprep.subr.bf16.mxu1 %v1767_v45  ;;  %v93_v45 = vld [vmem:[%s2516_s1 + $0x170] sm:$0xff] }
  0x4f   :  { %1327 = vmatpush1.bf16.msra.mxu0 %v1830_v50  ;;  %v1705_v50 = vcombine.high %v89_v44, %v93_v45  ;;  %v1704_v56 = vcombine.low %v89_v44, %v93_v45  ;;  %v98_v44 = vld [vmem:[%s2516_s1 + $0x198] sm:$0xff] }
  0x50   :  { %1328 = vmatprep.subr.bf16.mxu0 %v1823_v52  ;;  %v81_v52 = vld [vmem:[%s2516_s1 + $0x110] sm:$0xff]  ;;  %v102_v45 = vld [vmem:[%s2516_s1 + $0x1b8] sm:$0xff] }
  0x51   :  { %1302 = vmatpush2.bf16.msra.mxu1 %v1766_v51  ;;  %v1833_v51 = vcombine.high %v217_v46, %v221_v47  ;;  %v1722_v47 = vcombine.low %v106_v35, %v110_v36 }
  0x52   :  { %1303 = vmatprep.subr.bf16.mxu1 %v1759_v53  ;;  %v85_v53 = vld [vmem:[%s2516_s1 + $0x130] sm:$0xff] }
  0x53   :  { %1329 = vmatpush1.bf16.msra.mxu0 %v1822_v59  ;;  %v1697_v59 = vcombine.high %v81_v52, %v85_v53  ;;  %v1696_v1 = vcombine.low %v81_v52, %v85_v53  ;;  %v90_v52 = vld [vmem:[%s2516_s1 + $0x158] sm:$0xff] }
  0x54   :  { %1330 = vmatprep.subr.bf16.mxu0 %v1815_v61  ;;  %v73_v61 = vld [vmem:[%s2516_s1 + $0xd0] sm:$0xff]  ;;  %v94_v53 = vld [vmem:[%s2516_s1 + $0x178] sm:$0xff] }
  0x55   :  { %1304 = vmatpush2.bf16.msra.mxu1 %v1758_v60  ;;  %v1825_v60 = vcombine.high %v209_v54, %v213_v55  ;;  %v1714_v55 = vcombine.low %v98_v44, %v102_v45 }
  0x56   :  { %1305 = vmatprep.subr.bf16.mxu1 %v1751_v62  ;;  %v77_v62 = vld [vmem:[%s2516_s1 + $0xf0] sm:$0xff] }
  0x57   :  { %1331 = vmatpush1.bf16.msra.mxu0 %v1814_v4  ;;  %v1689_v4 = vcombine.high %v73_v61, %v77_v62  ;;  %v1688_v10 = vcombine.low %v73_v61, %v77_v62  ;;  %v82_v61 = vld [vmem:[%s2516_s1 + $0x118] sm:$0xff] }
  0x58   :  { %1332 = vmatprep.subr.bf16.mxu0 %v1807_v6  ;;  %v65_v6 = vld [vmem:[%s2516_s1 + $0x90] sm:$0xff]  ;;  %v86_v62 = vld [vmem:[%s2516_s1 + $0x138] sm:$0xff] }
  0x59   :  { %1306 = vmatpush2.bf16.msra.mxu1 %v1750_v5  ;;  %v1817_v5 = vcombine.high %v201_v63, %v205_v0  ;;  %v1706_v0 = vcombine.low %v90_v52, %v94_v53 }
  0x5a   :  { %1307 = vmatprep.subr.bf16.mxu1 %v1743_v7  ;;  %v69_v7 = vld [vmem:[%s2516_s1 + $0xb0] sm:$0xff] }
  0x5b   :  { %1333 = vmatpush1.bf16.msra.mxu0 %v1806_v12  ;;  %v1681_v12 = vcombine.high %v65_v6, %v69_v7  ;;  %v1680_v18 = vcombine.low %v65_v6, %v69_v7  ;;  %v78_v6 = vld [vmem:[%s2516_s1 + $0xf8] sm:$0xff] }
  0x5c   :  { %1334 = vmatprep.subr.bf16.mxu0 %v1799_v14  ;;  %v57_v14 = vld [vmem:[%s2516_s1 + $0x50] sm:$0xff] }
  0x5d   :  { %1308 = vmatpush2.bf16.msra.mxu1 %v1742_v13  ;;  %v1809_v13 = vcombine.high %v193_v8, %v197_v9  ;;  %v1698_v8 = vcombine.low %v82_v61, %v86_v62 }
  0x5e   :  { %1309 = vmatprep.subr.bf16.mxu1 %v1735_v15  ;;  %v61_v15 = vld [vmem:[%s2516_s1 + $0x70] sm:$0xff] }
  0x5f   :  { %1335 = vmatpush1.bf16.msra.mxu0 %v1798_v20  ;;  %v1673_v20 = vcombine.high %v57_v14, %v61_v15  ;;  %v1672_v27 = vcombine.low %v57_v14, %v61_v15  ;;  %v70_v14 = vld [vmem:[%s2516_s1 + $0xb8] sm:$0xff] }
  0x60   :  { %1336 = vmatprep.subr.bf16.mxu0 %v1791_v22  ;;  %v49_v22 = vld [vmem:[%s2516_s1 + $0x10] sm:$0xff] }
  0x61   :  { %1310 = vmatpush2.bf16.msra.mxu1 %v1734_v21  ;;  %v1801_v21 = vcombine.high %v185_v16, %v189_v17 }
  0x62   :  { %1311 = vmatprep.subr.bf16.mxu1 %v1727_v23  ;;  %v53_v23 = vld [vmem:[%s2516_s1 + $0x30] sm:$0xff] }
  0x63   :  { %1337 = vmatpush1.bf16.msra.mxu0 %v1790_v31  ;;  %v1665_v31 = vcombine.high %v49_v22, %v53_v23  ;;  %v1664_v43 = vcombine.low %v49_v22, %v53_v23  ;;  %v62_v22 = vld [vmem:[%s2516_s1 + $0x78] sm:$0xff] }
  0x64   :  { %1363 = vmatprep.subr.bf16.mxu0 %v1721_v33  ;;  %v169_v33 = vld [vmem:[%s2516_s1 + $0x3d0] sm:$0xff] }
  0x65   :  { %1312 = vmatpush2.bf16.msra.mxu1 %v1726_v32  ;;  %v1793_v32 = vcombine.high %v177_v25, %v181_v26 }
  0x66   :  { %1404 = vmatprep.subr.bf16.mxu1 %v1849_v34  ;;  %1355 = vmatmul.mubr.bf16.vlgmr.msra.gmra.mxu0 %v2015_v24  ;;  %v173_v34 = vld [vmem:[%s2516_s1 + $0x3f0] sm:$0xff] }
  0x67   :  { %1364 = vmatpush1.bf16.msra.mxu0 %v1720_v39  ;;  %1395 = vmatprep.mubr.bf16.mxu0 %v1969_v58  ;;  %v1785_v39 = vcombine.high %v169_v33, %v173_v34  ;;  %v1784_v46 = vcombine.low %v169_v33, %v173_v34  ;;  %v54_v33 = vld [vmem:[%s2516_s1 + $0x38] sm:$0xff] }
  0x68   :  { %1314 = vmatmul.mubr.bf16.vlgmr.msra.gmra.mxu1 %v2111_v30  ;;  %1365 = vmatprep.subr.bf16.mxu0 %v1713_v41  ;;  %v161_v41 = vld [vmem:[%s2516_s1 + $0x390] sm:$0xff] }
  0x69   :  { %1405 = vmatpush1.bf16.msra.mxu1 %v1848_v40  ;;  %1436 = vmatprep.mubr.bf16.mxu1 %v1855_v3  ;;  %v1723_v40 = vcombine.high %v106_v35, %v110_v36 }
  0x6a   :  { %1406 = vmatprep.subr.bf16.mxu1 %v1841_v42  ;;  %v165_v42 = vld [vmem:[%s2516_s1 + $0x3b0] sm:$0xff] }
  0x6b   :  { %1366 = vmatpush1.bf16.msra.mxu0 %v1712_v48  ;;  %v1777_v48 = vcombine.high %v161_v41, %v165_v42  ;;  %v1776_v54 = vcombine.low %v161_v41, %v165_v42  ;;  %v174_v41 = vld [vmem:[%s2516_s1 + $0x3f8] sm:$0xff] }
  0x6c   :  { %1367 = vmatprep.subr.bf16.mxu0 %v1705_v50  ;;  %v153_v50 = vld [vmem:[%s2516_s1 + $0x350] sm:$0xff] }
  0x6d   :  { %1407 = vmatpush1.bf16.msra.mxu1 %v1840_v49  ;;  %v1715_v49 = vcombine.high %v98_v44, %v102_v45 }
  0x6e   :  { %1408 = vmatprep.subr.bf16.mxu1 %v1833_v51  ;;  %v157_v51 = vld [vmem:[%s2516_s1 + $0x370] sm:$0xff] }
  0x6f   :  { %1368 = vmatpush1.bf16.msra.mxu0 %v1704_v56  ;;  %v1769_v56 = vcombine.high %v153_v50, %v157_v51  ;;  %v1768_v63 = vcombine.low %v153_v50, %v157_v51  ;;  %v166_v50 = vld [vmem:[%s2516_s1 + $0x3b8] sm:$0xff] }
  0x70   :  { %1369 = vmatprep.subr.bf16.mxu0 %v1697_v59  ;;  %v145_v59 = vld [vmem:[%s2516_s1 + $0x310] sm:$0xff] }
  0x71   :  { %1409 = vmatpush1.bf16.msra.mxu1 %v1832_v57  ;;  %v1707_v57 = vcombine.high %v90_v52, %v94_v53 }
  0x72   :  { %1410 = vmatprep.subr.bf16.mxu1 %v1825_v60  ;;  %v149_v60 = vld [vmem:[%s2516_s1 + $0x330] sm:$0xff] }
  0x73   :  { %1370 = vmatpush1.bf16.msra.mxu0 %v1696_v1  ;;  %v1761_v1 = vcombine.high %v145_v59, %v149_v60  ;;  %v1760_v7 = vcombine.low %v145_v59, %v149_v60  ;;  %v158_v59 = vld [vmem:[%s2516_s1 + $0x378] sm:$0xff] }
  0x74   :  { %1371 = vmatprep.subr.bf16.mxu0 %v1689_v4  ;;  %v141_v4 = vld [vmem:[%s2516_s1 + $0x2f0] sm:$0xff] }
  0x75   :  { %1411 = vmatpush1.bf16.msra.mxu1 %v1824_v2  ;;  %v1699_v2 = vcombine.high %v82_v61, %v86_v62 }
  0x76   :  { %1412 = vmatprep.subr.bf16.mxu1 %v1817_v5  ;;  %v74_v5 = vld [vmem:[%s2516_s1 + $0xd8] sm:$0xff] }
  0x77   :  { %1372 = vmatpush1.bf16.msra.mxu0 %v1688_v10  ;;  %v1691_v10 = vcombine.high %v74_v5, %v78_v6  ;;  %v1690_v16 = vcombine.low %v74_v5, %v78_v6 }
  0x78   :  { %1373 = vmatprep.subr.bf16.mxu0 %v1681_v12  ;;  %v133_v12 = vld [vmem:[%s2516_s1 + $0x2b0] sm:$0xff] }
  0x79   :  { %1413 = vmatpush1.bf16.msra.mxu1 %v1816_v11  ;;  %v129_v11 = vld [vmem:[%s2516_s1 + $0x290] sm:$0xff] }
  0x7a   :  { %1414 = vmatprep.subr.bf16.mxu1 %v1809_v13  ;;  %v66_v13 = vld [vmem:[%s2516_s1 + $0x98] sm:$0xff]  ;;  %v1745_v17 = vcombine.high %v129_v11, %v133_v12  ;;  %v1744_v23 = vcombine.low %v129_v11, %v133_v12 }
  0x7b   :  { %1374 = vmatpush1.bf16.msra.mxu0 %v1680_v18  ;;  %v1683_v18 = vcombine.high %v66_v13, %v70_v14  ;;  %v1682_v25 = vcombine.low %v66_v13, %v70_v14 }
  0x7c   :  { %1375 = vmatprep.subr.bf16.mxu0 %v1673_v20  ;;  %v125_v20 = vld [vmem:[%s2516_s1 + $0x270] sm:$0xff] }
  0x7d   :  { %1415 = vmatpush1.bf16.msra.mxu1 %v1808_v19  ;;  %v121_v19 = vld [vmem:[%s2516_s1 + $0x250] sm:$0xff] }
  0x7e   :  { %1416 = vmatprep.subr.bf16.mxu1 %v1801_v21  ;;  %v58_v21 = vld [vmem:[%s2516_s1 + $0x58] sm:$0xff]  ;;  %v1737_v26 = vcombine.high %v121_v19, %v125_v20  ;;  %v1736_v34 = vcombine.low %v121_v19, %v125_v20 }
  0x7f   :  { %1376 = vmatpush1.bf16.msra.mxu0 %v1672_v27  ;;  %v1675_v27 = vcombine.high %v58_v21, %v62_v22  ;;  %v1674_v35 = vcombine.low %v58_v21, %v62_v22 }
  0x80   :  { %1377 = vmatprep.subr.bf16.mxu0 %v1665_v31  ;;  %v117_v31 = vld [vmem:[%s2516_s1 + $0x230] sm:$0xff] }
  0x81   :  { %1417 = vmatpush1.bf16.msra.mxu1 %v1800_v28  ;;  %v113_v28 = vld [vmem:[%s2516_s1 + $0x210] sm:$0xff] }
  0x82   :  { %1418 = vmatprep.subr.bf16.mxu1 %v1793_v32  ;;  %v50_v32 = vld [vmem:[%s2516_s1 + $0x18] sm:$0xff]  ;;  %v1729_v36 = vcombine.high %v113_v28, %v117_v31  ;;  %v1728_v42 = vcombine.low %v113_v28, %v117_v31 }
  0x83   :  { %1378 = vmatpush1.bf16.msra.mxu0 %v1664_v43  ;;  %v1667_v43 = vcombine.high %v50_v32, %v54_v33  ;;  %v1666_v44 = vcombine.low %v50_v32, %v54_v33 }
  0x84   :  { %1379 = vmatprep.subr.bf16.mxu0 %v1785_v39  ;;  %v238_v39 = vld [vmem:[%s2516_s1 + $0x5f8] sm:$0xff] }
  0x85   :  { %1419 = vmatpush1.bf16.msra.mxu1 %v1792_v37  ;;  %v234_v37 = vld [vmem:[%s2516_s1 + $0x5d8] sm:$0xff] }
  0x86   :  { %1445 = vmatprep.subr.bf16.mxu1 %v1723_v40  ;;  %v170_v40 = vld [vmem:[%s2516_s1 + $0x3d8] sm:$0xff]  ;;  %v1851_v45 = vcombine.high %v234_v37, %v238_v39  ;;  %v1850_v51 = vcombine.low %v234_v37, %v238_v39 }
  0x87   :  { %1380 = vmatpush2.bf16.msra.mxu0 %v1784_v46  ;;  %v1787_v46 = vcombine.high %v170_v40, %v174_v41  ;;  %v1786_v52 = vcombine.low %v170_v40, %v174_v41 }
  0x88   :  { %1437 = vmatmul.mubr.bf16.vlgmr.msra.gmra.mxu1 %v2015_v24  ;;  %1381 = vmatprep.subr.bf16.mxu0 %v1777_v48  ;;  %v230_v48 = vld [vmem:[%s2516_s1 + $0x5b8] sm:$0xff] }
  0x89   :  { %1446 = vmatpush1.bf16.msra.mxu1 %v1722_v47  ;;  %1477 = vmatprep.mubr.bf16.mxu1 %v1969_v58  ;;  %v137_v58 = vld [vmem:[%s2516_s1 + $0x2d0] sm:$0xff]  ;;  %v226_v47 = vld [vmem:[%s2516_s1 + $0x598] sm:$0xff] }
  0x8a   :  { %1447 = vmatprep.subr.bf16.mxu1 %v1715_v49  ;;  %v1753_v9 = vcombine.high %v137_v58, %v141_v4  ;;  %v1752_v15 = vcombine.low %v137_v58, %v141_v4  ;;  %v162_v49 = vld [vmem:[%s2516_s1 + $0x398] sm:$0xff]  ;;  %v1843_v53 = vcombine.high %v226_v47, %v230_v48  ;;  %v1842_v60 = vcombine.low %v226_v47, %v230_v48 }
  0x8b   :  { %1382 = vmatpush2.bf16.msra.mxu0 %v1776_v54  ;;  %v1779_v54 = vcombine.high %v162_v49, %v166_v50  ;;  %v1778_v61 = vcombine.low %v162_v49, %v166_v50 }
  0x8c   :  { %1383 = vmatprep.subr.bf16.mxu0 %v1769_v56  ;;  %v222_v56 = vld [vmem:[%s2516_s1 + $0x578] sm:$0xff] }
  0x8d   :  { %1448 = vmatpush1.bf16.msra.mxu1 %v1714_v55  ;;  %v218_v55 = vld [vmem:[%s2516_s1 + $0x558] sm:$0xff] }
  0x8e   :  { %1449 = vmatprep.subr.bf16.mxu1 %v1707_v57  ;;  %v154_v57 = vld [vmem:[%s2516_s1 + $0x358] sm:$0xff]  ;;  %v1835_v62 = vcombine.high %v218_v55, %v222_v56  ;;  %v1834_v58 = vcombine.low %v218_v55, %v222_v56  ;;  %v1584_v56 = vsub.s32 0, %v1920_v29 }
  0x8f   :  { %1384 = vmatpush2.bf16.msra.mxu0 %v1768_v63  ;;  %v1771_v63 = vcombine.high %v154_v57, %v158_v59  ;;  %v1770_v4 = vcombine.low %v154_v57, %v158_v59  ;;  %v1588_v57 = vsub.s32 1, %v1920_v29  ;;  %v1592_v59 = vsub.s32 2, %v1920_v29 }
  0x90   :  { %1385 = vmatprep.subr.bf16.mxu0 %v1761_v1  ;;  %v214_v1 = vld [vmem:[%s2516_s1 + $0x538] sm:$0xff] }
  0x91   :  { %1450 = vmatpush1.bf16.msra.mxu1 %v1706_v0  ;;  %v210_v0 = vld [vmem:[%s2516_s1 + $0x518] sm:$0xff] }
  0x92   :  { %1451 = vmatprep.subr.bf16.mxu1 %v1699_v2  ;;  %v146_v2 = vld [vmem:[%s2516_s1 + $0x318] sm:$0xff]  ;;  %v1827_v5 = vcombine.high %v210_v0, %v214_v1  ;;  %v1826_v11 = vcombine.low %v210_v0, %v214_v1 }
  0x93   :  { %1386 = vmatpush2.bf16.msra.mxu0 %v1760_v7  ;;  %v202_v7 = vld [vmem:[%s2516_s1 + $0x4d8] sm:$0xff] }
  0x94   :  { %1387 = vmatprep.subr.bf16.mxu0 %v1753_v9  ;;  %v138_v9 = vld [vmem:[%s2516_s1 + $0x2d8] sm:$0xff] }
  0x95   :  { %1452 = vmatpush1.bf16.msra.mxu1 %v1698_v8  ;;  %v206_v8 = vld [vmem:[%s2516_s1 + $0x4f8] sm:$0xff] }
  0x96   :  { %1453 = vmatprep.subr.bf16.mxu1 %v1691_v10  ;;  %v142_v10 = vld [vmem:[%s2516_s1 + $0x2f8] sm:$0xff]  ;;  %v1819_v13 = vcombine.high %v202_v7, %v206_v8  ;;  %v1818_v19 = vcombine.low %v202_v7, %v206_v8 }
  0x97   :  { %1388 = vmatpush2.bf16.msra.mxu0 %v1752_v15  ;;  %v1755_v14 = vcombine.high %v138_v9, %v142_v10  ;;  %v194_v15 = vld [vmem:[%s2516_s1 + $0x498] sm:$0xff]  ;;  %v1754_v20 = vcombine.low %v138_v9, %v142_v10 }
  0x98   :  { %1389 = vmatprep.subr.bf16.mxu0 %v1745_v17  ;;  %v130_v17 = vld [vmem:[%s2516_s1 + $0x298] sm:$0xff] }
  0x99   :  { %1454 = vmatpush1.bf16.msra.mxu1 %v1690_v16  ;;  %v198_v16 = vld [vmem:[%s2516_s1 + $0x4b8] sm:$0xff] }
  0x9a   :  { %1455 = vmatprep.subr.bf16.mxu1 %v1683_v18  ;;  %v134_v18 = vld [vmem:[%s2516_s1 + $0x2b8] sm:$0xff]  ;;  %v1811_v21 = vcombine.high %v194_v15, %v198_v16  ;;  %v1810_v28 = vcombine.low %v194_v15, %v198_v16 }
  0x9b   :  { %1390 = vmatpush2.bf16.msra.mxu0 %v1744_v23  ;;  %v1747_v22 = vcombine.high %v130_v17, %v134_v18  ;;  %v186_v23 = vld [vmem:[%s2516_s1 + $0x458] sm:$0xff]  ;;  %v1746_v31 = vcombine.low %v130_v17, %v134_v18 }
  0x9c   :  { %1391 = vmatprep.subr.bf16.mxu0 %v1737_v26  ;;  %v122_v26 = vld [vmem:[%s2516_s1 + $0x258] sm:$0xff] }
  0x9d   :  { %1456 = vmatpush1.bf16.msra.mxu1 %v1682_v25  ;;  %v190_v25 = vld [vmem:[%s2516_s1 + $0x478] sm:$0xff] }
  0x9e   :  { %1457 = vmatprep.subr.bf16.mxu1 %v1675_v27  ;;  %v126_v27 = vld [vmem:[%s2516_s1 + $0x278] sm:$0xff]  ;;  %v1803_v32 = vcombine.high %v186_v23, %v190_v25  ;;  %v1802_v37 = vcombine.low %v186_v23, %v190_v25 }
  0x9f   :  { %1392 = vmatpush2.bf16.msra.mxu0 %v1736_v34  ;;  %v1739_v33 = vcombine.high %v122_v26, %v126_v27  ;;  %v178_v34 = vld [vmem:[%s2516_s1 + $0x418] sm:$0xff]  ;;  %v1738_v39 = vcombine.low %v122_v26, %v126_v27 }
  0xa0   :  { %1393 = vmatprep.subr.bf16.mxu0 %v1729_v36  ;;  %v114_v36 = vld [vmem:[%s2516_s1 + $0x218] sm:$0xff] }
  0xa1   :  { %1458 = vmatpush1.bf16.msra.mxu1 %v1674_v35  ;;  %v182_v35 = vld [vmem:[%s2516_s1 + $0x438] sm:$0xff] }
  0xa2   :  { %1459 = vmatprep.subr.bf16.mxu1 %v1667_v43  ;;  %v118_v43 = vld [vmem:[%s2516_s1 + $0x238] sm:$0xff]  ;;  %v1795_v40 = vcombine.high %v178_v34, %v182_v35 }
  0xa3   :  { %1394 = vmatpush2.bf16.msra.mxu0 %v1728_v42  ;;  %v1731_v41 = vcombine.high %v114_v36, %v118_v43  ;;  %v1794_v42 = vcombine.low %v178_v34, %v182_v35  ;;  %v1600_v34 = vsub.s32 4, %v1920_v29  ;;  %v1604_v35 = vsub.s32 5, %v1920_v29 }
  0xa4   :  { %1486 = vmatprep.subr.bf16.mxu0 %v1851_v45 }
  0xa5   :  { %1460 = vmatpush1.bf16.msra.mxu1 %v1666_v44  ;;  %v1730_v44 = vcombine.low %v114_v36, %v118_v43  ;;  %v1608_v36 = vsub.s32 6, %v1920_v29  ;;  %v1612_v43 = vsub.s32 7, %v1920_v29 }
  0xa6   :  { %1461 = vmatprep.subr.bf16.mxu1 %v1787_v46  ;;  %1396 = vmatmul.mubr.bf16.vlgmr.msra.gmra.mxu0 %v2111_v30 }
  0xa7   :  { %1487 = vmatpush1.bf16.msra.mxu0 %v1850_v51  ;;  %1518 = vmatprep.mubr.bf16.mxu0 %v1855_v3  ;;  %v150_v3 = vld [vmem:[%s2516_s1 + $0x338] sm:$0xff] }
  0xa8   :  { %1488 = vmatprep.subr.bf16.mxu0 %v1843_v53  ;;  %v1763_v6 = vcombine.high %v146_v2, %v150_v3  ;;  %v1762_v12 = vcombine.low %v146_v2, %v150_v3 }
  0xa9   :  { %1462 = vmatpush2.bf16.msra.mxu1 %v1786_v52 }
  0xaa   :  { %1463 = vmatprep.subr.bf16.mxu1 %v1779_v54 }
  0xab   :  { %1489 = vmatpush1.bf16.msra.mxu0 %v1842_v60 }
  0xac   :  { %1490 = vmatprep.subr.bf16.mxu0 %v1835_v62 }
  0xad   :  { %1464 = vmatpush2.bf16.msra.mxu1 %v1778_v61 }
  0xae   :  { %1465 = vmatprep.subr.bf16.mxu1 %v1771_v63 }
  0xaf   :  { %1491 = vmatpush1.bf16.msra.mxu0 %v1834_v58 }
  0xb0   :  { %1492 = vmatprep.subr.bf16.mxu0 %v1827_v5 }
  0xb1   :  { %1466 = vmatpush2.bf16.msra.mxu1 %v1770_v4 }
  0xb2   :  { %1467 = vmatprep.subr.bf16.mxu1 %v1763_v6 }
  0xb3   :  { %1493 = vmatpush1.bf16.msra.mxu0 %v1826_v11 }
  0xb4   :  { %1494 = vmatprep.subr.bf16.mxu0 %v1819_v13 }
  0xb5   :  { %1468 = vmatpush2.bf16.msra.mxu1 %v1762_v12 }
  0xb6   :  { %1469 = vmatprep.subr.bf16.mxu1 %v1755_v14 }
  0xb7   :  { %1495 = vmatpush1.bf16.msra.mxu0 %v1818_v19 }
  0xb8   :  { %1496 = vmatprep.subr.bf16.mxu0 %v1811_v21 }
  0xb9   :  { %1470 = vmatpush2.bf16.msra.mxu1 %v1754_v20 }
  0xba   :  { %1471 = vmatprep.subr.bf16.mxu1 %v1747_v22 }
  0xbb   :  { %1497 = vmatpush1.bf16.msra.mxu0 %v1810_v28 }
  0xbc   :  { %1498 = vmatprep.subr.bf16.mxu0 %v1803_v32 }
  0xbd   :  { %1472 = vmatpush2.bf16.msra.mxu1 %v1746_v31 }
  0xbe   :  { %1473 = vmatprep.subr.bf16.mxu1 %v1739_v33 }
  0xbf   :  { %1499 = vmatpush1.bf16.msra.mxu0 %v1802_v37 }
  0xc0   :  { %1500 = vmatprep.subr.bf16.mxu0 %v1795_v40 }
  0xc1   :  { %1474 = vmatpush2.bf16.msra.mxu1 %v1738_v39 }
  0xc2   :  { %1475 = vmatprep.subr.bf16.mxu1 %v1731_v41 }
  0xc3   :  { %1501 = vmatpush1.bf16.msra.mxu0 %v1794_v42 }
  0xc5   :  { %1476 = vmatpush2.bf16.msra.mxu1 %v1730_v44 }
  0xc6   :  { %1519 = vmatmul.mubr.bf16.vlgmr.msra.gmra.mxu0 %v2015_v24  ;;  %v1596_v24 = vsub.s32 3, %v1920_v29 }
  0xc8   :  { %1478 = vmatmul.mubr.bf16.vlgmr.msra.gmra.mxu1 %v2111_v30  ;;  %v1580_v30 = vld [vmem:[%s2518_s2] sm:$0xff] }
  0xc9   :  { %v1585_v60 = vrot.slane %v1580_v30, %v1584_v56  ;;  %v1589_v61 = vrot.slane %v1580_v30, %v1588_v57  ;;  %v1593_v62 = vrot.slane %v1580_v30, %v1592_v59  ;;  %v1597_v63 = vrot.slane %v1580_v30, %v1596_v24 }
  0xca   :  { %v1601_v37 = vrot.slane %v1580_v30, %v1600_v34  ;;  %v1605_v39 = vrot.slane %v1580_v30, %v1604_v35  ;;  %v1609_v40 = vrot.slane %v1580_v30, %v1608_v36  ;;  %v1613_v41 = vrot.slane %v1580_v30, %v1612_v43 }
  0xcb   :  { %v1614_v1 = vcombine.low %v1585_v60, %v1589_v61  ;;  %v1615_v2 = vcombine.low %v1593_v62, %v1597_v63 }
  0xcc   :  { %v1631_v44 = vcombine.low %v1601_v37, %v1605_v39 }
  0xcd   :  { %v1622_v7 = vrot.slane %v1614_v1, %v1935_v38  ;;  %v1629_v8 = vrot.slane %v1615_v2, %v1935_v38 }
  0xcf   :  { %v1630_v16 = vcombine.low %v1622_v7, %v1629_v8 }
  0xe8   :  { %v1274_v45 = vpop.f32.mrf.mxu1 }
  0xea   :  { %v1276_v46 = vpop.f32.mrf.mxu1 }
  0xec   :  { %v1278_v47 = vpop.f32.mrf.mxu1 }
  0xee   :  { %v1279_v48 = vpop.f32.mrf.mxu1 }
 0x106   :  { %v1233_v49 = vpop.f32.mrf.mxu0 }
 0x107   :  { %v1275_v51 = vadd.f32 %v1274_v45, %v1233_v49  ;;  %v1632_v45 = vcombine.low %v1609_v40, %v1613_v41 }
 0x108   :  { %v1235_v50 = vpop.f32.mrf.mxu0 }
 0x109   :  { %v1277_v52 = vadd.f32 %v1276_v46, %v1235_v50 }
 0x10a   :  { %v1237_v53 = vpop.f32.mrf.mxu0 }
 0x10b   :  { %v1535_v54 = vcombine.low %v1275_v51, %v1277_v52  ;;  %v1639_v51 = vrot.slane %v1631_v44, %v1935_v38  ;;  %v1646_v52 = vrot.slane %v1632_v45, %v1935_v38 }
 0x10c   :  { %v1238_v55 = vpop.f32.mrf.mxu0 }
 0x10d   :  { %v1543_v14 = vrot.slane %v1535_v54, %v1935_v38  ;;  %v1647_v24 = vcombine.low %v1639_v51, %v1646_v52 }
 0x126   :  { %v1356_v0 = vpop.f32.mrf.mxu0 }
 0x128   :  { %v1315_v3 = vpop.f32.mrf.mxu1  ;;  %v1358_v4 = vpop.f32.mrf.mxu0 }
 0x129   :  { %v1357_v58 = vadd.f32 %v1356_v0, %v1315_v3 }
 0x12a   :  { %v1317_v5 = vpop.f32.mrf.mxu1  ;;  %v1360_v9 = vpop.f32.mrf.mxu0 }
 0x12b   :  { %v1359_v6 = vadd.f32 %v1358_v4, %v1317_v5 }
 0x12c   :  { %v1319_v10 = vpop.f32.mrf.mxu1  ;;  %v1361_v12 = vpop.f32.mrf.mxu0 }
 0x12d   :  { %v1536_v11 = vcombine.low %v1357_v58, %v1359_v6 }
 0x12e   :  { %v1320_v13 = vpop.f32.mrf.mxu1 }
 0x12f   :  { %v1550_v15 = vrot.slane %v1536_v11, %v1935_v38 }
 0x131   :  { %v1551_v17 = vcombine.low %v1543_v14, %v1550_v15 }
 0x133   :  { %v1650_v18 = vadd.f32 %v1630_v16, %v1551_v17 }
 0x135   :  { %v1652_v19 = vmax.f32 %v1650_v18, 0.0 }
 0x137   :  { %1654 = vst [vmem:[%s2519_s3] sm:$0xff] %v1652_v19 }
 0x148   :  { %v1438_v20 = vpop.f32.mrf.mxu1 }
 0x14a   :  { %v1440_v21 = vpop.f32.mrf.mxu1 }
 0x14c   :  { %v1442_v22 = vpop.f32.mrf.mxu1 }
 0x14e   :  { %v1443_v23 = vpop.f32.mrf.mxu1 }
 0x166   :  { %v1397_v25 = vpop.f32.mrf.mxu0 }
 0x167   :  { %v1439_v27 = vadd.f32 %v1438_v20, %v1397_v25 }
 0x168   :  { %v1399_v26 = vpop.f32.mrf.mxu0 }
 0x169   :  { %v1441_v28 = vadd.f32 %v1440_v21, %v1399_v26 }
 0x16a   :  { %v1401_v31 = vpop.f32.mrf.mxu0 }
 0x16b   :  { %v1552_v32 = vcombine.low %v1439_v27, %v1441_v28 }
 0x16c   :  { %v1402_v33 = vpop.f32.mrf.mxu0 }
 0x16d   :  { %v1560_v57 = vrot.slane %v1552_v32, %v1935_v38 }
 0x186   :  { %v1520_v42 = vpop.f32.mrf.mxu0 }
 0x188   :  { %v1479_v46 = vpop.f32.mrf.mxu1  ;;  %v1522_v47 = vpop.f32.mrf.mxu0 }
 0x189   :  { %v1521_v49 = vadd.f32 %v1520_v42, %v1479_v46 }
 0x18a   :  { %v1481_v48 = vpop.f32.mrf.mxu1  ;;  %v1524_v53 = vpop.f32.mrf.mxu0 }
 0x18b   :  { %v1523_v50 = vadd.f32 %v1522_v47, %v1481_v48 }
 0x18c   :  { %v1483_v54 = vpop.f32.mrf.mxu1  ;;  %v1525_v29 = vpop.f32.mrf.mxu0 }
 0x18d   :  { %v1553_v55 = vcombine.low %v1521_v49, %v1523_v50 }
 0x18e   :  { %v1484_v56 = vpop.f32.mrf.mxu1 }
 0x18f   :  { %v1567_v59 = vrot.slane %v1553_v55, %v1935_v38 }
 0x191   :  { %v1568_v30 = vcombine.low %v1560_v57, %v1567_v59 }
 0x193   :  { %v1651_v60 = vadd.f32 %v1647_v24, %v1568_v30 }
 0x195   :  { %v1653_v61 = vmax.f32 %v1651_v60, 0.0 }
 0x197   :  { %1655 = vst [vmem:[%s2519_s3 + $0x8] sm:$0xff] %v1653_v61 }

</bundles_post_ra>
